<compile_context>
chip_gen: v5e
topology: v5e:2x2
jax: 0.10.0
libtpu: 0.0.40
codegen_flags: <defaults>
</compile_context>

<pallas_src>
import functools

import jax
import jax.numpy as jnp
from jax.experimental import pallas as pl
from jax.experimental.pallas import tpu as pltpu


# VMEM budget: v5e/v6e scoped defaults are 16/32 MiB (128 MiB physical); v7x has
# 64 MiB physical.  32 MiB is safe on every generation and far above what the blocks
# below need at these shapes.
_VMEM_LIMIT_BYTES = 32 * 1024 * 1024


def _compiler_params():
    return pltpu.CompilerParams(dimension_semantics=("parallel",),
                                vmem_limit_bytes=_VMEM_LIMIT_BYTES)


def _round_up(x, m):
    return (x + m - 1) // m * m


def _pick_block_m(m):
    """Row-tile size over the flattened N*H*W axis (multiple of 8 sublanes)."""
    if m <= 2048:
        # Small feature maps: keep >= 2 grid steps so the pipeline overlaps the
        # activation DMA with compute.
        return min(256, _round_up(m, 8))
    # Big maps: ~1K-row tiles reach 85%+ of HBM roofline and stay well under VMEM.
    return 1024


# ----------------------------- Pallas kernels ------------------------------

def _cv1_kernel(x_ref, wa_ref, wb_ref, ba_ref, bb_ref, ya_ref, yb_ref):
    # x_ref: (TM, Cin) f32; w*_ref: (Cin, c) bf16 (VMEM-resident); b*_ref: (1, c) f32.
    x = x_ref[...].astype(jnp.bfloat16)
    acc_a = jnp.dot(x, wa_ref[...], preferred_element_type=jnp.float32) + ba_ref[...]
    acc_b = jnp.dot(x, wb_ref[...], preferred_element_type=jnp.float32) + bb_ref[...]
    ya_ref[...] = (acc_a * jax.nn.sigmoid(acc_a)).astype(ya_ref.dtype)   # SiLU
    yb_ref[...] = (acc_b * jax.nn.sigmoid(acc_b)).astype(yb_ref.dtype)   # SiLU


def _cv2_kernel(n_branches, *refs):
    # refs: y_0..y_{nb-1} (TM, c) f32, w_0..w_{nb-1} (c, Cout) bf16, b (1, Cout) f32,
    #       o_ref (TM, Cout).  The channel concat is realised as a sum of per-branch
    #       partial GEMMs -> no concatenated activation ever hits HBM.
    y_refs = refs[:n_branches]
    w_refs = refs[n_branches:2 * n_branches]
    b_ref = refs[2 * n_branches]
    o_ref = refs[2 * n_branches + 1]
    acc = jnp.dot(y_refs[0][...].astype(jnp.bfloat16), w_refs[0][...],
                  preferred_element_type=jnp.float32)
    for i in range(1, n_branches):
        acc = acc + jnp.dot(y_refs[i][...].astype(jnp.bfloat16), w_refs[i][...],
                            preferred_element_type=jnp.float32)
    acc = acc + b_ref[...]
    o_ref[...] = (acc * jax.nn.sigmoid(acc)).astype(o_ref.dtype)


def _bottleneck_kernel(H, W, C, add_residual,
                       x_ref, w1_ref, b1_ref, w2_ref, b2_ref, o_ref,
                       xp_ref, hp_ref):
    # One image per grid step.  xp/hp: (H+2, W+2, C) f32 zero-padded VMEM scratch used
    # to build the 3x3 halo taps in VMEM (input is read from HBM exactly once; the
    # intermediate activation h never leaves VMEM).
    xp_ref[...] = jnp.zeros_like(xp_ref)
    hp_ref[...] = jnp.zeros_like(hp_ref)

    x = x_ref[0]                                        # (H, W, C) f32
    xp_ref[1:H + 1, 1:W + 1, :] = x

    def conv3x3_silu(src_ref, w_ref, b_ref):
        acc = None
        for t in range(9):
            ky, kx = divmod(t, 3)
            tap = src_ref[ky:ky + H, kx:kx + W, :]      # (H, W, C) VMEM window
            tap = tap.reshape(H * W, C).astype(jnp.bfloat16)
            part = jnp.dot(tap, w_ref[t], preferred_element_type=jnp.float32)
            acc = part if acc is None else acc + part
        acc = acc + b_ref[...]
        return acc * jax.nn.sigmoid(acc)                # (H*W, C) f32

    h = conv3x3_silu(xp_ref, w1_ref, b1_ref)            # Bottleneck.cv1
    hp_ref[1:H + 1, 1:W + 1, :] = h.reshape(H, W, C)
    y = conv3x3_silu(hp_ref, w2_ref, b2_ref)            # Bottleneck.cv2
    if add_residual:
        y = y + x.reshape(H * W, C)                     # shortcut (f32)
    o_ref[0] = y.reshape(H, W, C).astype(o_ref.dtype)


# ------------------------------ wrappers ------------------------------------

def conv1x1_silu_chunk2(x_nhwc, w, b):
    """cv1: fused 1x1 conv (folded BN) + SiLU, emitting the two chunk(2) halves."""
    N, H, W, Cin = x_nhwc.shape
    c = w.shape[-1] // 2
    M = N * H * W
    tm = _pick_block_m(M)
    n_blocks = pl.cdiv(M, tm)
    Mp = n_blocks * tm
    xm = x_nhwc.reshape(M, Cin)
    if Mp != M:
        xm = jnp.pad(xm, ((0, Mp - M), (0, 0)))
    wa = w[:, :c].astype(jnp.bfloat16)
    wb = w[:, c:].astype(jnp.bfloat16)
    ba = b[:c].reshape(1, c).astype(jnp.float32)
    bb = b[c:].reshape(1, c).astype(jnp.float32)
    ya, yb = pl.pallas_call(
        _cv1_kernel,
        grid=(n_blocks,),
        in_specs=[pl.BlockSpec((tm, Cin), lambda m: (m, 0)),
                  pl.BlockSpec((Cin, c), lambda m: (0, 0)),
                  pl.BlockSpec((Cin, c), lambda m: (0, 0)),
                  pl.BlockSpec((1, c), lambda m: (0, 0)),
                  pl.BlockSpec((1, c), lambda m: (0, 0))],
        out_specs=[pl.BlockSpec((tm, c), lambda m: (m, 0)),
                   pl.BlockSpec((tm, c), lambda m: (m, 0))],
        out_shape=[jax.ShapeDtypeStruct((Mp, c), x_nhwc.dtype),
                   jax.ShapeDtypeStruct((Mp, c), x_nhwc.dtype)],
        compiler_params=_compiler_params(),
    )(xm, wa, wb, ba, bb)
    return ya[:M].reshape(N, H, W, c), yb[:M].reshape(N, H, W, c)


def conv1x1_silu_over_branches(ys, w, b):
    """cv2: 1x1 conv (folded BN) + SiLU over the channel-concat of `ys`, computed as a
    sum of per-branch GEMMs so the concat is never materialised in HBM."""
    N, H, W, c = ys[0].shape
    nb = len(ys)
    Cout = w.shape[-1]
    M = N * H * W
    tm = _pick_block_m(M)
    n_blocks = pl.cdiv(M, tm)
    Mp = n_blocks * tm
    y_flat = []
    for y in ys:
        ym = y.reshape(M, c)
        if Mp != M:
            ym = jnp.pad(ym, ((0, Mp - M), (0, 0)))
        y_flat.append(ym)
    w_parts = [w[i * c:(i + 1) * c, :].astype(jnp.bfloat16) for i in range(nb)]
    bias = b.reshape(1, Cout).astype(jnp.float32)
    in_specs = ([pl.BlockSpec((tm, c), lambda m: (m, 0)) for _ in range(nb)]
                + [pl.BlockSpec((c, Cout), lambda m: (0, 0)) for _ in range(nb)]
                + [pl.BlockSpec((1, Cout), lambda m: (0, 0))])
    out = pl.pallas_call(
        functools.partial(_cv2_kernel, nb),
        grid=(n_blocks,),
        in_specs=in_specs,
        out_specs=pl.BlockSpec((tm, Cout), lambda m: (m, 0)),
        out_shape=jax.ShapeDtypeStruct((Mp, Cout), ys[0].dtype),
        compiler_params=_compiler_params(),
    )(*y_flat, *w_parts, bias)
    return out[:M].reshape(N, H, W, Cout)


def bottleneck_fused(x_nhwc, w1, b1, w2, b2, shortcut):
    """Fused YOLOv8 Bottleneck: 3x3 conv+SiLU -> 3x3 conv+SiLU -> (+x)."""
    N, H, W, C = x_nhwc.shape
    w1_9 = w1.reshape(9, C, C).astype(jnp.bfloat16)
    w2_9 = w2.reshape(9, C, C).astype(jnp.bfloat16)
    b1_r = b1.reshape(1, C).astype(jnp.float32)
    b2_r = b2.reshape(1, C).astype(jnp.float32)
    kernel = functools.partial(_bottleneck_kernel, H, W, C, bool(shortcut))
    return pl.pallas_call(
        kernel,
        grid=(N,),
        in_specs=[pl.BlockSpec((1, H, W, C), lambda n: (n, 0, 0, 0)),
                  pl.BlockSpec((9, C, C), lambda n: (0, 0, 0)),
                  pl.BlockSpec((1, C), lambda n: (0, 0)),
                  pl.BlockSpec((9, C, C), lambda n: (0, 0, 0)),
                  pl.BlockSpec((1, C), lambda n: (0, 0))],
        out_specs=pl.BlockSpec((1, H, W, C), lambda n: (n, 0, 0, 0)),
        out_shape=jax.ShapeDtypeStruct((N, H, W, C), x_nhwc.dtype),
        scratch_shapes=[pltpu.VMEM((H + 2, W + 2, C), jnp.float32),
                        pltpu.VMEM((H + 2, W + 2, C), jnp.float32)],
        compiler_params=_compiler_params(),
    )(x_nhwc, w1_9, b1_r, w2_9, b2_r)


# --------------------------- parameter setup --------------------------------

def _init_conv_bn(key, cin, cout, k, eps=1e-3):
    """Deterministic Conv+BN (eval mode) init, folded into (w_eff, b_eff)."""
    kw, kg, kb, km, kv = jax.random.split(key, 5)
    w = jax.random.normal(kw, (k, k, cin, cout), jnp.float32)
    w = w * (1.0 / (k * k * cin) ** 0.5)
    gamma = 1.0 + 0.1 * jax.random.normal(kg, (cout,), jnp.float32)
    beta = 0.1 * jax.random.normal(kb, (cout,), jnp.float32)
    mean = 0.1 * jax.random.normal(km, (cout,), jnp.float32)
    var = jnp.abs(jax.random.normal(kv, (cout,), jnp.float32)) + 1.0
    scale = gamma / jnp.sqrt(var + eps)
    w_eff = w * scale
    b_eff = beta - mean * scale
    return w_eff, b_eff


def init_c2f_params(key, c1, c2, n, e=0.5):
    c = int(c2 * e)
    keys = jax.random.split(key, 2 + 2 * n)
    p = {}
    w, b = _init_conv_bn(keys[0], c1, 2 * c, 1)
    p["cv1_w"], p["cv1_b"] = w[0, 0], b                 # (c1, 2c)
    w, b = _init_conv_bn(keys[1], (2 + n) * c, c2, 1)
    p["cv2_w"], p["cv2_b"] = w[0, 0], b                 # ((2+n)c, c2)
    p["m"] = []
    for i in range(n):
        w1, b1 = _init_conv_bn(keys[2 + 2 * i], c, c, 3)
        w2, b2 = _init_conv_bn(keys[3 + 2 * i], c, c, 3)
        p["m"].append({"w1": w1, "b1": b1, "w2": w2, "b2": b2})
    return p, c


# ----------------------------- C2f forward ----------------------------------

@functools.partial(jax.jit, static_argnums=(2, 3))
def c2f_forward(x_nchw, params, n, shortcut):
    """Matches C2f.forward: cv1 -> chunk(2) -> n Bottlenecks -> (concat) -> cv2."""
    # NCHW -> NHWC boundary transpose (layout only; XLA fuses it with the following
    # reshape).  TODO(synk): fold into the first GEMM by going fully channel-major.
    x = jnp.transpose(x_nchw, (0, 2, 3, 1))
    y0, y1 = conv1x1_silu_chunk2(x, params["cv1_w"], params["cv1_b"])
    ys = [y0, y1]
    for i in range(n):
        mp = params["m"][i]
        ys.append(bottleneck_fused(ys[-1], mp["w1"], mp["b1"],
                                   mp["w2"], mp["b2"], shortcut))
    out = conv1x1_silu_over_branches(ys, params["cv2_w"], params["cv2_b"])
    return jnp.transpose(out, (0, 3, 1, 2))             # NHWC -> NCHW


# ------------------------- pure-JAX reference -------------------------------

def _ref_conv_silu(x_nhwc, w_hwio, b):
    y = jax.lax.conv_general_dilated(
        x_nhwc, w_hwio, window_strides=(1, 1), padding="SAME",
        dimension_numbers=("NHWC", "HWIO", "NHWC"),
        precision=jax.lax.Precision.HIGHEST)
    y = y + b
    return y * jax.nn.sigmoid(y)


def c2f_reference(x_nchw, params, n, shortcut):
    x = jnp.transpose(x_nchw, (0, 2, 3, 1))
    y = _ref_conv_silu(x, params["cv1_w"][None, None], params["cv1_b"])
    c = y.shape[-1] // 2
    ys = [y[..., :c], y[..., c:]]
    for i in range(n):
        t = ys[-1]
        mp = params["m"][i]
        h = _ref_conv_silu(t, mp["w1"], mp["b1"])
        h = _ref_conv_silu(h, mp["w2"], mp["b2"])
        if shortcut:
            h = h + t
        ys.append(h)
    cat = jnp.concatenate(ys, axis=-1)
    out = _ref_conv_silu(cat, params["cv2_w"][None, None], params["cv2_b"])
    return jnp.transpose(out, (0, 3, 1, 2))


# --------------------------------- main --------------------------------------

if __name__ == "__main__":
    key = jax.random.PRNGKey(0)
    kx, kp = jax.random.split(key)

    # Small shapes: batch=2, c1=c2=16, spatial 16x16, n=2 bottlenecks, shortcut on.
    N, C1, H, W = 2, 16, 16, 16
    C2, n, shortcut = 16, 2, True

    x = jax.random.normal(kx, (N, C1, H, W), jnp.float32)
    params, c_hidden = init_c2f_params(kp, C1, C2, n)

    out = jax.block_until_ready(c2f_forward(x, params, n, shortcut))
    assert out.shape == (N, C2, H, W), out.shape

    ref = jax.block_until_ready(c2f_reference(x, params, n, shortcut))
    max_err = float(jnp.max(jnp.abs(out - ref)))
    # bf16 MXU operands (f32 accumulation) vs. an f32 HIGHEST-precision reference.
    assert max_err < 1e-1, f"mismatch vs reference: max abs err {max_err}"

    print("KERNEL_OK")
</pallas_src>

<mosaic_0001>
module attributes {stable_mosaic.version = 11 : i64} {
  func.func @_cv1_kernel(%arg0: i32, %arg1: memref<256x16xf32, #tpu.memory_space<vmem>>, %arg2: memref<16x8xbf16, #tpu.memory_space<vmem>>, %arg3: memref<16x8xbf16, #tpu.memory_space<vmem>>, %arg4: memref<1x8xf32, #tpu.memory_space<vmem>>, %arg5: memref<1x8xf32, #tpu.memory_space<vmem>>, %arg6: memref<256x8xf32, #tpu.memory_space<vmem>>, %arg7: memref<256x8xf32, #tpu.memory_space<vmem>>) attributes {dimension_semantics = [#tpu.dimension_semantics<parallel>], iteration_bounds = array<i64: 2>, scalar_prefetch = 0 : i64, scratch_operands = 0 : i64, tpu.core_type = #tpu.core_type<tc>, window_params = [{transform_indices = @transform_0, window_bounds = array<i64: 256, 16>}, {pipeline_mode = #tpu.pipeline_mode<synchronous>, transform_indices = @transform_1, window_bounds = array<i64: 16, 8>}, {pipeline_mode = #tpu.pipeline_mode<synchronous>, transform_indices = @transform_2, window_bounds = array<i64: 16, 8>}, {pipeline_mode = #tpu.pipeline_mode<synchronous>, transform_indices = @transform_3, window_bounds = array<i64: 1, 8>}, {pipeline_mode = #tpu.pipeline_mode<synchronous>, transform_indices = @transform_4, window_bounds = array<i64: 1, 8>}, {transform_indices = @transform_5, window_bounds = array<i64: 256, 8>}, {transform_indices = @transform_6, window_bounds = array<i64: 256, 8>}]} {
    %c0 = arith.constant 0 : index
    %c0_0 = arith.constant 0 : index
    %0 = vector.load %arg1[%c0, %c0_0] : memref<256x16xf32, #tpu.memory_space<vmem>>, vector<256x16xf32>
    %1 = arith.truncf %0 : vector<256x16xf32> to vector<256x16xbf16>
    %c0_1 = arith.constant 0 : index
    %c0_2 = arith.constant 0 : index
    %2 = vector.load %arg2[%c0_1, %c0_2] : memref<16x8xbf16, #tpu.memory_space<vmem>>, vector<16x8xbf16>
    %cst = arith.constant dense<0.000000e+00> : vector<256x8xf32>
    %3 = tpu.matmul %1, %2, %cst {dimension_numbers = #tpu.dot_dimension_numbers<[1], [0], [0], [1], [0, 0, 1, 1], [], []>} : vector<256x16xbf16>, vector<16x8xbf16>, vector<256x8xf32> -> vector<256x8xf32>
    %c0_3 = arith.constant 0 : index
    %c0_4 = arith.constant 0 : index
    %4 = vector.load %arg4[%c0_3, %c0_4] : memref<1x8xf32, #tpu.memory_space<vmem>>, vector<1x8xf32>
    %5 = vector.broadcast %4 : vector<1x8xf32> to vector<256x8xf32>
    %6 = arith.addf %3, %5 : vector<256x8xf32>
    %c0_5 = arith.constant 0 : index
    %c0_6 = arith.constant 0 : index
    %7 = vector.load %arg3[%c0_5, %c0_6] : memref<16x8xbf16, #tpu.memory_space<vmem>>, vector<16x8xbf16>
    %cst_7 = arith.constant dense<0.000000e+00> : vector<256x8xf32>
    %8 = tpu.matmul %1, %7, %cst_7 {dimension_numbers = #tpu.dot_dimension_numbers<[1], [0], [0], [1], [0, 0, 1, 1], [], []>} : vector<256x16xbf16>, vector<16x8xbf16>, vector<256x8xf32> -> vector<256x8xf32>
    %c0_8 = arith.constant 0 : index
    %c0_9 = arith.constant 0 : index
    %9 = vector.load %arg5[%c0_8, %c0_9] : memref<1x8xf32, #tpu.memory_space<vmem>>, vector<1x8xf32>
    %10 = vector.broadcast %9 : vector<1x8xf32> to vector<256x8xf32>
    %11 = arith.addf %8, %10 : vector<256x8xf32>
    %12 = arith.negf %6 : vector<256x8xf32>
    %13 = math.exp %12 : vector<256x8xf32>
    %cst_10 = arith.constant 1.000000e+00 : f32
    %14 = vector.broadcast %cst_10 : f32 to vector<256x8xf32>
    %15 = arith.addf %14, %13 : vector<256x8xf32>
    %16 = arith.divf %14, %15 : vector<256x8xf32>
    %17 = arith.mulf %6, %16 : vector<256x8xf32>
    %c0_11 = arith.constant 0 : index
    %c0_12 = arith.constant 0 : index
    %18 = vector.load %arg6[%c0_11, %c0_12] : memref<256x8xf32, #tpu.memory_space<vmem>>, vector<256x8xf32>
    tpu.vector_store %arg6[%c0_11, %c0_12], %17 {strides = array<i32>} : memref<256x8xf32, #tpu.memory_space<vmem>>, vector<256x8xf32>,
    %19 = arith.negf %11 : vector<256x8xf32>
    %20 = math.exp %19 : vector<256x8xf32>
    %cst_13 = arith.constant 1.000000e+00 : f32
    %21 = vector.broadcast %cst_13 : f32 to vector<256x8xf32>
    %22 = arith.addf %21, %20 : vector<256x8xf32>
    %23 = arith.divf %21, %22 : vector<256x8xf32>
    %24 = arith.mulf %11, %23 : vector<256x8xf32>
    %c0_14 = arith.constant 0 : index
    %c0_15 = arith.constant 0 : index
    %25 = vector.load %arg7[%c0_14, %c0_15] : memref<256x8xf32, #tpu.memory_space<vmem>>, vector<256x8xf32>
    tpu.vector_store %arg7[%c0_14, %c0_15], %24 {strides = array<i32>} : memref<256x8xf32, #tpu.memory_space<vmem>>, vector<256x8xf32>,
    return
  }
  func.func @transform_0(%arg0: i32) -> (i32, i32) {
    %c0_i32 = arith.constant 0 : i32
    %c0_i32_0 = arith.constant 0 : i32
    return %arg0, %c0_i32 : i32, i32
  }
  func.func @transform_1(%arg0: i32) -> (i32, i32) {
    %c0_i32 = arith.constant 0 : i32
    %c0_i32_0 = arith.constant 0 : i32
    %c0_i32_1 = arith.constant 0 : i32
    return %c0_i32, %c0_i32_0 : i32, i32
  }
  func.func @transform_2(%arg0: i32) -> (i32, i32) {
    %c0_i32 = arith.constant 0 : i32
    %c0_i32_0 = arith.constant 0 : i32
    %c0_i32_1 = arith.constant 0 : i32
    return %c0_i32, %c0_i32_0 : i32, i32
  }
  func.func @transform_3(%arg0: i32) -> (i32, i32) {
    %c0_i32 = arith.constant 0 : i32
    %c0_i32_0 = arith.constant 0 : i32
    %c0_i32_1 = arith.constant 0 : i32
    return %c0_i32, %c0_i32_0 : i32, i32
  }
  func.func @transform_4(%arg0: i32) -> (i32, i32) {
    %c0_i32 = arith.constant 0 : i32
    %c0_i32_0 = arith.constant 0 : i32
    %c0_i32_1 = arith.constant 0 : i32
    return %c0_i32, %c0_i32_0 : i32, i32
  }
  func.func @transform_5(%arg0: i32) -> (i32, i32) {
    %c0_i32 = arith.constant 0 : i32
    %c0_i32_0 = arith.constant 0 : i32
    return %arg0, %c0_i32 : i32, i32
  }
  func.func @transform_6(%arg0: i32) -> (i32, i32) {
    %c0_i32 = arith.constant 0 : i32
    %c0_i32_0 = arith.constant 0 : i32
    return %arg0, %c0_i32 : i32, i32
  }
}

module attributes {stable_mosaic.version = 11 : i64} {
  func.func @_cv2_kernel(%arg0: i32, %arg1: memref<256x8xf32, #tpu.memory_space<vmem>>, %arg2: memref<256x8xf32, #tpu.memory_space<vmem>>, %arg3: memref<256x8xf32, #tpu.memory_space<vmem>>, %arg4: memref<256x8xf32, #tpu.memory_space<vmem>>, %arg5: memref<8x16xbf16, #tpu.memory_space<vmem>>, %arg6: memref<8x16xbf16, #tpu.memory_space<vmem>>, %arg7: memref<8x16xbf16, #tpu.memory_space<vmem>>, %arg8: memref<8x16xbf16, #tpu.memory_space<vmem>>, %arg9: memref<1x16xf32, #tpu.memory_space<vmem>>, %arg10: memref<256x16xf32, #tpu.memory_space<vmem>>) attributes {dimension_semantics = [#tpu.dimension_semantics<parallel>], iteration_bounds = array<i64: 2>, scalar_prefetch = 0 : i64, scratch_operands = 0 : i64, tpu.core_type = #tpu.core_type<tc>, window_params = [{transform_indices = @transform_0, window_bounds = array<i64: 256, 8>}, {transform_indices = @transform_1, window_bounds = array<i64: 256, 8>}, {transform_indices = @transform_2, window_bounds = array<i64: 256, 8>}, {transform_indices = @transform_3, window_bounds = array<i64: 256, 8>}, {pipeline_mode = #tpu.pipeline_mode<synchronous>, transform_indices = @transform_4, window_bounds = array<i64: 8, 16>}, {pipeline_mode = #tpu.pipeline_mode<synchronous>, transform_indices = @transform_5, window_bounds = array<i64: 8, 16>}, {pipeline_mode = #tpu.pipeline_mode<synchronous>, transform_indices = @transform_6, window_bounds = array<i64: 8, 16>}, {pipeline_mode = #tpu.pipeline_mode<synchronous>, transform_indices = @transform_7, window_bounds = array<i64: 8, 16>}, {pipeline_mode = #tpu.pipeline_mode<synchronous>, transform_indices = @transform_8, window_bounds = array<i64: 1, 16>}, {transform_indices = @transform_9, window_bounds = array<i64: 256, 16>}]} {
    %c0 = arith.constant 0 : index
    %c0_0 = arith.constant 0 : index
    %0 = vector.load %arg1[%c0, %c0_0] : memref<256x8xf32, #tpu.memory_space<vmem>>, vector<256x8xf32>
    %1 = arith.truncf %0 : vector<256x8xf32> to vector<256x8xbf16>
    %c0_1 = arith.constant 0 : index
    %c0_2 = arith.constant 0 : index
    %2 = vector.load %arg5[%c0_1, %c0_2] : memref<8x16xbf16, #tpu.memory_space<vmem>>, vector<8x16xbf16>
    %cst = arith.constant dense<0.000000e+00> : vector<256x16xf32>
    %3 = tpu.matmul %1, %2, %cst {dimension_numbers = #tpu.dot_dimension_numbers<[1], [0], [0], [1], [0, 0, 1, 1], [], []>} : vector<256x8xbf16>, vector<8x16xbf16>, vector<256x16xf32> -> vector<256x16xf32>
    %c0_3 = arith.constant 0 : index
    %c0_4 = arith.constant 0 : index
    %4 = vector.load %arg2[%c0_3, %c0_4] : memref<256x8xf32, #tpu.memory_space<vmem>>, vector<256x8xf32>
    %5 = arith.truncf %4 : vector<256x8xf32> to vector<256x8xbf16>
    %c0_5 = arith.constant 0 : index
    %c0_6 = arith.constant 0 : index
    %6 = vector.load %arg6[%c0_5, %c0_6] : memref<8x16xbf16, #tpu.memory_space<vmem>>, vector<8x16xbf16>
    %cst_7 = arith.constant dense<0.000000e+00> : vector<256x16xf32>
    %7 = tpu.matmul %5, %6, %cst_7 {dimension_numbers = #tpu.dot_dimension_numbers<[1], [0], [0], [1], [0, 0, 1, 1], [], []>} : vector<256x8xbf16>, vector<8x16xbf16>, vector<256x16xf32> -> vector<256x16xf32>
    %8 = arith.addf %3, %7 : vector<256x16xf32>
    %c0_8 = arith.constant 0 : index
    %c0_9 = arith.constant 0 : index
    %9 = vector.load %arg3[%c0_8, %c0_9] : memref<256x8xf32, #tpu.memory_space<vmem>>, vector<256x8xf32>
    %10 = arith.truncf %9 : vector<256x8xf32> to vector<256x8xbf16>
    %c0_10 = arith.constant 0 : index
    %c0_11 = arith.constant 0 : index
    %11 = vector.load %arg7[%c0_10, %c0_11] : memref<8x16xbf16, #tpu.memory_space<vmem>>, vector<8x16xbf16>
    %cst_12 = arith.constant dense<0.000000e+00> : vector<256x16xf32>
    %12 = tpu.matmul %10, %11, %cst_12 {dimension_numbers = #tpu.dot_dimension_numbers<[1], [0], [0], [1], [0, 0, 1, 1], [], []>} : vector<256x8xbf16>, vector<8x16xbf16>, vector<256x16xf32> -> vector<256x16xf32>
    %13 = arith.addf %8, %12 : vector<256x16xf32>
    %c0_13 = arith.constant 0 : index
    %c0_14 = arith.constant 0 : index
    %14 = vector.load %arg4[%c0_13, %c0_14] : memref<256x8xf32, #tpu.memory_space<vmem>>, vector<256x8xf32>
    %15 = arith.truncf %14 : vector<256x8xf32> to vector<256x8xbf16>
    %c0_15 = arith.constant 0 : index
    %c0_16 = arith.constant 0 : index
    %16 = vector.load %arg8[%c0_15, %c0_16] : memref<8x16xbf16, #tpu.memory_space<vmem>>, vector<8x16xbf16>
    %cst_17 = arith.constant dense<0.000000e+00> : vector<256x16xf32>
    %17 = tpu.matmul %15, %16, %cst_17 {dimension_numbers = #tpu.dot_dimension_numbers<[1], [0], [0], [1], [0, 0, 1, 1], [], []>} : vector<256x8xbf16>, vector<8x16xbf16>, vector<256x16xf32> -> vector<256x16xf32>
    %18 = arith.addf %13, %17 : vector<256x16xf32>
    %c0_18 = arith.constant 0 : index
    %c0_19 = arith.constant 0 : index
    %19 = vector.load %arg9[%c0_18, %c0_19] : memref<1x16xf32, #tpu.memory_space<vmem>>, vector<1x16xf32>
    %20 = vector.broadcast %19 : vector<1x16xf32> to vector<256x16xf32>
    %21 = arith.addf %18, %20 : vector<256x16xf32>
    %22 = arith.negf %21 : vector<256x16xf32>
    %23 = math.exp %22 : vector<256x16xf32>
    %cst_20 = arith.constant 1.000000e+00 : f32
    %24 = vector.broadcast %cst_20 : f32 to vector<256x16xf32>
    %25 = arith.addf %24, %23 : vector<256x16xf32>
    %26 = arith.divf %24, %25 : vector<256x16xf32>
    %27 = arith.mulf %21, %26 : vector<256x16xf32>
    %c0_21 = arith.constant 0 : index
    %c0_22 = arith.constant 0 : index
    %28 = vector.load %arg10[%c0_21, %c0_22] : memref<256x16xf32, #tpu.memory_space<vmem>>, vector<256x16xf32>
    tpu.vector_store %arg10[%c0_21, %c0_22], %27 {strides = array<i32>} : memref<256x16xf32, #tpu.memory_space<vmem>>, vector<256x16xf32>,
    return
  }
  func.func @transform_0(%arg0: i32) -> (i32, i32) {
    %c0_i32 = arith.constant 0 : i32
    %c0_i32_0 = arith.constant 0 : i32
    return %arg0, %c0_i32 : i32, i32
  }
  func.func @transform_1(%arg0: i32) -> (i32, i32) {
    %c0_i32 = arith.constant 0 : i32
    %c0_i32_0 = arith.constant 0 : i32
    return %arg0, %c0_i32 : i32, i32
  }
  func.func @transform_2(%arg0: i32) -> (i32, i32) {
    %c0_i32 = arith.constant 0 : i32
    %c0_i32_0 = arith.constant 0 : i32
    return %arg0, %c0_i32 : i32, i32
  }
  func.func @transform_3(%arg0: i32) -> (i32, i32) {
    %c0_i32 = arith.constant 0 : i32
    %c0_i32_0 = arith.constant 0 : i32
    return %arg0, %c0_i32 : i32, i32
  }
  func.func @transform_4(%arg0: i32) -> (i32, i32) {
    %c0_i32 = arith.constant 0 : i32
    %c0_i32_0 = arith.constant 0 : i32
    %c0_i32_1 = arith.constant 0 : i32
    return %c0_i32, %c0_i32_0 : i32, i32
  }
  func.func @transform_5(%arg0: i32) -> (i32, i32) {
    %c0_i32 = arith.constant 0 : i32
    %c0_i32_0 = arith.constant 0 : i32
    %c0_i32_1 = arith.constant 0 : i32
    return %c0_i32, %c0_i32_0 : i32, i32
  }
  func.func @transform_6(%arg0: i32) -> (i32, i32) {
    %c0_i32 = arith.constant 0 : i32
    %c0_i32_0 = arith.constant 0 : i32
    %c0_i32_1 = arith.constant 0 : i32
    return %c0_i32, %c0_i32_0 : i32, i32
  }
  func.func @transform_7(%arg0: i32) -> (i32, i32) {
    %c0_i32 = arith.constant 0 : i32
    %c0_i32_0 = arith.constant 0 : i32
    %c0_i32_1 = arith.constant 0 : i32
    return %c0_i32, %c0_i32_0 : i32, i32
  }
  func.func @transform_8(%arg0: i32) -> (i32, i32) {
    %c0_i32 = arith.constant 0 : i32
    %c0_i32_0 = arith.constant 0 : i32
    %c0_i32_1 = arith.constant 0 : i32
    return %c0_i32, %c0_i32_0 : i32, i32
  }
  func.func @transform_9(%arg0: i32) -> (i32, i32) {
    %c0_i32 = arith.constant 0 : i32
    %c0_i32_0 = arith.constant 0 : i32
    return %arg0, %c0_i32 : i32, i32
  }
}

module attributes {stable_mosaic.version = 11 : i64} {
  func.func @_bottleneck_kernel(%arg0: i32, %arg1: memref<1x16x16x8xf32, #tpu.memory_space<vmem>>, %arg2: memref<9x8x8xbf16, #tpu.memory_space<vmem>>, %arg3: memref<1x8xf32, #tpu.memory_space<vmem>>, %arg4: memref<9x8x8xbf16, #tpu.memory_space<vmem>>, %arg5: memref<1x8xf32, #tpu.memory_space<vmem>>, %arg6: memref<1x16x16x8xf32, #tpu.memory_space<vmem>>, %arg7: memref<18x18x8xf32, #tpu.memory_space<vmem>>, %arg8: memref<18x18x8xf32, #tpu.memory_space<vmem>>) attributes {dimension_semantics = [#tpu.dimension_semantics<parallel>], iteration_bounds = array<i64: 2>, scalar_prefetch = 0 : i64, scratch_operands = 2 : i64, tpu.core_type = #tpu.core_type<tc>, window_params = [{transform_indices = @transform_0, window_bounds = array<i64: 1, 16, 16, 8>}, {pipeline_mode = #tpu.pipeline_mode<synchronous>, transform_indices = @transform_1, window_bounds = array<i64: 9, 8, 8>}, {pipeline_mode = #tpu.pipeline_mode<synchronous>, transform_indices = @transform_2, window_bounds = array<i64: 1, 8>}, {pipeline_mode = #tpu.pipeline_mode<synchronous>, transform_indices = @transform_3, window_bounds = array<i64: 9, 8, 8>}, {pipeline_mode = #tpu.pipeline_mode<synchronous>, transform_indices = @transform_4, window_bounds = array<i64: 1, 8>}, {transform_indices = @transform_5, window_bounds = array<i64: 1, 16, 16, 8>}]} {
    %cst = arith.constant 0.000000e+00 : f32
    %0 = vector.broadcast %cst : f32 to vector<18x18x8xf32>
    %c0 = arith.constant 0 : index
    %c0_0 = arith.constant 0 : index
    %c0_1 = arith.constant 0 : index
    %1 = vector.load %arg7[%c0, %c0_0, %c0_1] : memref<18x18x8xf32, #tpu.memory_space<vmem>>, vector<18x18x8xf32>
    tpu.vector_store %arg7[%c0, %c0_0, %c0_1], %0 {strides = array<i32>} : memref<18x18x8xf32, #tpu.memory_space<vmem>>, vector<18x18x8xf32>,
    %cst_2 = arith.constant 0.000000e+00 : f32
    %2 = vector.broadcast %cst_2 : f32 to vector<18x18x8xf32>
    %c0_3 = arith.constant 0 : index
    %c0_4 = arith.constant 0 : index
    %c0_5 = arith.constant 0 : index
    %3 = vector.load %arg8[%c0_3, %c0_4, %c0_5] : memref<18x18x8xf32, #tpu.memory_space<vmem>>, vector<18x18x8xf32>
    tpu.vector_store %arg8[%c0_3, %c0_4, %c0_5], %2 {strides = array<i32>} : memref<18x18x8xf32, #tpu.memory_space<vmem>>, vector<18x18x8xf32>,
    %c0_6 = arith.constant 0 : index
    %c0_7 = arith.constant 0 : index
    %c0_8 = arith.constant 0 : index
    %c0_9 = arith.constant 0 : index
    %4 = vector.load %arg1[%c0_6, %c0_7, %c0_8, %c0_9] : memref<1x16x16x8xf32, #tpu.memory_space<vmem>>, vector<1x16x16x8xf32>
    %5 = vector.shape_cast %4 : vector<1x16x16x8xf32> to vector<16x16x8xf32>
    %c1 = arith.constant 1 : index
    %c1_10 = arith.constant 1 : index
    %c0_11 = arith.constant 0 : index
    %6 = vector.load %arg7[%c1, %c1_10, %c0_11] : memref<18x18x8xf32, #tpu.memory_space<vmem>>, vector<16x16x8xf32>
    tpu.vector_store %arg7[%c1, %c1_10, %c0_11], %5 {strides = array<i32>} : memref<18x18x8xf32, #tpu.memory_space<vmem>>, vector<16x16x8xf32>,
    %c0_12 = arith.constant 0 : index
    %c0_13 = arith.constant 0 : index
    %c0_14 = arith.constant 0 : index
    %7 = vector.load %arg7[%c0_12, %c0_13, %c0_14] : memref<18x18x8xf32, #tpu.memory_space<vmem>>, vector<16x16x8xf32>
    %8 = vector.shape_cast %7 : vector<16x16x8xf32> to vector<256x8xf32>
    %9 = arith.truncf %8 : vector<256x8xf32> to vector<256x8xbf16>
    %c0_15 = arith.constant 0 : index
    %c0_16 = arith.constant 0 : index
    %c0_17 = arith.constant 0 : index
    %10 = vector.load %arg2[%c0_15, %c0_16, %c0_17] : memref<9x8x8xbf16, #tpu.memory_space<vmem>>, vector<1x8x8xbf16>
    %11 = vector.shape_cast %10 : vector<1x8x8xbf16> to vector<8x8xbf16>
    %cst_18 = arith.constant dense<0.000000e+00> : vector<256x8xf32>
    %12 = tpu.matmul %9, %11, %cst_18 {dimension_numbers = #tpu.dot_dimension_numbers<[1], [0], [0], [1], [0, 0, 1, 1], [], []>} : vector<256x8xbf16>, vector<8x8xbf16>, vector<256x8xf32> -> vector<256x8xf32>
    %c0_19 = arith.constant 0 : index
    %c1_20 = arith.constant 1 : index
    %c0_21 = arith.constant 0 : index
    %13 = vector.load %arg7[%c0_19, %c1_20, %c0_21] : memref<18x18x8xf32, #tpu.memory_space<vmem>>, vector<16x16x8xf32>
    %14 = vector.shape_cast %13 : vector<16x16x8xf32> to vector<256x8xf32>
    %15 = arith.truncf %14 : vector<256x8xf32> to vector<256x8xbf16>
    %c1_22 = arith.constant 1 : index
    %c0_23 = arith.constant 0 : index
    %c0_24 = arith.constant 0 : index
    %16 = vector.load %arg2[%c1_22, %c0_23, %c0_24] : memref<9x8x8xbf16, #tpu.memory_space<vmem>>, vector<1x8x8xbf16>
    %17 = vector.shape_cast %16 : vector<1x8x8xbf16> to vector<8x8xbf16>
    %cst_25 = arith.constant dense<0.000000e+00> : vector<256x8xf32>
    %18 = tpu.matmul %15, %17, %cst_25 {dimension_numbers = #tpu.dot_dimension_numbers<[1], [0], [0], [1], [0, 0, 1, 1], [], []>} : vector<256x8xbf16>, vector<8x8xbf16>, vector<256x8xf32> -> vector<256x8xf32>
    %19 = arith.addf %12, %18 : vector<256x8xf32>
    %c0_26 = arith.constant 0 : index
    %c2 = arith.constant 2 : index
    %c0_27 = arith.constant 0 : index
    %20 = vector.load %arg7[%c0_26, %c2, %c0_27] : memref<18x18x8xf32, #tpu.memory_space<vmem>>, vector<16x16x8xf32>
    %21 = vector.shape_cast %20 : vector<16x16x8xf32> to vector<256x8xf32>
    %22 = arith.truncf %21 : vector<256x8xf32> to vector<256x8xbf16>
    %c2_28 = arith.constant 2 : index
    %c0_29 = arith.constant 0 : index
    %c0_30 = arith.constant 0 : index
    %23 = vector.load %arg2[%c2_28, %c0_29, %c0_30] : memref<9x8x8xbf16, #tpu.memory_space<vmem>>, vector<1x8x8xbf16>
    %24 = vector.shape_cast %23 : vector<1x8x8xbf16> to vector<8x8xbf16>
    %cst_31 = arith.constant dense<0.000000e+00> : vector<256x8xf32>
    %25 = tpu.matmul %22, %24, %cst_31 {dimension_numbers = #tpu.dot_dimension_numbers<[1], [0], [0], [1], [0, 0, 1, 1], [], []>} : vector<256x8xbf16>, vector<8x8xbf16>, vector<256x8xf32> -> vector<256x8xf32>
    %26 = arith.addf %19, %25 : vector<256x8xf32>
    %c1_32 = arith.constant 1 : index
    %c0_33 = arith.constant 0 : index
    %c0_34 = arith.constant 0 : index
    %27 = vector.load %arg7[%c1_32, %c0_33, %c0_34] : memref<18x18x8xf32, #tpu.memory_space<vmem>>, vector<16x16x8xf32>
    %28 = vector.shape_cast %27 : vector<16x16x8xf32> to vector<256x8xf32>
    %29 = arith.truncf %28 : vector<256x8xf32> to vector<256x8xbf16>
    %c3 = arith.constant 3 : index
    %c0_35 = arith.constant 0 : index
    %c0_36 = arith.constant 0 : index
    %30 = vector.load %arg2[%c3, %c0_35, %c0_36] : memref<9x8x8xbf16, #tpu.memory_space<vmem>>, vector<1x8x8xbf16>
    %31 = vector.shape_cast %30 : vector<1x8x8xbf16> to vector<8x8xbf16>
    %cst_37 = arith.constant dense<0.000000e+00> : vector<256x8xf32>
    %32 = tpu.matmul %29, %31, %cst_37 {dimension_numbers = #tpu.dot_dimension_numbers<[1], [0], [0], [1], [0, 0, 1, 1], [], []>} : vector<256x8xbf16>, vector<8x8xbf16>, vector<256x8xf32> -> vector<256x8xf32>
    %33 = arith.addf %26, %32 : vector<256x8xf32>
    %c1_38 = arith.constant 1 : index
    %c1_39 = arith.constant 1 : index
    %c0_40 = arith.constant 0 : index
    %34 = vector.load %arg7[%c1_38, %c1_39, %c0_40] : memref<18x18x8xf32, #tpu.memory_space<vmem>>, vector<16x16x8xf32>
    %35 = vector.shape_cast %34 : vector<16x16x8xf32> to vector<256x8xf32>
    %36 = arith.truncf %35 : vector<256x8xf32> to vector<256x8xbf16>
    %c4 = arith.constant 4 : index
    %c0_41 = arith.constant 0 : index
    %c0_42 = arith.constant 0 : index
    %37 = vector.load %arg2[%c4, %c0_41, %c0_42] : memref<9x8x8xbf16, #tpu.memory_space<vmem>>, vector<1x8x8xbf16>
    %38 = vector.shape_cast %37 : vector<1x8x8xbf16> to vector<8x8xbf16>
    %cst_43 = arith.constant dense<0.000000e+00> : vector<256x8xf32>
    %39 = tpu.matmul %36, %38, %cst_43 {dimension_numbers = #tpu.dot_dimension_numbers<[1], [0], [0], [1], [0, 0, 1, 1], [], []>} : vector<256x8xbf16>, vector<8x8xbf16>, vector<256x8xf32> -> vector<256x8xf32>
    %40 = arith.addf %33, %39 : vector<256x8xf32>
    %c1_44 = arith.constant 1 : index
    %c2_45 = arith.constant 2 : index
    %c0_46 = arith.constant 0 : index
    %41 = vector.load %arg7[%c1_44, %c2_45, %c0_46] : memref<18x18x8xf32, #tpu.memory_space<vmem>>, vector<16x16x8xf32>
    %42 = vector.shape_cast %41 : vector<16x16x8xf32> to vector<256x8xf32>
    %43 = arith.truncf %42 : vector<256x8xf32> to vector<256x8xbf16>
    %c5 = arith.constant 5 : index
    %c0_47 = arith.constant 0 : index
    %c0_48 = arith.constant 0 : index
    %44 = vector.load %arg2[%c5, %c0_47, %c0_48] : memref<9x8x8xbf16, #tpu.memory_space<vmem>>, vector<1x8x8xbf16>
    %45 = vector.shape_cast %44 : vector<1x8x8xbf16> to vector<8x8xbf16>
    %cst_49 = arith.constant dense<0.000000e+00> : vector<256x8xf32>
    %46 = tpu.matmul %43, %45, %cst_49 {dimension_numbers = #tpu.dot_dimension_numbers<[1], [0], [0], [1], [0, 0, 1, 1], [], []>} : vector<256x8xbf16>, vector<8x8xbf16>, vector<256x8xf32> -> vector<256x8xf32>
    %47 = arith.addf %40, %46 : vector<256x8xf32>
    %c2_50 = arith.constant 2 : index
    %c0_51 = arith.constant 0 : index
    %c0_52 = arith.constant 0 : index
    %48 = vector.load %arg7[%c2_50, %c0_51, %c0_52] : memref<18x18x8xf32, #tpu.memory_space<vmem>>, vector<16x16x8xf32>
    %49 = vector.shape_cast %48 : vector<16x16x8xf32> to vector<256x8xf32>
    %50 = arith.truncf %49 : vector<256x8xf32> to vector<256x8xbf16>
    %c6 = arith.constant 6 : index
    %c0_53 = arith.constant 0 : index
    %c0_54 = arith.constant 0 : index
    %51 = vector.load %arg2[%c6, %c0_53, %c0_54] : memref<9x8x8xbf16, #tpu.memory_space<vmem>>, vector<1x8x8xbf16>
    %52 = vector.shape_cast %51 : vector<1x8x8xbf16> to vector<8x8xbf16>
    %cst_55 = arith.constant dense<0.000000e+00> : vector<256x8xf32>
    %53 = tpu.matmul %50, %52, %cst_55 {dimension_numbers = #tpu.dot_dimension_numbers<[1], [0], [0], [1], [0, 0, 1, 1], [], []>} : vector<256x8xbf16>, vector<8x8xbf16>, vector<256x8xf32> -> vector<256x8xf32>
    %54 = arith.addf %47, %53 : vector<256x8xf32>
    %c2_56 = arith.constant 2 : index
    %c1_57 = arith.constant 1 : index
    %c0_58 = arith.constant 0 : index
    %55 = vector.load %arg7[%c2_56, %c1_57, %c0_58] : memref<18x18x8xf32, #tpu.memory_space<vmem>>, vector<16x16x8xf32>
    %56 = vector.shape_cast %55 : vector<16x16x8xf32> to vector<256x8xf32>
    %57 = arith.truncf %56 : vector<256x8xf32> to vector<256x8xbf16>
    %c7 = arith.constant 7 : index
    %c0_59 = arith.constant 0 : index
    %c0_60 = arith.constant 0 : index
    %58 = vector.load %arg2[%c7, %c0_59, %c0_60] : memref<9x8x8xbf16, #tpu.memory_space<vmem>>, vector<1x8x8xbf16>
    %59 = vector.shape_cast %58 : vector<1x8x8xbf16> to vector<8x8xbf16>
    %cst_61 = arith.constant dense<0.000000e+00> : vector<256x8xf32>
    %60 = tpu.matmul %57, %59, %cst_61 {dimension_numbers = #tpu.dot_dimension_numbers<[1], [0], [0], [1], [0, 0, 1, 1], [], []>} : vector<256x8xbf16>, vector<8x8xbf16>, vector<256x8xf32> -> vector<256x8xf32>
    %61 = arith.addf %54, %60 : vector<256x8xf32>
    %c2_62 = arith.constant 2 : index
    %c2_63 = arith.constant 2 : index
    %c0_64 = arith.constant 0 : index
    %62 = vector.load %arg7[%c2_62, %c2_63, %c0_64] : memref<18x18x8xf32, #tpu.memory_space<vmem>>, vector<16x16x8xf32>
    %63 = vector.shape_cast %62 : vector<16x16x8xf32> to vector<256x8xf32>
    %64 = arith.truncf %63 : vector<256x8xf32> to vector<256x8xbf16>
    %c8 = arith.constant 8 : index
    %c0_65 = arith.constant 0 : index
    %c0_66 = arith.constant 0 : index
    %65 = vector.load %arg2[%c8, %c0_65, %c0_66] : memref<9x8x8xbf16, #tpu.memory_space<vmem>>, vector<1x8x8xbf16>
    %66 = vector.shape_cast %65 : vector<1x8x8xbf16> to vector<8x8xbf16>
    %cst_67 = arith.constant dense<0.000000e+00> : vector<256x8xf32>
    %67 = tpu.matmul %64, %66, %cst_67 {dimension_numbers = #tpu.dot_dimension_numbers<[1], [0], [0], [1], [0, 0, 1, 1], [], []>} : vector<256x8xbf16>, vector<8x8xbf16>, vector<256x8xf32> -> vector<256x8xf32>
    %68 = arith.addf %61, %67 : vector<256x8xf32>
    %c0_68 = arith.constant 0 : index
    %c0_69 = arith.constant 0 : index
    %69 = vector.load %arg3[%c0_68, %c0_69] : memref<1x8xf32, #tpu.memory_space<vmem>>, vector<1x8xf32>
    %70 = vector.broadcast %69 : vector<1x8xf32> to vector<256x8xf32>
    %71 = arith.addf %68, %70 : vector<256x8xf32>
    %72 = arith.negf %71 : vector<256x8xf32>
    %73 = math.exp %72 : vector<256x8xf32>
    %cst_70 = arith.constant 1.000000e+00 : f32
    %74 = vector.broadcast %cst_70 : f32 to vector<256x8xf32>
    %75 = arith.addf %74, %73 : vector<256x8xf32>
    %76 = arith.divf %74, %75 : vector<256x8xf32>
    %77 = arith.mulf %71, %76 : vector<256x8xf32>
    %78 = vector.shape_cast %77 : vector<256x8xf32> to vector<16x16x8xf32>
    %c1_71 = arith.constant 1 : index
    %c1_72 = arith.constant 1 : index
    %c0_73 = arith.constant 0 : index
    %79 = vector.load %arg8[%c1_71, %c1_72, %c0_73] : memref<18x18x8xf32, #tpu.memory_space<vmem>>, vector<16x16x8xf32>
    tpu.vector_store %arg8[%c1_71, %c1_72, %c0_73], %78 {strides = array<i32>} : memref<18x18x8xf32, #tpu.memory_space<vmem>>, vector<16x16x8xf32>,
    %c0_74 = arith.constant 0 : index
    %c0_75 = arith.constant 0 : index
    %c0_76 = arith.constant 0 : index
    %80 = vector.load %arg8[%c0_74, %c0_75, %c0_76] : memref<18x18x8xf32, #tpu.memory_space<vmem>>, vector<16x16x8xf32>
    %81 = vector.shape_cast %80 : vector<16x16x8xf32> to vector<256x8xf32>
    %82 = arith.truncf %81 : vector<256x8xf32> to vector<256x8xbf16>
    %c0_77 = arith.constant 0 : index
    %c0_78 = arith.constant 0 : index
    %c0_79 = arith.constant 0 : index
    %83 = vector.load %arg4[%c0_77, %c0_78, %c0_79] : memref<9x8x8xbf16, #tpu.memory_space<vmem>>, vector<1x8x8xbf16>
    %84 = vector.shape_cast %83 : vector<1x8x8xbf16> to vector<8x8xbf16>
    %cst_80 = arith.constant dense<0.000000e+00> : vector<256x8xf32>
    %85 = tpu.matmul %82, %84, %cst_80 {dimension_numbers = #tpu.dot_dimension_numbers<[1], [0], [0], [1], [0, 0, 1, 1], [], []>} : vector<256x8xbf16>, vector<8x8xbf16>, vector<256x8xf32> -> vector<256x8xf32>
    %c0_81 = arith.constant 0 : index
    %c1_82 = arith.constant 1 : index
    %c0_83 = arith.constant 0 : index
    %86 = vector.load %arg8[%c0_81, %c1_82, %c0_83] : memref<18x18x8xf32, #tpu.memory_space<vmem>>, vector<16x16x8xf32>
    %87 = vector.shape_cast %86 : vector<16x16x8xf32> to vector<256x8xf32>
    %88 = arith.truncf %87 : vector<256x8xf32> to vector<256x8xbf16>
    %c1_84 = arith.constant 1 : index
    %c0_85 = arith.constant 0 : index
    %c0_86 = arith.constant 0 : index
    %89 = vector.load %arg4[%c1_84, %c0_85, %c0_86] : memref<9x8x8xbf16, #tpu.memory_space<vmem>>, vector<1x8x8xbf16>
    %90 = vector.shape_cast %89 : vector<1x8x8xbf16> to vector<8x8xbf16>
    %cst_87 = arith.constant dense<0.000000e+00> : vector<256x8xf32>
    %91 = tpu.matmul %88, %90, %cst_87 {dimension_numbers = #tpu.dot_dimension_numbers<[1], [0], [0], [1], [0, 0, 1, 1], [], []>} : vector<256x8xbf16>, vector<8x8xbf16>, vector<256x8xf32> -> vector<256x8xf32>
    %92 = arith.addf %85, %91 : vector<256x8xf32>
    %c0_88 = arith.constant 0 : index
    %c2_89 = arith.constant 2 : index
    %c0_90 = arith.constant 0 : index
    %93 = vector.load %arg8[%c0_88, %c2_89, %c0_90] : memref<18x18x8xf32, #tpu.memory_space<vmem>>, vector<16x16x8xf32>
    %94 = vector.shape_cast %93 : vector<16x16x8xf32> to vector<256x8xf32>
    %95 = arith.truncf %94 : vector<256x8xf32> to vector<256x8xbf16>
    %c2_91 = arith.constant 2 : index
    %c0_92 = arith.constant 0 : index
    %c0_93 = arith.constant 0 : index
    %96 = vector.load %arg4[%c2_91, %c0_92, %c0_93] : memref<9x8x8xbf16, #tpu.memory_space<vmem>>, vector<1x8x8xbf16>
    %97 = vector.shape_cast %96 : vector<1x8x8xbf16> to vector<8x8xbf16>
    %cst_94 = arith.constant dense<0.000000e+00> : vector<256x8xf32>
    %98 = tpu.matmul %95, %97, %cst_94 {dimension_numbers = #tpu.dot_dimension_numbers<[1], [0], [0], [1], [0, 0, 1, 1], [], []>} : vector<256x8xbf16>, vector<8x8xbf16>, vector<256x8xf32> -> vector<256x8xf32>
    %99 = arith.addf %92, %98 : vector<256x8xf32>
    %c1_95 = arith.constant 1 : index
    %c0_96 = arith.constant 0 : index
    %c0_97 = arith.constant 0 : index
    %100 = vector.load %arg8[%c1_95, %c0_96, %c0_97] : memref<18x18x8xf32, #tpu.memory_space<vmem>>, vector<16x16x8xf32>
    %101 = vector.shape_cast %100 : vector<16x16x8xf32> to vector<256x8xf32>
    %102 = arith.truncf %101 : vector<256x8xf32> to vector<256x8xbf16>
    %c3_98 = arith.constant 3 : index
    %c0_99 = arith.constant 0 : index
    %c0_100 = arith.constant 0 : index
    %103 = vector.load %arg4[%c3_98, %c0_99, %c0_100] : memref<9x8x8xbf16, #tpu.memory_space<vmem>>, vector<1x8x8xbf16>
    %104 = vector.shape_cast %103 : vector<1x8x8xbf16> to vector<8x8xbf16>
    %cst_101 = arith.constant dense<0.000000e+00> : vector<256x8xf32>
    %105 = tpu.matmul %102, %104, %cst_101 {dimension_numbers = #tpu.dot_dimension_numbers<[1], [0], [0], [1], [0, 0, 1, 1], [], []>} : vector<256x8xbf16>, vector<8x8xbf16>, vector<256x8xf32> -> vector<256x8xf32>
    %106 = arith.addf %99, %105 : vector<256x8xf32>
    %c1_102 = arith.constant 1 : index
    %c1_103 = arith.constant 1 : index
    %c0_104 = arith.constant 0 : index
    %107 = vector.load %arg8[%c1_102, %c1_103, %c0_104] : memref<18x18x8xf32, #tpu.memory_space<vmem>>, vector<16x16x8xf32>
    %108 = vector.shape_cast %107 : vector<16x16x8xf32> to vector<256x8xf32>
    %109 = arith.truncf %108 : vector<256x8xf32> to vector<256x8xbf16>
    %c4_105 = arith.constant 4 : index
    %c0_106 = arith.constant 0 : index
    %c0_107 = arith.constant 0 : index
    %110 = vector.load %arg4[%c4_105, %c0_106, %c0_107] : memref<9x8x8xbf16, #tpu.memory_space<vmem>>, vector<1x8x8xbf16>
    %111 = vector.shape_cast %110 : vector<1x8x8xbf16> to vector<8x8xbf16>
    %cst_108 = arith.constant dense<0.000000e+00> : vector<256x8xf32>
    %112 = tpu.matmul %109, %111, %cst_108 {dimension_numbers = #tpu.dot_dimension_numbers<[1], [0], [0], [1], [0, 0, 1, 1], [], []>} : vector<256x8xbf16>, vector<8x8xbf16>, vector<256x8xf32> -> vector<256x8xf32>
    %113 = arith.addf %106, %112 : vector<256x8xf32>
    %c1_109 = arith.constant 1 : index
    %c2_110 = arith.constant 2 : index
    %c0_111 = arith.constant 0 : index
    %114 = vector.load %arg8[%c1_109, %c2_110, %c0_111] : memref<18x18x8xf32, #tpu.memory_space<vmem>>, vector<16x16x8xf32>
    %115 = vector.shape_cast %114 : vector<16x16x8xf32> to vector<256x8xf32>
    %116 = arith.truncf %115 : vector<256x8xf32> to vector<256x8xbf16>
    %c5_112 = arith.constant 5 : index
    %c0_113 = arith.constant 0 : index
    %c0_114 = arith.constant 0 : index
    %117 = vector.load %arg4[%c5_112, %c0_113, %c0_114] : memref<9x8x8xbf16, #tpu.memory_space<vmem>>, vector<1x8x8xbf16>
    %118 = vector.shape_cast %117 : vector<1x8x8xbf16> to vector<8x8xbf16>
    %cst_115 = arith.constant dense<0.000000e+00> : vector<256x8xf32>
    %119 = tpu.matmul %116, %118, %cst_115 {dimension_numbers = #tpu.dot_dimension_numbers<[1], [0], [0], [1], [0, 0, 1, 1], [], []>} : vector<256x8xbf16>, vector<8x8xbf16>, vector<256x8xf32> -> vector<256x8xf32>
    %120 = arith.addf %113, %119 : vector<256x8xf32>
    %c2_116 = arith.constant 2 : index
    %c0_117 = arith.constant 0 : index
    %c0_118 = arith.constant 0 : index
    %121 = vector.load %arg8[%c2_116, %c0_117, %c0_118] : memref<18x18x8xf32, #tpu.memory_space<vmem>>, vector<16x16x8xf32>
    %122 = vector.shape_cast %121 : vector<16x16x8xf32> to vector<256x8xf32>
    %123 = arith.truncf %122 : vector<256x8xf32> to vector<256x8xbf16>
    %c6_119 = arith.constant 6 : index
    %c0_120 = arith.constant 0 : index
    %c0_121 = arith.constant 0 : index
    %124 = vector.load %arg4[%c6_119, %c0_120, %c0_121] : memref<9x8x8xbf16, #tpu.memory_space<vmem>>, vector<1x8x8xbf16>
    %125 = vector.shape_cast %124 : vector<1x8x8xbf16> to vector<8x8xbf16>
    %cst_122 = arith.constant dense<0.000000e+00> : vector<256x8xf32>
    %126 = tpu.matmul %123, %125, %cst_122 {dimension_numbers = #tpu.dot_dimension_numbers<[1], [0], [0], [1], [0, 0, 1, 1], [], []>} : vector<256x8xbf16>, vector<8x8xbf16>, vector<256x8xf32> -> vector<256x8xf32>
    %127 = arith.addf %120, %126 : vector<256x8xf32>
    %c2_123 = arith.constant 2 : index
    %c1_124 = arith.constant 1 : index
    %c0_125 = arith.constant 0 : index
    %128 = vector.load %arg8[%c2_123, %c1_124, %c0_125] : memref<18x18x8xf32, #tpu.memory_space<vmem>>, vector<16x16x8xf32>
    %129 = vector.shape_cast %128 : vector<16x16x8xf32> to vector<256x8xf32>
    %130 = arith.truncf %129 : vector<256x8xf32> to vector<256x8xbf16>
    %c7_126 = arith.constant 7 : index
    %c0_127 = arith.constant 0 : index
    %c0_128 = arith.constant 0 : index
    %131 = vector.load %arg4[%c7_126, %c0_127, %c0_128] : memref<9x8x8xbf16, #tpu.memory_space<vmem>>, vector<1x8x8xbf16>
    %132 = vector.shape_cast %131 : vector<1x8x8xbf16> to vector<8x8xbf16>
    %cst_129 = arith.constant dense<0.000000e+00> : vector<256x8xf32>
    %133 = tpu.matmul %130, %132, %cst_129 {dimension_numbers = #tpu.dot_dimension_numbers<[1], [0], [0], [1], [0, 0, 1, 1], [], []>} : vector<256x8xbf16>, vector<8x8xbf16>, vector<256x8xf32> -> vector<256x8xf32>
    %134 = arith.addf %127, %133 : vector<256x8xf32>
    %c2_130 = arith.constant 2 : index
    %c2_131 = arith.constant 2 : index
    %c0_132 = arith.constant 0 : index
    %135 = vector.load %arg8[%c2_130, %c2_131, %c0_132] : memref<18x18x8xf32, #tpu.memory_space<vmem>>, vector<16x16x8xf32>
    %136 = vector.shape_cast %135 : vector<16x16x8xf32> to vector<256x8xf32>
    %137 = arith.truncf %136 : vector<256x8xf32> to vector<256x8xbf16>
    %c8_133 = arith.constant 8 : index
    %c0_134 = arith.constant 0 : index
    %c0_135 = arith.constant 0 : index
    %138 = vector.load %arg4[%c8_133, %c0_134, %c0_135] : memref<9x8x8xbf16, #tpu.memory_space<vmem>>, vector<1x8x8xbf16>
    %139 = vector.shape_cast %138 : vector<1x8x8xbf16> to vector<8x8xbf16>
    %cst_136 = arith.constant dense<0.000000e+00> : vector<256x8xf32>
    %140 = tpu.matmul %137, %139, %cst_136 {dimension_numbers = #tpu.dot_dimension_numbers<[1], [0], [0], [1], [0, 0, 1, 1], [], []>} : vector<256x8xbf16>, vector<8x8xbf16>, vector<256x8xf32> -> vector<256x8xf32>
    %141 = arith.addf %134, %140 : vector<256x8xf32>
    %c0_137 = arith.constant 0 : index
    %c0_138 = arith.constant 0 : index
    %142 = vector.load %arg5[%c0_137, %c0_138] : memref<1x8xf32, #tpu.memory_space<vmem>>, vector<1x8xf32>
    %143 = vector.broadcast %142 : vector<1x8xf32> to vector<256x8xf32>
    %144 = arith.addf %141, %143 : vector<256x8xf32>
    %145 = arith.negf %144 : vector<256x8xf32>
    %146 = math.exp %145 : vector<256x8xf32>
    %cst_139 = arith.constant 1.000000e+00 : f32
    %147 = vector.broadcast %cst_139 : f32 to vector<256x8xf32>
    %148 = arith.addf %147, %146 : vector<256x8xf32>
    %149 = arith.divf %147, %148 : vector<256x8xf32>
    %150 = arith.mulf %144, %149 : vector<256x8xf32>
    %151 = vector.shape_cast %5 : vector<16x16x8xf32> to vector<256x8xf32>
    %152 = arith.addf %150, %151 : vector<256x8xf32>
    %153 = vector.shape_cast %152 : vector<256x8xf32> to vector<16x16x8xf32>
    %c0_140 = arith.constant 0 : index
    %c0_141 = arith.constant 0 : index
    %c0_142 = arith.constant 0 : index
    %c0_143 = arith.constant 0 : index
    %154 = vector.load %arg6[%c0_140, %c0_141, %c0_142, %c0_143] : memref<1x16x16x8xf32, #tpu.memory_space<vmem>>, vector<1x16x16x8xf32>
    %155 = vector.shape_cast %154 : vector<1x16x16x8xf32> to vector<16x16x8xf32>
    %156 = vector.shape_cast %153 : vector<16x16x8xf32> to vector<1x16x16x8xf32>
    tpu.vector_store %arg6[%c0_140, %c0_141, %c0_142, %c0_143], %156 {strides = array<i32>} : memref<1x16x16x8xf32, #tpu.memory_space<vmem>>, vector<1x16x16x8xf32>,
    return
  }
  func.func @transform_0(%arg0: i32) -> (i32, i32, i32, i32) {
    %c0_i32 = arith.constant 0 : i32
    %c0_i32_0 = arith.constant 0 : i32
    %c0_i32_1 = arith.constant 0 : i32
    %c0_i32_2 = arith.constant 0 : i32
    return %arg0, %c0_i32, %c0_i32_0, %c0_i32_1 : i32, i32, i32, i32
  }
  func.func @transform_1(%arg0: i32) -> (i32, i32, i32) {
    %c0_i32 = arith.constant 0 : i32
    %c0_i32_0 = arith.constant 0 : i32
    %c0_i32_1 = arith.constant 0 : i32
    %c0_i32_2 = arith.constant 0 : i32
    return %c0_i32, %c0_i32_0, %c0_i32_1 : i32, i32, i32
  }
  func.func @transform_2(%arg0: i32) -> (i32, i32) {
    %c0_i32 = arith.constant 0 : i32
    %c0_i32_0 = arith.constant 0 : i32
    %c0_i32_1 = arith.constant 0 : i32
    return %c0_i32, %c0_i32_0 : i32, i32
  }
  func.func @transform_3(%arg0: i32) -> (i32, i32, i32) {
    %c0_i32 = arith.constant 0 : i32
    %c0_i32_0 = arith.constant 0 : i32
    %c0_i32_1 = arith.constant 0 : i32
    %c0_i32_2 = arith.constant 0 : i32
    return %c0_i32, %c0_i32_0, %c0_i32_1 : i32, i32, i32
  }
  func.func @transform_4(%arg0: i32) -> (i32, i32) {
    %c0_i32 = arith.constant 0 : i32
    %c0_i32_0 = arith.constant 0 : i32
    %c0_i32_1 = arith.constant 0 : i32
    return %c0_i32, %c0_i32_0 : i32, i32
  }
  func.func @transform_5(%arg0: i32) -> (i32, i32, i32, i32) {
    %c0_i32 = arith.constant 0 : i32
    %c0_i32_0 = arith.constant 0 : i32
    %c0_i32_1 = arith.constant 0 : i32
    %c0_i32_2 = arith.constant 0 : i32
    return %arg0, %c0_i32, %c0_i32_0, %c0_i32_1 : i32, i32, i32, i32
  }
}

</mosaic_0001>

<bundles_post_ra>
// kernel: c2f_forward.4
= control target key start
LH: loop header
LB: loop body
LE: loop exit
PB: predicated region body
PF: predicated region fallthrough
CT: control target
= control target key end

     0   :  { %s2438_s21 = smov 0   ;;  %s3891_s0 = inlined_call_operand.vmem [shape: f32[512,16], index: 0, kind: input, shape index: {}]   ;;  %s3892_s1 = inlined_call_operand.vmem [shape: bf16[16,8], index: 1, kind: input, shape index: {}]   ;;  %s3893_s2 = inlined_call_operand.vmem [shape: bf16[16,8], index: 2, kind: input, shape index: {}]   ;;  %s3894_s3 = inlined_call_operand.vmem [shape: f32[1,8], index: 3, kind: input, shape index: {}]   ;;  %s3895_s4 = inlined_call_operand.vmem [shape: f32[1,8], index: 4, kind: input, shape index: {}]   ;;  %s3896_s5 = inlined_call_operand.vmem [shape: f32[512,8], index: 5, kind: output, shape index: {0}]   ;;  %s3897_s6 = inlined_call_operand.vmem [shape: f32[512,8], index: 6, kind: output, shape index: {1}]  }
   0x1 LB: > { %s2004_s22 = sadd.s32 4294967295, %s2401_s21   ;;  %p2008_p0 = scmp.ge.s32.totalorder %s2401_s21, 1  ;;  %s2401_s21 = sphi %s2438_s21, %s17_s21  }
   0x2   : > { %p216_p1 = scmp.lt.s32.totalorder %s2401_s21, 3 }
   0x4   : > { %p217_p2 = pnand %p2008_p0, %p216_p1 }
   0x5   : > { %s2009_s27 = sshll.u32 (!%p217_p2), %s2004_s22, 5 }
   0x6   : > { %220 = sbr.rel (%p217_p2) target bundleno = 454 (0x1c6), region = 40  ;;  %p252_p3 = scmp.lt.s32.totalorder (!%p217_p2), %s2009_s27, 63 }
   0xb   : > { %v2121_v0 = vld [vmem:[%s3892_s1] sm:$0xff]  ;;  %s3997_s27 = smov (!%p252_p3, %s2009_s27), 63  ;;  %vm330_vm0 = vcmask 130048   ;;  %vm1209_vm4 = vcmask 64512  }
   0xc   : > { %v2122_v1 = vld [vmem:[%s3893_s2] sm:$0xff]  ;;  %386 = vmatpush.bf16.msra.mxu0 %v2121_v0  ;;  %2123 = vmatpush.bf16.msra.mxu2 %v2121_v0  ;;  %s2452_s28 = sshll.u32 %s3997_s27, 3 }
   0xd   : > { %487 = vmatpush.bf16.msra.mxu1 %v2122_v1  ;;  %2124 = vmatpush.bf16.msra.mxu3 %v2122_v1  ;;  %s2458_s7 = scalar_lea.vmem %s3891_s0, %s2452_s28  ;;  %v2527_v50 = vld [vmem:[%s3894_s3] ss:$0 sm:$0xff]  ;;  %s2631_s14 = scalar_lea.vmem %s3896_s5, %s2452_s28 }
   0xe   : > { %v270_v2 = vld [vmem:[%s2458_s7] sm:$0xff]  ;;  %v271_v3 = vld [vmem:[%s2458_s7 + $0x8] sm:$0xff]  ;;  %v272_v8 = vld [vmem:[%s2458_s7 + $0x10] sm:$0xff]  ;;  %s2645_s17 = scalar_lea.vmem %s3897_s6, %s2452_s28 }
   0xf   : > { %v286_v4 = vld [vmem:[%s2458_s7 + $0x80] sm:$0xff]  ;;  %v302_v5 = vpack.c.bf16 %v271_v3, %v270_v2  ;;  %v287_v6 = vld [vmem:[%s2458_s7 + $0x88] sm:$0xff]  ;;  %v273_v9 = vld [vmem:[%s2458_s7 + $0x18] sm:$0xff] }
  0x10   : > { %v310_v7 = vpack.c.bf16 %v287_v6, %v286_v4  ;;  %v288_v10 = vld [vmem:[%s2458_s7 + $0x90] sm:$0xff]  ;;  %v289_v11 = vld [vmem:[%s2458_s7 + $0x98] sm:$0xff]  ;;  %v303_v12 = vpack.c.bf16 %v273_v9, %v272_v8  ;;  %v274_v14 = vld [vmem:[%s2458_s7 + $0x20] sm:$0xff] }
  0x11   : > { %2019 = vmatmul.msk.bf16.vlgmr.msra.gmra.mxu0 %vm330_vm0, %v302_v5  ;;  %2039 = vmatmul.msk.bf16.vlgmr.msra.gmra.mxu1 %vm330_vm0, %v302_v5  ;;  %v311_v13 = vpack.c.bf16 %v289_v11, %v288_v10  ;;  %v275_v15 = vld [vmem:[%s2458_s7 + $0x28] sm:$0xff]  ;;  %v290_v16 = vld [vmem:[%s2458_s7 + $0xa0] sm:$0xff]  ;;  %v276_v20 = vld [vmem:[%s2458_s7 + $0x30] sm:$0xff] }
  0x12   : > { %2027 = vmatmul.msk.bf16.vlgmr.msra.gmra.mxu2 %vm330_vm0, %v310_v7  ;;  %2047 = vmatmul.msk.bf16.vlgmr.msra.gmra.mxu3 %vm330_vm0, %v310_v7  ;;  %v291_v17 = vld [vmem:[%s2458_s7 + $0xa8] sm:$0xff]  ;;  %v304_v18 = vpack.c.bf16 %v275_v15, %v274_v14  ;;  %v277_v21 = vld [vmem:[%s2458_s7 + $0x38] sm:$0xff]  ;;  %v292_v22 = vld [vmem:[%s2458_s7 + $0xb0] sm:$0xff] }
  0x13   : > { %v312_v19 = vpack.c.bf16 %v291_v17, %v290_v16  ;;  %v293_v23 = vld [vmem:[%s2458_s7 + $0xb8] sm:$0xff]  ;;  %v305_v24 = vpack.c.bf16 %v277_v21, %v276_v20  ;;  %v278_v26 = vld [vmem:[%s2458_s7 + $0x40] sm:$0xff]  ;;  %v279_v27 = vld [vmem:[%s2458_s7 + $0x48] sm:$0xff] }
  0x14   : > { %v313_v25 = vpack.c.bf16 %v293_v23, %v292_v22  ;;  %v294_v28 = vld [vmem:[%s2458_s7 + $0xc0] sm:$0xff]  ;;  %v295_v29 = vld [vmem:[%s2458_s7 + $0xc8] sm:$0xff]  ;;  %v306_v30 = vpack.c.bf16 %v279_v27, %v278_v26  ;;  %v280_v32 = vld [vmem:[%s2458_s7 + $0x50] sm:$0xff] }
  0x15   : > { %v314_v31 = vpack.c.bf16 %v295_v29, %v294_v28  ;;  %v281_v33 = vld [vmem:[%s2458_s7 + $0x58] sm:$0xff]  ;;  %v296_v34 = vld [vmem:[%s2458_s7 + $0xd0] sm:$0xff]  ;;  %v282_v38 = vld [vmem:[%s2458_s7 + $0x60] sm:$0xff] }
  0x16   : > { %v297_v35 = vld [vmem:[%s2458_s7 + $0xd8] sm:$0xff]  ;;  %v307_v36 = vpack.c.bf16 %v281_v33, %v280_v32  ;;  %v283_v39 = vld [vmem:[%s2458_s7 + $0x68] sm:$0xff]  ;;  %v298_v40 = vld [vmem:[%s2458_s7 + $0xe0] sm:$0xff] }
  0x17   : > { %v315_v37 = vpack.c.bf16 %v297_v35, %v296_v34  ;;  %v299_v41 = vld [vmem:[%s2458_s7 + $0xe8] sm:$0xff]  ;;  %v308_v42 = vpack.c.bf16 %v283_v39, %v282_v38  ;;  %v284_v44 = vld [vmem:[%s2458_s7 + $0x70] sm:$0xff]  ;;  %v285_v45 = vld [vmem:[%s2458_s7 + $0x78] sm:$0xff] }
  0x18   : > { %v316_v43 = vpack.c.bf16 %v299_v41, %v298_v40  ;;  %v300_v46 = vld [vmem:[%s2458_s7 + $0xf0] sm:$0xff]  ;;  %v301_v47 = vld [vmem:[%s2458_s7 + $0xf8] sm:$0xff]  ;;  %v309_v48 = vpack.c.bf16 %v285_v45, %v284_v44  ;;  %v2532_v51 = vld [vmem:[%s3895_s4] ss:$0 sm:$0xff] }
  0x19   : > { %v317_v49 = vpack.c.bf16 %v301_v47, %v300_v46 }
  0x21   : > { %2020 = vmatmul.msk.bf16.gmra.mxu0 %vm330_vm0, %v303_v12  ;;  %2040 = vmatmul.msk.bf16.gmra.mxu1 %vm330_vm0, %v303_v12 }
  0x22   : > { %2028 = vmatmul.msk.bf16.gmra.mxu2 %vm330_vm0, %v311_v13  ;;  %2048 = vmatmul.msk.bf16.gmra.mxu3 %vm330_vm0, %v311_v13 }
  0x31   : > { %2021 = vmatmul.msk.bf16.gmra.mxu0 %vm330_vm0, %v304_v18  ;;  %2041 = vmatmul.msk.bf16.gmra.mxu1 %vm330_vm0, %v304_v18 }
  0x32   : > { %2029 = vmatmul.msk.bf16.gmra.mxu2 %vm330_vm0, %v312_v19  ;;  %2049 = vmatmul.msk.bf16.gmra.mxu3 %vm330_vm0, %v312_v19 }
  0x41   : > { %2022 = vmatmul.msk.bf16.gmra.mxu0 %vm330_vm0, %v305_v24  ;;  %2042 = vmatmul.msk.bf16.gmra.mxu1 %vm330_vm0, %v305_v24 }
  0x42   : > { %2030 = vmatmul.msk.bf16.gmra.mxu2 %vm330_vm0, %v313_v25  ;;  %2050 = vmatmul.msk.bf16.gmra.mxu3 %vm330_vm0, %v313_v25 }
  0x51   : > { %2023 = vmatmul.msk.bf16.gmra.mxu0 %vm330_vm0, %v306_v30  ;;  %2043 = vmatmul.msk.bf16.gmra.mxu1 %vm330_vm0, %v306_v30 }
  0x52   : > { %2031 = vmatmul.msk.bf16.gmra.mxu2 %vm330_vm0, %v314_v31  ;;  %2051 = vmatmul.msk.bf16.gmra.mxu3 %vm330_vm0, %v314_v31 }
  0x61   : > { %2024 = vmatmul.msk.bf16.gmra.mxu0 %vm330_vm0, %v307_v36  ;;  %2044 = vmatmul.msk.bf16.gmra.mxu1 %vm330_vm0, %v307_v36 }
  0x62   : > { %2032 = vmatmul.msk.bf16.gmra.mxu2 %vm330_vm0, %v315_v37  ;;  %2052 = vmatmul.msk.bf16.gmra.mxu3 %vm330_vm0, %v315_v37 }
  0x71   : > { %2025 = vmatmul.msk.bf16.gmra.mxu0 %vm330_vm0, %v308_v42  ;;  %2045 = vmatmul.msk.bf16.gmra.mxu1 %vm330_vm0, %v308_v42 }
  0x72   : > { %2033 = vmatmul.msk.bf16.gmra.mxu2 %vm330_vm0, %v316_v43  ;;  %2053 = vmatmul.msk.bf16.gmra.mxu3 %vm330_vm0, %v316_v43 }
  0x81   : > { %2026 = vmatmul.msk.bf16.gmra.mxu0 %vm330_vm0, %v309_v48  ;;  %2046 = vmatmul.msk.bf16.gmra.mxu1 %vm330_vm0, %v309_v48 }
  0x82   : > { %2034 = vmatmul.msk.bf16.gmra.mxu2 %vm330_vm0, %v317_v49  ;;  %2054 = vmatmul.msk.bf16.gmra.mxu3 %vm330_vm0, %v317_v49 }
  0x8e   : > { %v388_v52 = vpop.f32.mrf.mxu0  ;;  %v489_v53 = vpop.f32.mrf.mxu1 }
  0x8f   : > { %v2535_v54 = vadd.f32 %v2527_v50, %v388_v52  ;;  %v2538_v55 = vadd.f32 %v2532_v51, %v489_v53 }
  0x91   : > { %v2055_v56 = vmul.f32 -1.442695, %v2535_v54  ;;  %v2087_v57 = vmul.f32 -1.442695, %v2538_v55 }
  0x93   : > { %2135 = vpow2.f32 %v2055_v56 }
  0x94   : > { %2137 = vpow2.f32 %v2087_v57 }
  0x95   : > { %v428_v58 = vpop.f32.mrf.mxu2  ;;  %v529_v59 = vpop.f32.mrf.mxu3 }
  0x96   : > { %v2543_v60 = vadd.f32 %v2527_v50, %v428_v58  ;;  %v2546_v61 = vadd.f32 %v2532_v51, %v529_v59  ;;  %v390_v62 = vpop.f32.mrf.mxu0  ;;  %v491_v63 = vpop.f32.mrf.mxu1 }
  0x97   : > { %v2549_v0 = vadd.f32 %v2527_v50, %v390_v62  ;;  %v2552_v1 = vadd.f32 %v2532_v51, %v491_v63 }
  0x98   : > { %v2071_v2 = vmul.f32 -1.442695, %v2543_v60  ;;  %v2103_v3 = vmul.f32 -1.442695, %v2546_v61 }
  0x99   : > { %v2136_v4 = vpop.eup %2135  ;;  %v2056_v7 = vmul.f32 -1.442695, %v2549_v0  ;;  %v2088_v9 = vmul.f32 -1.442695, %v2552_v1 }
  0x9a   : > { %v2138_v5 = vpop.eup %2137  ;;  %v2556_v6 = vadd.f32 1.0, %v2136_v4  ;;  %2139 = vpow2.f32 %v2071_v2 }
  0x9b   : > { %v2559_v8 = vadd.f32 1.0, %v2138_v5  ;;  %2141 = vpow2.f32 %v2103_v3 }
  0x9c   : > { %2143 = vrcp.f32 %v2556_v6  ;;  %v706_v14 = vand.u32 2147483647, %v2556_v6  ;;  %v708_v15 = vand.u32 2147483648, %v2556_v6  ;;  %vm702_vm1 = vweird.f32 %v2556_v6 }
  0x9d   : > { %2145 = vrcp.f32 %v2559_v8  ;;  %v430_v10 = vpop.f32.mrf.mxu2  ;;  %v531_v11 = vpop.f32.mrf.mxu3  ;;  %v1379_v17 = vand.u32 2147483647, %v2559_v8  ;;  %v1381_v18 = vand.u32 2147483648, %v2559_v8  ;;  %vm1375_vm2 = vweird.f32 %v2559_v8 }
  0x9e   : > { %2147 = vpow2.f32 %v2056_v7  ;;  %v2565_v12 = vadd.f32 %v2527_v50, %v430_v10  ;;  %v393_v13 = vpop.f32.mrf.mxu0  ;;  %v2573_v20 = vadd.f32 %v2532_v51, %v531_v11  ;;  %v494_v26 = vpop.f32.mrf.mxu1  ;;  %vm2585_vm3 = vcmp.eq.f32.partialorder %v706_v14, 8.507059e+37 }
  0x9f   : > { %2149 = vpow2.f32 %v2088_v9  ;;  %v2578_v23 = vadd.f32 %v2527_v50, %v393_v13  ;;  %v709_v30 = vor.u32 1.1754944e-38, %v708_v15  ;;  %vm2591_vm5 = vcmp.eq.f32.partialorder %v1379_v17, 8.507059e+37 }
  0xa0   : > { %v2140_v16 = vpop.eup %2139  ;;  %v2072_v19 = vmul.f32 -1.442695, %v2565_v12  ;;  %v1382_v34 = vor.u32 1.1754944e-38, %v1381_v18  ;;  %v2104_v35 = vmul.f32 -1.442695, %v2573_v20  ;;  %v2599_v39 = vadd.f32 %v2532_v51, %v494_v26 }
  0xa1   : > { %v2142_v21 = vpop.eup %2141  ;;  %v2575_v22 = vadd.f32 1.0, %v2140_v16  ;;  %v2057_v38 = vmul.f32 -1.442695, %v2578_v23 }
  0xa2   : > { %v2144_v24 = vpop.eup %2143  ;;  %v2582_v25 = vadd.f32 1.0, %v2142_v21  ;;  %v2612_v53 = vmul.f32 -1.442695, %v2599_v39 }
  0xa3   : > { %v2146_v27 = vpop.eup %2145  ;;  %v698_v28 = vmul.f32 %v2144_v24, %v2556_v6  ;;  %2151 = vrcp.f32 %v2575_v22  ;;  %vm703_vm6 = vweird.f32 %v2144_v24  ;;  %v946_v41 = vand.u32 2147483647, %v2575_v22 }
  0xa4   : > { %v2148_v31 = vpop.eup %2147  ;;  %v1371_v32 = vmul.f32 %v2146_v27, %v2559_v8  ;;  %2153 = vpow2.f32 %v2072_v19  ;;  %v948_v42 = vand.u32 2147483648, %v2575_v22  ;;  %v1621_v44 = vand.u32 2147483648, %v2582_v25  ;;  %vm704_vm9 = vmor %vm702_vm1, %vm703_vm6 }
  0xa5   : > { %v2150_v36 = vpop.eup %2149  ;;  %v699_v37 = vsub.f32 1.0, %v698_v28  ;;  %2155 = vrcp.f32 %v2582_v25  ;;  %v2604_v45 = vadd.f32 1.0, %v2148_v31  ;;  %vm1376_vm7 = vweird.f32 %v2146_v27  ;;  %v433_v62 = vpop.f32.mrf.mxu2 }
  0xa6   : > { %v1372_v40 = vsub.f32 1.0, %v1371_v32  ;;  %v2606_v46 = vadd.f32 1.0, %v2150_v36  ;;  %v1619_v48 = vand.u32 2147483647, %v2582_v25  ;;  %2157 = vpow2.f32 %v2104_v35  ;;  %vm1377_vm12 = vmor %vm1375_vm2, %vm1376_vm7 }
  0xa7   : > { %v700_v43 = vmul.f32 %v2144_v24, %v699_v37  ;;  %vm942_vm8 = vweird.f32 %v2575_v22  ;;  %2159 = vrcp.f32 %v2604_v45  ;;  %vm2618_vm10 = vcmp.eq.f32.partialorder %v946_v41, 8.507059e+37 }
  0xa8   : > { %v1373_v47 = vmul.f32 %v2146_v27, %v1372_v40  ;;  %vm1615_vm11 = vweird.f32 %v2582_v25  ;;  %v949_v3 = vor.u32 1.1754944e-38, %v948_v42  ;;  %v1622_v4 = vor.u32 1.1754944e-38, %v1621_v44 }
  0xa9   : > { %v2152_v49 = vpop.eup %2151  ;;  %v701_v52 = vadd.f32 %v2144_v24, %v700_v43  ;;  %2161 = vrcp.f32 %v2606_v46  ;;  %vm2636_vm13 = vcmp.eq.f32.partialorder %v1619_v48, 8.507059e+37  ;;  %v721_v13 = vand.u32 2147483647, %v2604_v45  ;;  %v534_v48 = vpop.f32.mrf.mxu3 }
  0xaa   : > { %v2154_v56 = vpop.eup %2153  ;;  %v1374_v57 = vadd.f32 %v2146_v27, %v1373_v47  ;;  %v938_v58 = vmul.f32 %v2152_v49, %v2575_v22  ;;  %v2651_v14 = vadd.f32 %v2527_v50, %v433_v62  ;;  %vm943_vm14 = vweird.f32 %v2152_v49 }
  0xab   : > { %v2156_v63 = vpop.eup %2155  ;;  %v705_v2 = vsel %vm704_vm9, %v2144_v24, %v701_v52  ;;  %vm717_vm15 = vweird.f32 %v2604_v45  ;;  %v723_v19 = vand.u32 2147483648, %v2604_v45  ;;  %v2658_v21 = vadd.f32 1.0, %v2154_v56  ;;  %vm944_vm1 = vmor %vm942_vm8, %vm943_vm14 }
  0xac   : > { %v710_v5 = vsel %vm2585_vm3, %v709_v30, %v705_v2  ;;  %v1378_v6 = vsel %vm1377_vm12, %v2146_v27, %v1374_v57  ;;  %v939_v7 = vsub.f32 1.0, %v938_v58  ;;  %v1611_v9 = vmul.f32 %v2156_v63, %v2582_v25  ;;  %v2158_v15 = vpop.eup %2157 }
  0xad   : > { %v1177_v10 = vmul.f32 %v710_v5, %v2535_v54  ;;  %v1383_v11 = vsel %vm2591_vm5, %v1382_v34, %v1378_v6  ;;  %v2160_v18 = vpop.eup %2159  ;;  %2163 = vpow2.f32 %v2057_v38  ;;  %vm1616_vm0 = vweird.f32 %v2156_v63  ;;  %v395_v5 = vpop.f32.mrf.mxu0 }
  0xae   : > { %v1850_v16 = vmul.f32 %v1383_v11, %v2538_v55  ;;  %v940_v17 = vmul.f32 %v2152_v49, %v939_v7  ;;  %v1612_v54 = vsub.f32 1.0, %v1611_v9  ;;  %v713_v55 = vmul.f32 %v2160_v18, %v2604_v45  ;;  %vm1617_vm3 = vmor %vm1615_vm11, %vm1616_vm0 }
  0xaf   : > { %1210 = vst.msk [vmem:[%s2631_s14] sm:$0xff] %vm1209_vm4, %v1177_v10  ;;  %v2162_v27 = vpop.eup %2161  ;;  %vm2665_vm2 = vcmp.eq.f32.partialorder %v721_v13, 8.507059e+37  ;;  %v1394_v29 = vand.u32 2147483647, %v2606_v46  ;;  %2165 = vrcp.f32 %v2658_v21  ;;  %v2671_v30 = vadd.f32 1.0, %v2158_v15  ;;  %v496_v13 = vpop.f32.mrf.mxu1 }
  0xb0   : > { %1882 = vst.msk [vmem:[%s2645_s17] sm:$0xff] %vm1209_vm4, %v1850_v16  ;;  %v941_v24 = vadd.f32 %v2152_v49, %v940_v17  ;;  %v1613_v26 = vmul.f32 %v2156_v63, %v1612_v54  ;;  %v714_v33 = vsub.f32 1.0, %v713_v55  ;;  %v1386_v34 = vmul.f32 %v2162_v27, %v2606_v46 }
  0xb1   : > { %vm718_vm5 = vweird.f32 %v2160_v18  ;;  %vm1390_vm6 = vweird.f32 %v2606_v46  ;;  %v1396_v35 = vand.u32 2147483648, %v2606_v46  ;;  %v724_v43 = vor.u32 1.1754944e-38, %v723_v19 }
  0xb2   : > { %v945_v31 = vsel %vm944_vm1, %v2152_v49, %v941_v24  ;;  %v1614_v32 = vadd.f32 %v2156_v63, %v1613_v26  ;;  %v715_v38 = vmul.f32 %v2160_v18, %v714_v33  ;;  %v1387_v40 = vsub.f32 1.0, %v1386_v34  ;;  %vm719_vm9 = vmor %vm717_vm15, %vm718_vm5  ;;  %v435_v24 = vpop.f32.mrf.mxu2  ;;  %v536_v33 = vpop.f32.mrf.mxu3 }
  0xb3   : > { %v950_v22 = vsel %vm2618_vm10, %v949_v3, %v945_v31  ;;  %v2164_v41 = vpop.eup %2163  ;;  %vm2683_vm7 = vcmp.eq.f32.partialorder %v1394_v29, 8.507059e+37  ;;  %2167 = vrcp.f32 %v2671_v30  ;;  %vm1391_vm8 = vweird.f32 %v2162_v27 }
  0xb4   : > { %v1193_v36 = vmul.f32 %v950_v22, %v2543_v60  ;;  %v1618_v37 = vsel %vm1617_vm3, %v2156_v63, %v1614_v32  ;;  %v716_v60 = vadd.f32 %v2160_v18, %v715_v38  ;;  %v1388_v47 = vmul.f32 %v2162_v27, %v1387_v40  ;;  %vm1392_vm10 = vmor %vm1390_vm6, %vm1391_vm8 }
  0xb5   : > { %v1623_v42 = vsel %vm2636_vm13, %v1622_v4, %v1618_v37  ;;  %v2166_v49 = vpop.eup %2165  ;;  %v961_v52 = vand.u32 2147483647, %v2658_v21  ;;  %v963_v56 = vand.u32 2147483648, %v2658_v21  ;;  %v2696_v57 = vadd.f32 1.0, %v2164_v41 }
  0xb6   : > { %1226 = vst.msk [vmem:[%s2631_s14 + $0x80] sm:$0xff] %vm1209_vm4, %v1193_v36  ;;  %v1866_v25 = vmul.f32 %v1623_v42, %v2546_v61  ;;  %2169 = vpow2.f32 %v2612_v53  ;;  %v720_v61 = vsel %vm719_vm9, %v2160_v18, %v716_v60  ;;  %v1389_v58 = vadd.f32 %v2162_v27, %v1388_v47  ;;  %v398_v60 = vpop.f32.mrf.mxu0 }
  0xb7   : > { %v1397_v59 = vor.u32 1.1754944e-38, %v1396_v35  ;;  %v953_v62 = vmul.f32 %v2166_v49, %v2658_v21  ;;  %v725_v45 = vsel %vm2665_vm2, %v724_v43, %v720_v61  ;;  %vm957_vm11 = vweird.f32 %v2658_v21 }
  0xb8   : > { %1898 = vst.msk [vmem:[%s2645_s17 + $0x80] sm:$0xff] %vm1209_vm4, %v1866_v25  ;;  %v1634_v63 = vand.u32 2147483647, %v2671_v30  ;;  %2171 = vrcp.f32 %v2696_v57  ;;  %v1178_v53 = vmul.f32 %v725_v45, %v2549_v0  ;;  %v1393_v2 = vsel %vm1392_vm10, %v2162_v27, %v1389_v58 }
  0xb9   : > { %v954_v3 = vsub.f32 1.0, %v953_v62  ;;  %v1636_v4 = vand.u32 2147483648, %v2671_v30  ;;  %v2168_v6 = vpop.eup %2167  ;;  %v1398_v7 = vsel %vm2683_vm7, %v1397_v59, %v1393_v2  ;;  %vm2713_vm12 = vcmp.eq.f32.partialorder %v961_v52, 8.507059e+37 }
  0xba   : > { %v964_v9 = vor.u32 1.1754944e-38, %v963_v56  ;;  %v2073_v8 = vmul.f32 -1.442695, %v2651_v14  ;;  %1211 = vst.msk [vmem:[%s2631_s14 + $0x8] sm:$0xff] %vm1209_vm4, %v1178_v53  ;;  %v1851_v0 = vmul.f32 %v1398_v7, %v2552_v1  ;;  %vm958_vm13 = vweird.f32 %v2166_v49 }
  0xbb   : > { %v955_v10 = vmul.f32 %v2166_v49, %v954_v3  ;;  %v1626_v11 = vmul.f32 %v2168_v6, %v2671_v30  ;;  %vm1630_vm14 = vweird.f32 %v2671_v30  ;;  %vm2723_vm15 = vcmp.eq.f32.partialorder %v1634_v63, 8.507059e+37  ;;  %vm959_vm0 = vmor %vm957_vm11, %vm958_vm13 }
  0xbc   : > { %v2170_v15 = vpop.eup %2169  ;;  %2173 = vpow2.f32 %v2073_v8  ;;  %v2728_v17 = vadd.f32 %v2532_v51, %v534_v48  ;;  %1883 = vst.msk [vmem:[%s2645_s17 + $0x8] sm:$0xff] %vm1209_vm4, %v1851_v0  ;;  %v1637_v18 = vor.u32 1.1754944e-38, %v1636_v4  ;;  %vm732_vm1 = vweird.f32 %v2696_v57  ;;  %v499_v8 = vpop.f32.mrf.mxu1 }
  0xbd   : > { %v956_v54 = vadd.f32 %v2166_v49, %v955_v10  ;;  %v1627_v1 = vsub.f32 1.0, %v1626_v11  ;;  %v2732_v19 = vadd.f32 1.0, %v2170_v15  ;;  %v2740_v27 = vadd.f32 %v2527_v50, %v395_v5 }
  0xbe   : > { %v2172_v26 = vpop.eup %2171  ;;  %v2105_v55 = vmul.f32 -1.442695, %v2728_v17  ;;  %v2743_v28 = vadd.f32 %v2532_v51, %v496_v13  ;;  %vm1631_vm2 = vweird.f32 %v2168_v6  ;;  %v738_v34 = vand.u32 2147483648, %v2696_v57 }
  0xbf   : > { %v960_v29 = vsel %vm959_vm0, %v2166_v49, %v956_v54  ;;  %v1628_v31 = vmul.f32 %v2168_v6, %v1627_v1  ;;  %v728_v32 = vmul.f32 %v2172_v26, %v2696_v57  ;;  %2175 = vrcp.f32 %v2732_v19  ;;  %vm1632_vm3 = vmor %vm1630_vm14, %vm1631_vm2  ;;  %v438_v54 = vpop.f32.mrf.mxu2  ;;  %v539_v1 = vpop.f32.mrf.mxu3 }
  0xc0   : > { %v965_v21 = vsel %vm2713_vm12, %v964_v9, %v960_v29  ;;  %v2751_v22 = vadd.f32 %v2527_v50, %v435_v24  ;;  %v736_v38 = vand.u32 2147483647, %v2696_v57  ;;  %2177 = vpow2.f32 %v2105_v55 }
  0xc1   : > { %v1194_v35 = vmul.f32 %v965_v21, %v2565_v12  ;;  %v1629_v36 = vadd.f32 %v2168_v6, %v1628_v31  ;;  %v729_v37 = vsub.f32 1.0, %v728_v32  ;;  %v2058_v41 = vmul.f32 -1.442695, %v2740_v27 }
  0xc2   : > { %v2174_v40 = vpop.eup %2173  ;;  %v2090_v42 = vmul.f32 -1.442695, %v2743_v28  ;;  %v2760_v43 = vadd.f32 %v2532_v51, %v536_v33  ;;  %vm733_vm5 = vweird.f32 %v2172_v26  ;;  %v739_v47 = vor.u32 1.1754944e-38, %v738_v34  ;;  %v400_v33 = vpop.f32.mrf.mxu0 }
  0xc3   : > { %1227 = vst.msk [vmem:[%s2631_s14 + $0x88] sm:$0xff] %vm1209_vm4, %v1194_v35  ;;  %v1633_v44 = vsel %vm1632_vm3, %v2168_v6, %v1629_v36  ;;  %v730_v12 = vmul.f32 %v2172_v26, %v729_v37  ;;  %v2764_v25 = vadd.f32 1.0, %v2174_v40  ;;  %2179 = vpow2.f32 %v2058_v41  ;;  %vm734_vm6 = vmor %vm732_vm1, %vm733_vm5 }
  0xc4   : > { %v1638_v30 = vsel %vm2723_vm15, %v1637_v18, %v1633_v44  ;;  %v2074_v48 = vmul.f32 -1.442695, %v2751_v22  ;;  %v1409_v56 = vand.u32 2147483647, %v2732_v19  ;;  %v1411_v58 = vand.u32 2147483648, %v2732_v19 }
  0xc5   : > { %v1867_v49 = vmul.f32 %v1638_v30, %v2573_v20  ;;  %v731_v52 = vadd.f32 %v2172_v26, %v730_v12  ;;  %2181 = vrcp.f32 %v2764_v25  ;;  %v2176_v61 = vpop.eup %2175  ;;  %v2106_v59 = vmul.f32 -1.442695, %v2760_v43 }
  0xc6   : > { %2183 = vpow2.f32 %v2090_v42  ;;  %v2777_v62 = vadd.f32 %v2527_v50, %v398_v60  ;;  %vm737_vm7 = vcmp.eq.f32.partialorder %v736_v38, 8.507059e+37  ;;  %v1401_v45 = vmul.f32 %v2176_v61, %v2732_v19  ;;  %v2178_v63 = vpop.eup %2177 }
  0xc7   : > { %1899 = vst.msk [vmem:[%s2645_s17 + $0x88] sm:$0xff] %vm1209_vm4, %v1867_v49  ;;  %v735_v20 = vsel %vm734_vm6, %v2172_v26, %v731_v52  ;;  %v976_v57 = vand.u32 2147483647, %v2764_v25  ;;  %v978_v2 = vand.u32 2147483648, %v2764_v25  ;;  %2185 = vpow2.f32 %v2074_v48 }
  0xc8   : > { %v740_v53 = vsel %vm737_vm7, %v739_v47, %v735_v20  ;;  %v1402_v4 = vsub.f32 1.0, %v1401_v45  ;;  %v2785_v5 = vadd.f32 1.0, %v2178_v63  ;;  %v2059_v6 = vmul.f32 -1.442695, %v2777_v62 }
  0xc9   : > { %v1179_v3 = vmul.f32 %v740_v53, %v2578_v23  ;;  %v2180_v7 = vpop.eup %2179  ;;  %vm1405_vm8 = vweird.f32 %v2732_v19  ;;  %vm2789_vm9 = vcmp.eq.f32.partialorder %v1409_v56, 8.507059e+37  ;;  %v1412_v9 = vor.u32 1.1754944e-38, %v1411_v58 }
  0xca   : > { %2187 = vpow2.f32 %v2106_v59  ;;  %v1403_v10 = vmul.f32 %v2176_v61, %v1402_v4  ;;  %vm1406_vm10 = vweird.f32 %v2176_v61  ;;  %vm972_vm11 = vweird.f32 %v2764_v25 }
  0xcb   : > { %v2182_v0 = vpop.eup %2181  ;;  %1212 = vst.msk [vmem:[%s2631_s14 + $0x10] sm:$0xff] %vm1209_vm4, %v1179_v3  ;;  %2189 = vrcp.f32 %v2785_v5  ;;  %vm2798_vm12 = vcmp.eq.f32.partialorder %v976_v57, 8.507059e+37  ;;  %v979_v15 = vor.u32 1.1754944e-38, %v978_v2  ;;  %v2802_v16 = vadd.f32 1.0, %v2180_v7  ;;  %vm1407_vm13 = vmor %vm1405_vm8, %vm1406_vm10 }
  0xcc   : > { %v2184_v23 = vpop.eup %2183  ;;  %v968_v11 = vmul.f32 %v2182_v0, %v2764_v25  ;;  %v1404_v18 = vadd.f32 %v2176_v61, %v1403_v10  ;;  %2191 = vpow2.f32 %v2059_v6  ;;  %v2807_v26 = vadd.f32 %v2532_v51, %v499_v8 }
  0xcd   : > { %v2804_v24 = vadd.f32 1.0, %v2184_v23  ;;  %v2186_v55 = vpop.eup %2185  ;;  %v1649_v31 = vand.u32 2147483647, %v2785_v5  ;;  %v1651_v32 = vand.u32 2147483648, %v2785_v5  ;;  %2193 = vrcp.f32 %v2802_v16 }
  0xce   : > { %v969_v29 = vsub.f32 1.0, %v968_v11  ;;  %v1408_v21 = vsel %vm1407_vm13, %v2176_v61, %v1404_v18  ;;  %v2817_v34 = vadd.f32 %v2527_v50, %v438_v54  ;;  %v2820_v35 = vadd.f32 %v2532_v51, %v539_v1 }
  0xcf   : > { %2195 = vrcp.f32 %v2804_v24  ;;  %v1413_v36 = vsel %vm2789_vm9, %v1412_v9, %v1408_v21  ;;  %vm973_vm14 = vweird.f32 %v2182_v0  ;;  %v753_v38 = vand.u32 2147483648, %v2802_v16 }
  0xd0   : > { %v2188_v19 = vpop.eup %2187  ;;  %v970_v37 = vmul.f32 %v2182_v0, %v969_v29  ;;  %v1852_v41 = vmul.f32 %v1413_v36, %v2599_v39  ;;  %vm1645_vm15 = vweird.f32 %v2785_v5  ;;  %v751_v42 = vand.u32 2147483647, %v2802_v16  ;;  %vm974_vm1 = vmor %vm972_vm11, %vm973_vm14 }
  0xd1   : > { %v2190_v40 = vpop.eup %2189  ;;  %v2829_v44 = vadd.f32 %v2527_v50, %v400_v33  ;;  %vm2832_vm0 = vcmp.eq.f32.partialorder %v1649_v31, 8.507059e+37  ;;  %v1652_v47 = vor.u32 1.1754944e-38, %v1651_v32  ;;  %vm747_vm2 = vweird.f32 %v2802_v16 }
  0xd2   : > { %v971_v12 = vadd.f32 %v2182_v0, %v970_v37  ;;  %v1641_v60 = vmul.f32 %v2190_v40, %v2785_v5  ;;  %v2192_v48 = vpop.eup %2191  ;;  %1884 = vst.msk [vmem:[%s2645_s17 + $0x10] sm:$0xff] %vm1209_vm4, %v1852_v41  ;;  %v1424_v39 = vand.u32 2147483647, %v2804_v24  ;;  %v1426_v49 = vand.u32 2147483648, %v2804_v24 }
  0xd3   : > { %v2843_v52 = vadd.f32 1.0, %v2186_v55  ;;  %v2194_v56 = vpop.eup %2193  ;;  %v754_v59 = vor.u32 1.1754944e-38, %v753_v38  ;;  %vm1420_vm3 = vweird.f32 %v2804_v24  ;;  %v2846_v20 = vadd.f32 1.0, %v2188_v19 }
  0xd4   : > { %v975_v61 = vsel %vm974_vm1, %v2182_v0, %v971_v12  ;;  %v1642_v58 = vsub.f32 1.0, %v1641_v60  ;;  %vm1646_vm5 = vweird.f32 %v2190_v40  ;;  %v743_v63 = vmul.f32 %v2194_v56, %v2802_v16 }
  0xd5   : > { %v2196_v45 = vpop.eup %2195  ;;  %v980_v25 = vsel %vm2798_vm12, %v979_v15, %v975_v61  ;;  %vm2851_vm6 = vcmp.eq.f32.partialorder %v751_v42, 8.507059e+37  ;;  %2197 = vrcp.f32 %v2843_v52  ;;  %v2858_v4 = vadd.f32 1.0, %v2192_v48  ;;  %vm1647_vm8 = vmor %vm1645_vm15, %vm1646_vm5  ;;  %v501_v42 = vpop.f32.mrf.mxu1 }
  0xd6   : > { %v1195_v57 = vmul.f32 %v980_v25, %v2651_v14  ;;  %v1643_v2 = vmul.f32 %v2190_v40, %v1642_v58  ;;  %v1416_v3 = vmul.f32 %v2196_v45, %v2804_v24  ;;  %v744_v6 = vsub.f32 1.0, %v743_v63  ;;  %v440_v48 = vpop.f32.mrf.mxu2 }
  0xd7   : > { %vm2860_vm7 = vcmp.eq.f32.partialorder %v1424_v39, 8.507059e+37  ;;  %v1427_v46 = vor.u32 1.1754944e-38, %v1426_v49  ;;  %v2091_v9 = vmul.f32 -1.442695, %v2807_v26  ;;  %v991_v10 = vand.u32 2147483647, %v2843_v52 }
  0xd8   : > { %1228 = vst.msk [vmem:[%s2631_s14 + $0x90] sm:$0xff] %vm1209_vm4, %v1195_v57  ;;  %v1644_v8 = vadd.f32 %v2190_v40, %v1643_v2  ;;  %v1417_v0 = vsub.f32 1.0, %v1416_v3  ;;  %2199 = vrcp.f32 %v2846_v20  ;;  %v745_v14 = vmul.f32 %v2194_v56, %v744_v6 }
  0xd9   : > { %vm748_vm9 = vweird.f32 %v2194_v56  ;;  %v993_v23 = vand.u32 2147483648, %v2843_v52  ;;  %v2075_v11 = vmul.f32 -1.442695, %v2817_v34  ;;  %vm1421_vm10 = vweird.f32 %v2196_v45 }
  0xda   : > { %v1648_v13 = vsel %vm1647_vm8, %v2190_v40, %v1644_v8  ;;  %v1418_v15 = vmul.f32 %v2196_v45, %v1417_v0  ;;  %2201 = vrcp.f32 %v2858_v4  ;;  %v746_v18 = vadd.f32 %v2194_v56, %v745_v14  ;;  %vm749_vm12 = vmor %vm747_vm2, %vm748_vm9 }
  0xdb   : > { %v2198_v54 = vpop.eup %2197  ;;  %v1653_v1 = vsel %vm2832_vm0, %v1652_v47, %v1648_v13  ;;  %vm987_vm11 = vweird.f32 %v2843_v52  ;;  %v1664_v5 = vand.u32 2147483647, %v2846_v20  ;;  %vm2883_vm13 = vcmp.eq.f32.partialorder %v991_v10, 8.507059e+37  ;;  %vm1422_vm14 = vmor %vm1420_vm3, %vm1421_vm10 }
  0xdc   : > { %v1868_v55 = vmul.f32 %v1653_v1, %v2728_v17  ;;  %v1419_v29 = vadd.f32 %v2196_v45, %v1418_v15  ;;  %v983_v31 = vmul.f32 %v2198_v54, %v2843_v52  ;;  %v750_v33 = vsel %vm749_vm12, %v2194_v56, %v746_v18  ;;  %v541_v56 = vpop.f32.mrf.mxu3 }
  0xdd   : > { %v994_v21 = vor.u32 1.1754944e-38, %v993_v23  ;;  %vm1660_vm15 = vweird.f32 %v2846_v20  ;;  %v1666_v19 = vand.u32 2147483648, %v2846_v20  ;;  %vm762_vm0 = vweird.f32 %v2858_v4 }
  0xde   : > { %v2200_v17 = vpop.eup %2199  ;;  %1900 = vst.msk [vmem:[%s2645_s17 + $0x90] sm:$0xff] %vm1209_vm4, %v1868_v55  ;;  %v755_v16 = vsel %vm2851_vm6, %v754_v59, %v750_v33  ;;  %v1423_v36 = vsel %vm1422_vm14, %v2196_v45, %v1419_v29  ;;  %v984_v37 = vsub.f32 1.0, %v983_v31  ;;  %2203 = vpow2.f32 %v2091_v9  ;;  %v403_v9 = vpop.f32.mrf.mxu0 }
  0xdf   : > { %v1180_v24 = vmul.f32 %v755_v16, %v2740_v27  ;;  %v1428_v38 = vsel %vm2860_vm7, %v1427_v46, %v1423_v36  ;;  %vm988_vm1 = vweird.f32 %v2198_v54  ;;  %v1656_v40 = vmul.f32 %v2200_v17, %v2846_v20 }
  0xe0   : > { %vm2900_vm2 = vcmp.eq.f32.partialorder %v1664_v5, 8.507059e+37  ;;  %v2202_v12 = vpop.eup %2201  ;;  %v1853_v60 = vmul.f32 %v1428_v38, %v2743_v28  ;;  %v985_v30 = vmul.f32 %v2198_v54, %v984_v37  ;;  %v766_v47 = vand.u32 2147483647, %v2858_v4  ;;  %vm989_vm5 = vmor %vm987_vm11, %vm988_vm1  ;;  %v443_v37 = vpop.f32.mrf.mxu2 }
  0xe1   : > { %v768_v27 = vand.u32 2147483648, %v2858_v4  ;;  %1213 = vst.msk [vmem:[%s2631_s14 + $0x18] sm:$0xff] %vm1209_vm4, %v1180_v24  ;;  %v1657_v39 = vsub.f32 1.0, %v1656_v40  ;;  %vm1661_vm3 = vweird.f32 %v2200_v17  ;;  %v758_v49 = vmul.f32 %v2202_v12, %v2858_v4 }
  0xe2   : > { %2205 = vpow2.f32 %v2075_v11  ;;  %1885 = vst.msk [vmem:[%s2645_s17 + $0x18] sm:$0xff] %vm1209_vm4, %v1853_v60  ;;  %v986_v61 = vadd.f32 %v2198_v54, %v985_v30  ;;  %v2107_v58 = vmul.f32 -1.442695, %v2820_v35  ;;  %v2060_v28 = vmul.f32 -1.442695, %v2829_v44  ;;  %vm1662_vm7 = vmor %vm1660_vm15, %vm1661_vm3 }
  0xe3   : > { %v2915_v59 = vadd.f32 %v2532_v51, %v501_v42  ;;  %v1658_v45 = vmul.f32 %v2200_v17, %v1657_v39  ;;  %v759_v25 = vsub.f32 1.0, %v758_v49  ;;  %vm763_vm6 = vweird.f32 %v2202_v12 }
  0xe4   : > { %v2921_v63 = vadd.f32 %v2527_v50, %v440_v48  ;;  %v2204_v53 = vpop.eup %2203  ;;  %v990_v57 = vsel %vm989_vm5, %v2198_v54, %v986_v61  ;;  %2207 = vpow2.f32 %v2107_v58  ;;  %v2925_v3 = vadd.f32 %v2532_v51, %v541_v56  ;;  %vm764_vm9 = vmor %vm762_vm0, %vm763_vm6 }
  0xe5   : > { %v2092_v2 = vmul.f32 -1.442695, %v2915_v59  ;;  %v995_v6 = vsel %vm2883_vm13, %v994_v21, %v990_v57  ;;  %v1659_v52 = vadd.f32 %v2200_v17, %v1658_v45  ;;  %v760_v7 = vmul.f32 %v2202_v12, %v759_v25  ;;  %v504_v21 = vpop.f32.mrf.mxu1 }
  0xe6   : > { %v2929_v46 = vadd.f32 1.0, %v2204_v53  ;;  %v1196_v8 = vmul.f32 %v995_v6, %v2751_v22  ;;  %v1667_v0 = vor.u32 1.1754944e-38, %v1666_v19  ;;  %vm2935_vm8 = vcmp.eq.f32.partialorder %v766_v47, 8.507059e+37 }
  0xe7   : > { %2209 = vpow2.f32 %v2060_v28  ;;  %v1663_v23 = vsel %vm1662_vm7, %v2200_v17, %v1659_v52  ;;  %v761_v11 = vadd.f32 %v2202_v12, %v760_v7  ;;  %v769_v13 = vor.u32 1.1754944e-38, %v768_v27 }
  0xe8   : > { %v2206_v14 = vpop.eup %2205  ;;  %2211 = vrcp.f32 %v2929_v46  ;;  %1229 = vst.msk [vmem:[%s2631_s14 + $0x98] sm:$0xff] %vm1209_vm4, %v1196_v8  ;;  %v1668_v22 = vsel %vm2900_vm2, %v1667_v0, %v1663_v23  ;;  %v2076_v15 = vmul.f32 -1.442695, %v2921_v63  ;;  %v2951_v54 = vadd.f32 %v2527_v50, %v403_v9 }
  0xe9   : > { %v2947_v20 = vadd.f32 1.0, %v2206_v14  ;;  %v1869_v1 = vmul.f32 %v1668_v22, %v2760_v43  ;;  %v765_v18 = vsel %vm764_vm9, %v2202_v12, %v761_v11  ;;  %2213 = vpow2.f32 %v2092_v2 }
  0xea   : > { %v2108_v5 = vmul.f32 -1.442695, %v2925_v3  ;;  %v2208_v55 = vpop.eup %2207  ;;  %v770_v29 = vsel %vm2935_vm8, %v769_v13, %v765_v18  ;;  %v1439_v4 = vand.u32 2147483647, %v2929_v46  ;;  %v1441_v31 = vand.u32 2147483648, %v2929_v46 }
  0xeb   : > { %2215 = vrcp.f32 %v2947_v20  ;;  %1901 = vst.msk [vmem:[%s2645_s17 + $0x98] sm:$0xff] %vm1209_vm4, %v1869_v1  ;;  %v1181_v32 = vmul.f32 %v770_v29, %v2777_v62  ;;  %vm1435_vm10 = vweird.f32 %v2929_v46  ;;  %v2964_v33 = vadd.f32 1.0, %v2208_v55 }
  0xec   : > { %2217 = vpow2.f32 %v2076_v15  ;;  %v1006_v17 = vand.u32 2147483647, %v2947_v20  ;;  %v2061_v36 = vmul.f32 -1.442695, %v2951_v54  ;;  %vm2973_vm11 = vcmp.eq.f32.partialorder %v1439_v4, 8.507059e+37 }
  0xed   : > { %v2210_v43 = vpop.eup %2209  ;;  %1214 = vst.msk [vmem:[%s2631_s14 + $0x20] sm:$0xff] %vm1209_vm4, %v1181_v32  ;;  %2219 = vpow2.f32 %v2108_v5  ;;  %v1442_v38 = vor.u32 1.1754944e-38, %v1441_v31  ;;  %vm1002_vm12 = vweird.f32 %v2947_v20  ;;  %v1008_v41 = vand.u32 2147483648, %v2947_v20 }
  0xee   : > { %v2212_v19 = vpop.eup %2211  ;;  %v2969_v16 = vadd.f32 1.0, %v2210_v43  ;;  %2221 = vrcp.f32 %v2964_v33  ;;  %v2982_v42 = vadd.f32 %v2532_v51, %v504_v21  ;;  %v1681_v30 = vand.u32 2147483648, %v2964_v33 }
  0xef   : > { %v1431_v62 = vmul.f32 %v2212_v19, %v2929_v46  ;;  %v2214_v40 = vpop.eup %2213  ;;  %v2988_v27 = vadd.f32 %v2527_v50, %v443_v37  ;;  %vm2991_vm13 = vcmp.eq.f32.partialorder %v1006_v17, 8.507059e+37  ;;  %v1679_v49 = vand.u32 2147483647, %v2964_v33 }
  0xf0   : > { %2223 = vrcp.f32 %v2969_v16  ;;  %v2985_v47 = vadd.f32 1.0, %v2214_v40  ;;  %v783_v51 = vand.u32 2147483648, %v2969_v16  ;;  %vm1436_vm14 = vweird.f32 %v2212_v19 }
  0xf1   : > { %v2216_v12 = vpop.eup %2215  ;;  %v1432_v60 = vsub.f32 1.0, %v1431_v62  ;;  %v781_v58 = vand.u32 2147483647, %v2969_v16  ;;  %v1009_v45 = vor.u32 1.1754944e-38, %v1008_v41  ;;  %vm1675_vm0 = vweird.f32 %v2964_v33  ;;  %vm1437_vm2 = vmor %vm1435_vm10, %vm1436_vm14 }
  0xf2   : > { %v998_v48 = vmul.f32 %v2216_v12, %v2947_v20  ;;  %v2218_v56 = vpop.eup %2217  ;;  %2225 = vrcp.f32 %v2985_v47  ;;  %vm1003_vm15 = vweird.f32 %v2216_v12  ;;  %v1682_v57 = vor.u32 1.1754944e-38, %v1681_v30 }
  0xf3   : > { %v1433_v61 = vmul.f32 %v2212_v19, %v1432_v60  ;;  %v2220_v28 = vpop.eup %2219  ;;  %vm777_vm1 = vweird.f32 %v2969_v16  ;;  %v3001_v2 = vadd.f32 1.0, %v2218_v56  ;;  %2227 = vpow2.f32 %v2061_v36  ;;  %vm1004_vm6 = vmor %vm1002_vm12, %vm1003_vm15 }
  0xf4   : > { %v999_v50 = vsub.f32 1.0, %v998_v48  ;;  %v2222_v25 = vpop.eup %2221  ;;  %vm3007_vm3 = vcmp.eq.f32.partialorder %v1679_v49, 8.507059e+37  ;;  %v784_v8 = vor.u32 1.1754944e-38, %v783_v51  ;;  %v1454_v0 = vand.u32 2147483647, %v2985_v47 }
  0xf5   : > { %v1434_v53 = vadd.f32 %v2212_v19, %v1433_v61  ;;  %v1671_v7 = vmul.f32 %v2222_v25, %v2964_v33  ;;  %vm3013_vm5 = vcmp.eq.f32.partialorder %v781_v58, 8.507059e+37  ;;  %v1456_v46 = vand.u32 2147483648, %v2985_v47  ;;  %v544_v33 = vpop.f32.mrf.mxu3 }
  0xf6   : > { %v2224_v6 = vpop.eup %2223  ;;  %v1000_v52 = vmul.f32 %v2216_v12, %v999_v50  ;;  %v3018_v11 = vadd.f32 1.0, %v2220_v28  ;;  %2229 = vrcp.f32 %v3001_v2  ;;  %vm1676_vm7 = vweird.f32 %v2222_v25  ;;  %v506_v50 = vpop.f32.mrf.mxu1 }
  0xf7   : > { %v1438_v10 = vsel %vm1437_vm2, %v2212_v19, %v1434_v53  ;;  %v773_v14 = vmul.f32 %v2224_v6, %v2969_v16  ;;  %v1672_v15 = vsub.f32 1.0, %v1671_v7  ;;  %vm1450_vm8 = vweird.f32 %v2985_v47 }
  0xf8   : > { %v1443_v13 = vsel %vm2973_vm11, %v1442_v38, %v1438_v10  ;;  %v1001_v22 = vadd.f32 %v2216_v12, %v1000_v52  ;;  %v2226_v1 = vpop.eup %2225  ;;  %vm3029_vm9 = vcmp.eq.f32.partialorder %v1454_v0, 8.507059e+37  ;;  %vm778_vm10 = vweird.f32 %v2224_v6  ;;  %vm1677_vm11 = vmor %vm1675_vm0, %vm1676_vm7  ;;  %v3086_v10 = vld [vmem:[%s3895_s4] ss:$0 sm:$0xff] }
  0xf9   : > { %v1854_v18 = vmul.f32 %v1443_v13, %v2807_v26  ;;  %v774_v5 = vsub.f32 1.0, %v773_v14  ;;  %v1673_v29 = vmul.f32 %v2222_v25, %v1672_v15  ;;  %v1446_v4 = vmul.f32 %v2226_v1, %v2985_v47  ;;  %v2228_v32 = vpop.eup %2227 }
  0xfa   : > { %v1005_v55 = vsel %vm1004_vm6, %v2216_v12, %v1001_v22  ;;  %v1457_v43 = vor.u32 1.1754944e-38, %v1456_v46  ;;  %2231 = vrcp.f32 %v3018_v11  ;;  %vm1451_vm12 = vweird.f32 %v2226_v1 }
  0xfb   : > { %1886 = vst.msk [vmem:[%s2645_s17 + $0x20] sm:$0xff] %vm1209_vm4, %v1854_v18  ;;  %v1010_v26 = vsel %vm2991_vm13, %v1009_v45, %v1005_v55  ;;  %v775_v20 = vmul.f32 %v2224_v6, %v774_v5  ;;  %v1674_v19 = vadd.f32 %v2222_v25, %v1673_v29  ;;  %v1447_v17 = vsub.f32 1.0, %v1446_v4  ;;  %vm779_vm13 = vmor %vm777_vm1, %vm778_vm10 }
  0xfc   : > { %v1197_v21 = vmul.f32 %v1010_v26, %v2817_v34  ;;  %vm1017_vm14 = vweird.f32 %v3001_v2  ;;  %v1021_v37 = vand.u32 2147483647, %v3001_v2  ;;  %v2230_v62 = vpop.eup %2229  ;;  %v1023_v38 = vand.u32 2147483648, %v3001_v2  ;;  %vm1452_vm15 = vmor %vm1450_vm8, %vm1451_vm12 }
  0xfd   : > { %v776_v36 = vadd.f32 %v2224_v6, %v775_v20  ;;  %v1678_v24 = vsel %vm1677_vm11, %v2222_v25, %v1674_v19  ;;  %v1448_v34 = vmul.f32 %v2226_v1, %v1447_v17  ;;  %v3049_v40 = vadd.f32 1.0, %v2228_v32  ;;  %v546_v29 = vpop.f32.mrf.mxu3 }
  0xfe   : > { %1230 = vst.msk [vmem:[%s2631_s14 + $0xa0] sm:$0xff] %vm1209_vm4, %v1197_v21  ;;  %v1683_v41 = vsel %vm3007_vm3, %v1682_v57, %v1678_v24  ;;  %v1013_v60 = vmul.f32 %v2230_v62, %v3001_v2  ;;  %v1694_v30 = vand.u32 2147483647, %v3018_v11  ;;  %v1696_v49 = vand.u32 2147483648, %v3018_v11  ;;  %v445_v57 = vpop.f32.mrf.mxu2 }
  0xff   : > { %v780_v12 = vsel %vm779_vm13, %v2224_v6, %v776_v36  ;;  %v1870_v48 = vmul.f32 %v1683_v41, %v2820_v35  ;;  %v1449_v39 = vadd.f32 %v2226_v1, %v1448_v34  ;;  %vm3063_vm0 = vcmp.eq.f32.partialorder %v1021_v37, 8.507059e+37 }
 0x100   : > { %v785_v16 = vsel %vm3013_vm5, %v784_v8, %v780_v12  ;;  %v1014_v56 = vsub.f32 1.0, %v1013_v60  ;;  %2233 = vrcp.f32 %v3049_v40  ;;  %v2232_v35 = vpop.eup %2231  ;;  %vm1018_vm1 = vweird.f32 %v2230_v62 }
 0x101   : > { %v1182_v51 = vmul.f32 %v785_v16, %v2829_v44  ;;  %1902 = vst.msk [vmem:[%s2645_s17 + $0xa0] sm:$0xff] %vm1209_vm4, %v1870_v48  ;;  %v1453_v58 = vsel %vm1452_vm15, %v2226_v1, %v1449_v39  ;;  %v1024_v28 = vor.u32 1.1754944e-38, %v1023_v38  ;;  %vm1690_vm2 = vweird.f32 %v3018_v11  ;;  %v405_v44 = vpop.f32.mrf.mxu0  ;;  %vm1019_vm6 = vmor %vm1017_vm14, %vm1018_vm1 }
 0x102   : > { %v1458_v47 = vsel %vm3029_vm9, %v1457_v43, %v1453_v58  ;;  %v1015_v45 = vmul.f32 %v2230_v62, %v1014_v56  ;;  %v1686_v25 = vmul.f32 %v2232_v35, %v3018_v11  ;;  %vm3076_vm3 = vcmp.eq.f32.partialorder %v1694_v30, 8.507059e+37 }
 0x103   : > { %1215 = vst.msk [vmem:[%s2631_s14 + $0x28] sm:$0xff] %vm1209_vm4, %v1182_v51  ;;  %v1855_v6 = vmul.f32 %v1458_v47, %v2915_v59  ;;  %vm1691_vm5 = vweird.f32 %v2232_v35  ;;  %v1697_v52 = vor.u32 1.1754944e-38, %v1696_v49  ;;  %v2093_v7 = vmul.f32 -1.442695, %v2982_v42  ;;  %v3099_v59 = vld [vmem:[%s3894_s3] ss:$0 sm:$0xff] }
 0x104   : > { %v1016_v9 = vadd.f32 %v2230_v62, %v1015_v45  ;;  %v1687_v8 = vsub.f32 1.0, %v1686_v25  ;;  %v2077_v0 = vmul.f32 -1.442695, %v2988_v27  ;;  %v3089_v14 = vadd.f32 %v3086_v10, %v544_v33  ;;  %vm1692_vm8 = vmor %vm1690_vm2, %vm1691_vm5 }
 0x105   : > { %1887 = vst.msk [vmem:[%s2645_s17 + $0x28] sm:$0xff] %vm1209_vm4, %v1855_v6  ;;  %2235 = vpow2.f32 %v2093_v7  ;;  %v3102_v23 = vadd.f32 %v3099_v59, %v405_v44  ;;  %v3105_v46 = vadd.f32 %v3086_v10, %v506_v50  ;;  %v3108_v13 = vadd.f32 %v3099_v59, %v445_v57 }
 0x106   : > { %v2234_v22 = vpop.eup %2233  ;;  %v1020_v15 = vsel %vm1019_vm6, %v2230_v62, %v1016_v9  ;;  %v1688_v1 = vmul.f32 %v2232_v35, %v1687_v8  ;;  %2237 = vpow2.f32 %v2077_v0  ;;  %v2109_v2 = vmul.f32 -1.442695, %v3089_v14  ;;  %v509_v62 = vpop.f32.mrf.mxu1 }
 0x107   : > { %v1025_v18 = vsel %vm3063_vm0, %v1024_v28, %v1020_v15  ;;  %v788_v5 = vmul.f32 %v2234_v22, %v3049_v40  ;;  %vm792_vm7 = vweird.f32 %v3049_v40  ;;  %v2062_v55 = vmul.f32 -1.442695, %v3102_v23  ;;  %v448_v56 = vpop.f32.mrf.mxu2 }
 0x108   : > { %v1198_v4 = vmul.f32 %v1025_v18, %v2921_v63  ;;  %v1689_v31 = vadd.f32 %v2232_v35, %v1688_v1  ;;  %2239 = vpow2.f32 %v2109_v2  ;;  %v2094_v32 = vmul.f32 -1.442695, %v3105_v46 }
 0x109   : > { %v789_v26 = vsub.f32 1.0, %v788_v5  ;;  %v798_v20 = vand.u32 2147483648, %v3049_v40  ;;  %2241 = vpow2.f32 %v2062_v55  ;;  %v2078_v43 = vmul.f32 -1.442695, %v3108_v13  ;;  %v408_v37 = vpop.f32.mrf.mxu0 }
 0x10a   : > { %1231 = vst.msk [vmem:[%s2631_s14 + $0xa8] sm:$0xff] %vm1209_vm4, %v1198_v4  ;;  %v1693_v21 = vsel %vm1692_vm8, %v2232_v35, %v1689_v31  ;;  %v796_v19 = vand.u32 2147483647, %v3049_v40  ;;  %2243 = vpow2.f32 %v2094_v32  ;;  %v3127_v63 = vadd.f32 %v3086_v10, %v546_v29 }
 0x10b   : > { %v2236_v17 = vpop.eup %2235  ;;  %v1698_v11 = vsel %vm3076_vm3, %v1697_v52, %v1693_v21  ;;  %v790_v36 = vmul.f32 %v2234_v22, %v789_v26  ;;  %vm793_vm9 = vweird.f32 %v2234_v22  ;;  %2245 = vpow2.f32 %v2078_v43 }
 0x10c   : > { %v2238_v24 = vpop.eup %2237  ;;  %v1871_v34 = vmul.f32 %v1698_v11, %v2925_v3  ;;  %v3132_v38 = vadd.f32 1.0, %v2236_v17  ;;  %v799_v41 = vor.u32 1.1754944e-38, %v798_v20  ;;  %vm794_vm10 = vmor %vm792_vm7, %vm793_vm9  ;;  %v2110_v30 = vmul.f32 -1.442695, %v3127_v63 }
 0x10d   : > { %v791_v33 = vadd.f32 %v2234_v22, %v790_v36  ;;  %v3134_v12 = vadd.f32 1.0, %v2238_v24  ;;  %v3143_v48 = vadd.f32 %v3099_v59, %v408_v37  ;;  %v3146_v3 = vadd.f32 %v3086_v10, %v509_v62 }
 0x10e   : > { %v2240_v60 = vpop.eup %2239  ;;  %1903 = vst.msk [vmem:[%s2645_s17 + $0xa8] sm:$0xff] %vm1209_vm4, %v1871_v34  ;;  %2247 = vrcp.f32 %v3132_v38  ;;  %vm797_vm11 = vcmp.eq.f32.partialorder %v796_v19, 8.507059e+37  ;;  %v1469_v40 = vand.u32 2147483647, %v3132_v38  ;;  %v1471_v58 = vand.u32 2147483648, %v3132_v38 }
 0x10f   : > { %v2242_v16 = vpop.eup %2241  ;;  %v795_v39 = vsel %vm794_vm10, %v2234_v22, %v791_v33  ;;  %2249 = vrcp.f32 %v3134_v12  ;;  %v3152_v28 = vadd.f32 1.0, %v2240_v60  ;;  %v1036_v50 = vand.u32 2147483647, %v3134_v12 }
 0x110   : > { %v2244_v49 = vpop.eup %2243  ;;  %v800_v51 = vsel %vm797_vm11, %v799_v41, %v795_v39  ;;  %v3154_v44 = vadd.f32 1.0, %v2242_v16  ;;  %2251 = vpow2.f32 %v2110_v30  ;;  %v2063_v47 = vmul.f32 -1.442695, %v3143_v48 }
 0x111   : > { %v2246_v61 = vpop.eup %2245  ;;  %v1183_v35 = vmul.f32 %v800_v51, %v2951_v54  ;;  %v2095_v45 = vmul.f32 -1.442695, %v3146_v3  ;;  %vm1465_vm12 = vweird.f32 %v3132_v38  ;;  %2253 = vrcp.f32 %v3152_v28 }
 0x112   : > { %v3163_v54 = vadd.f32 1.0, %v2244_v49  ;;  %v3166_v25 = vadd.f32 %v3099_v59, %v448_v56  ;;  %vm1032_vm14 = vweird.f32 %v3134_v12  ;;  %v1038_v57 = vand.u32 2147483648, %v3134_v12 }
 0x113   : > { %1216 = vst.msk [vmem:[%s2631_s14 + $0x30] sm:$0xff] %vm1209_vm4, %v1183_v35  ;;  %2255 = vrcp.f32 %v3154_v44  ;;  %v3171_v6 = vadd.f32 1.0, %v2246_v61  ;;  %vm3174_vm13 = vcmp.eq.f32.partialorder %v1469_v40, 8.507059e+37  ;;  %v1472_v8 = vor.u32 1.1754944e-38, %v1471_v58 }
 0x114   : > { %v2248_v53 = vpop.eup %2247  ;;  %v1711_v0 = vand.u32 2147483648, %v3152_v28  ;;  %vm3180_vm15 = vcmp.eq.f32.partialorder %v1036_v50, 8.507059e+37  ;;  %v1709_v1 = vand.u32 2147483647, %v3152_v28  ;;  %2257 = vpow2.f32 %v2063_v47 }
 0x115   : > { %v2250_v52 = vpop.eup %2249  ;;  %v1461_v7 = vmul.f32 %v2248_v53, %v3132_v38  ;;  %v811_v18 = vand.u32 2147483647, %v3154_v44  ;;  %v813_v5 = vand.u32 2147483648, %v3154_v44  ;;  %2259 = vrcp.f32 %v3163_v54 }
 0x116   : > { %v1028_v22 = vmul.f32 %v2250_v52, %v3134_v12  ;;  %v2252_v55 = vpop.eup %2251  ;;  %v1039_v4 = vor.u32 1.1754944e-38, %v1038_v57  ;;  %vm1705_vm0 = vweird.f32 %v3152_v28  ;;  %2261 = vrcp.f32 %v3171_v6 }
 0x117   : > { %v1462_v2 = vsub.f32 1.0, %v1461_v7  ;;  %v2254_v31 = vpop.eup %2253  ;;  %vm1466_vm1 = vweird.f32 %v2248_v53  ;;  %v1712_v26 = vor.u32 1.1754944e-38, %v1711_v0  ;;  %vm807_vm2 = vweird.f32 %v3154_v44 }
 0x118   : > { %v1029_v29 = vsub.f32 1.0, %v1028_v22  ;;  %vm1033_vm3 = vweird.f32 %v2250_v52  ;;  %v1701_v21 = vmul.f32 %v2254_v31, %v3152_v28  ;;  %vm3192_vm5 = vcmp.eq.f32.partialorder %v1709_v1, 8.507059e+37  ;;  %vm1467_vm7 = vmor %vm1465_vm12, %vm1466_vm1  ;;  %v549_v28 = vpop.f32.mrf.mxu3 }
 0x119   : > { %v1463_v32 = vmul.f32 %v2248_v53, %v1462_v2  ;;  %v2256_v20 = vpop.eup %2255  ;;  %v1484_v17 = vand.u32 2147483647, %v3163_v54  ;;  %vm3198_vm6 = vcmp.eq.f32.partialorder %v811_v18, 8.507059e+37  ;;  %v814_v62 = vor.u32 1.1754944e-38, %v813_v5  ;;  %vm1034_vm11 = vmor %vm1032_vm14, %vm1033_vm3 }
 0x11a   : > { %v1030_v43 = vmul.f32 %v2250_v52, %v1029_v29  ;;  %v803_v36 = vmul.f32 %v2256_v20, %v3154_v44  ;;  %v1486_v24 = vand.u32 2147483648, %v3163_v54  ;;  %v2258_v34 = vpop.eup %2257  ;;  %v1702_v41 = vsub.f32 1.0, %v1701_v21 }
 0x11b   : > { %v1464_v11 = vadd.f32 %v2248_v53, %v1463_v32  ;;  %vm1706_vm8 = vweird.f32 %v2254_v31  ;;  %vm808_vm9 = vweird.f32 %v2256_v20  ;;  %vm1480_vm10 = vweird.f32 %v3163_v54  ;;  %v2260_v60 = vpop.eup %2259 }
 0x11c   : > { %v1031_v33 = vadd.f32 %v2250_v52, %v1030_v43  ;;  %v804_v16 = vsub.f32 1.0, %v803_v36  ;;  %v3210_v39 = vadd.f32 1.0, %v2252_v55  ;;  %2263 = vpow2.f32 %v2095_v45  ;;  %v2262_v49 = vpop.eup %2261 }
 0x11d   : > { %v1468_v30 = vsel %vm1467_vm7, %v2248_v53, %v1464_v11  ;;  %v1703_v40 = vmul.f32 %v2254_v31, %v1702_v41  ;;  %v1476_v56 = vmul.f32 %v2260_v60, %v3163_v54  ;;  %vm3215_vm12 = vcmp.eq.f32.partialorder %v1484_v17, 8.507059e+37 }
 0x11e   : > { %v1473_v38 = vsel %vm3174_vm13, %v1472_v8, %v1468_v30  ;;  %v1035_v51 = vsel %vm1034_vm11, %v2250_v52, %v1031_v33  ;;  %vm1047_vm14 = vweird.f32 %v3171_v6  ;;  %v805_v58 = vmul.f32 %v2256_v20, %v804_v16  ;;  %vm1707_vm13 = vmor %vm1705_vm0, %vm1706_vm8  ;;  %v450_v30 = vpop.f32.mrf.mxu2 }
 0x11f   : > { %v1856_v12 = vmul.f32 %v1473_v38, %v2982_v42  ;;  %v1040_v35 = vsel %vm3180_vm15, %v1039_v4, %v1035_v51  ;;  %v3223_v50 = vadd.f32 1.0, %v2258_v34  ;;  %v1704_v45 = vadd.f32 %v2254_v31, %v1703_v40  ;;  %vm809_vm15 = vmor %vm807_vm2, %vm808_vm9 }
 0x120   : > { %v1199_v47 = vmul.f32 %v1040_v35, %v2988_v27  ;;  %v1477_v53 = vsub.f32 1.0, %v1476_v56  ;;  %v1043_v57 = vmul.f32 %v2262_v49, %v3171_v6  ;;  %v806_v52 = vadd.f32 %v2256_v20, %v805_v58 }
 0x121   : > { %1888 = vst.msk [vmem:[%s2645_s17 + $0x30] sm:$0xff] %vm1209_vm4, %v1856_v12  ;;  %v1051_v42 = vand.u32 2147483647, %v3171_v6  ;;  %v1053_v7 = vand.u32 2147483648, %v3171_v6  ;;  %2265 = vrcp.f32 %v3210_v39  ;;  %v1708_v27 = vsel %vm1707_vm13, %v2254_v31, %v1704_v45 }
 0x122   : > { %1232 = vst.msk [vmem:[%s2631_s14 + $0xb0] sm:$0xff] %vm1209_vm4, %v1199_v47  ;;  %v1478_v9 = vmul.f32 %v2260_v60, %v1477_v53  ;;  %vm1481_vm1 = vweird.f32 %v2260_v60  ;;  %v1044_v8 = vsub.f32 1.0, %v1043_v57  ;;  %v2264_v0 = vpop.eup %2263  ;;  %v1713_v22 = vsel %vm3192_vm5, %v1712_v26, %v1708_v27 }
 0x123   : > { %v810_v15 = vsel %vm809_vm15, %v2256_v20, %v806_v52  ;;  %vm1048_vm0 = vweird.f32 %v2262_v49  ;;  %2267 = vrcp.f32 %v3223_v50  ;;  %v1872_v1 = vmul.f32 %v1713_v22, %v3089_v14  ;;  %vm1482_vm2 = vmor %vm1480_vm10, %vm1481_vm1  ;;  %v410_v20 = vpop.f32.mrf.mxu0 }
 0x124   : > { %v815_v44 = vsel %vm3198_vm6, %v814_v62, %v810_v15  ;;  %v1479_v2 = vadd.f32 %v2260_v60, %v1478_v9  ;;  %v1045_v18 = vmul.f32 %v2262_v49, %v1044_v8  ;;  %v1487_v55 = vor.u32 1.1754944e-38, %v1486_v24  ;;  %vm1049_vm5 = vmor %vm1047_vm14, %vm1048_vm0 }
 0x125   : > { %v1184_v5 = vmul.f32 %v815_v44, %v3102_v23  ;;  %vm3249_vm3 = vcmp.eq.f32.partialorder %v1051_v42, 8.507059e+37  ;;  %v1724_v4 = vand.u32 2147483647, %v3210_v39  ;;  %1904 = vst.msk [vmem:[%s2645_s17 + $0xb0] sm:$0xff] %vm1209_vm4, %v1872_v1  ;;  %v1054_v32 = vor.u32 1.1754944e-38, %v1053_v7 }
 0x126   : > { %v1483_v14 = vsel %vm1482_vm2, %v2260_v60, %v1479_v2  ;;  %v1046_v31 = vadd.f32 %v2262_v49, %v1045_v18  ;;  %v1726_v26 = vand.u32 2147483648, %v3210_v39  ;;  %vm1720_vm6 = vweird.f32 %v3210_v39 }
 0x127   : > { %v2266_v43 = vpop.eup %2265  ;;  %1217 = vst.msk [vmem:[%s2631_s14 + $0x38] sm:$0xff] %vm1209_vm4, %v1184_v5  ;;  %v1488_v23 = vsel %vm3215_vm12, %v1487_v55, %v1483_v14  ;;  %v3265_v54 = vadd.f32 1.0, %v2264_v0  ;;  %v2079_v21 = vmul.f32 -1.442695, %v3166_v25  ;;  %v3271_v36 = vadd.f32 %v3086_v10, %v549_v28  ;;  %v453_v14 = vpop.f32.mrf.mxu2 }
 0x128   : > { %v1857_v19 = vmul.f32 %v1488_v23, %v3105_v46  ;;  %v1050_v17 = vsel %vm1049_vm5, %v2262_v49, %v1046_v31  ;;  %v1716_v11 = vmul.f32 %v2266_v43, %v3210_v39  ;;  %vm3275_vm7 = vcmp.eq.f32.partialorder %v1724_v4, 8.507059e+37  ;;  %v511_v46 = vpop.f32.mrf.mxu1 }
 0x129   : > { %v2268_v37 = vpop.eup %2267  ;;  %v1055_v6 = vsel %vm3249_vm3, %v1054_v32, %v1050_v17  ;;  %v826_v24 = vand.u32 2147483647, %v3223_v50  ;;  %2269 = vrcp.f32 %v3265_v54  ;;  %v1727_v41 = vor.u32 1.1754944e-38, %v1726_v26 }
 0x12a   : > { %1889 = vst.msk [vmem:[%s2645_s17 + $0x38] sm:$0xff] %vm1209_vm4, %v1857_v19  ;;  %v1200_v34 = vmul.f32 %v1055_v6, %v3108_v13  ;;  %v1717_v33 = vsub.f32 1.0, %v1716_v11  ;;  %v818_v60 = vmul.f32 %v2268_v37, %v3223_v50  ;;  %vm1721_vm8 = vweird.f32 %v2266_v43  ;;  %v551_v13 = vpop.f32.mrf.mxu3 }
 0x12b   : > { %vm822_vm9 = vweird.f32 %v3223_v50  ;;  %v828_v16 = vand.u32 2147483648, %v3223_v50  ;;  %2271 = vpow2.f32 %v2079_v21  ;;  %v2111_v51 = vmul.f32 -1.442695, %v3271_v36  ;;  %vm1722_vm12 = vmor %vm1720_vm6, %vm1721_vm8  ;;  %v413_v8 = vpop.f32.mrf.mxu0 }
 0x12c   : > { %1233 = vst.msk [vmem:[%s2631_s14 + $0xb8] sm:$0xff] %vm1209_vm4, %v1200_v34  ;;  %v1718_v49 = vmul.f32 %v2266_v43, %v1717_v33  ;;  %v819_v38 = vsub.f32 1.0, %v818_v60  ;;  %v3291_v40 = vadd.f32 %v3099_v59, %v410_v20  ;;  %vm823_vm10 = vweird.f32 %v2268_v37 }
 0x12d   : > { %vm3293_vm11 = vcmp.eq.f32.partialorder %v826_v24, 8.507059e+37  ;;  %v3298_v61 = vadd.f32 %v3086_v10, %v511_v46  ;;  %v3301_v12 = vadd.f32 %v3099_v59, %v450_v30  ;;  %2273 = vpow2.f32 %v2111_v51  ;;  %vm824_vm13 = vmor %vm822_vm9, %vm823_vm10 }
 0x12e   : > { %v1719_v35 = vadd.f32 %v2266_v43, %v1718_v49  ;;  %v820_v58 = vmul.f32 %v2268_v37, %v819_v38  ;;  %v2064_v47 = vmul.f32 -1.442695, %v3291_v40  ;;  %v829_v53 = vor.u32 1.1754944e-38, %v828_v16 }
 0x12f   : > { %v2270_v45 = vpop.eup %2269  ;;  %vm1495_vm14 = vweird.f32 %v3265_v54  ;;  %v2096_v57 = vmul.f32 -1.442695, %v3298_v61  ;;  %v3310_v52 = vadd.f32 %v3086_v10, %v551_v13  ;;  %v1501_v9 = vand.u32 2147483648, %v3265_v54 }
 0x130   : > { %v1723_v42 = vsel %vm1722_vm12, %v2266_v43, %v1719_v35  ;;  %v821_v7 = vadd.f32 %v2268_v37, %v820_v58  ;;  %v1491_v27 = vmul.f32 %v2270_v45, %v3265_v54  ;;  %2275 = vpow2.f32 %v2064_v47  ;;  %v514_v55 = vpop.f32.mrf.mxu1 }
 0x131   : > { %v2272_v28 = vpop.eup %2271  ;;  %v1728_v39 = vsel %vm3275_vm7, %v1727_v41, %v1723_v42  ;;  %v2080_v0 = vmul.f32 -1.442695, %v3301_v12  ;;  %v2112_v22 = vmul.f32 -1.442695, %v3310_v52  ;;  %v1499_v5 = vand.u32 2147483647, %v3265_v54 }
 0x132   : > { %v1873_v15 = vmul.f32 %v1728_v39, %v3127_v63  ;;  %v825_v1 = vsel %vm824_vm13, %v2268_v37, %v821_v7  ;;  %v1492_v44 = vsub.f32 1.0, %v1491_v27  ;;  %v3322_v2 = vadd.f32 1.0, %v2272_v28  ;;  %v554_v34 = vpop.f32.mrf.mxu3 }
 0x133   : > { %v830_v18 = vsel %vm3293_vm11, %v829_v53, %v825_v1  ;;  %2277 = vpow2.f32 %v2096_v57  ;;  %v3328_v50 = vadd.f32 %v3099_v59, %v413_v8  ;;  %v2274_v29 = vpop.eup %2273  ;;  %vm1496_vm15 = vweird.f32 %v2270_v45  ;;  %v415_v33 = vpop.f32.mrf.mxu0 }
 0x134   : > { %1905 = vst.msk [vmem:[%s2645_s17 + $0xb8] sm:$0xff] %vm1209_vm4, %v1873_v15  ;;  %v1185_v63 = vmul.f32 %v830_v18, %v3143_v48  ;;  %v1493_v4 = vmul.f32 %v2270_v45, %v1492_v44  ;;  %2279 = vrcp.f32 %v3322_v2  ;;  %v3334_v31 = vadd.f32 1.0, %v2274_v29  ;;  %vm1497_vm1 = vmor %vm1495_vm14, %vm1496_vm15 }
 0x135   : > { %2281 = vpow2.f32 %v2080_v0  ;;  %v1502_v26 = vor.u32 1.1754944e-38, %v1501_v9  ;;  %v3339_v20 = vadd.f32 %v3086_v10, %v514_v55  ;;  %v1066_v48 = vand.u32 2147483647, %v3322_v2 }
 0x136   : > { %1218 = vst.msk [vmem:[%s2631_s14 + $0x40] sm:$0xff] %vm1209_vm4, %v1185_v63  ;;  %v1494_v32 = vadd.f32 %v2270_v45, %v1493_v4  ;;  %2283 = vpow2.f32 %v2112_v22  ;;  %v2276_v43 = vpop.eup %2275  ;;  %v1068_v23 = vand.u32 2147483648, %v3322_v2  ;;  %v3347_v21 = vadd.f32 %v3099_v59, %v453_v14 }
 0x137   : > { %2285 = vrcp.f32 %v3334_v31  ;;  %vm1500_vm0 = vcmp.eq.f32.partialorder %v1499_v5, 8.507059e+37  ;;  %v3349_v17 = vadd.f32 1.0, %v2276_v43  ;;  %v2065_v11 = vmul.f32 -1.442695, %v3328_v50 }
 0x138   : > { %v1498_v19 = vsel %vm1497_vm1, %v2270_v45, %v1494_v32  ;;  %vm1062_vm2 = vweird.f32 %v3322_v2  ;;  %v1739_v24 = vand.u32 2147483647, %v3334_v31  ;;  %v2097_v46 = vmul.f32 -1.442695, %v3339_v20 }
 0x139   : > { %v2278_v37 = vpop.eup %2277  ;;  %v1503_v6 = vsel %vm1500_vm0, %v1502_v26, %v1498_v19  ;;  %2287 = vrcp.f32 %v3349_v17  ;;  %vm3358_vm3 = vcmp.eq.f32.partialorder %v1066_v48, 8.507059e+37  ;;  %v1069_v16 = vor.u32 1.1754944e-38, %v1068_v23 }
 0x13a   : > { %v2280_v54 = vpop.eup %2279  ;;  %v1858_v62 = vmul.f32 %v1503_v6, %v3146_v3  ;;  %v2081_v49 = vmul.f32 -1.442695, %v3347_v21  ;;  %vm1735_vm5 = vweird.f32 %v3334_v31  ;;  %v1741_v3 = vand.u32 2147483648, %v3334_v31 }
 0x13b   : > { %v2282_v41 = vpop.eup %2281  ;;  %v1058_v60 = vmul.f32 %v2280_v54, %v3322_v2  ;;  %v3367_v51 = vadd.f32 1.0, %v2278_v37  ;;  %2289 = vpow2.f32 %v2065_v11  ;;  %v841_v58 = vand.u32 2147483647, %v3349_v17 }
 0x13c   : > { %v2284_v38 = vpop.eup %2283  ;;  %1890 = vst.msk [vmem:[%s2645_s17 + $0x40] sm:$0xff] %vm1209_vm4, %v1858_v62  ;;  %v3369_v13 = vadd.f32 1.0, %v2282_v41  ;;  %v3373_v47 = vadd.f32 %v3086_v10, %v554_v34  ;;  %v3376_v45 = vadd.f32 %v3099_v59, %v415_v33  ;;  %vm3379_vm6 = vcmp.eq.f32.partialorder %v1739_v24, 8.507059e+37 }
 0x13d   : > { %v2286_v56 = vpop.eup %2285  ;;  %v1059_v35 = vsub.f32 1.0, %v1058_v60  ;;  %v843_v42 = vand.u32 2147483648, %v3349_v17  ;;  %2291 = vrcp.f32 %v3367_v51  ;;  %vm1063_vm7 = vweird.f32 %v2280_v54 }
 0x13e   : > { %v1731_v53 = vmul.f32 %v2286_v56, %v3334_v31  ;;  %v3385_v27 = vadd.f32 1.0, %v2284_v38  ;;  %2293 = vpow2.f32 %v2097_v46  ;;  %v1742_v28 = vor.u32 1.1754944e-38, %v1741_v3  ;;  %vm1064_vm10 = vmor %vm1062_vm2, %vm1063_vm7 }
 0x13f   : > { %v1060_v7 = vmul.f32 %v2280_v54, %v1059_v35  ;;  %v2288_v9 = vpop.eup %2287  ;;  %vm837_vm8 = vweird.f32 %v3349_v17  ;;  %2295 = vrcp.f32 %v3369_v13  ;;  %vm3390_vm9 = vcmp.eq.f32.partialorder %v841_v58, 8.507059e+37 }
 0x140   : > { %v1732_v8 = vsub.f32 1.0, %v1731_v53  ;;  %v833_v0 = vmul.f32 %v2288_v9, %v3349_v17  ;;  %2297 = vpow2.f32 %v2081_v49  ;;  %vm1736_vm11 = vweird.f32 %v2286_v56 }
 0x141   : > { %v1061_v39 = vadd.f32 %v2280_v54, %v1060_v7  ;;  %v2290_v15 = vpop.eup %2289  ;;  %v844_v44 = vor.u32 1.1754944e-38, %v843_v42  ;;  %v1514_v18 = vand.u32 2147483647, %v3367_v51  ;;  %vm1510_vm12 = vweird.f32 %v3367_v51  ;;  %vm1737_vm14 = vmor %vm1735_vm5, %vm1736_vm11 }
 0x142   : > { %v1733_v1 = vmul.f32 %v2286_v56, %v1732_v8  ;;  %v834_v55 = vsub.f32 1.0, %v833_v0  ;;  %2299 = vrcp.f32 %v3385_v27  ;;  %v1516_v2 = vand.u32 2147483648, %v3367_v51 }
 0x143   : > { %v1065_v5 = vsel %vm1064_vm10, %v2280_v54, %v1061_v39  ;;  %v2292_v29 = vpop.eup %2291  ;;  %v1081_v14 = vand.u32 2147483647, %v3369_v13  ;;  %vm838_vm13 = vweird.f32 %v2288_v9  ;;  %vm1077_vm15 = vweird.f32 %v3369_v13 }
 0x144   : > { %v1070_v63 = vsel %vm3358_vm3, %v1069_v16, %v1065_v5  ;;  %v1734_v4 = vadd.f32 %v2286_v56, %v1733_v1  ;;  %v2294_v32 = vpop.eup %2293  ;;  %v835_v43 = vmul.f32 %v2288_v9, %v834_v55  ;;  %v1506_v48 = vmul.f32 %v2292_v29, %v3367_v51  ;;  %vm839_vm0 = vmor %vm837_vm8, %vm838_vm13 }
 0x145   : > { %v1201_v26 = vmul.f32 %v1070_v63, %v3166_v25  ;;  %v2296_v23 = vpop.eup %2295  ;;  %vm3408_vm1 = vcmp.eq.f32.partialorder %v1514_v18, 8.507059e+37  ;;  %v1083_v37 = vand.u32 2147483648, %v3369_v13  ;;  %v3413_v6 = vadd.f32 1.0, %v2290_v15 }
 0x146   : > { %v1738_v19 = vsel %vm1737_vm14, %v2286_v56, %v1734_v4  ;;  %v2298_v25 = vpop.eup %2297  ;;  %v836_v54 = vadd.f32 %v2288_v9, %v835_v43  ;;  %v1507_v62 = vsub.f32 1.0, %v1506_v48  ;;  %v1073_v24 = vmul.f32 %v2296_v23, %v3369_v13  ;;  %v516_v13 = vpop.f32.mrf.mxu1 }
 0x147   : > { %1234 = vst.msk [vmem:[%s2631_s14 + $0xc0] sm:$0xff] %vm1209_vm4, %v1201_v26  ;;  %v1743_v31 = vsel %vm3379_vm6, %v1742_v28, %v1738_v19  ;;  %v1517_v34 = vor.u32 1.1754944e-38, %v1516_v2  ;;  %vm3424_vm2 = vcmp.eq.f32.partialorder %v1081_v14, 8.507059e+37  ;;  %2301 = vrcp.f32 %v3413_v6  ;;  %v556_v14 = vpop.f32.mrf.mxu3 }
 0x148   : > { %v1874_v46 = vmul.f32 %v1743_v31, %v3271_v36  ;;  %v2300_v41 = vpop.eup %2299  ;;  %v840_v60 = vsel %vm839_vm0, %v2288_v9, %v836_v54  ;;  %v1508_v30 = vmul.f32 %v2292_v29, %v1507_v62  ;;  %vm1511_vm3 = vweird.f32 %v2292_v29 }
 0x149   : > { %v1074_v16 = vsub.f32 1.0, %v1073_v24  ;;  %v845_v36 = vsel %vm3390_vm9, %v844_v44, %v840_v60  ;;  %v1084_v17 = vor.u32 1.1754944e-38, %v1083_v37  ;;  %v1746_v49 = vmul.f32 %v2300_v41, %v3385_v27  ;;  %vm1512_vm6 = vmor %vm1510_vm12, %vm1511_vm3 }
 0x14a   : > { %1906 = vst.msk [vmem:[%s2645_s17 + $0xc0] sm:$0xff] %vm1209_vm4, %v1874_v46  ;;  %v1754_v38 = vand.u32 2147483647, %v3385_v27  ;;  %v1186_v3 = vmul.f32 %v845_v36, %v3291_v40  ;;  %v1509_v56 = vadd.f32 %v2292_v29, %v1508_v30  ;;  %vm1078_vm5 = vweird.f32 %v2296_v23 }
 0x14b   : > { %v1075_v35 = vmul.f32 %v2296_v23, %v1074_v16  ;;  %v1747_v58 = vsub.f32 1.0, %v1746_v49  ;;  %vm1751_vm7 = vweird.f32 %v2300_v41  ;;  %v1756_v53 = vand.u32 2147483648, %v3385_v27  ;;  %vm1079_vm8 = vmor %vm1077_vm15, %vm1078_vm5 }
 0x14c   : > { %v3439_v57 = vadd.f32 1.0, %v2294_v32  ;;  %1219 = vst.msk [vmem:[%s2631_s14 + $0x48] sm:$0xff] %vm1209_vm4, %v1186_v3  ;;  %v1513_v42 = vsel %vm1512_vm6, %v2292_v29, %v1509_v56  ;;  %v856_v9 = vand.u32 2147483647, %v3413_v6  ;;  %v3444_v8 = vadd.f32 1.0, %v2298_v25  ;;  %v455_v29 = vpop.f32.mrf.mxu2 }
 0x14d   : > { %v1076_v7 = vadd.f32 %v2296_v23, %v1075_v35  ;;  %v2302_v40 = vpop.eup %2301  ;;  %v1518_v51 = vsel %vm3408_vm1, %v1517_v34, %v1513_v42  ;;  %v1748_v28 = vmul.f32 %v2300_v41, %v1747_v58  ;;  %v858_v39 = vand.u32 2147483648, %v3413_v6 }
 0x14e   : > { %2303 = vrcp.f32 %v3439_v57  ;;  %v1859_v0 = vmul.f32 %v1518_v51, %v3298_v61  ;;  %v848_v15 = vmul.f32 %v2302_v40, %v3413_v6  ;;  %v2113_v1 = vmul.f32 -1.442695, %v3373_v47  ;;  %v519_v35 = vpop.f32.mrf.mxu1 }
 0x14f   : > { %v1080_v22 = vsel %vm1079_vm8, %v2296_v23, %v1076_v7  ;;  %v1749_v18 = vadd.f32 %v2300_v41, %v1748_v28  ;;  %vm1750_vm9 = vweird.f32 %v3385_v27  ;;  %vm1755_vm10 = vcmp.eq.f32.partialorder %v1754_v38, 8.507059e+37  ;;  %v418_v23 = vpop.f32.mrf.mxu0 }
 0x150   : > { %v1085_v44 = vsel %vm3424_vm2, %v1084_v17, %v1080_v22  ;;  %1891 = vst.msk [vmem:[%s2645_s17 + $0x48] sm:$0xff] %vm1209_vm4, %v1859_v0  ;;  %vm1752_vm11 = vmor %vm1750_vm9, %vm1751_vm7  ;;  %v1757_v61 = vor.u32 1.1754944e-38, %v1756_v53  ;;  %v849_v55 = vsub.f32 1.0, %v848_v15  ;;  %2305 = vrcp.f32 %v3444_v8 }
 0x151   : > { %v1202_v5 = vmul.f32 %v1085_v44, %v3301_v12  ;;  %v1753_v63 = vsel %vm1752_vm11, %v2300_v41, %v1749_v18  ;;  %vm852_vm12 = vweird.f32 %v3413_v6  ;;  %vm3464_vm14 = vcmp.eq.f32.partialorder %v856_v9, 8.507059e+37 }
 0x152   : > { %v859_v27 = vor.u32 1.1754944e-38, %v858_v39  ;;  %v1758_v2 = vsel %vm1755_vm10, %v1757_v61, %v1753_v63  ;;  %v850_v12 = vmul.f32 %v2302_v40, %v849_v55  ;;  %vm853_vm13 = vweird.f32 %v2302_v40 }
 0x153   : > { %1235 = vst.msk [vmem:[%s2631_s14 + $0xc8] sm:$0xff] %vm1209_vm4, %v1202_v5  ;;  %2307 = vpow2.f32 %v2113_v1  ;;  %v1875_v26 = vmul.f32 %v1758_v2, %v3310_v52  ;;  %vm1525_vm15 = vweird.f32 %v3439_v57  ;;  %v2066_v43 = vmul.f32 -1.442695, %v3376_v45  ;;  %vm854_vm1 = vmor %vm852_vm12, %vm853_vm13  ;;  %v559_v1 = vpop.f32.mrf.mxu3 }
 0x154   : > { %v2304_v32 = vpop.eup %2303  ;;  %v3474_v48 = vadd.f32 %v3086_v10, %v516_v13  ;;  %v851_v19 = vadd.f32 %v2302_v40, %v850_v12  ;;  %v1529_v37 = vand.u32 2147483647, %v3439_v57  ;;  %v1531_v25 = vand.u32 2147483648, %v3439_v57  ;;  %v458_v42 = vpop.f32.mrf.mxu2 }
 0x155   : > { %v1521_v11 = vmul.f32 %v2304_v32, %v3439_v57  ;;  %1907 = vst.msk [vmem:[%s2645_s17 + $0xc8] sm:$0xff] %vm1209_vm4, %v1875_v26  ;;  %vm1092_vm0 = vweird.f32 %v3444_v8  ;;  %2309 = vpow2.f32 %v2066_v43  ;;  %v3486_v31 = vadd.f32 %v3099_v59, %v455_v29 }
 0x156   : > { %v2098_v52 = vmul.f32 -1.442695, %v3474_v48  ;;  %v3489_v54 = vadd.f32 %v3086_v10, %v556_v14  ;;  %v2306_v62 = vpop.eup %2305  ;;  %v855_v24 = vsel %vm854_vm1, %v2302_v40, %v851_v19  ;;  %v1098_v34 = vand.u32 2147483648, %v3444_v8 }
 0x157   : > { %v1522_v46 = vsub.f32 1.0, %v1521_v11  ;;  %v3493_v6 = vadd.f32 %v3099_v59, %v418_v23  ;;  %v860_v33 = vsel %vm3464_vm14, %v859_v27, %v855_v24  ;;  %vm1526_vm2 = vweird.f32 %v2304_v32 }
 0x158   : > { %v1088_v41 = vmul.f32 %v2306_v62, %v3444_v8  ;;  %2311 = vpow2.f32 %v2098_v52  ;;  %v1187_v30 = vmul.f32 %v860_v33, %v3328_v50  ;;  %v2082_v36 = vmul.f32 -1.442695, %v3486_v31  ;;  %vm1527_vm5 = vmor %vm1525_vm15, %vm1526_vm2 }
 0x159   : > { %v2308_v60 = vpop.eup %2307  ;;  %v1523_v16 = vmul.f32 %v2304_v32, %v1522_v46  ;;  %v2114_v17 = vmul.f32 -1.442695, %v3489_v54  ;;  %vm3501_vm3 = vcmp.eq.f32.partialorder %v1529_v37, 8.507059e+37  ;;  %v2067_v56 = vmul.f32 -1.442695, %v3493_v6 }
 0x15a   : > { %v1089_v38 = vsub.f32 1.0, %v1088_v41  ;;  %v3505_v3 = vadd.f32 1.0, %v2308_v60  ;;  %1220 = vst.msk [vmem:[%s2631_s14 + $0x50] sm:$0xff] %vm1209_vm4, %v1187_v30  ;;  %v1532_v53 = vor.u32 1.1754944e-38, %v1531_v25  ;;  %v1096_v50 = vand.u32 2147483647, %v3444_v8 }
 0x15b   : > { %v1524_v58 = vadd.f32 %v2304_v32, %v1523_v16  ;;  %2313 = vpow2.f32 %v2082_v36  ;;  %v2310_v7 = vpop.eup %2309  ;;  %vm1093_vm6 = vweird.f32 %v2306_v62  ;;  %v1099_v40 = vor.u32 1.1754944e-38, %v1098_v34 }
 0x15c   : > { %v1090_v9 = vmul.f32 %v2306_v62, %v1089_v38  ;;  %2315 = vrcp.f32 %v3505_v3  ;;  %v3515_v28 = vadd.f32 1.0, %v2310_v7  ;;  %v3518_v39 = vadd.f32 %v3086_v10, %v519_v35  ;;  %vm1094_vm7 = vmor %vm1092_vm0, %vm1093_vm6 }
 0x15d   : > { %v1528_v51 = vsel %vm1527_vm5, %v2304_v32, %v1524_v58  ;;  %2317 = vpow2.f32 %v2114_v17  ;;  %v3523_v57 = vadd.f32 %v3099_v59, %v458_v42  ;;  %v1769_v18 = vand.u32 2147483647, %v3505_v3 }
 0x15e   : > { %v2312_v0 = vpop.eup %2311  ;;  %v1533_v22 = vsel %vm3501_vm3, %v1532_v53, %v1528_v51  ;;  %v1091_v15 = vadd.f32 %v2306_v62, %v1090_v9  ;;  %2319 = vpow2.f32 %v2067_v56  ;;  %v1771_v13 = vand.u32 2147483648, %v3505_v3 }
 0x15f   : > { %v1860_v44 = vmul.f32 %v1533_v22, %v3339_v20  ;;  %2321 = vrcp.f32 %v3515_v28  ;;  %vm1097_vm8 = vcmp.eq.f32.partialorder %v1096_v50, 8.507059e+37  ;;  %v3531_v61 = vadd.f32 1.0, %v2312_v0 }
 0x160   : > { %v1095_v5 = vsel %vm1094_vm7, %v2306_v62, %v1091_v15  ;;  %v2099_v20 = vmul.f32 -1.442695, %v3518_v39  ;;  %v3537_v8 = vadd.f32 %v3086_v10, %v559_v1  ;;  %vm1765_vm9 = vweird.f32 %v3505_v3 }
 0x161   : > { %v2314_v55 = vpop.eup %2313  ;;  %1892 = vst.msk [vmem:[%s2645_s17 + $0x50] sm:$0xff] %vm1209_vm4, %v1860_v44  ;;  %v1100_v59 = vsel %vm1097_vm8, %v1099_v40, %v1095_v5  ;;  %v871_v4 = vand.u32 2147483647, %v3515_v28  ;;  %2323 = vrcp.f32 %v3531_v61  ;;  %vm3544_vm10 = vcmp.eq.f32.partialorder %v1769_v18, 8.507059e+37 }
 0x162   : > { %v2316_v29 = vpop.eup %2315  ;;  %v1203_v63 = vmul.f32 %v1100_v59, %v3347_v21  ;;  %v1772_v14 = vor.u32 1.1754944e-38, %v1771_v13  ;;  %v2083_v10 = vmul.f32 -1.442695, %v3523_v57  ;;  %vm867_vm11 = vweird.f32 %v3515_v28 }
 0x163   : > { %v2318_v27 = vpop.eup %2317  ;;  %v1761_v2 = vmul.f32 %v2316_v29, %v3505_v3  ;;  %v873_v21 = vand.u32 2147483648, %v3515_v28  ;;  %v3553_v26 = vadd.f32 1.0, %v2314_v55  ;;  %v1544_v11 = vand.u32 2147483647, %v3531_v61 }
 0x164   : > { %v2320_v32 = vpop.eup %2319  ;;  %1236 = vst.msk [vmem:[%s2631_s14 + $0xd0] sm:$0xff] %vm1209_vm4, %v1203_v63  ;;  %v3555_v43 = vadd.f32 1.0, %v2318_v27  ;;  %2325 = vpow2.f32 %v2099_v20  ;;  %v2115_v37 = vmul.f32 -1.442695, %v3537_v8  ;;  %vm3560_vm12 = vcmp.eq.f32.partialorder %v871_v4, 8.507059e+37 }
 0x165   : > { %v2322_v23 = vpop.eup %2321  ;;  %v1762_v19 = vsub.f32 1.0, %v1761_v2  ;;  %v1546_v62 = vand.u32 2147483648, %v3531_v61  ;;  %2327 = vrcp.f32 %v3553_v26  ;;  %vm1766_vm14 = vweird.f32 %v2316_v29 }
 0x166   : > { %v863_v25 = vmul.f32 %v2322_v23, %v3515_v28  ;;  %v3566_v46 = vadd.f32 1.0, %v2320_v32  ;;  %2329 = vpow2.f32 %v2083_v10  ;;  %v874_v41 = vor.u32 1.1754944e-38, %v873_v21  ;;  %vm1767_vm1 = vmor %vm1765_vm9, %vm1766_vm14  ;;  %v521_v10 = vpop.f32.mrf.mxu1 }
 0x167   : > { %v1763_v24 = vmul.f32 %v2316_v29, %v1762_v19  ;;  %v2324_v34 = vpop.eup %2323  ;;  %vm1540_vm13 = vweird.f32 %v3531_v61  ;;  %2331 = vrcp.f32 %v3555_v43  ;;  %vm3571_vm15 = vcmp.eq.f32.partialorder %v1544_v11, 8.507059e+37 }
 0x168   : > { %v864_v33 = vsub.f32 1.0, %v863_v25  ;;  %v1536_v30 = vmul.f32 %v2324_v34, %v3531_v61  ;;  %v1111_v36 = vand.u32 2147483647, %v3553_v26  ;;  %2333 = vpow2.f32 %v2115_v37 }
 0x169   : > { %v1764_v60 = vadd.f32 %v2316_v29, %v1763_v24  ;;  %vm868_vm0 = vweird.f32 %v2322_v23  ;;  %v1547_v49 = vor.u32 1.1754944e-38, %v1546_v62  ;;  %v1113_v38 = vand.u32 2147483648, %v3553_v26 }
 0x16a   : > { %v865_v17 = vmul.f32 %v2322_v23, %v864_v33  ;;  %v2326_v56 = vpop.eup %2325  ;;  %v1537_v58 = vsub.f32 1.0, %v1536_v30  ;;  %vm1107_vm2 = vweird.f32 %v3553_v26  ;;  %2335 = vrcp.f32 %v3566_v46  ;;  %vm869_vm5 = vmor %vm867_vm11, %vm868_vm0 }
 0x16b   : > { %v1768_v35 = vsel %vm1767_vm1, %v2316_v29, %v1764_v60  ;;  %v2328_v53 = vpop.eup %2327  ;;  %vm1541_vm3 = vweird.f32 %v2324_v34  ;;  %v1784_v3 = vand.u32 2147483647, %v3555_v43  ;;  %vm3589_vm6 = vcmp.eq.f32.partialorder %v1111_v36, 8.507059e+37  ;;  %v420_v29 = vpop.f32.mrf.mxu0  ;;  %v3640_v36 = vld [vmem:[%s3894_s3] ss:$0 sm:$0xff] }
 0x16c   : > { %v1773_v50 = vsel %vm3544_vm10, %v1772_v14, %v1768_v35  ;;  %v866_v42 = vadd.f32 %v2322_v23, %v865_v17  ;;  %v2330_v7 = vpop.eup %2329  ;;  %v1538_v40 = vmul.f32 %v2324_v34, %v1537_v58  ;;  %v1103_v51 = vmul.f32 %v2328_v53, %v3553_v26  ;;  %vm1542_vm8 = vmor %vm1540_vm13, %vm1541_vm3 }
 0x16d   : > { %v1876_v9 = vmul.f32 %v1773_v50, %v3373_v47  ;;  %vm1780_vm7 = vweird.f32 %v3555_v43  ;;  %v2332_v22 = vpop.eup %2331  ;;  %v1114_v1 = vor.u32 1.1754944e-38, %v1113_v38  ;;  %v1786_v44 = vand.u32 2147483648, %v3555_v43  ;;  %v561_v38 = vpop.f32.mrf.mxu3 }
 0x16e   : > { %v870_v15 = vsel %vm869_vm5, %v2322_v23, %v866_v42  ;;  %v3595_v18 = vadd.f32 1.0, %v2326_v56  ;;  %v2334_v47 = vpop.eup %2333  ;;  %v1539_v13 = vadd.f32 %v2324_v34, %v1538_v40  ;;  %v1104_v5 = vsub.f32 1.0, %v1103_v51  ;;  %v3668_v51 = vld [vmem:[%s3895_s4] ss:$0 sm:$0xff] }
 0x16f   : > { %1908 = vst.msk [vmem:[%s2645_s17 + $0xd0] sm:$0xff] %vm1209_vm4, %v1876_v9  ;;  %v875_v28 = vsel %vm3560_vm12, %v874_v41, %v870_v15  ;;  %v1776_v55 = vmul.f32 %v2332_v22, %v3555_v43  ;;  %vm3606_vm9 = vcmp.eq.f32.partialorder %v1784_v3, 8.507059e+37  ;;  %vm882_vm10 = vweird.f32 %v3566_v46  ;;  %v524_v15 = vpop.f32.mrf.mxu1 }
 0x170   : > { %v1188_v59 = vmul.f32 %v875_v28, %v3376_v45  ;;  %2337 = vrcp.f32 %v3595_v18  ;;  %v2336_v63 = vpop.eup %2335  ;;  %v1543_v4 = vsel %vm1542_vm8, %v2324_v34, %v1539_v13  ;;  %v1105_v27 = vmul.f32 %v2328_v53, %v1104_v5 }
 0x171   : > { %vm1108_vm11 = vweird.f32 %v2328_v53  ;;  %v1777_v2 = vsub.f32 1.0, %v1776_v55  ;;  %v1548_v45 = vsel %vm3571_vm15, %v1547_v49, %v1543_v4  ;;  %v1787_v61 = vor.u32 1.1754944e-38, %v1786_v44 }
 0x172   : > { %1221 = vst.msk [vmem:[%s2631_s14 + $0x58] sm:$0xff] %vm1209_vm4, %v1188_v59  ;;  %v878_v12 = vmul.f32 %v2336_v63, %v3566_v46  ;;  %v886_v14 = vand.u32 2147483647, %v3566_v46  ;;  %v1861_v32 = vmul.f32 %v1548_v45, %v3474_v48  ;;  %v1106_v21 = vadd.f32 %v2328_v53, %v1105_v27  ;;  %vm1109_vm14 = vmor %vm1107_vm2, %vm1108_vm11  ;;  %v460_v48 = vpop.f32.mrf.mxu2 }
 0x173   : > { %v1778_v23 = vmul.f32 %v2332_v22, %v1777_v2  ;;  %vm1781_vm12 = vweird.f32 %v2332_v22  ;;  %vm883_vm13 = vweird.f32 %v2336_v63  ;;  %v888_v11 = vand.u32 2147483648, %v3566_v46  ;;  %v423_v42 = vpop.f32.mrf.mxu0 }
 0x174   : > { %v879_v19 = vsub.f32 1.0, %v878_v12  ;;  %v3622_v37 = vadd.f32 1.0, %v2330_v7  ;;  %1893 = vst.msk [vmem:[%s2645_s17 + $0x58] sm:$0xff] %vm1209_vm4, %v1861_v32  ;;  %v1110_v25 = vsel %vm1109_vm14, %v2328_v53, %v1106_v21  ;;  %v1559_v62 = vand.u32 2147483647, %v3595_v18  ;;  %vm1782_vm15 = vmor %vm1780_vm7, %vm1781_vm12 }
 0x175   : > { %v1779_v52 = vadd.f32 %v2332_v22, %v1778_v23  ;;  %v3627_v24 = vadd.f32 1.0, %v2334_v47  ;;  %v1115_v26 = vsel %vm3589_vm6, %v1114_v1, %v1110_v25  ;;  %v1561_v41 = vand.u32 2147483648, %v3595_v18  ;;  %vm884_vm0 = vmor %vm882_vm10, %vm883_vm13  ;;  %v564_v21 = vpop.f32.mrf.mxu3 }
 0x176   : > { %v2338_v34 = vpop.eup %2337  ;;  %v880_v33 = vmul.f32 %v2336_v63, %v879_v19  ;;  %2339 = vrcp.f32 %v3622_v37  ;;  %v1204_v60 = vmul.f32 %v1115_v26, %v3486_v31  ;;  %v3643_v17 = vadd.f32 %v3640_v36, %v420_v29 }
 0x177   : > { %v1783_v30 = vsel %vm1782_vm15, %v2332_v22, %v1779_v52  ;;  %v1551_v16 = vmul.f32 %v2338_v34, %v3595_v18  ;;  %vm887_vm1 = vcmp.eq.f32.partialorder %v886_v14, 8.507059e+37  ;;  %v889_v56 = vor.u32 1.1754944e-38, %v888_v11 }
 0x178   : > { %v1788_v43 = vsel %vm3606_vm9, %v1787_v61, %v1783_v30  ;;  %v881_v49 = vadd.f32 %v2336_v63, %v880_v33  ;;  %1237 = vst.msk [vmem:[%s2631_s14 + $0xd8] sm:$0xff] %vm1209_vm4, %v1204_v60  ;;  %2341 = vrcp.f32 %v3627_v24  ;;  %vm1555_vm2 = vweird.f32 %v3595_v18 }
 0x179   : > { %v1877_v31 = vmul.f32 %v1788_v43, %v3489_v54  ;;  %v1552_v35 = vsub.f32 1.0, %v1551_v16  ;;  %vm3655_vm3 = vcmp.eq.f32.partialorder %v1559_v62, 8.507059e+37  ;;  %v1562_v50 = vor.u32 1.1754944e-38, %v1561_v41 }
 0x17a   : > { %v885_v58 = vsel %vm884_vm0, %v2336_v63, %v881_v49  ;;  %vm1556_vm5 = vweird.f32 %v2338_v34  ;;  %vm1122_vm6 = vweird.f32 %v3622_v37  ;;  %v2068_v46 = vmul.f32 -1.442695, %v3643_v17  ;;  %v463_v63 = vpop.f32.mrf.mxu2  ;;  %v526_v49 = vpop.f32.mrf.mxu1 }
 0x17b   : > { %1909 = vst.msk [vmem:[%s2645_s17 + $0xd8] sm:$0xff] %vm1209_vm4, %v1877_v31  ;;  %v890_v54 = vsel %vm887_vm1, %v889_v56, %v885_v58  ;;  %v1553_v3 = vmul.f32 %v2338_v34, %v1552_v35  ;;  %v1126_v40 = vand.u32 2147483647, %v3622_v37  ;;  %v3671_v0 = vadd.f32 %v3668_v51, %v521_v10  ;;  %vm1557_vm7 = vmor %vm1555_vm2, %vm1556_vm5  ;;  %v425_v62 = vpop.f32.mrf.mxu0 }
 0x17c   : > { %v2340_v7 = vpop.eup %2339  ;;  %v1189_v9 = vmul.f32 %v890_v54, %v3493_v6  ;;  %v3674_v22 = vadd.f32 %v3640_v36, %v460_v48  ;;  %v1128_v47 = vand.u32 2147483648, %v3622_v37  ;;  %v1799_v6 = vand.u32 2147483647, %v3627_v24 }
 0x17d   : > { %v1554_v1 = vadd.f32 %v2338_v34, %v1553_v3  ;;  %v1118_v44 = vmul.f32 %v2340_v7, %v3622_v37  ;;  %vm1795_vm8 = vweird.f32 %v3627_v24  ;;  %2343 = vpow2.f32 %v2068_v46 }
 0x17e   : > { %1222 = vst.msk [vmem:[%s2631_s14 + $0x60] sm:$0xff] %vm1209_vm4, %v1189_v9  ;;  %v2100_v28 = vmul.f32 -1.442695, %v3671_v0  ;;  %v2084_v13 = vmul.f32 -1.442695, %v3674_v22  ;;  %v3688_v5 = vadd.f32 %v3668_v51, %v561_v38  ;;  %v2342_v55 = vpop.eup %2341  ;;  %v3691_v29 = vadd.f32 %v3640_v36, %v423_v42 }
 0x17f   : > { %v1558_v59 = vsel %vm1557_vm7, %v2338_v34, %v1554_v1  ;;  %v1119_v20 = vsub.f32 1.0, %v1118_v44  ;;  %v3694_v18 = vadd.f32 %v3668_v51, %v524_v15  ;;  %vm1123_vm9 = vweird.f32 %v2340_v7 }
 0x180   : > { %v1563_v4 = vsel %vm3655_vm3, %v1562_v50, %v1558_v59  ;;  %v1791_v27 = vmul.f32 %v2342_v55, %v3627_v24  ;;  %2345 = vpow2.f32 %v2100_v28  ;;  %v2116_v61 = vmul.f32 -1.442695, %v3688_v5  ;;  %vm1124_vm10 = vmor %vm1122_vm6, %vm1123_vm9 }
 0x181   : > { %v1862_v2 = vmul.f32 %v1563_v4, %v3518_v39  ;;  %v1120_v45 = vmul.f32 %v2340_v7, %v1119_v20  ;;  %2347 = vpow2.f32 %v2084_v13  ;;  %v2069_v14 = vmul.f32 -1.442695, %v3691_v29 }
 0x182   : > { %v1792_v12 = vsub.f32 1.0, %v1791_v27  ;;  %v2101_v10 = vmul.f32 -1.442695, %v3694_v18  ;;  %v3704_v32 = vadd.f32 %v3640_v36, %v463_v63  ;;  %v1129_v19 = vor.u32 1.1754944e-38, %v1128_v47 }
 0x183   : > { %1894 = vst.msk [vmem:[%s2645_s17 + $0x60] sm:$0xff] %vm1209_vm4, %v1862_v2  ;;  %v1121_v23 = vadd.f32 %v2340_v7, %v1120_v45  ;;  %v1801_v11 = vand.u32 2147483648, %v3627_v24  ;;  %2349 = vpow2.f32 %v2116_v61  ;;  %v2344_v39 = vpop.eup %2343  ;;  %vm1796_vm11 = vweird.f32 %v2342_v55 }
 0x184   : > { %v1793_v25 = vmul.f32 %v2342_v55, %v1792_v12  ;;  %2351 = vpow2.f32 %v2069_v14  ;;  %v2085_v52 = vmul.f32 -1.442695, %v3704_v32  ;;  %vm1127_vm12 = vcmp.eq.f32.partialorder %v1126_v40, 8.507059e+37  ;;  %vm1797_vm13 = vmor %vm1795_vm8, %vm1796_vm11 }
 0x185   : > { %v1125_v48 = vsel %vm1124_vm10, %v2340_v7, %v1121_v23  ;;  %v3713_v34 = vadd.f32 1.0, %v2344_v39  ;;  %v3716_v26 = vadd.f32 %v3668_v51, %v564_v21  ;;  %vm1800_vm14 = vcmp.eq.f32.partialorder %v1799_v6, 8.507059e+37 }
 0x186   : > { %v2346_v33 = vpop.eup %2345  ;;  %v1130_v41 = vsel %vm1127_vm12, %v1129_v19, %v1125_v48  ;;  %v1794_v60 = vadd.f32 %v2342_v55, %v1793_v25  ;;  %2353 = vpow2.f32 %v2101_v10  ;;  %v1802_v16 = vor.u32 1.1754944e-38, %v1801_v11 }
 0x187   : > { %v2348_v37 = vpop.eup %2347  ;;  %v1205_v30 = vmul.f32 %v1130_v41, %v3523_v57  ;;  %2355 = vrcp.f32 %v3713_v34  ;;  %v3724_v43 = vadd.f32 %v3640_v36, %v425_v62  ;;  %v3726_v31 = vadd.f32 1.0, %v2346_v33 }
 0x188   : > { %v1798_v38 = vsel %vm1797_vm13, %v2342_v55, %v1794_v60  ;;  %v3728_v56 = vadd.f32 1.0, %v2348_v37  ;;  %2357 = vpow2.f32 %v2085_v52  ;;  %v2117_v24 = vmul.f32 -1.442695, %v3716_v26 }
 0x189   : > { %v2350_v35 = vpop.eup %2349  ;;  %1238 = vst.msk [vmem:[%s2631_s14 + $0xe0] sm:$0xff] %vm1209_vm4, %v1205_v30  ;;  %v1803_v57 = vsel %vm1800_vm14, %v1802_v16, %v1798_v38  ;;  %v901_v50 = vand.u32 2147483647, %v3713_v34  ;;  %2359 = vrcp.f32 %v3726_v31  ;;  %v3737_v42 = vadd.f32 %v3668_v51, %v526_v49 }
 0x18a   : > { %v2352_v58 = vpop.eup %2351  ;;  %v1878_v53 = vmul.f32 %v1803_v57, %v3537_v8  ;;  %v903_v54 = vand.u32 2147483648, %v3713_v34  ;;  %2361 = vrcp.f32 %v3728_v56  ;;  %v3743_v46 = vadd.f32 1.0, %v2350_v35 }
 0x18b   : > { %v3745_v7 = vadd.f32 1.0, %v2352_v58  ;;  %v3748_v8 = vmul.f32 -1.442695, %v3724_v43  ;;  %vm897_vm15 = vweird.f32 %v3713_v34  ;;  %v1574_v40 = vand.u32 2147483647, %v3726_v31 }
 0x18c   : > { %v2354_v3 = vpop.eup %2353  ;;  %1910 = vst.msk [vmem:[%s2645_s17 + $0xe0] sm:$0xff] %vm1209_vm4, %v1878_v53  ;;  %v1576_v15 = vand.u32 2147483648, %v3726_v31  ;;  %2363 = vpow2.f32 %v2117_v24  ;;  %vm3754_vm1 = vcmp.eq.f32.partialorder %v901_v50, 8.507059e+37  ;;  %v1141_v6 = vand.u32 2147483647, %v3728_v56 }
 0x18d   : > { %v2356_v9 = vpop.eup %2355  ;;  %v1143_v28 = vand.u32 2147483648, %v3728_v56  ;;  %v3761_v13 = vmul.f32 -1.442695, %v3737_v42  ;;  %v904_v55 = vor.u32 1.1754944e-38, %v903_v54  ;;  %vm1570_vm0 = vweird.f32 %v3726_v31 }
 0x18e   : > { %v2358_v1 = vpop.eup %2357  ;;  %v893_v44 = vmul.f32 %v2356_v9, %v3713_v34  ;;  %2365 = vrcp.f32 %v3743_v46  ;;  %v3765_v59 = vadd.f32 1.0, %v2354_v3  ;;  %vm1137_vm2 = vweird.f32 %v3728_v56 }
 0x18f   : > { %v2360_v20 = vpop.eup %2359  ;;  %v1816_v4 = vand.u32 2147483648, %v3743_v46  ;;  %2367 = vrcp.f32 %v3745_v7  ;;  %vm898_vm3 = vweird.f32 %v2356_v9  ;;  %vm3771_vm5 = vcmp.eq.f32.partialorder %v1574_v40, 8.507059e+37 }
 0x190   : > { %v894_v63 = vsub.f32 1.0, %v893_v44  ;;  %v2362_v27 = vpop.eup %2361  ;;  %v1566_v2 = vmul.f32 %v2360_v20, %v3726_v31  ;;  %v1577_v61 = vor.u32 1.1754944e-38, %v1576_v15  ;;  %v3775_v12 = vadd.f32 1.0, %v2358_v1  ;;  %vm899_vm10 = vmor %vm897_vm15, %vm898_vm3 }
 0x191   : > { %v1133_v10 = vmul.f32 %v2362_v27, %v3728_v56  ;;  %vm3778_vm6 = vcmp.eq.f32.partialorder %v1141_v6, 8.507059e+37  ;;  %v1144_v23 = vor.u32 1.1754944e-38, %v1143_v28  ;;  %v1814_v19 = vand.u32 2147483647, %v3743_v46 }
 0x192   : > { %v895_v14 = vmul.f32 %v2356_v9, %v894_v63  ;;  %v2364_v11 = vpop.eup %2363  ;;  %v1567_v39 = vsub.f32 1.0, %v1566_v2  ;;  %vm912_vm7 = vweird.f32 %v3745_v7  ;;  %v916_v25 = vand.u32 2147483647, %v3745_v7 }
 0x193   : > { %2369 = vrcp.f32 %v3765_v59  ;;  %vm1571_vm8 = vweird.f32 %v2360_v20  ;;  %v1134_v62 = vsub.f32 1.0, %v1133_v10  ;;  %vm1810_vm9 = vweird.f32 %v3743_v46 }
 0x194   : > { %v896_v52 = vadd.f32 %v2356_v9, %v895_v14  ;;  %v1817_v48 = vor.u32 1.1754944e-38, %v1816_v4  ;;  %v2366_v33 = vpop.eup %2365  ;;  %v1568_v41 = vmul.f32 %v2360_v20, %v1567_v39  ;;  %vm1138_vm11 = vweird.f32 %v2362_v27  ;;  %vm1572_vm15 = vmor %vm1570_vm0, %vm1571_vm8 }
 0x195   : > { %v918_v60 = vand.u32 2147483648, %v3745_v7  ;;  %2371 = vrcp.f32 %v3775_v12  ;;  %v2368_v37 = vpop.eup %2367  ;;  %v1135_v16 = vmul.f32 %v2362_v27, %v1134_v62  ;;  %v1806_v49 = vmul.f32 %v2366_v33, %v3743_v46 }
 0x196   : > { %v900_v30 = vsel %vm899_vm10, %v2356_v9, %v896_v52  ;;  %vm3793_vm12 = vcmp.eq.f32.partialorder %v1814_v19, 8.507059e+37  ;;  %vm1585_vm14 = vweird.f32 %v3765_v59  ;;  %v1569_v35 = vadd.f32 %v2360_v20, %v1568_v41  ;;  %v566_v52 = vpop.f32.mrf.mxu3 }
 0x197   : > { %v905_v34 = vsel %vm3754_vm1, %v904_v55, %v900_v30  ;;  %v908_v57 = vmul.f32 %v2368_v37, %v3745_v7  ;;  %vm3801_vm13 = vcmp.eq.f32.partialorder %v916_v25, 8.507059e+37  ;;  %v1589_v58 = vand.u32 2147483647, %v3765_v59  ;;  %vm1139_vm1 = vmor %vm1137_vm2, %vm1138_vm11  ;;  %v465_v25 = vpop.f32.mrf.mxu2 }
 0x198   : > { %v1190_v53 = vmul.f32 %v905_v34, %v3643_v17  ;;  %v1136_v50 = vadd.f32 %v2362_v27, %v1135_v16  ;;  %v1807_v54 = vsub.f32 1.0, %v1806_v49  ;;  %v1591_v3 = vand.u32 2147483648, %v3765_v59 }
 0x199   : > { %v2370_v9 = vpop.eup %2369  ;;  %v1573_v40 = vsel %vm1572_vm15, %v2360_v20, %v1569_v35  ;;  %vm1811_vm3 = vweird.f32 %v2366_v33  ;;  %v909_v15 = vsub.f32 1.0, %v908_v57  ;;  %v919_v1 = vor.u32 1.1754944e-38, %v918_v60 }
 0x19a   : > { %1223 = vst.msk [vmem:[%s2631_s14 + $0x68] sm:$0xff] %vm1209_vm4, %v1190_v53  ;;  %v1578_v17 = vsel %vm3771_vm5, %v1577_v61, %v1573_v40  ;;  %v1140_v31 = vsel %vm1139_vm1, %v2362_v27, %v1136_v50  ;;  %v1808_v44 = vmul.f32 %v2366_v33, %v1807_v54  ;;  %v1581_v47 = vmul.f32 %v2370_v9, %v3765_v59  ;;  %vm1812_vm2 = vmor %vm1810_vm9, %vm1811_vm3 }
 0x19b   : > { %v2372_v6 = vpop.eup %2371  ;;  %v1863_v28 = vmul.f32 %v1578_v17, %v3671_v0  ;;  %v1145_v56 = vsel %vm3778_vm6, %v1144_v23, %v1140_v31  ;;  %v910_v55 = vmul.f32 %v2368_v37, %v909_v15  ;;  %vm913_vm0 = vweird.f32 %v2368_v37 }
 0x19c   : > { %v1206_v20 = vmul.f32 %v1145_v56, %v3674_v22  ;;  %v1809_v63 = vadd.f32 %v2366_v33, %v1808_v44  ;;  %v1582_v4 = vsub.f32 1.0, %v1581_v47  ;;  %v1148_v2 = vmul.f32 %v2372_v6, %v3775_v12  ;;  %vm914_vm6 = vmor %vm912_vm7, %vm913_vm0 }
 0x19d   : > { %1895 = vst.msk [vmem:[%s2645_s17 + $0x68] sm:$0xff] %vm1209_vm4, %v1863_v28  ;;  %v911_v27 = vadd.f32 %v2368_v37, %v910_v55  ;;  %vm1586_vm5 = vweird.f32 %v2370_v9  ;;  %vm1153_vm8 = vweird.f32 %v2372_v6  ;;  %v1156_v0 = vand.u32 2147483647, %v3775_v12 }
 0x19e   : > { %1239 = vst.msk [vmem:[%s2631_s14 + $0xe8] sm:$0xff] %vm1209_vm4, %v1206_v20  ;;  %v1813_v45 = vsel %vm1812_vm2, %v2366_v33, %v1809_v63  ;;  %v1583_v22 = vmul.f32 %v2370_v9, %v1582_v4  ;;  %v1149_v61 = vsub.f32 1.0, %v1148_v2  ;;  %v1368_v14 = vadd.f32 1.0, %v2364_v11  ;;  %vm1587_vm7 = vmor %vm1585_vm14, %vm1586_vm5 }
 0x19f   : > { %v1818_v10 = vsel %vm3793_vm12, %v1817_v48, %v1813_v45  ;;  %v915_v46 = vsel %vm914_vm6, %v2368_v37, %v911_v27  ;;  %v1158_v21 = vand.u32 2147483648, %v3775_v12  ;;  %2373 = vpow2.f32 %v3748_v8 }
 0x1a0   : > { %v1879_v23 = vmul.f32 %v1818_v10, %v3688_v5  ;;  %v920_v19 = vsel %vm3801_vm13, %v919_v1, %v915_v46  ;;  %v1584_v7 = vadd.f32 %v2370_v9, %v1583_v22  ;;  %v1150_v39 = vmul.f32 %v2372_v6, %v1149_v61 }
 0x1a1   : > { %v1191_v11 = vmul.f32 %v920_v19, %v3691_v29  ;;  %v1592_v62 = vor.u32 1.1754944e-38, %v1591_v3  ;;  %vm1152_vm9 = vweird.f32 %v3775_v12  ;;  %2375 = vrcp.f32 %v1368_v14 }
 0x1a2   : > { %1911 = vst.msk [vmem:[%s2645_s17 + $0xe8] sm:$0xff] %vm1209_vm4, %v1879_v23  ;;  %v1588_v5 = vsel %vm1587_vm7, %v2370_v9, %v1584_v7  ;;  %vm1590_vm10 = vcmp.eq.f32.partialorder %v1589_v58, 8.507059e+37  ;;  %v1151_v8 = vadd.f32 %v2372_v6, %v1150_v39  ;;  %2377 = vpow2.f32 %v3761_v13  ;;  %vm1154_vm11 = vmor %vm1152_vm9, %vm1153_vm8 }
 0x1a3   : > { %1224 = vst.msk [vmem:[%s2631_s14 + $0x70] sm:$0xff] %vm1209_vm4, %v1191_v11  ;;  %v1593_v48 = vsel %vm1590_vm10, %v1592_v62, %v1588_v5  ;;  %v1159_v29 = vor.u32 1.1754944e-38, %v1158_v21  ;;  %v3853_v59 = vadd.f32 %v3640_v36, %v465_v25  ;;  %v3856_v12 = vadd.f32 %v3668_v51, %v566_v52 }
 0x1a4   : > { %v1864_v33 = vmul.f32 %v1593_v48, %v3694_v18  ;;  %v1155_v41 = vsel %vm1154_vm11, %v2372_v6, %v1151_v8  ;;  %vm1157_vm12 = vcmp.eq.f32.partialorder %v1156_v0, 8.507059e+37  ;;  %v1831_v35 = vand.u32 2147483648, %v1368_v14 }
 0x1a5   : > { %v2374_v60 = vpop.eup %2373  ;;  %v1160_v37 = vsel %vm1157_vm12, %v1159_v29, %v1155_v41  ;;  %v2086_v13 = vmul.f32 -1.442695, %v3853_v59  ;;  %v2118_v30 = vmul.f32 -1.442695, %v3856_v12  ;;  %v1829_v24 = vand.u32 2147483647, %v1368_v14 }
 0x1a6   : > { %1896 = vst.msk [vmem:[%s2645_s17 + $0x70] sm:$0xff] %vm1209_vm4, %v1864_v33  ;;  %v1207_v16 = vmul.f32 %v1160_v37, %v3704_v32  ;;  %v680_v49 = vadd.f32 1.0, %v2374_v60  ;;  %vm1825_vm13 = vweird.f32 %v1368_v14  ;;  %v1832_v3 = vor.u32 1.1754944e-38, %v1831_v35 }
 0x1a7   : > { %v2376_v36 = vpop.eup %2375  ;;  %2379 = vpow2.f32 %v2086_v13  ;;  %vm1830_vm1 = vcmp.eq.f32.partialorder %v1829_v24, 8.507059e+37 }
 0x1a8   : > { %v2378_v38 = vpop.eup %2377  ;;  %1240 = vst.msk [vmem:[%s2631_s14 + $0xf0] sm:$0xff] %vm1209_vm4, %v1207_v16  ;;  %v1821_v51 = vmul.f32 %v2376_v36, %v1368_v14  ;;  %2381 = vrcp.f32 %v680_v49  ;;  %vm1826_vm14 = vweird.f32 %v2376_v36  ;;  %v933_v47 = vand.u32 2147483648, %v680_v49 }
 0x1a9   : > { %v1353_v18 = vadd.f32 1.0, %v2378_v38  ;;  %2383 = vpow2.f32 %v2118_v30  ;;  %vm1827_vm15 = vmor %vm1825_vm13, %vm1826_vm14  ;;  %v931_v56 = vand.u32 2147483647, %v680_v49  ;;  %vm927_vm0 = vweird.f32 %v680_v49 }
 0x1aa   : > { %v1822_v34 = vsub.f32 1.0, %v1821_v51  ;;  %v934_v2 = vor.u32 1.1754944e-38, %v933_v47 }
 0x1ab   : > { %2385 = vrcp.f32 %v1353_v18  ;;  %v1606_v63 = vand.u32 2147483648, %v1353_v18  ;;  %v1604_v0 = vand.u32 2147483647, %v1353_v18  ;;  %vm932_vm8 = vcmp.eq.f32.partialorder %v931_v56, 8.507059e+37 }
 0x1ac   : > { %v1823_v57 = vmul.f32 %v2376_v36, %v1822_v34  ;;  %vm1600_vm6 = vweird.f32 %v1353_v18 }
 0x1ad   : > { %v2380_v58 = vpop.eup %2379  ;;  %v1607_v46 = vor.u32 1.1754944e-38, %v1606_v63  ;;  %vm1605_vm9 = vcmp.eq.f32.partialorder %v1604_v0, 8.507059e+37 }
 0x1ae   : > { %v2382_v53 = vpop.eup %2381  ;;  %v1824_v50 = vadd.f32 %v2376_v36, %v1823_v57  ;;  %v3866_v32 = vadd.f32 1.0, %v2380_v58 }
 0x1af   : > { %v2384_v54 = vpop.eup %2383  ;;  %v923_v9 = vmul.f32 %v2382_v53, %v680_v49  ;;  %vm928_vm3 = vweird.f32 %v2382_v53 }
 0x1b0   : > { %v1828_v40 = vsel %vm1827_vm15, %v2376_v36, %v1824_v50  ;;  %2387 = vrcp.f32 %v3866_v32  ;;  %v1369_v31 = vadd.f32 1.0, %v2384_v54  ;;  %vm929_vm2 = vmor %vm927_vm0, %vm928_vm3  ;;  %v1173_v19 = vand.u32 2147483648, %v3866_v32 }
 0x1b1   : > { %v2386_v15 = vpop.eup %2385  ;;  %v1833_v1 = vsel %vm1830_vm1, %v1832_v3, %v1828_v40  ;;  %v924_v17 = vsub.f32 1.0, %v923_v9  ;;  %v1171_v52 = vand.u32 2147483647, %v3866_v32  ;;  %vm1167_vm11 = vweird.f32 %v3866_v32 }
 0x1b2   : > { %v1880_v44 = vmul.f32 %v1833_v1, %v3716_v26  ;;  %v1596_v6 = vmul.f32 %v2386_v15, %v1353_v18  ;;  %2389 = vrcp.f32 %v1369_v31  ;;  %vm1601_vm5 = vweird.f32 %v2386_v15 }
 0x1b3   : > { %v925_v28 = vmul.f32 %v2382_v53, %v924_v17  ;;  %vm1602_vm7 = vmor %vm1600_vm6, %vm1601_vm5  ;;  %v1846_v5 = vand.u32 2147483648, %v1369_v31  ;;  %v1174_v8 = vor.u32 1.1754944e-38, %v1173_v19  ;;  %v1844_v29 = vand.u32 2147483647, %v1369_v31 }
 0x1b4   : > { %1912 = vst.msk [vmem:[%s2645_s17 + $0xf0] sm:$0xff] %vm1209_vm4, %v1880_v44  ;;  %v1597_v55 = vsub.f32 1.0, %v1596_v6  ;;  %vm1172_vm13 = vcmp.eq.f32.partialorder %v1171_v52, 8.507059e+37  ;;  %vm1840_vm15 = vweird.f32 %v1369_v31 }
 0x1b5   : > { %v926_v20 = vadd.f32 %v2382_v53, %v925_v28  ;;  %v1847_v37 = vor.u32 1.1754944e-38, %v1846_v5  ;;  %vm1845_vm3 = vcmp.eq.f32.partialorder %v1844_v29, 8.507059e+37 }
 0x1b6   : > { %v2388_v4 = vpop.eup %2387  ;;  %v1598_v27 = vmul.f32 %v2386_v15, %v1597_v55 }
 0x1b7   : > { %v930_v26 = vsel %vm929_vm2, %v2382_v53, %v926_v20  ;;  %v1163_v45 = vmul.f32 %v2388_v4, %v3866_v32  ;;  %vm1168_vm10 = vweird.f32 %v2388_v4 }
 0x1b8   : > { %v935_v22 = vsel %vm932_vm8, %v934_v2, %v930_v26  ;;  %v1599_v61 = vadd.f32 %v2386_v15, %v1598_v27  ;;  %v2390_v14 = vpop.eup %2389  ;;  %vm1169_vm12 = vmor %vm1167_vm11, %vm1168_vm10 }
 0x1b9   : > { %v1192_v10 = vmul.f32 %v935_v22, %v3724_v43  ;;  %v1164_v21 = vsub.f32 1.0, %v1163_v45  ;;  %v1836_v7 = vmul.f32 %v2390_v14, %v1369_v31  ;;  %vm1841_vm14 = vweird.f32 %v2390_v14 }
 0x1ba   : > { %v1603_v23 = vsel %vm1602_vm7, %v2386_v15, %v1599_v61  ;;  %vm1842_vm1 = vmor %vm1840_vm15, %vm1841_vm14 }
 0x1bb   : > { %1225 = vst.msk [vmem:[%s2631_s14 + $0x78] sm:$0xff] %vm1209_vm4, %v1192_v10  ;;  %v1608_v39 = vsel %vm1605_vm9, %v1607_v46, %v1603_v23  ;;  %v1165_v25 = vmul.f32 %v2388_v4, %v1164_v21  ;;  %v1837_v62 = vsub.f32 1.0, %v1836_v7 }
 0x1bc   : > { %v1865_v11 = vmul.f32 %v1608_v39, %v3737_v42 }
 0x1bd   : > { %v1166_v43 = vadd.f32 %v2388_v4, %v1165_v25  ;;  %v1838_v48 = vmul.f32 %v2390_v14, %v1837_v62 }
 0x1be   : > { %1897 = vst.msk [vmem:[%s2645_s17 + $0x78] sm:$0xff] %vm1209_vm4, %v1865_v11 }
 0x1bf   : > { %v1170_v33 = vsel %vm1169_vm12, %v2388_v4, %v1166_v43  ;;  %v1839_v60 = vadd.f32 %v2390_v14, %v1838_v48 }
 0x1c0   : > { %v1175_v41 = vsel %vm1172_vm13, %v1174_v8, %v1170_v33 }
 0x1c1   : > { %v1208_v42 = vmul.f32 %v1175_v41, %v3853_v59  ;;  %v1843_v13 = vsel %vm1842_vm1, %v2390_v14, %v1839_v60 }
 0x1c2   : > { %v1848_v30 = vsel %vm1845_vm3, %v1847_v37, %v1843_v13 }
 0x1c3   : > { %1241 = vst.msk [vmem:[%s2631_s14 + $0xf8] sm:$0xff] %vm1209_vm4, %v1208_v42  ;;  %v1881_v16 = vmul.f32 %v1848_v30, %v3856_v12 }
 0x1c5   : > { %1913 = vst.msk [vmem:[%s2645_s17 + $0xf8] sm:$0xff] %vm1209_vm4, %v1881_v16 }
 0x1c6 PF: > { %s17_s21 = sadd.s32 1, %s2401_s21  }
 0x1c7   : > { %p14_p4 = scmp.ge.s32.totalorder %s17_s21, 4  }
 0x1c9   :  { %16 = sbr.rel (!%p14_p4) target bundleno = 1 (0x1), region = 82 }

// kernel: c2f_forward.7
= control target key start
LH: loop header
LB: loop body
LE: loop exit
PB: predicated region body
PF: predicated region fallthrough
CT: control target
= control target key end

     0   :  { %s2335_s30 = smov 0   ;;  %s2950_s0 = inlined_call_operand.vmem [shape: f32[512,8], index: 0, kind: input, shape index: {}]   ;;  %s2951_s1 = inlined_call_operand.vmem [shape: f32[512,8], index: 1, kind: input, shape index: {}]   ;;  %s2952_s2 = inlined_call_operand.vmem [shape: f32[512,8], index: 2, kind: input, shape index: {}]   ;;  %s2953_s3 = inlined_call_operand.vmem [shape: f32[512,8], index: 3, kind: input, shape index: {}]   ;;  %s2954_s4 = inlined_call_operand.vmem [shape: bf16[8,16], index: 4, kind: input, shape index: {}]   ;;  %s2955_s5 = inlined_call_operand.vmem [shape: bf16[8,16], index: 5, kind: input, shape index: {}]   ;;  %s2956_s6 = inlined_call_operand.vmem [shape: bf16[8,16], index: 6, kind: input, shape index: {}]   ;;  %s2957_s7 = inlined_call_operand.vmem [shape: bf16[8,16], index: 7, kind: input, shape index: {}]   ;;  %s2958_s8 = inlined_call_operand.vmem [shape: f32[1,16], index: 8, kind: input, shape index: {}]   ;;  %s2959_s9 = inlined_call_operand.vmem [shape: f32[512,16], index: 9, kind: output, shape index: {}]  }
   0x1 LB: > { %s2026_s10 = sadd.s32 4294967295, %s2283_s30   ;;  %p2030_p0 = scmp.ge.s32.totalorder %s2283_s30, 1  ;;  %s2283_s30 = sphi %s2335_s30, %s19_s30  }
   0x2   : > { %p321_p1 = scmp.lt.s32.totalorder %s2283_s30, 3 }
   0x4   : > { %p322_p2 = pnand %p2030_p0, %p321_p1 }
   0x5   : > { %s2031_s15 = sshll.u32 (!%p322_p2), %s2026_s10, 5 }
   0x6   : > { %325 = sbr.rel (%p322_p2) target bundleno = 437 (0x1b5), region = 56  ;;  %p373_p3 = scmp.lt.s32.totalorder (!%p322_p2), %s2031_s15, 63 }
   0xb   : > { %v500_v0 = vld [vmem:[%s2955_s5] sm:$0xf]  ;;  %vm550_vm0 = vcmask 1043456   ;;  %s2961_s15 = smov (!%p373_p3, %s2031_s15), 63  ;;  %vm501_vm1 = vcmask 64512   ;;  %vm1901_vm6 = vcmask 130048  }
   0xc   : > { %v451_v1 = vld [vmem:[%s2954_s4] sm:$0xf]  ;;  %v552_v2 = vsel %vm550_vm0, %v500_v0, 0  ;;  %s2355_s20 = sshll.u32 %s2961_s15, 3 }
   0xd   : > { %v692_v3 = vsel %vm550_vm0, %v451_v1, 0  ;;  %v831_v4 = vld [vmem:[%s2956_s6] sm:$0xf]  ;;  %561 = vmatpush.bf16.msra.mxu0 %v552_v2  ;;  %s2361_s23 = scalar_lea.vmem %s2951_s1, %s2355_s20  ;;  %s2367_s26 = scalar_lea.vmem %s2950_s0, %s2355_s20 }
   0xe   : > { %v1052_v5 = vld [vmem:[%s2957_s7] sm:$0xf]  ;;  %701 = vmatpush.bf16.msra.mxu1 %v692_v3  ;;  %v881_v6 = vsel %vm550_vm0, %v831_v4, 0  ;;  %v453_v9 = vld [vmem:[%s2361_s23 + $0x8] sm:$0xff]  ;;  %s2376_s29 = scalar_lea.vmem %s2952_s2, %s2355_s20  ;;  %s2382_s12 = scalar_lea.vmem %s2953_s3, %s2355_s20  ;;  %v454_v20 = vld [vmem:[%s2361_s23 + $0x10] sm:$0xff] }
   0xf   : > { %v1102_v7 = vsel %vm550_vm0, %v1052_v5, 0  ;;  %890 = vmatpush.bf16.msra.mxu2 %v881_v6  ;;  %v452_v8 = vld [vmem:[%s2361_s23] sm:$0xff]  ;;  %v404_v12 = vld [vmem:[%s2367_s26 + $0x8] sm:$0xff]  ;;  %v455_v21 = vld [vmem:[%s2361_s23 + $0x18] sm:$0xff]  ;;  %s2544_s17 = scalar_lea.vmem %s2959_s9, %s2355_s20 }
  0x10   : > { %1111 = vmatpush.bf16.msra.mxu3 %v1102_v7  ;;  %v403_v10 = vld [vmem:[%s2367_s26] sm:$0xff]  ;;  %v484_v11 = vpack.c.bf16 %v453_v9, %v452_v8  ;;  %v784_v14 = vld [vmem:[%s2376_s29 + $0x8] sm:$0xff]  ;;  %v405_v22 = vld [vmem:[%s2367_s26 + $0x10] sm:$0xff]  ;;  %v485_v28 = vpack.c.bf16 %v455_v21, %v454_v20 }
  0x11   : > { %v783_v13 = vld [vmem:[%s2376_s29] sm:$0xff]  ;;  %v435_v15 = vpack.c.bf16 %v404_v12, %v403_v10  ;;  %v1005_v18 = vld [vmem:[%s2382_s12 + $0x8] sm:$0xff]  ;;  %v406_v23 = vld [vmem:[%s2367_s26 + $0x18] sm:$0xff] }
  0x12   : > { %v815_v16 = vpack.c.bf16 %v784_v14, %v783_v13  ;;  %v1004_v17 = vld [vmem:[%s2382_s12] sm:$0xff]  ;;  %2041 = vmatmul.msk.bf16.vlgmr.msra.gmra.mxu0 %vm501_vm1, %v484_v11  ;;  %v785_v24 = vld [vmem:[%s2376_s29 + $0x10] sm:$0xff]  ;;  %v786_v25 = vld [vmem:[%s2376_s29 + $0x18] sm:$0xff]  ;;  %v436_v29 = vpack.c.bf16 %v406_v23, %v405_v22 }
  0x13   : > { %v1036_v19 = vpack.c.bf16 %v1005_v18, %v1004_v17  ;;  %2057 = vmatmul.msk.bf16.vlgmr.msra.gmra.mxu1 %vm501_vm1, %v435_v15  ;;  %v1006_v26 = vld [vmem:[%s2382_s12 + $0x10] sm:$0xff]  ;;  %v1007_v27 = vld [vmem:[%s2382_s12 + $0x18] sm:$0xff]  ;;  %v816_v30 = vpack.c.bf16 %v786_v25, %v785_v24  ;;  %v456_v32 = vld [vmem:[%s2361_s23 + $0x20] sm:$0xff] }
  0x14   : > { %2073 = vmatmul.msk.bf16.vlgmr.msra.gmra.mxu2 %vm501_vm1, %v815_v16  ;;  %v1037_v31 = vpack.c.bf16 %v1007_v27, %v1006_v26  ;;  %v457_v33 = vld [vmem:[%s2361_s23 + $0x28] sm:$0xff]  ;;  %v407_v34 = vld [vmem:[%s2367_s26 + $0x20] sm:$0xff]  ;;  %v458_v44 = vld [vmem:[%s2361_s23 + $0x30] sm:$0xff] }
  0x15   : > { %2089 = vmatmul.msk.bf16.vlgmr.msra.gmra.mxu3 %vm501_vm1, %v1036_v19  ;;  %v408_v35 = vld [vmem:[%s2367_s26 + $0x28] sm:$0xff]  ;;  %v787_v36 = vld [vmem:[%s2376_s29 + $0x20] sm:$0xff]  ;;  %v486_v40 = vpack.c.bf16 %v457_v33, %v456_v32  ;;  %v459_v45 = vld [vmem:[%s2361_s23 + $0x38] sm:$0xff] }
  0x16   : > { %v788_v37 = vld [vmem:[%s2376_s29 + $0x28] sm:$0xff]  ;;  %v1008_v38 = vld [vmem:[%s2382_s12 + $0x20] sm:$0xff]  ;;  %v437_v41 = vpack.c.bf16 %v408_v35, %v407_v34  ;;  %v409_v46 = vld [vmem:[%s2367_s26 + $0x30] sm:$0xff]  ;;  %v487_v52 = vpack.c.bf16 %v459_v45, %v458_v44 }
  0x17   : > { %v1009_v39 = vld [vmem:[%s2382_s12 + $0x28] sm:$0xff]  ;;  %v817_v42 = vpack.c.bf16 %v788_v37, %v787_v36  ;;  %v410_v47 = vld [vmem:[%s2367_s26 + $0x38] sm:$0xff]  ;;  %v789_v48 = vld [vmem:[%s2376_s29 + $0x30] sm:$0xff] }
  0x18   : > { %v1038_v43 = vpack.c.bf16 %v1009_v39, %v1008_v38  ;;  %v790_v49 = vld [vmem:[%s2376_s29 + $0x38] sm:$0xff]  ;;  %v1010_v50 = vld [vmem:[%s2382_s12 + $0x30] sm:$0xff]  ;;  %v438_v53 = vpack.c.bf16 %v410_v47, %v409_v46  ;;  %v460_v56 = vld [vmem:[%s2361_s23 + $0x40] sm:$0xff] }
  0x19   : > { %v1011_v51 = vld [vmem:[%s2382_s12 + $0x38] sm:$0xff]  ;;  %v818_v54 = vpack.c.bf16 %v790_v49, %v789_v48  ;;  %v461_v57 = vld [vmem:[%s2361_s23 + $0x48] sm:$0xff]  ;;  %v411_v58 = vld [vmem:[%s2367_s26 + $0x40] sm:$0xff] }
  0x1a   : > { %v1039_v55 = vpack.c.bf16 %v1011_v51, %v1010_v50  ;;  %v412_v59 = vld [vmem:[%s2367_s26 + $0x48] sm:$0xff]  ;;  %v791_v60 = vld [vmem:[%s2376_s29 + $0x40] sm:$0xff]  ;;  %v488_v0 = vpack.c.bf16 %v461_v57, %v460_v56  ;;  %v462_v4 = vld [vmem:[%s2361_s23 + $0x50] sm:$0xff] }
  0x1b   : > { %v792_v61 = vld [vmem:[%s2376_s29 + $0x48] sm:$0xff]  ;;  %v1012_v62 = vld [vmem:[%s2382_s12 + $0x40] sm:$0xff]  ;;  %v439_v1 = vpack.c.bf16 %v412_v59, %v411_v58  ;;  %v463_v5 = vld [vmem:[%s2361_s23 + $0x58] sm:$0xff] }
  0x1c   : > { %v1013_v63 = vld [vmem:[%s2382_s12 + $0x48] sm:$0xff]  ;;  %v819_v2 = vpack.c.bf16 %v792_v61, %v791_v60  ;;  %v413_v6 = vld [vmem:[%s2367_s26 + $0x50] sm:$0xff]  ;;  %v414_v7 = vld [vmem:[%s2367_s26 + $0x58] sm:$0xff]  ;;  %v489_v12 = vpack.c.bf16 %v463_v5, %v462_v4 }
  0x1d   : > { %v1040_v3 = vpack.c.bf16 %v1013_v63, %v1012_v62  ;;  %v793_v8 = vld [vmem:[%s2376_s29 + $0x50] sm:$0xff]  ;;  %v794_v9 = vld [vmem:[%s2376_s29 + $0x58] sm:$0xff]  ;;  %v440_v13 = vpack.c.bf16 %v414_v7, %v413_v6  ;;  %v464_v16 = vld [vmem:[%s2361_s23 + $0x60] sm:$0xff] }
  0x1e   : > { %v1014_v10 = vld [vmem:[%s2382_s12 + $0x50] sm:$0xff]  ;;  %v1015_v11 = vld [vmem:[%s2382_s12 + $0x58] sm:$0xff]  ;;  %v820_v14 = vpack.c.bf16 %v794_v9, %v793_v8  ;;  %v465_v17 = vld [vmem:[%s2361_s23 + $0x68] sm:$0xff] }
  0x1f   : > { %v1041_v15 = vpack.c.bf16 %v1015_v11, %v1014_v10  ;;  %v415_v18 = vld [vmem:[%s2367_s26 + $0x60] sm:$0xff]  ;;  %v416_v19 = vld [vmem:[%s2367_s26 + $0x68] sm:$0xff]  ;;  %v490_v24 = vpack.c.bf16 %v465_v17, %v464_v16  ;;  %v797_v32 = vld [vmem:[%s2376_s29 + $0x70] sm:$0xff] }
  0x20   : > { %v795_v20 = vld [vmem:[%s2376_s29 + $0x60] sm:$0xff]  ;;  %v796_v21 = vld [vmem:[%s2376_s29 + $0x68] sm:$0xff]  ;;  %v441_v25 = vpack.c.bf16 %v416_v19, %v415_v18  ;;  %v798_v33 = vld [vmem:[%s2376_s29 + $0x78] sm:$0xff] }
  0x21   : > { %v1016_v22 = vld [vmem:[%s2382_s12 + $0x60] sm:$0xff]  ;;  %v1017_v23 = vld [vmem:[%s2382_s12 + $0x68] sm:$0xff]  ;;  %v821_v26 = vpack.c.bf16 %v796_v21, %v795_v20  ;;  %v1018_v34 = vld [vmem:[%s2382_s12 + $0x70] sm:$0xff]  ;;  %v822_v38 = vpack.c.bf16 %v798_v33, %v797_v32 }
  0x22   : > { %2042 = vmatmul.msk.bf16.gmra.mxu0 %vm501_vm1, %v485_v28  ;;  %v1042_v27 = vpack.c.bf16 %v1017_v23, %v1016_v22  ;;  %v466_v28 = vld [vmem:[%s2361_s23 + $0x70] sm:$0xff]  ;;  %v1019_v35 = vld [vmem:[%s2382_s12 + $0x78] sm:$0xff]  ;;  %v799_v44 = vld [vmem:[%s2376_s29 + $0x80] sm:$0xff] }
  0x23   : > { %2058 = vmatmul.msk.bf16.gmra.mxu1 %vm501_vm1, %v436_v29  ;;  %v467_v29 = vld [vmem:[%s2361_s23 + $0x78] sm:$0xff]  ;;  %v1043_v39 = vpack.c.bf16 %v1019_v35, %v1018_v34  ;;  %v800_v45 = vld [vmem:[%s2376_s29 + $0x88] sm:$0xff]  ;;  %v1020_v46 = vld [vmem:[%s2382_s12 + $0x80] sm:$0xff] }
  0x24   : > { %2074 = vmatmul.msk.bf16.gmra.mxu2 %vm501_vm1, %v816_v30  ;;  %v417_v30 = vld [vmem:[%s2367_s26 + $0x70] sm:$0xff]  ;;  %v491_v36 = vpack.c.bf16 %v467_v29, %v466_v28  ;;  %v1021_v47 = vld [vmem:[%s2382_s12 + $0x88] sm:$0xff]  ;;  %v823_v51 = vpack.c.bf16 %v800_v45, %v799_v44  ;;  %v2492_v58 = vld [vmem:[%s2958_s8] ss:$0 sm:$0xff] }
  0x25   : > { %2090 = vmatmul.msk.bf16.gmra.mxu3 %vm501_vm1, %v1037_v31  ;;  %v418_v31 = vld [vmem:[%s2367_s26 + $0x78] sm:$0xff]  ;;  %v470_v63 = vld [vmem:[%s2361_s23 + $0x90] sm:$0xff]  ;;  %v473_v32 = vld [vmem:[%s2361_s23 + $0xa8] sm:$0xff] }
  0x26   : > { %v442_v37 = vpack.c.bf16 %v418_v31, %v417_v30  ;;  %v802_v4 = vld [vmem:[%s2376_s29 + $0x98] sm:$0xff]  ;;  %v1022_v7 = vld [vmem:[%s2382_s12 + $0x90] sm:$0xff]  ;;  %v472_v30 = vld [vmem:[%s2361_s23 + $0xa0] sm:$0xff] }
  0x27   : > { %v1023_v8 = vld [vmem:[%s2382_s12 + $0x98] sm:$0xff]  ;;  %v423_v33 = vld [vmem:[%s2367_s26 + $0xa0] sm:$0xff]  ;;  %v424_v34 = vld [vmem:[%s2367_s26 + $0xa8] sm:$0xff]  ;;  %v494_v45 = vpack.c.bf16 %v473_v32, %v472_v30 }
  0x28   : > { %v1045_v17 = vpack.c.bf16 %v1023_v8, %v1022_v7  ;;  %v803_v35 = vld [vmem:[%s2376_s29 + $0xa0] sm:$0xff]  ;;  %v1027_v30 = vld [vmem:[%s2382_s12 + $0xb8] sm:$0xff] }
  0x32   : > { %2043 = vmatmul.msk.bf16.gmra.mxu0 %vm501_vm1, %v486_v40  ;;  %v468_v40 = vld [vmem:[%s2361_s23 + $0x80] sm:$0xff] }
  0x33   : > { %2059 = vmatmul.msk.bf16.gmra.mxu1 %vm501_vm1, %v437_v41  ;;  %v469_v41 = vld [vmem:[%s2361_s23 + $0x88] sm:$0xff] }
  0x34   : > { %2075 = vmatmul.msk.bf16.gmra.mxu2 %vm501_vm1, %v817_v42  ;;  %v419_v42 = vld [vmem:[%s2367_s26 + $0x80] sm:$0xff]  ;;  %v492_v48 = vpack.c.bf16 %v469_v41, %v468_v40  ;;  %v1025_v41 = vld [vmem:[%s2382_s12 + $0xa8] sm:$0xff] }
  0x35   : > { %2091 = vmatmul.msk.bf16.gmra.mxu3 %vm501_vm1, %v1038_v43  ;;  %v420_v43 = vld [vmem:[%s2367_s26 + $0x88] sm:$0xff]  ;;  %v1024_v40 = vld [vmem:[%s2382_s12 + $0xa0] sm:$0xff] }
  0x36   : > { %v443_v50 = vpack.c.bf16 %v420_v43, %v419_v42 }
  0x42   : > { %2044 = vmatmul.msk.bf16.gmra.mxu0 %vm501_vm1, %v487_v52 }
  0x43   : > { %2060 = vmatmul.msk.bf16.gmra.mxu1 %vm501_vm1, %v438_v53  ;;  %v1044_v53 = vpack.c.bf16 %v1021_v47, %v1020_v46  ;;  %v445_v46 = vpack.c.bf16 %v424_v34, %v423_v33 }
  0x44   : > { %2076 = vmatmul.msk.bf16.gmra.mxu2 %vm501_vm1, %v818_v54 }
  0x45   : > { %2092 = vmatmul.msk.bf16.gmra.mxu3 %vm501_vm1, %v1039_v55 }
  0x52   : > { %2045 = vmatmul.msk.bf16.gmra.mxu0 %vm501_vm1, %v488_v0  ;;  %v471_v0 = vld [vmem:[%s2361_s23 + $0x98] sm:$0xff] }
  0x53   : > { %2061 = vmatmul.msk.bf16.gmra.mxu1 %vm501_vm1, %v439_v1  ;;  %v421_v1 = vld [vmem:[%s2367_s26 + $0x90] sm:$0xff]  ;;  %v493_v10 = vpack.c.bf16 %v471_v0, %v470_v63 }
  0x54   : > { %2077 = vmatmul.msk.bf16.gmra.mxu2 %vm501_vm1, %v819_v2  ;;  %v422_v2 = vld [vmem:[%s2367_s26 + $0x98] sm:$0xff] }
  0x55   : > { %2093 = vmatmul.msk.bf16.gmra.mxu3 %vm501_vm1, %v1040_v3  ;;  %v801_v3 = vld [vmem:[%s2376_s29 + $0x90] sm:$0xff] }
  0x62   : > { %2046 = vmatmul.msk.bf16.gmra.mxu0 %vm501_vm1, %v489_v12 }
  0x63   : > { %2062 = vmatmul.msk.bf16.gmra.mxu1 %vm501_vm1, %v440_v13 }
  0x64   : > { %2078 = vmatmul.msk.bf16.gmra.mxu2 %vm501_vm1, %v820_v14  ;;  %v444_v14 = vpack.c.bf16 %v422_v2, %v421_v1 }
  0x65   : > { %2094 = vmatmul.msk.bf16.gmra.mxu3 %vm501_vm1, %v1041_v15  ;;  %v824_v15 = vpack.c.bf16 %v802_v4, %v801_v3 }
  0x72   : > { %2047 = vmatmul.msk.bf16.gmra.mxu0 %vm501_vm1, %v490_v24 }
  0x73   : > { %2063 = vmatmul.msk.bf16.gmra.mxu1 %vm501_vm1, %v441_v25 }
  0x74   : > { %2079 = vmatmul.msk.bf16.gmra.mxu2 %vm501_vm1, %v821_v26 }
  0x75   : > { %2095 = vmatmul.msk.bf16.gmra.mxu3 %vm501_vm1, %v1042_v27 }
  0x82   : > { %2048 = vmatmul.msk.bf16.gmra.mxu0 %vm501_vm1, %v491_v36  ;;  %v804_v36 = vld [vmem:[%s2376_s29 + $0xa8] sm:$0xff] }
  0x83   : > { %2064 = vmatmul.msk.bf16.gmra.mxu1 %vm501_vm1, %v442_v37 }
  0x84   : > { %2080 = vmatmul.msk.bf16.gmra.mxu2 %vm501_vm1, %v822_v38 }
  0x85   : > { %2096 = vmatmul.msk.bf16.gmra.mxu3 %vm501_vm1, %v1043_v39 }
  0x8f   : > { %v563_v49 = vpop.f32.mrf.mxu0 }
  0x90   : > { %v703_v52 = vpop.f32.mrf.mxu1 }
  0x91   : > { %v704_v54 = vadd.f32 %v703_v52, %v563_v49 }
  0x92   : > { %2049 = vmatmul.msk.bf16.gmra.mxu0 %vm501_vm1, %v492_v48 }
  0x93   : > { %2065 = vmatmul.msk.bf16.gmra.mxu1 %vm501_vm1, %v443_v50 }
  0x94   : > { %2081 = vmatmul.msk.bf16.gmra.mxu2 %vm501_vm1, %v823_v51  ;;  %v825_v51 = vpack.c.bf16 %v804_v36, %v803_v35 }
  0x95   : > { %2097 = vmatmul.msk.bf16.gmra.mxu3 %vm501_vm1, %v1044_v53  ;;  %v1046_v53 = vpack.c.bf16 %v1025_v41, %v1024_v40 }
  0x97   : > { %v892_v55 = vpop.f32.mrf.mxu2  ;;  %v565_v59 = vpop.f32.mrf.mxu0 }
  0x98   : > { %v972_v56 = vadd.f32 %v892_v55, %v704_v54  ;;  %v1113_v57 = vpop.f32.mrf.mxu3  ;;  %v705_v60 = vpop.f32.mrf.mxu1 }
  0x99   : > { %v706_v6 = vadd.f32 %v705_v60, %v565_v59 }
  0x9a   : > { %v1193_v61 = vadd.f32 %v1113_v57, %v972_v56 }
  0x9c   : > { %v2495_v62 = vadd.f32 %v2492_v58, %v1193_v61 }
  0x9e   : > { %v2105_v5 = vmul.f32 -1.442695, %v2495_v62 }
  0x9f   : > { %v894_v9 = vpop.f32.mrf.mxu2  ;;  %v568_v13 = vpop.f32.mrf.mxu0 }
  0xa0   : > { %2148 = vpow2.f32 %v2105_v5  ;;  %v973_v11 = vadd.f32 %v894_v9, %v706_v6  ;;  %v1115_v12 = vpop.f32.mrf.mxu3  ;;  %v708_v16 = vpop.f32.mrf.mxu1 }
  0xa1   : > { %v709_v20 = vadd.f32 %v708_v16, %v568_v13  ;;  %v474_v16 = vld [vmem:[%s2361_s23 + $0xb0] sm:$0xff] }
  0xa2   : > { %v1194_v18 = vadd.f32 %v1115_v12, %v973_v11  ;;  %2050 = vmatmul.msk.bf16.gmra.mxu0 %vm501_vm1, %v493_v10 }
  0xa3   : > { %2066 = vmatmul.msk.bf16.gmra.mxu1 %vm501_vm1, %v444_v14 }
  0xa4   : > { %v2508_v19 = vadd.f32 %v2492_v58, %v1194_v18  ;;  %2082 = vmatmul.msk.bf16.gmra.mxu2 %vm501_vm1, %v824_v15  ;;  %v425_v18 = vld [vmem:[%s2367_s26 + $0xb0] sm:$0xff] }
  0xa5   : > { %2098 = vmatmul.msk.bf16.gmra.mxu3 %vm501_vm1, %v1045_v17  ;;  %v475_v17 = vld [vmem:[%s2361_s23 + $0xb8] sm:$0xff] }
  0xa6   : > { %v2149_v21 = vpop.eup %2148  ;;  %v2106_v22 = vmul.f32 -1.442695, %v2508_v19 }
  0xa7   : > { %v1357_v23 = vadd.f32 1.0, %v2149_v21  ;;  %v897_v24 = vpop.f32.mrf.mxu2  ;;  %v570_v27 = vpop.f32.mrf.mxu0 }
  0xa8   : > { %2150 = vpow2.f32 %v2106_v22  ;;  %v974_v25 = vadd.f32 %v897_v24, %v709_v20  ;;  %v1118_v26 = vpop.f32.mrf.mxu3  ;;  %v710_v28 = vpop.f32.mrf.mxu1  ;;  %v805_v24 = vld [vmem:[%s2376_s29 + $0xb0] sm:$0xff] }
  0xa9   : > { %2152 = vrcp.f32 %v1357_v23  ;;  %v711_v39 = vadd.f32 %v710_v28, %v570_v27  ;;  %v1400_v56 = vand.u32 2147483648, %v1357_v23  ;;  %v1398_v59 = vand.u32 2147483647, %v1357_v23 }
  0xaa   : > { %v1195_v29 = vadd.f32 %v1118_v26, %v974_v25  ;;  %vm1394_vm3 = vweird.f32 %v1357_v23  ;;  %v806_v25 = vld [vmem:[%s2376_s29 + $0xb8] sm:$0xff]  ;;  %v495_v28 = vpack.c.bf16 %v475_v17, %v474_v16  ;;  %v428_v17 = vld [vmem:[%s2367_s26 + $0xc8] sm:$0xff] }
  0xab   : > { %v1401_v3 = vor.u32 1.1754944e-38, %v1400_v56  ;;  %vm1399_vm5 = vcmp.eq.f32.partialorder %v1398_v59, 8.507059e+37 }
  0xac   : > { %v2516_v31 = vadd.f32 %v2492_v58, %v1195_v29  ;;  %v1026_v29 = vld [vmem:[%s2382_s12 + $0xb0] sm:$0xff] }
  0xae   : > { %v2151_v37 = vpop.eup %2150  ;;  %v2107_v38 = vmul.f32 -1.442695, %v2516_v31 }
  0xaf   : > { %v2153_v42 = vpop.eup %2152  ;;  %v2526_v43 = vadd.f32 1.0, %v2151_v37  ;;  %v899_v44 = vpop.f32.mrf.mxu2  ;;  %v826_v37 = vpack.c.bf16 %v806_v25, %v805_v24  ;;  %v1028_v24 = vld [vmem:[%s2382_s12 + $0xc0] sm:$0xff]  ;;  %v1029_v25 = vld [vmem:[%s2382_s12 + $0xc8] sm:$0xff] }
  0xb0   : > { %v1390_v47 = vmul.f32 %v2153_v42, %v1357_v23  ;;  %2154 = vpow2.f32 %v2107_v38  ;;  %v975_v48 = vadd.f32 %v899_v44, %v711_v39  ;;  %v1120_v49 = vpop.f32.mrf.mxu3  ;;  %v573_v50 = vpop.f32.mrf.mxu0  ;;  %vm1395_vm2 = vweird.f32 %v2153_v42  ;;  %v426_v23 = vld [vmem:[%s2367_s26 + $0xb8] sm:$0xff] }
  0xb1   : > { %2156 = vrcp.f32 %v2526_v43  ;;  %v713_v52 = vpop.f32.mrf.mxu1  ;;  %vm1396_vm4 = vmor %vm1394_vm3, %vm1395_vm2  ;;  %v1415_v15 = vand.u32 2147483648, %v2526_v43  ;;  %v1413_v21 = vand.u32 2147483647, %v2526_v43  ;;  %vm1409_vm8 = vweird.f32 %v2526_v43 }
  0xb2   : > { %v1391_v54 = vsub.f32 1.0, %v1390_v47  ;;  %v1196_v55 = vadd.f32 %v1120_v49, %v975_v48  ;;  %2051 = vmatmul.msk.bf16.gmra.mxu0 %vm501_vm1, %v494_v45  ;;  %v714_v1 = vadd.f32 %v713_v52, %v573_v50  ;;  %v446_v36 = vpack.c.bf16 %v426_v23, %v425_v18  ;;  %v807_v18 = vld [vmem:[%s2376_s29 + $0xc0] sm:$0xff] }
  0xb3   : > { %2067 = vmatmul.msk.bf16.gmra.mxu1 %vm501_vm1, %v445_v46  ;;  %v1416_v33 = vor.u32 1.1754944e-38, %v1415_v15  ;;  %vm1414_vm10 = vcmp.eq.f32.partialorder %v1413_v21, 8.507059e+37  ;;  %v1047_v46 = vpack.c.bf16 %v1027_v30, %v1026_v29  ;;  %v427_v15 = vld [vmem:[%s2367_s26 + $0xc0] sm:$0xff] }
  0xb4   : > { %v1392_v57 = vmul.f32 %v2153_v42, %v1391_v54  ;;  %v2531_v60 = vadd.f32 %v2492_v58, %v1196_v55  ;;  %2083 = vmatmul.msk.bf16.gmra.mxu2 %vm501_vm1, %v825_v51  ;;  %v447_v29 = vpack.c.bf16 %v428_v17, %v427_v15 }
  0xb5   : > { %2099 = vmatmul.msk.bf16.gmra.mxu3 %vm501_vm1, %v1046_v53 }
  0xb6   : > { %v2155_v61 = vpop.eup %2154  ;;  %v1393_v63 = vadd.f32 %v2153_v42, %v1392_v57  ;;  %v2108_v0 = vmul.f32 -1.442695, %v2531_v60 }
  0xb7   : > { %v2157_v2 = vpop.eup %2156  ;;  %v2537_v4 = vadd.f32 1.0, %v2155_v61  ;;  %v902_v5 = vpop.f32.mrf.mxu2 }
  0xb8   : > { %v1397_v6 = vsel %vm1396_vm4, %v2153_v42, %v1393_v63  ;;  %v1405_v7 = vmul.f32 %v2157_v2, %v2526_v43  ;;  %2158 = vpow2.f32 %v2108_v0  ;;  %v1123_v8 = vpop.f32.mrf.mxu3  ;;  %v575_v9 = vpop.f32.mrf.mxu0  ;;  %v976_v14 = vadd.f32 %v902_v5, %v714_v1 }
  0xb9   : > { %v1402_v10 = vsel %vm1399_vm5, %v1401_v3, %v1397_v6  ;;  %2160 = vrcp.f32 %v2537_v4  ;;  %v715_v11 = vpop.f32.mrf.mxu1  ;;  %vm1410_vm7 = vweird.f32 %v2157_v2  ;;  %v1430_v49 = vand.u32 2147483648, %v2537_v4 }
  0xba   : > { %v1869_v12 = vmul.f32 %v1402_v10, %v2495_v62  ;;  %v1406_v13 = vsub.f32 1.0, %v1405_v7  ;;  %v1197_v22 = vadd.f32 %v1123_v8, %v976_v14  ;;  %vm1411_vm9 = vmor %vm1409_vm8, %vm1410_vm7  ;;  %v716_v44 = vadd.f32 %v715_v11, %v575_v9  ;;  %v477_v14 = vld [vmem:[%s2361_s23 + $0xc8] sm:$0xff] }
  0xbb   : > { %v1428_v52 = vand.u32 2147483647, %v2537_v4  ;;  %vm1424_vm12 = vweird.f32 %v2537_v4  ;;  %v1431_v56 = vor.u32 1.1754944e-38, %v1430_v49 }
  0xbc   : > { %1902 = vst.msk [vmem:[%s2544_s17] sm:$0xff] %vm1901_vm6, %v1869_v12  ;;  %v1407_v20 = vmul.f32 %v2157_v2, %v1406_v13  ;;  %v2560_v27 = vadd.f32 %v2492_v58, %v1197_v22  ;;  %v476_v13 = vld [vmem:[%s2361_s23 + $0xc0] sm:$0xff] }
  0xbd   : > { %vm1429_vm14 = vcmp.eq.f32.partialorder %v1428_v52, 8.507059e+37 }
  0xbe   : > { %v2159_v62 = vpop.eup %2158  ;;  %v1408_v26 = vadd.f32 %v2157_v2, %v1407_v20  ;;  %v2109_v40 = vmul.f32 -1.442695, %v2560_v27  ;;  %v808_v20 = vld [vmem:[%s2376_s29 + $0xc8] sm:$0xff] }
  0xbf   : > { %v2161_v32 = vpop.eup %2160  ;;  %v2564_v34 = vadd.f32 1.0, %v2159_v62  ;;  %v904_v35 = vpop.f32.mrf.mxu2  ;;  %v827_v30 = vpack.c.bf16 %v808_v20, %v807_v18  ;;  %v1030_v18 = vld [vmem:[%s2382_s12 + $0xd0] sm:$0xff]  ;;  %v1031_v20 = vld [vmem:[%s2382_s12 + $0xd8] sm:$0xff] }
  0xc0   : > { %v1412_v38 = vsel %vm1411_vm9, %v2157_v2, %v1408_v26  ;;  %v1420_v39 = vmul.f32 %v2161_v32, %v2537_v4  ;;  %v1125_v41 = vpop.f32.mrf.mxu3  ;;  %v578_v42 = vpop.f32.mrf.mxu0  ;;  %v977_v50 = vadd.f32 %v904_v35, %v716_v44  ;;  %vm1425_vm11 = vweird.f32 %v2161_v32 }
  0xc1   : > { %v1417_v43 = vsel %vm1414_vm10, %v1416_v33, %v1412_v38  ;;  %2162 = vrcp.f32 %v2564_v34  ;;  %v718_v45 = vpop.f32.mrf.mxu1  ;;  %vm1426_vm13 = vmor %vm1424_vm12, %vm1425_vm11  ;;  %v1443_v11 = vand.u32 2147483647, %v2564_v34  ;;  %v1445_v12 = vand.u32 2147483648, %v2564_v34 }
  0xc2   : > { %v1870_v47 = vmul.f32 %v1417_v43, %v2508_v19  ;;  %v1421_v48 = vsub.f32 1.0, %v1420_v39  ;;  %2164 = vpow2.f32 %v2109_v40  ;;  %2052 = vmatmul.msk.bf16.gmra.mxu0 %vm501_vm1, %v495_v28  ;;  %v719_v53 = vadd.f32 %v718_v45, %v578_v42 }
  0xc3   : > { %2068 = vmatmul.msk.bf16.gmra.mxu1 %vm501_vm1, %v446_v36  ;;  %v1198_v54 = vadd.f32 %v1125_v41, %v977_v50  ;;  %vm1439_vm0 = vweird.f32 %v2564_v34  ;;  %v1446_v62 = vor.u32 1.1754944e-38, %v1445_v12  ;;  %v496_v28 = vpack.c.bf16 %v477_v14, %v476_v13 }
  0xc4   : > { %1903 = vst.msk [vmem:[%s2544_s17 + $0x8] sm:$0xff] %vm1901_vm6, %v1870_v47  ;;  %v1422_v51 = vmul.f32 %v2161_v32, %v1421_v48  ;;  %2084 = vmatmul.msk.bf16.gmra.mxu2 %vm501_vm1, %v826_v37  ;;  %vm1444_vm3 = vcmp.eq.f32.partialorder %v1443_v11, 8.507059e+37  ;;  %v1048_v39 = vpack.c.bf16 %v1029_v25, %v1028_v24 }
  0xc5   : > { %2100 = vmatmul.msk.bf16.gmra.mxu3 %vm501_vm1, %v1047_v46  ;;  %v2580_v57 = vadd.f32 %v2492_v58, %v1198_v54 }
  0xc6   : > { %v1423_v19 = vadd.f32 %v2161_v32, %v1422_v51 }
  0xc7   : > { %v2163_v55 = vpop.eup %2162  ;;  %v907_v59 = vpop.f32.mrf.mxu2  ;;  %v2110_v6 = vmul.f32 -1.442695, %v2580_v57 }
  0xc8   : > { %v2165_v61 = vpop.eup %2164  ;;  %v1427_v63 = vsel %vm1426_vm13, %v2161_v32, %v1423_v19  ;;  %v1435_v0 = vmul.f32 %v2163_v55, %v2564_v34  ;;  %v978_v1 = vadd.f32 %v907_v59, %v719_v53  ;;  %v1128_v2 = vpop.f32.mrf.mxu3  ;;  %vm1440_vm15 = vweird.f32 %v2163_v55 }
  0xc9   : > { %v580_v3 = vpop.f32.mrf.mxu0  ;;  %v1432_v4 = vsel %vm1429_vm14, %v1431_v56, %v1427_v63  ;;  %v2583_v5 = vadd.f32 1.0, %v2165_v61  ;;  %v720_v7 = vpop.f32.mrf.mxu1  ;;  %vm1441_vm2 = vmor %vm1439_vm0, %vm1440_vm15 }
  0xca   : > { %v1871_v8 = vmul.f32 %v1432_v4, %v2516_v31  ;;  %v1436_v9 = vsub.f32 1.0, %v1435_v0  ;;  %v1199_v10 = vadd.f32 %v1128_v2, %v978_v1  ;;  %v721_v23 = vadd.f32 %v720_v7, %v580_v3  ;;  %v478_v1 = vld [vmem:[%s2361_s23 + $0xd0] sm:$0xff]  ;;  %v479_v2 = vld [vmem:[%s2361_s23 + $0xd8] sm:$0xff] }
  0xcb   : > { %2166 = vrcp.f32 %v2583_v5  ;;  %v1458_v50 = vand.u32 2147483647, %v2583_v5  ;;  %vm1454_vm5 = vweird.f32 %v2583_v5  ;;  %v429_v3 = vld [vmem:[%s2367_s26 + $0xd0] sm:$0xff]  ;;  %v497_v12 = vpack.c.bf16 %v479_v2, %v478_v1  ;;  %v480_v1 = vld [vmem:[%s2361_s23 + $0xe0] sm:$0xff]  ;;  %v481_v2 = vld [vmem:[%s2361_s23 + $0xe8] sm:$0xff] }
  0xcc   : > { %1904 = vst.msk [vmem:[%s2544_s17 + $0x10] sm:$0xff] %vm1901_vm6, %v1871_v8  ;;  %v1437_v16 = vmul.f32 %v2163_v55, %v1436_v9  ;;  %2168 = vpow2.f32 %v2110_v6  ;;  %v2596_v31 = vadd.f32 %v2492_v58, %v1199_v10  ;;  %v430_v6 = vld [vmem:[%s2367_s26 + $0xd8] sm:$0xff]  ;;  %v809_v7 = vld [vmem:[%s2376_s29 + $0xd0] sm:$0xff] }
  0xcd   : > { %vm1459_vm8 = vcmp.eq.f32.partialorder %v1458_v50, 8.507059e+37  ;;  %v810_v8 = vld [vmem:[%s2376_s29 + $0xd8] sm:$0xff] }
  0xce   : > { %v1438_v21 = vadd.f32 %v2163_v55, %v1437_v16  ;;  %v2111_v22 = vmul.f32 -1.442695, %v2596_v31  ;;  %v448_v16 = vpack.c.bf16 %v430_v6, %v429_v3  ;;  %v828_v17 = vpack.c.bf16 %v810_v8, %v809_v7  ;;  %v431_v3 = vld [vmem:[%s2367_s26 + $0xe0] sm:$0xff]  ;;  %v432_v6 = vld [vmem:[%s2367_s26 + $0xe8] sm:$0xff] }
  0xcf   : > { %v909_v26 = vpop.f32.mrf.mxu2  ;;  %v811_v7 = vld [vmem:[%s2376_s29 + $0xe0] sm:$0xff]  ;;  %v812_v8 = vld [vmem:[%s2376_s29 + $0xe8] sm:$0xff] }
  0xd0   : > { %v1442_v32 = vsel %vm1441_vm2, %v2163_v55, %v1438_v21  ;;  %2170 = vpow2.f32 %v2111_v22  ;;  %v979_v33 = vadd.f32 %v909_v26, %v721_v23  ;;  %v1130_v35 = vpop.f32.mrf.mxu3 }
  0xd1   : > { %v583_v36 = vpop.f32.mrf.mxu0  ;;  %v2167_v37 = vpop.eup %2166  ;;  %v1447_v34 = vsel %vm1444_vm3, %v1446_v62, %v1442_v32  ;;  %v1049_v32 = vpack.c.bf16 %v1031_v20, %v1030_v18  ;;  %v449_v20 = vpack.c.bf16 %v432_v6, %v431_v3 }
  0xd2   : > { %v723_v38 = vpop.f32.mrf.mxu1  ;;  %v2169_v40 = vpop.eup %2168  ;;  %v1872_v41 = vmul.f32 %v1447_v34, %v2531_v60  ;;  %v1450_v42 = vmul.f32 %v2167_v37, %v2583_v5  ;;  %v1200_v43 = vadd.f32 %v1130_v35, %v979_v33  ;;  %2053 = vmatmul.msk.bf16.gmra.mxu0 %vm501_vm1, %v496_v28  ;;  %v1460_v60 = vand.u32 2147483648, %v2583_v5 }
  0xd3   : > { %v2607_v44 = vadd.f32 1.0, %v2169_v40  ;;  %v724_v47 = vadd.f32 %v723_v38, %v583_v36  ;;  %2069 = vmatmul.msk.bf16.gmra.mxu1 %vm501_vm1, %v447_v29  ;;  %vm1455_vm4 = vweird.f32 %v2167_v37 }
  0xd4   : > { %1905 = vst.msk [vmem:[%s2544_s17 + $0x18] sm:$0xff] %vm1901_vm6, %v1872_v41  ;;  %v1451_v45 = vsub.f32 1.0, %v1450_v42  ;;  %v2613_v46 = vadd.f32 %v2492_v58, %v1200_v43  ;;  %2085 = vmatmul.msk.bf16.gmra.mxu2 %vm501_vm1, %v827_v30  ;;  %vm1456_vm7 = vmor %vm1454_vm5, %vm1455_vm4  ;;  %v1461_v59 = vor.u32 1.1754944e-38, %v1460_v60 }
  0xd5   : > { %2172 = vrcp.f32 %v2607_v44  ;;  %2101 = vmatmul.msk.bf16.gmra.mxu3 %vm501_vm1, %v1048_v39  ;;  %v1473_v22 = vand.u32 2147483647, %v2607_v44  ;;  %vm1469_vm10 = vweird.f32 %v2607_v44 }
  0xd6   : > { %v2171_v48 = vpop.eup %2170  ;;  %v1452_v49 = vmul.f32 %v2167_v37, %v1451_v45  ;;  %v2112_v51 = vmul.f32 -1.442695, %v2613_v46 }
  0xd7   : > { %v2622_v52 = vadd.f32 1.0, %v2171_v48  ;;  %v912_v53 = vpop.f32.mrf.mxu2  ;;  %vm1474_vm12 = vcmp.eq.f32.partialorder %v1473_v22, 8.507059e+37 }
  0xd8   : > { %v1453_v54 = vadd.f32 %v2167_v37, %v1452_v49  ;;  %2174 = vpow2.f32 %v2112_v51  ;;  %v980_v19 = vadd.f32 %v912_v53, %v724_v47  ;;  %v1133_v55 = vpop.f32.mrf.mxu3 }
  0xd9   : > { %v585_v56 = vpop.f32.mrf.mxu0  ;;  %2176 = vrcp.f32 %v2622_v52  ;;  %v1488_v34 = vand.u32 2147483647, %v2622_v52  ;;  %v1490_v38 = vand.u32 2147483648, %v2622_v52  ;;  %vm1484_vm14 = vweird.f32 %v2622_v52 }
  0xda   : > { %v725_v61 = vpop.f32.mrf.mxu1  ;;  %v1457_v63 = vsel %vm1456_vm7, %v2167_v37, %v1453_v54  ;;  %v1201_v0 = vadd.f32 %v1133_v55, %v980_v19 }
  0xdb   : > { %v2173_v4 = vpop.eup %2172  ;;  %v1462_v5 = vsel %vm1459_vm8, %v1461_v59, %v1457_v63  ;;  %v726_v24 = vadd.f32 %v725_v61, %v585_v56  ;;  %v1491_v48 = vor.u32 1.1754944e-38, %v1490_v38  ;;  %vm1489_vm0 = vcmp.eq.f32.partialorder %v1488_v34, 8.507059e+37 }
  0xdc   : > { %v1873_v9 = vmul.f32 %v1462_v5, %v2560_v27  ;;  %v1465_v10 = vmul.f32 %v2173_v4, %v2607_v44  ;;  %v2635_v11 = vadd.f32 %v2492_v58, %v1201_v0  ;;  %v1475_v27 = vand.u32 2147483648, %v2607_v44 }
  0xdd   : > { %vm1470_vm9 = vweird.f32 %v2173_v4 }
  0xde   : > { %v2175_v13 = vpop.eup %2174  ;;  %1906 = vst.msk [vmem:[%s2544_s17 + $0x20] sm:$0xff] %vm1901_vm6, %v1873_v9  ;;  %v1466_v14 = vsub.f32 1.0, %v1465_v10  ;;  %v2113_v15 = vmul.f32 -1.442695, %v2635_v11  ;;  %vm1471_vm11 = vmor %vm1469_vm10, %vm1470_vm9  ;;  %v1476_v37 = vor.u32 1.1754944e-38, %v1475_v27 }
  0xdf   : > { %v2177_v21 = vpop.eup %2176  ;;  %v2644_v23 = vadd.f32 1.0, %v2175_v13  ;;  %v914_v25 = vpop.f32.mrf.mxu2  ;;  %v1032_v13 = vld [vmem:[%s2382_s12 + $0xe0] sm:$0xff] }
  0xe0   : > { %v1467_v62 = vmul.f32 %v2173_v4, %v1466_v14  ;;  %v1480_v26 = vmul.f32 %v2177_v21, %v2622_v52  ;;  %2178 = vpow2.f32 %v2113_v15  ;;  %v1135_v28 = vpop.f32.mrf.mxu3  ;;  %v981_v36 = vadd.f32 %v914_v25, %v726_v24  ;;  %v1033_v14 = vld [vmem:[%s2382_s12 + $0xe8] sm:$0xff] }
  0xe1   : > { %v588_v29 = vpop.f32.mrf.mxu0  ;;  %2180 = vrcp.f32 %v2644_v23  ;;  %vm1485_vm13 = vweird.f32 %v2177_v21  ;;  %v1505_v63 = vand.u32 2147483648, %v2644_v23  ;;  %v1503_v5 = vand.u32 2147483647, %v2644_v23 }
  0xe2   : > { %v728_v30 = vpop.f32.mrf.mxu1  ;;  %v1468_v33 = vadd.f32 %v2173_v4, %v1467_v62  ;;  %v1481_v35 = vsub.f32 1.0, %v1480_v26  ;;  %2054 = vmatmul.msk.bf16.gmra.mxu0 %vm501_vm1, %v497_v12  ;;  %v1202_v41 = vadd.f32 %v1135_v28, %v981_v36  ;;  %vm1486_vm15 = vmor %vm1484_vm14, %vm1485_vm13  ;;  %vm1499_vm3 = vweird.f32 %v2644_v23 }
  0xe3   : > { %2070 = vmatmul.msk.bf16.gmra.mxu1 %vm501_vm1, %v448_v16  ;;  %v729_v50 = vadd.f32 %v728_v30, %v588_v29  ;;  %v498_v12 = vpack.c.bf16 %v481_v2, %v480_v1  ;;  %v1506_v16 = vor.u32 1.1754944e-38, %v1505_v63  ;;  %vm1504_vm5 = vcmp.eq.f32.partialorder %v1503_v5, 8.507059e+37  ;;  %v813_v1 = vld [vmem:[%s2376_s29 + $0xf0] sm:$0xff]  ;;  %v814_v2 = vld [vmem:[%s2376_s29 + $0xf8] sm:$0xff] }
  0xe4   : > { %v1472_v39 = vsel %vm1471_vm11, %v2173_v4, %v1468_v33  ;;  %v1482_v40 = vmul.f32 %v2177_v21, %v1481_v35  ;;  %2086 = vmatmul.msk.bf16.gmra.mxu2 %vm501_vm1, %v828_v17  ;;  %v2658_v47 = vadd.f32 %v2492_v58, %v1202_v41 }
  0xe5   : > { %v1477_v42 = vsel %vm1474_vm12, %v1476_v37, %v1472_v39  ;;  %2102 = vmatmul.msk.bf16.gmra.mxu3 %vm501_vm1, %v1049_v32  ;;  %v1050_v32 = vpack.c.bf16 %v1033_v14, %v1032_v13  ;;  %v830_v14 = vpack.c.bf16 %v814_v2, %v813_v1 }
  0xe6   : > { %v2179_v43 = vpop.eup %2178  ;;  %v1874_v44 = vmul.f32 %v1477_v42, %v2580_v57  ;;  %v1483_v45 = vadd.f32 %v2177_v21, %v1482_v40  ;;  %v2114_v52 = vmul.f32 -1.442695, %v2658_v47 }
  0xe7   : > { %v2181_v60 = vpop.eup %2180  ;;  %v2660_v49 = vadd.f32 1.0, %v2179_v43  ;;  %v917_v51 = vpop.f32.mrf.mxu2 }
  0xe8   : > { %1907 = vst.msk [vmem:[%s2544_s17 + $0x28] sm:$0xff] %vm1901_vm6, %v1874_v44  ;;  %v1487_v53 = vsel %vm1486_vm15, %v2177_v21, %v1483_v45  ;;  %v1495_v57 = vmul.f32 %v2181_v60, %v2644_v23  ;;  %v1138_v54 = vpop.f32.mrf.mxu3  ;;  %v982_v0 = vadd.f32 %v917_v51, %v729_v50  ;;  %vm1500_vm2 = vweird.f32 %v2181_v60 }
  0xe9   : > { %v590_v19 = vpop.f32.mrf.mxu0  ;;  %v1492_v55 = vsel %vm1489_vm0, %v1491_v48, %v1487_v53  ;;  %2182 = vrcp.f32 %v2660_v49  ;;  %vm1501_vm4 = vmor %vm1499_vm3, %vm1500_vm2  ;;  %v829_v21 = vpack.c.bf16 %v812_v8, %v811_v7  ;;  %v1518_v37 = vand.u32 2147483647, %v2660_v49  ;;  %v1034_v8 = vld [vmem:[%s2382_s12 + $0xf0] sm:$0xff] }
  0xea   : > { %v730_v56 = vpop.f32.mrf.mxu1  ;;  %v1875_v59 = vmul.f32 %v1492_v55, %v2596_v31  ;;  %v1496_v61 = vsub.f32 1.0, %v1495_v57  ;;  %2184 = vpow2.f32 %v2114_v52  ;;  %v1203_v31 = vadd.f32 %v1138_v54, %v982_v0  ;;  %v482_v55 = vld [vmem:[%s2361_s23 + $0xf0] sm:$0xff]  ;;  %v434_v0 = vld [vmem:[%s2367_s26 + $0xf8] sm:$0xff] }
  0xeb   : > { %v731_v10 = vadd.f32 %v730_v56, %v590_v19  ;;  %v1520_v34 = vand.u32 2147483648, %v2660_v49  ;;  %vm1514_vm8 = vweird.f32 %v2660_v49  ;;  %vm1519_vm10 = vcmp.eq.f32.partialorder %v1518_v37, 8.507059e+37  ;;  %v483_v56 = vld [vmem:[%s2361_s23 + $0xf8] sm:$0xff] }
  0xec   : > { %1908 = vst.msk [vmem:[%s2544_s17 + $0x30] sm:$0xff] %vm1901_vm6, %v1875_v59  ;;  %v1497_v4 = vmul.f32 %v2181_v60, %v1496_v61  ;;  %v2682_v17 = vadd.f32 %v2492_v58, %v1203_v31  ;;  %v433_v59 = vld [vmem:[%s2367_s26 + $0xf0] sm:$0xff]  ;;  %v1035_v31 = vld [vmem:[%s2382_s12 + $0xf8] sm:$0xff] }
  0xed   : > { %v1521_v42 = vor.u32 1.1754944e-38, %v1520_v34  ;;  %v450_v13 = vpack.c.bf16 %v434_v0, %v433_v59 }
  0xee   : > { %v1498_v9 = vadd.f32 %v2181_v60, %v1497_v4  ;;  %v2115_v29 = vmul.f32 -1.442695, %v2682_v17 }
  0xef   : > { %v2183_v15 = vpop.eup %2182  ;;  %v919_v18 = vpop.f32.mrf.mxu2 }
  0xf0   : > { %v2185_v22 = vpop.eup %2184  ;;  %v1502_v27 = vsel %vm1501_vm4, %v2181_v60, %v1498_v9  ;;  %v1510_v24 = vmul.f32 %v2183_v15, %v2660_v49  ;;  %v983_v25 = vadd.f32 %v919_v18, %v731_v10  ;;  %v1140_v23 = vpop.f32.mrf.mxu3  ;;  %vm1515_vm7 = vweird.f32 %v2183_v15 }
  0xf1   : > { %v593_v62 = vpop.f32.mrf.mxu0  ;;  %v1507_v26 = vsel %vm1504_vm5, %v1506_v16, %v1502_v27  ;;  %v2685_v28 = vadd.f32 1.0, %v2185_v22  ;;  %vm1516_vm9 = vmor %vm1514_vm8, %vm1515_vm7  ;;  %v1051_v27 = vpack.c.bf16 %v1035_v31, %v1034_v8 }
  0xf2   : > { %v733_v30 = vpop.f32.mrf.mxu1  ;;  %v1876_v33 = vmul.f32 %v1507_v26, %v2613_v46  ;;  %v1511_v35 = vsub.f32 1.0, %v1510_v24  ;;  %v1204_v36 = vadd.f32 %v1140_v23, %v983_v25  ;;  %2055 = vmatmul.msk.bf16.gmra.mxu0 %vm501_vm1, %v498_v12  ;;  %v499_v12 = vpack.c.bf16 %v483_v56, %v482_v55 }
  0xf3   : > { %2186 = vrcp.f32 %v2685_v28  ;;  %v734_v38 = vadd.f32 %v733_v30, %v593_v62  ;;  %2071 = vmatmul.msk.bf16.gmra.mxu1 %vm501_vm1, %v449_v20  ;;  %v1535_v3 = vand.u32 2147483648, %v2685_v28  ;;  %vm1529_vm12 = vweird.f32 %v2685_v28 }
  0xf4   : > { %1909 = vst.msk [vmem:[%s2544_s17 + $0x38] sm:$0xff] %vm1901_vm6, %v1876_v33  ;;  %v1512_v39 = vmul.f32 %v2183_v15, %v1511_v35  ;;  %2188 = vpow2.f32 %v2115_v29  ;;  %v2696_v40 = vadd.f32 %v2492_v58, %v1204_v36  ;;  %2087 = vmatmul.msk.bf16.gmra.mxu2 %vm501_vm1, %v829_v21 }
  0xf5   : > { %2103 = vmatmul.msk.bf16.gmra.mxu3 %vm501_vm1, %v1050_v32  ;;  %v1536_v21 = vor.u32 1.1754944e-38, %v1535_v3 }
  0xf6   : > { %v1513_v46 = vadd.f32 %v2183_v15, %v1512_v39  ;;  %v2116_v41 = vmul.f32 -1.442695, %v2696_v40 }
  0xf7   : > { %v922_v43 = vpop.f32.mrf.mxu2 }
  0xf8   : > { %v1517_v44 = vsel %vm1516_vm9, %v2183_v15, %v1513_v46  ;;  %2190 = vpow2.f32 %v2116_v41  ;;  %v984_v45 = vadd.f32 %v922_v43, %v734_v38  ;;  %v1143_v60 = vpop.f32.mrf.mxu3 }
  0xf9   : > { %v595_v48 = vpop.f32.mrf.mxu0  ;;  %v2187_v50 = vpop.eup %2186  ;;  %v1522_v49 = vsel %vm1519_vm10, %v1521_v42, %v1517_v44 }
  0xfa   : > { %v735_v51 = vpop.f32.mrf.mxu1  ;;  %v2189_v53 = vpop.eup %2188  ;;  %v1877_v57 = vmul.f32 %v1522_v49, %v2635_v11  ;;  %v1525_v52 = vmul.f32 %v2187_v50, %v2685_v28  ;;  %v1205_v54 = vadd.f32 %v1143_v60, %v984_v45  ;;  %v1533_v11 = vand.u32 2147483647, %v2685_v28 }
  0xfb   : > { %v2705_v19 = vadd.f32 1.0, %v2189_v53  ;;  %vm1530_vm11 = vweird.f32 %v2187_v50  ;;  %v736_v7 = vadd.f32 %v735_v51, %v595_v48 }
  0xfc   : > { %1910 = vst.msk [vmem:[%s2544_s17 + $0x40] sm:$0xff] %vm1901_vm6, %v1877_v57  ;;  %v1526_v61 = vsub.f32 1.0, %v1525_v52  ;;  %v2713_v63 = vadd.f32 %v2492_v58, %v1205_v54  ;;  %vm1531_vm13 = vmor %vm1529_vm12, %vm1530_vm11  ;;  %vm1534_vm14 = vcmp.eq.f32.partialorder %v1533_v11, 8.507059e+37 }
  0xfd   : > { %2192 = vrcp.f32 %v2705_v19  ;;  %v1550_v37 = vand.u32 2147483648, %v2705_v19 }
  0xfe   : > { %v2191_v4 = vpop.eup %2190  ;;  %v1527_v5 = vmul.f32 %v2187_v50, %v1526_v61  ;;  %v2117_v6 = vmul.f32 -1.442695, %v2713_v63 }
  0xff   : > { %v2724_v9 = vadd.f32 1.0, %v2191_v4  ;;  %v924_v10 = vpop.f32.mrf.mxu2  ;;  %v1551_v48 = vor.u32 1.1754944e-38, %v1550_v37 }
 0x100   : > { %v1528_v15 = vadd.f32 %v2187_v50, %v1527_v5  ;;  %2194 = vpow2.f32 %v2117_v6  ;;  %v985_v16 = vadd.f32 %v924_v10, %v736_v7  ;;  %v1145_v18 = vpop.f32.mrf.mxu3 }
 0x101   : > { %v598_v20 = vpop.f32.mrf.mxu0  ;;  %2196 = vrcp.f32 %v2724_v9  ;;  %v1565_v49 = vand.u32 2147483648, %v2724_v9  ;;  %vm1559_vm4 = vweird.f32 %v2724_v9 }
 0x102   : > { %v738_v22 = vpop.f32.mrf.mxu1  ;;  %v1532_v24 = vsel %vm1531_vm13, %v2187_v50, %v1528_v15  ;;  %v1206_v25 = vadd.f32 %v1145_v18, %v985_v16  ;;  %2056 = vmatmul.msk.bf16.gmra.mxu0 %vm501_vm1, %v499_v12  ;;  %v1563_v50 = vand.u32 2147483647, %v2724_v9 }
 0x103   : > { %v2193_v23 = vpop.eup %2192  ;;  %v1537_v62 = vsel %vm1534_vm14, %v1536_v21, %v1532_v24  ;;  %2072 = vmatmul.msk.bf16.gmra.mxu1 %vm501_vm1, %v450_v13  ;;  %v739_v35 = vadd.f32 %v738_v22, %v598_v20  ;;  %v1566_v61 = vor.u32 1.1754944e-38, %v1565_v49 }
 0x104   : > { %v1878_v26 = vmul.f32 %v1537_v62, %v2658_v47  ;;  %v1540_v28 = vmul.f32 %v2193_v23, %v2705_v19  ;;  %v2733_v29 = vadd.f32 %v2492_v58, %v1206_v25  ;;  %2088 = vmatmul.msk.bf16.gmra.mxu2 %vm501_vm1, %v830_v14  ;;  %v1548_v47 = vand.u32 2147483647, %v2705_v19 }
 0x105   : > { %2104 = vmatmul.msk.bf16.gmra.mxu3 %vm501_vm1, %v1051_v27  ;;  %vm1545_vm15 = vweird.f32 %v2193_v23  ;;  %vm1544_vm1 = vweird.f32 %v2705_v19  ;;  %vm1564_vm7 = vcmp.eq.f32.partialorder %v1563_v50, 8.507059e+37 }
 0x106   : > { %v2195_v30 = vpop.eup %2194  ;;  %1911 = vst.msk [vmem:[%s2544_s17 + $0x48] sm:$0xff] %vm1901_vm6, %v1878_v26  ;;  %v1541_v32 = vsub.f32 1.0, %v1540_v28  ;;  %v2118_v33 = vmul.f32 -1.442695, %v2733_v29  ;;  %vm1546_vm0 = vmor %vm1544_vm1, %vm1545_vm15  ;;  %vm1549_vm2 = vcmp.eq.f32.partialorder %v1548_v47, 8.507059e+37 }
 0x107   : > { %v2197_v36 = vpop.eup %2196  ;;  %v2743_v34 = vadd.f32 1.0, %v2195_v30  ;;  %v927_v38 = vpop.f32.mrf.mxu2 }
 0x108   : > { %v1542_v39 = vmul.f32 %v2193_v23, %v1541_v32  ;;  %v1555_v46 = vmul.f32 %v2197_v36, %v2724_v9  ;;  %2198 = vpow2.f32 %v2118_v33  ;;  %v1148_v41 = vpop.f32.mrf.mxu3  ;;  %v986_v60 = vadd.f32 %v927_v38, %v739_v35 }
 0x109   : > { %v600_v42 = vpop.f32.mrf.mxu0  ;;  %2200 = vrcp.f32 %v2743_v34  ;;  %vm1560_vm3 = vweird.f32 %v2197_v36  ;;  %v1580_v31 = vand.u32 2147483648, %v2743_v34  ;;  %v1578_v12 = vand.u32 2147483647, %v2743_v34 }
 0x10a   : > { %v740_v43 = vpop.f32.mrf.mxu1  ;;  %v1543_v44 = vadd.f32 %v2193_v23, %v1542_v39  ;;  %v1556_v45 = vsub.f32 1.0, %v1555_v46  ;;  %v1207_v57 = vadd.f32 %v1148_v41, %v986_v60  ;;  %vm1561_vm5 = vmor %vm1559_vm4, %vm1560_vm3  ;;  %vm1574_vm9 = vweird.f32 %v2743_v34 }
 0x10b   : > { %v1581_v18 = vor.u32 1.1754944e-38, %v1580_v31  ;;  %vm1579_vm11 = vcmp.eq.f32.partialorder %v1578_v12, 8.507059e+37 }
 0x10c   : > { %v1547_v51 = vsel %vm1546_vm0, %v2193_v23, %v1543_v44  ;;  %v1557_v53 = vmul.f32 %v2197_v36, %v1556_v45  ;;  %v2753_v19 = vadd.f32 %v2492_v58, %v1207_v57  ;;  %v741_v58 = vadd.f32 %v740_v43, %v600_v42 }
 0x10d   : > { %v1552_v52 = vsel %vm1549_vm2, %v1551_v48, %v1547_v51 }
 0x10e   : > { %v2199_v54 = vpop.eup %2198  ;;  %v1879_v55 = vmul.f32 %v1552_v52, %v2682_v17  ;;  %v1558_v56 = vadd.f32 %v2197_v36, %v1557_v53  ;;  %v2119_v17 = vmul.f32 -1.442695, %v2753_v19 }
 0x10f   : > { %v2201_v59 = vpop.eup %2200  ;;  %v2755_v0 = vadd.f32 1.0, %v2199_v54  ;;  %v929_v1 = vpop.f32.mrf.mxu2 }
 0x110   : > { %1912 = vst.msk [vmem:[%s2544_s17 + $0x50] sm:$0xff] %vm1901_vm6, %v1879_v55  ;;  %v1562_v2 = vsel %vm1561_vm5, %v2197_v36, %v1558_v56  ;;  %v1570_v11 = vmul.f32 %v2201_v59, %v2743_v34  ;;  %v1150_v3 = vpop.f32.mrf.mxu3  ;;  %v987_v9 = vadd.f32 %v929_v1, %v741_v58  ;;  %vm1575_vm8 = vweird.f32 %v2201_v59 }
 0x111   : > { %v603_v4 = vpop.f32.mrf.mxu0  ;;  %v1567_v5 = vsel %vm1564_vm7, %v1566_v61, %v1562_v2  ;;  %2202 = vrcp.f32 %v2755_v0  ;;  %vm1576_vm10 = vmor %vm1574_vm9, %vm1575_vm8  ;;  %v1593_v47 = vand.u32 2147483647, %v2755_v0  ;;  %v1595_v37 = vand.u32 2147483648, %v2755_v0 }
 0x112   : > { %v743_v6 = vpop.f32.mrf.mxu1  ;;  %v1880_v7 = vmul.f32 %v1567_v5, %v2696_v40  ;;  %v1571_v8 = vsub.f32 1.0, %v1570_v11  ;;  %2204 = vpow2.f32 %v2119_v17  ;;  %v1208_v14 = vadd.f32 %v1150_v3, %v987_v9  ;;  %v2771_v40 = vld [vmem:[%s2958_s8] ss:$0 sm:$0xff] }
 0x113   : > { %v744_v13 = vadd.f32 %v743_v6, %v603_v4  ;;  %vm1589_vm13 = vweird.f32 %v2755_v0  ;;  %v1596_v41 = vor.u32 1.1754944e-38, %v1595_v37  ;;  %vm1594_vm15 = vcmp.eq.f32.partialorder %v1593_v47, 8.507059e+37 }
 0x114   : > { %1913 = vst.msk [vmem:[%s2544_s17 + $0x58] sm:$0xff] %vm1901_vm6, %v1880_v7  ;;  %v1572_v10 = vmul.f32 %v2201_v59, %v1571_v8  ;;  %v2774_v20 = vadd.f32 %v2771_v40, %v1208_v14 }
 0x116   : > { %v1573_v15 = vadd.f32 %v2201_v59, %v1572_v10  ;;  %v2120_v30 = vmul.f32 -1.442695, %v2774_v20 }
 0x117   : > { %v2203_v16 = vpop.eup %2202  ;;  %v932_v21 = vpop.f32.mrf.mxu2 }
 0x118   : > { %v2205_v22 = vpop.eup %2204  ;;  %v1577_v27 = vsel %vm1576_vm10, %v2201_v59, %v1573_v15  ;;  %v1585_v24 = vmul.f32 %v2203_v16, %v2755_v0  ;;  %v988_v25 = vadd.f32 %v932_v21, %v744_v13  ;;  %v1153_v23 = vpop.f32.mrf.mxu3  ;;  %vm1590_vm12 = vweird.f32 %v2203_v16 }
 0x119   : > { %v605_v62 = vpop.f32.mrf.mxu0  ;;  %v1582_v26 = vsel %vm1579_vm11, %v1581_v18, %v1577_v27  ;;  %v1371_v28 = vadd.f32 1.0, %v2205_v22  ;;  %vm1591_vm14 = vmor %vm1589_vm13, %vm1590_vm12 }
 0x11a   : > { %v745_v32 = vpop.f32.mrf.mxu1  ;;  %v1881_v33 = vmul.f32 %v1582_v26, %v2713_v63  ;;  %v1586_v35 = vsub.f32 1.0, %v1585_v24  ;;  %v1209_v36 = vadd.f32 %v1153_v23, %v988_v25 }
 0x11b   : > { %2206 = vrcp.f32 %v1371_v28  ;;  %v746_v46 = vadd.f32 %v745_v32, %v605_v62  ;;  %v1610_v61 = vand.u32 2147483648, %v1371_v28  ;;  %v1608_v2 = vand.u32 2147483647, %v1371_v28 }
 0x11c   : > { %1914 = vst.msk [vmem:[%s2544_s17 + $0x60] sm:$0xff] %vm1901_vm6, %v1881_v33  ;;  %v1587_v34 = vmul.f32 %v2203_v16, %v1586_v35  ;;  %2208 = vpow2.f32 %v2120_v30  ;;  %v2784_v38 = vadd.f32 %v2771_v40, %v1209_v36  ;;  %vm1604_vm0 = vweird.f32 %v1371_v28 }
 0x11d   : > { %v1611_v6 = vor.u32 1.1754944e-38, %v1610_v61  ;;  %vm1609_vm3 = vcmp.eq.f32.partialorder %v1608_v2, 8.507059e+37 }
 0x11e   : > { %v1588_v39 = vadd.f32 %v2203_v16, %v1587_v34  ;;  %v2121_v63 = vmul.f32 -1.442695, %v2784_v38 }
 0x11f   : > { %v934_v42 = vpop.f32.mrf.mxu2 }
 0x120   : > { %v1592_v43 = vsel %vm1591_vm14, %v2203_v16, %v1588_v39  ;;  %2210 = vpow2.f32 %v2121_v63  ;;  %v989_v44 = vadd.f32 %v934_v42, %v746_v46  ;;  %v1155_v45 = vpop.f32.mrf.mxu3 }
 0x121   : > { %v608_v60 = vpop.f32.mrf.mxu0  ;;  %v2207_v48 = vpop.eup %2206  ;;  %v1597_v50 = vsel %vm1594_vm15, %v1596_v41, %v1592_v43 }
 0x122   : > { %v748_v49 = vpop.f32.mrf.mxu1  ;;  %v2209_v51 = vpop.eup %2208  ;;  %v1882_v53 = vmul.f32 %v1597_v50, %v2733_v29  ;;  %v1600_v57 = vmul.f32 %v2207_v48, %v1371_v28  ;;  %v1210_v52 = vadd.f32 %v1155_v45, %v989_v44  ;;  %vm1605_vm1 = vweird.f32 %v2207_v48 }
 0x123   : > { %v1372_v54 = vadd.f32 1.0, %v2209_v51  ;;  %v749_v59 = vadd.f32 %v748_v49, %v608_v60  ;;  %vm1606_vm2 = vmor %vm1604_vm0, %vm1605_vm1 }
 0x124   : > { %1915 = vst.msk [vmem:[%s2544_s17 + $0x68] sm:$0xff] %vm1901_vm6, %v1882_v53  ;;  %v1601_v55 = vsub.f32 1.0, %v1600_v57  ;;  %v2792_v56 = vadd.f32 %v2771_v40, %v1210_v52 }
 0x125   : > { %2212 = vrcp.f32 %v1372_v54  ;;  %v1623_v22 = vand.u32 2147483647, %v1372_v54  ;;  %v1625_v27 = vand.u32 2147483648, %v1372_v54  ;;  %vm1619_vm5 = vweird.f32 %v1372_v54 }
 0x126   : > { %v2211_v0 = vpop.eup %2210  ;;  %v1602_v1 = vmul.f32 %v2207_v48, %v1601_v55  ;;  %v2122_v11 = vmul.f32 -1.442695, %v2792_v56 }
 0x127   : > { %v2795_v17 = vadd.f32 1.0, %v2211_v0  ;;  %v937_v29 = vpop.f32.mrf.mxu2  ;;  %vm1624_vm8 = vcmp.eq.f32.partialorder %v1623_v22, 8.507059e+37  ;;  %v1626_v36 = vor.u32 1.1754944e-38, %v1625_v27 }
 0x128   : > { %v1603_v3 = vadd.f32 %v2207_v48, %v1602_v1  ;;  %2214 = vpow2.f32 %v2122_v11  ;;  %v990_v4 = vadd.f32 %v937_v29, %v749_v59  ;;  %v1158_v5 = vpop.f32.mrf.mxu3 }
 0x129   : > { %v610_v58 = vpop.f32.mrf.mxu0  ;;  %2216 = vrcp.f32 %v2795_v17  ;;  %v1638_v47 = vand.u32 2147483647, %v2795_v17  ;;  %v1640_v37 = vand.u32 2147483648, %v2795_v17  ;;  %vm1634_vm10 = vweird.f32 %v2795_v17 }
 0x12a   : > { %v750_v7 = vpop.f32.mrf.mxu1  ;;  %v1607_v8 = vsel %vm1606_vm2, %v2207_v48, %v1603_v3  ;;  %v1211_v31 = vadd.f32 %v1158_v5, %v990_v4 }
 0x12b   : > { %v2213_v9 = vpop.eup %2212  ;;  %v1612_v10 = vsel %vm1609_vm3, %v1611_v6, %v1607_v8  ;;  %v751_v25 = vadd.f32 %v750_v7, %v610_v58  ;;  %v1641_v60 = vor.u32 1.1754944e-38, %v1640_v37  ;;  %vm1639_vm12 = vcmp.eq.f32.partialorder %v1638_v47, 8.507059e+37 }
 0x12c   : > { %v1883_v12 = vmul.f32 %v1612_v10, %v2753_v19  ;;  %v1615_v13 = vmul.f32 %v2213_v9, %v1372_v54  ;;  %v2800_v14 = vadd.f32 %v2771_v40, %v1211_v31  ;;  %vm1620_vm4 = vweird.f32 %v2213_v9 }
 0x12d   : > { %vm1621_vm7 = vmor %vm1619_vm5, %vm1620_vm4 }
 0x12e   : > { %v2215_v15 = vpop.eup %2214  ;;  %1916 = vst.msk [vmem:[%s2544_s17 + $0x70] sm:$0xff] %vm1901_vm6, %v1883_v12  ;;  %v1616_v16 = vsub.f32 1.0, %v1615_v13  ;;  %v2123_v18 = vmul.f32 -1.442695, %v2800_v14 }
 0x12f   : > { %v2217_v21 = vpop.eup %2216  ;;  %v2805_v24 = vadd.f32 1.0, %v2215_v15  ;;  %v939_v23 = vpop.f32.mrf.mxu2 }
 0x130   : > { %v1617_v62 = vmul.f32 %v2213_v9, %v1616_v16  ;;  %v1630_v19 = vmul.f32 %v2217_v21, %v2795_v17  ;;  %2218 = vpow2.f32 %v2123_v18  ;;  %v1160_v26 = vpop.f32.mrf.mxu3  ;;  %v991_v35 = vadd.f32 %v939_v23, %v751_v25 }
 0x131   : > { %v613_v28 = vpop.f32.mrf.mxu0  ;;  %2220 = vrcp.f32 %v2805_v24  ;;  %vm1635_vm9 = vweird.f32 %v2217_v21  ;;  %v1655_v0 = vand.u32 2147483648, %v2805_v24  ;;  %v1653_v11 = vand.u32 2147483647, %v2805_v24 }
 0x132   : > { %v753_v30 = vpop.f32.mrf.mxu1  ;;  %v1618_v32 = vadd.f32 %v2213_v9, %v1617_v62  ;;  %v1631_v33 = vsub.f32 1.0, %v1630_v19  ;;  %v1212_v63 = vadd.f32 %v1160_v26, %v991_v35  ;;  %vm1636_vm11 = vmor %vm1634_vm10, %vm1635_vm9  ;;  %vm1649_vm14 = vweird.f32 %v2805_v24 }
 0x133   : > { %v754_v50 = vadd.f32 %v753_v30, %v613_v28  ;;  %v1656_v5 = vor.u32 1.1754944e-38, %v1655_v0  ;;  %vm1654_vm1 = vcmp.eq.f32.partialorder %v1653_v11, 8.507059e+37 }
 0x134   : > { %v1622_v34 = vsel %vm1621_vm7, %v2213_v9, %v1618_v32  ;;  %v1632_v39 = vmul.f32 %v2217_v21, %v1631_v33  ;;  %v2814_v44 = vadd.f32 %v2771_v40, %v1212_v63 }
 0x135   : > { %v1627_v46 = vsel %vm1624_vm8, %v1626_v36, %v1622_v34 }
 0x136   : > { %v2219_v41 = vpop.eup %2218  ;;  %v1884_v42 = vmul.f32 %v1627_v46, %v2774_v20  ;;  %v1633_v43 = vadd.f32 %v2217_v21, %v1632_v39  ;;  %v2124_v20 = vmul.f32 -1.442695, %v2814_v44 }
 0x137   : > { %v2221_v45 = vpop.eup %2220  ;;  %v1375_v48 = vadd.f32 1.0, %v2219_v41  ;;  %v942_v49 = vpop.f32.mrf.mxu2 }
 0x138   : > { %1917 = vst.msk [vmem:[%s2544_s17 + $0x78] sm:$0xff] %vm1901_vm6, %v1884_v42  ;;  %v1637_v51 = vsel %vm1636_vm11, %v2217_v21, %v1633_v43  ;;  %v1645_v53 = vmul.f32 %v2221_v45, %v2805_v24  ;;  %v1163_v57 = vpop.f32.mrf.mxu3  ;;  %v992_v1 = vadd.f32 %v942_v49, %v754_v50  ;;  %vm1650_vm13 = vweird.f32 %v2221_v45 }
 0x139   : > { %v615_v52 = vpop.f32.mrf.mxu0  ;;  %v1642_v54 = vsel %vm1639_vm12, %v1641_v60, %v1637_v51  ;;  %2222 = vrcp.f32 %v1375_v48  ;;  %vm1651_vm15 = vmor %vm1649_vm14, %vm1650_vm13  ;;  %v1668_v27 = vand.u32 2147483647, %v1375_v48  ;;  %v1670_v24 = vand.u32 2147483648, %v1375_v48 }
 0x13a   : > { %v755_v55 = vpop.f32.mrf.mxu1  ;;  %v1885_v59 = vmul.f32 %v1642_v54, %v2784_v38  ;;  %v1646_v61 = vsub.f32 1.0, %v1645_v53  ;;  %2224 = vpow2.f32 %v2124_v20  ;;  %v1213_v17 = vadd.f32 %v1163_v57, %v992_v1 }
 0x13b   : > { %v756_v3 = vadd.f32 %v755_v55, %v615_v52  ;;  %vm1664_vm2 = vweird.f32 %v1375_v48  ;;  %vm1669_vm4 = vcmp.eq.f32.partialorder %v1668_v27, 8.507059e+37 }
 0x13c   : > { %1918 = vst.msk [vmem:[%s2544_s17 + $0x80] sm:$0xff] %vm1901_vm6, %v1885_v59  ;;  %v1647_v2 = vmul.f32 %v2221_v45, %v1646_v61  ;;  %v2827_v38 = vadd.f32 %v2771_v40, %v1213_v17 }
 0x13e   : > { %v1648_v29 = vadd.f32 %v2221_v45, %v1647_v2  ;;  %v2125_v15 = vmul.f32 -1.442695, %v2827_v38 }
 0x13f   : > { %v2223_v4 = vpop.eup %2222  ;;  %v944_v58 = vpop.f32.mrf.mxu2 }
 0x140   : > { %v2225_v6 = vpop.eup %2224  ;;  %v1652_v7 = vsel %vm1651_vm15, %v2221_v45, %v1648_v29  ;;  %v1660_v8 = vmul.f32 %v2223_v4, %v1375_v48  ;;  %v993_v31 = vadd.f32 %v944_v58, %v756_v3  ;;  %v1165_v9 = vpop.f32.mrf.mxu3  ;;  %vm1665_vm0 = vweird.f32 %v2223_v4 }
 0x141   : > { %v618_v10 = vpop.f32.mrf.mxu0  ;;  %v1657_v12 = vsel %vm1654_vm1, %v1656_v5, %v1652_v7  ;;  %v1376_v13 = vadd.f32 1.0, %v2225_v6  ;;  %vm1666_vm3 = vmor %vm1664_vm2, %vm1665_vm0 }
 0x142   : > { %v758_v16 = vpop.f32.mrf.mxu1  ;;  %v1886_v18 = vmul.f32 %v1657_v12, %v2792_v56  ;;  %v1661_v21 = vsub.f32 1.0, %v1660_v8  ;;  %v1214_v22 = vadd.f32 %v1165_v9, %v993_v31  ;;  %v1671_v56 = vor.u32 1.1754944e-38, %v1670_v24 }
 0x143   : > { %2226 = vrcp.f32 %v1376_v13  ;;  %v759_v62 = vadd.f32 %v758_v16, %v618_v10  ;;  %v1683_v45 = vand.u32 2147483647, %v1376_v13  ;;  %v1685_v60 = vand.u32 2147483648, %v1376_v13 }
 0x144   : > { %1919 = vst.msk [vmem:[%s2544_s17 + $0x88] sm:$0xff] %vm1901_vm6, %v1886_v18  ;;  %v1662_v25 = vmul.f32 %v2223_v4, %v1661_v21  ;;  %2228 = vpow2.f32 %v2125_v15  ;;  %v2834_v23 = vadd.f32 %v2771_v40, %v1214_v22  ;;  %vm1679_vm7 = vweird.f32 %v1376_v13 }
 0x145   : > { %v1686_v55 = vor.u32 1.1754944e-38, %v1685_v60  ;;  %vm1684_vm9 = vcmp.eq.f32.partialorder %v1683_v45, 8.507059e+37 }
 0x146   : > { %v1663_v19 = vadd.f32 %v2223_v4, %v1662_v25  ;;  %v2126_v26 = vmul.f32 -1.442695, %v2834_v23 }
 0x147   : > { %v947_v28 = vpop.f32.mrf.mxu2 }
 0x148   : > { %v1667_v30 = vsel %vm1666_vm3, %v2223_v4, %v1663_v19  ;;  %2230 = vpow2.f32 %v2126_v26  ;;  %v994_v32 = vadd.f32 %v947_v28, %v759_v62  ;;  %v1168_v33 = vpop.f32.mrf.mxu3 }
 0x149   : > { %v620_v35 = vpop.f32.mrf.mxu0  ;;  %v2227_v36 = vpop.eup %2226  ;;  %v1672_v47 = vsel %vm1669_vm4, %v1671_v56, %v1667_v30 }
 0x14a   : > { %v760_v37 = vpop.f32.mrf.mxu1  ;;  %v2229_v34 = vpop.eup %2228  ;;  %v1887_v39 = vmul.f32 %v1672_v47, %v2800_v14  ;;  %v1675_v63 = vmul.f32 %v2227_v36, %v1376_v13  ;;  %v1215_v46 = vadd.f32 %v1168_v33, %v994_v32  ;;  %vm1680_vm5 = vweird.f32 %v2227_v36 }
 0x14b   : > { %v1377_v41 = vadd.f32 1.0, %v2229_v34  ;;  %v761_v51 = vadd.f32 %v760_v37, %v620_v35  ;;  %vm1681_vm8 = vmor %vm1679_vm7, %vm1680_vm5 }
 0x14c   : > { %1920 = vst.msk [vmem:[%s2544_s17 + $0x90] sm:$0xff] %vm1901_vm6, %v1887_v39  ;;  %v1676_v42 = vsub.f32 1.0, %v1675_v63  ;;  %v2841_v43 = vadd.f32 %v2771_v40, %v1215_v46 }
 0x14d   : > { %2232 = vrcp.f32 %v1377_v41  ;;  %v1698_v7 = vand.u32 2147483647, %v1377_v41  ;;  %v1700_v8 = vand.u32 2147483648, %v1377_v41  ;;  %vm1694_vm11 = vweird.f32 %v1377_v41 }
 0x14e   : > { %v2231_v48 = vpop.eup %2230  ;;  %v1677_v50 = vmul.f32 %v2227_v36, %v1676_v42  ;;  %v2127_v49 = vmul.f32 -1.442695, %v2841_v43 }
 0x14f   : > { %v2844_v53 = vadd.f32 1.0, %v2231_v48  ;;  %v949_v14 = vpop.f32.mrf.mxu2  ;;  %vm1699_vm13 = vcmp.eq.f32.partialorder %v1698_v7, 8.507059e+37  ;;  %v1701_v22 = vor.u32 1.1754944e-38, %v1700_v8 }
 0x150   : > { %v1678_v20 = vadd.f32 %v2227_v36, %v1677_v50  ;;  %2234 = vpow2.f32 %v2127_v49  ;;  %v995_v57 = vadd.f32 %v949_v14, %v761_v51  ;;  %v1170_v52 = vpop.f32.mrf.mxu3 }
 0x151   : > { %v623_v54 = vpop.f32.mrf.mxu0  ;;  %2236 = vrcp.f32 %v2844_v53  ;;  %v1713_v27 = vand.u32 2147483647, %v2844_v53  ;;  %v1715_v24 = vand.u32 2147483648, %v2844_v53  ;;  %vm1709_vm15 = vweird.f32 %v2844_v53 }
 0x152   : > { %v763_v59 = vpop.f32.mrf.mxu1  ;;  %v1682_v61 = vsel %vm1681_vm8, %v2227_v36, %v1678_v20  ;;  %v1216_v0 = vadd.f32 %v1170_v52, %v995_v57 }
 0x153   : > { %v2233_v1 = vpop.eup %2232  ;;  %v1687_v2 = vsel %vm1684_vm9, %v1686_v55, %v1682_v61  ;;  %v764_v58 = vadd.f32 %v763_v59, %v623_v54  ;;  %v1716_v35 = vor.u32 1.1754944e-38, %v1715_v24  ;;  %vm1714_vm0 = vcmp.eq.f32.partialorder %v1713_v27, 8.507059e+37 }
 0x154   : > { %v1888_v11 = vmul.f32 %v1687_v2, %v2814_v44  ;;  %v1690_v17 = vmul.f32 %v2233_v1, %v1377_v41  ;;  %v2849_v29 = vadd.f32 %v2771_v40, %v1216_v0  ;;  %vm1695_vm10 = vweird.f32 %v2233_v1 }
 0x155   : > { %vm1696_vm12 = vmor %vm1694_vm11, %vm1695_vm10 }
 0x156   : > { %v2235_v3 = vpop.eup %2234  ;;  %1921 = vst.msk [vmem:[%s2544_s17 + $0x98] sm:$0xff] %vm1901_vm6, %v1888_v11  ;;  %v1691_v4 = vsub.f32 1.0, %v1690_v17  ;;  %v2128_v5 = vmul.f32 -1.442695, %v2849_v29 }
 0x157   : > { %v2237_v6 = vpop.eup %2236  ;;  %v2854_v31 = vadd.f32 1.0, %v2235_v3  ;;  %v952_v9 = vpop.f32.mrf.mxu2 }
 0x158   : > { %v1692_v10 = vmul.f32 %v2233_v1, %v1691_v4  ;;  %v1705_v44 = vmul.f32 %v2237_v6, %v2844_v53  ;;  %2238 = vpow2.f32 %v2128_v5  ;;  %v1173_v12 = vpop.f32.mrf.mxu3  ;;  %v996_v21 = vadd.f32 %v952_v9, %v764_v58 }
 0x159   : > { %v625_v13 = vpop.f32.mrf.mxu0  ;;  %2240 = vrcp.f32 %v2854_v31  ;;  %vm1710_vm14 = vweird.f32 %v2237_v6  ;;  %v1730_v48 = vand.u32 2147483648, %v2854_v31  ;;  %v1728_v51 = vand.u32 2147483647, %v2854_v31 }
 0x15a   : > { %v765_v15 = vpop.f32.mrf.mxu1  ;;  %v1693_v16 = vadd.f32 %v2233_v1, %v1692_v10  ;;  %v1706_v18 = vsub.f32 1.0, %v1705_v44  ;;  %v1217_v19 = vadd.f32 %v1173_v12, %v996_v21  ;;  %vm1711_vm1 = vmor %vm1709_vm15, %vm1710_vm14  ;;  %vm1724_vm3 = vweird.f32 %v2854_v31 }
 0x15b   : > { %v766_v41 = vadd.f32 %v765_v15, %v625_v13  ;;  %v1731_v52 = vor.u32 1.1754944e-38, %v1730_v48  ;;  %vm1729_vm5 = vcmp.eq.f32.partialorder %v1728_v51, 8.507059e+37 }
 0x15c   : > { %v1697_v25 = vsel %vm1696_vm12, %v2233_v1, %v1693_v16  ;;  %v1707_v62 = vmul.f32 %v2237_v6, %v1706_v18  ;;  %v2863_v32 = vadd.f32 %v2771_v40, %v1217_v19 }
 0x15d   : > { %v1702_v26 = vsel %vm1699_vm13, %v1701_v22, %v1697_v25 }
 0x15e   : > { %v2239_v56 = vpop.eup %2238  ;;  %v1889_v28 = vmul.f32 %v1702_v26, %v2827_v38  ;;  %v1708_v30 = vadd.f32 %v2237_v6, %v1707_v62  ;;  %v2129_v38 = vmul.f32 -1.442695, %v2863_v32 }
 0x15f   : > { %v2241_v33 = vpop.eup %2240  ;;  %v1380_v36 = vadd.f32 1.0, %v2239_v56  ;;  %v954_v47 = vpop.f32.mrf.mxu2 }
 0x160   : > { %1922 = vst.msk [vmem:[%s2544_s17 + $0xa0] sm:$0xff] %vm1901_vm6, %v1889_v28  ;;  %v1712_v37 = vsel %vm1711_vm1, %v2237_v6, %v1708_v30  ;;  %v1720_v34 = vmul.f32 %v2241_v33, %v2854_v31  ;;  %v1175_v39 = vpop.f32.mrf.mxu3  ;;  %v997_v50 = vadd.f32 %v954_v47, %v766_v41  ;;  %vm1725_vm2 = vweird.f32 %v2241_v33 }
 0x161   : > { %v628_v63 = vpop.f32.mrf.mxu0  ;;  %v1717_v46 = vsel %vm1714_vm0, %v1716_v35, %v1712_v37  ;;  %2242 = vrcp.f32 %v1380_v36  ;;  %vm1726_vm4 = vmor %vm1724_vm3, %vm1725_vm2  ;;  %v1743_v7 = vand.u32 2147483647, %v1380_v36  ;;  %v1745_v8 = vand.u32 2147483648, %v1380_v36 }
 0x162   : > { %v768_v42 = vpop.f32.mrf.mxu1  ;;  %v1890_v45 = vmul.f32 %v1717_v46, %v2834_v23  ;;  %v1721_v60 = vsub.f32 1.0, %v1720_v34  ;;  %2244 = vpow2.f32 %v2129_v38  ;;  %v1218_v14 = vadd.f32 %v1175_v39, %v997_v50 }
 0x163   : > { %v769_v53 = vadd.f32 %v768_v42, %v628_v63  ;;  %vm1739_vm8 = vweird.f32 %v1380_v36  ;;  %vm1744_vm10 = vcmp.eq.f32.partialorder %v1743_v7, 8.507059e+37 }
 0x164   : > { %1923 = vst.msk [vmem:[%s2544_s17 + $0xa8] sm:$0xff] %vm1901_vm6, %v1890_v45  ;;  %v1722_v49 = vmul.f32 %v2241_v33, %v1721_v60  ;;  %v2876_v23 = vadd.f32 %v2771_v40, %v1218_v14 }
 0x166   : > { %v1723_v20 = vadd.f32 %v2241_v33, %v1722_v49  ;;  %v2130_v3 = vmul.f32 -1.442695, %v2876_v23 }
 0x167   : > { %v2243_v57 = vpop.eup %2242  ;;  %v957_v54 = vpop.f32.mrf.mxu2 }
 0x168   : > { %v2245_v55 = vpop.eup %2244  ;;  %v1727_v59 = vsel %vm1726_vm4, %v2241_v33, %v1723_v20  ;;  %v1735_v61 = vmul.f32 %v2243_v57, %v1380_v36  ;;  %v998_v0 = vadd.f32 %v957_v54, %v769_v53  ;;  %v1178_v1 = vpop.f32.mrf.mxu3  ;;  %vm1740_vm7 = vweird.f32 %v2243_v57 }
 0x169   : > { %v630_v2 = vpop.f32.mrf.mxu0  ;;  %v1732_v11 = vsel %vm1729_vm5, %v1731_v52, %v1727_v59  ;;  %v1381_v17 = vadd.f32 1.0, %v2245_v55  ;;  %vm1741_vm9 = vmor %vm1739_vm8, %vm1740_vm7 }
 0x16a   : > { %v770_v4 = vpop.f32.mrf.mxu1  ;;  %v1891_v5 = vmul.f32 %v1732_v11, %v2841_v43  ;;  %v1736_v58 = vsub.f32 1.0, %v1735_v61  ;;  %v1219_v6 = vadd.f32 %v1178_v1, %v998_v0  ;;  %v1746_v43 = vor.u32 1.1754944e-38, %v1745_v8 }
 0x16b   : > { %2246 = vrcp.f32 %v1381_v17  ;;  %v771_v12 = vadd.f32 %v770_v4, %v630_v2  ;;  %v1760_v35 = vand.u32 2147483648, %v1381_v17  ;;  %v1758_v37 = vand.u32 2147483647, %v1381_v17 }
 0x16c   : > { %1924 = vst.msk [vmem:[%s2544_s17 + $0xb0] sm:$0xff] %vm1901_vm6, %v1891_v5  ;;  %v1737_v31 = vmul.f32 %v2243_v57, %v1736_v58  ;;  %2248 = vpow2.f32 %v2130_v3  ;;  %v2883_v9 = vadd.f32 %v2771_v40, %v1219_v6  ;;  %vm1754_vm12 = vweird.f32 %v1381_v17 }
 0x16d   : > { %v1761_v42 = vor.u32 1.1754944e-38, %v1760_v35  ;;  %vm1759_vm14 = vcmp.eq.f32.partialorder %v1758_v37, 8.507059e+37 }
 0x16e   : > { %v1738_v10 = vadd.f32 %v2243_v57, %v1737_v31  ;;  %v2131_v44 = vmul.f32 -1.442695, %v2883_v9 }
 0x16f   : > { %v959_v13 = vpop.f32.mrf.mxu2 }
 0x170   : > { %v1742_v15 = vsel %vm1741_vm9, %v2243_v57, %v1738_v10  ;;  %2250 = vpow2.f32 %v2131_v44  ;;  %v999_v16 = vadd.f32 %v959_v13, %v771_v12  ;;  %v1180_v18 = vpop.f32.mrf.mxu3 }
 0x171   : > { %v633_v21 = vpop.f32.mrf.mxu0  ;;  %v2247_v22 = vpop.eup %2246  ;;  %v1747_v27 = vsel %vm1744_vm10, %v1746_v43, %v1742_v15 }
 0x172   : > { %v773_v24 = vpop.f32.mrf.mxu1  ;;  %v2249_v25 = vpop.eup %2248  ;;  %v1892_v62 = vmul.f32 %v1747_v27, %v2849_v29  ;;  %v1750_v19 = vmul.f32 %v2247_v22, %v1381_v17  ;;  %v1220_v26 = vadd.f32 %v1180_v18, %v999_v16  ;;  %vm1755_vm11 = vweird.f32 %v2247_v22 }
 0x173   : > { %v1382_v56 = vadd.f32 1.0, %v2249_v25  ;;  %v774_v33 = vadd.f32 %v773_v24, %v633_v21  ;;  %vm1756_vm13 = vmor %vm1754_vm12, %vm1755_vm11 }
 0x174   : > { %1925 = vst.msk [vmem:[%s2544_s17 + $0xb8] sm:$0xff] %vm1901_vm6, %v1892_v62  ;;  %v1751_v28 = vsub.f32 1.0, %v1750_v19  ;;  %v2890_v30 = vadd.f32 %v2771_v40, %v1220_v26 }
 0x175   : > { %2252 = vrcp.f32 %v1382_v56  ;;  %v1773_v55 = vand.u32 2147483647, %v1382_v56  ;;  %v1775_v59 = vand.u32 2147483648, %v1382_v56  ;;  %vm1769_vm1 = vweird.f32 %v1382_v56 }
 0x176   : > { %v2251_v36 = vpop.eup %2250  ;;  %v1752_v47 = vmul.f32 %v2247_v22, %v1751_v28  ;;  %v2132_v34 = vmul.f32 -1.442695, %v2890_v30 }
 0x177   : > { %v2893_v38 = vadd.f32 1.0, %v2251_v36  ;;  %v962_v29 = vpop.f32.mrf.mxu2  ;;  %vm1774_vm2 = vcmp.eq.f32.partialorder %v1773_v55, 8.507059e+37  ;;  %v1776_v6 = vor.u32 1.1754944e-38, %v1775_v59 }
 0x178   : > { %v1753_v39 = vadd.f32 %v2247_v22, %v1752_v47  ;;  %2254 = vpow2.f32 %v2132_v34  ;;  %v1000_v63 = vadd.f32 %v962_v29, %v774_v33  ;;  %v1183_v46 = vpop.f32.mrf.mxu3 }
 0x179   : > { %v635_v41 = vpop.f32.mrf.mxu0  ;;  %2256 = vrcp.f32 %v2893_v38  ;;  %v1788_v7 = vand.u32 2147483647, %v2893_v38  ;;  %v1790_v8 = vand.u32 2147483648, %v2893_v38  ;;  %vm1784_vm4 = vweird.f32 %v2893_v38 }
 0x17a   : > { %v775_v45 = vpop.f32.mrf.mxu1  ;;  %v1757_v60 = vsel %vm1756_vm13, %v2247_v22, %v1753_v39  ;;  %v1221_v48 = vadd.f32 %v1183_v46, %v1000_v63 }
 0x17b   : > { %v2253_v50 = vpop.eup %2252  ;;  %v1762_v49 = vsel %vm1759_vm14, %v1761_v42, %v1757_v60  ;;  %v776_v0 = vadd.f32 %v775_v45, %v635_v41  ;;  %v1791_v21 = vor.u32 1.1754944e-38, %v1790_v8  ;;  %vm1789_vm7 = vcmp.eq.f32.partialorder %v1788_v7, 8.507059e+37 }
 0x17c   : > { %v1893_v51 = vmul.f32 %v1762_v49, %v2863_v32  ;;  %v1765_v53 = vmul.f32 %v2253_v50, %v1382_v56  ;;  %v2898_v14 = vadd.f32 %v2771_v40, %v1221_v48  ;;  %vm1770_vm15 = vweird.f32 %v2253_v50 }
 0x17d   : > { %vm1771_vm0 = vmor %vm1769_vm1, %vm1770_vm15 }
 0x17e   : > { %v2255_v20 = vpop.eup %2254  ;;  %1926 = vst.msk [vmem:[%s2544_s17 + $0xc0] sm:$0xff] %vm1901_vm6, %v1893_v51  ;;  %v1766_v57 = vsub.f32 1.0, %v1765_v53  ;;  %v2133_v52 = vmul.f32 -1.442695, %v2898_v14 }
 0x17f   : > { %v2257_v54 = vpop.eup %2256  ;;  %v2903_v61 = vadd.f32 1.0, %v2255_v20  ;;  %v964_v1 = vpop.f32.mrf.mxu2 }
 0x180   : > { %v1767_v2 = vmul.f32 %v2253_v50, %v1766_v57  ;;  %v1780_v32 = vmul.f32 %v2257_v54, %v2893_v38  ;;  %2258 = vpow2.f32 %v2133_v52  ;;  %v1185_v11 = vpop.f32.mrf.mxu3  ;;  %v1001_v58 = vadd.f32 %v964_v1, %v776_v0 }
 0x181   : > { %2260 = vrcp.f32 %v2903_v61  ;;  %v638_v17 = vpop.f32.mrf.mxu0  ;;  %vm1785_vm3 = vweird.f32 %v2257_v54  ;;  %v1805_v33 = vand.u32 2147483648, %v2903_v61  ;;  %v1803_v34 = vand.u32 2147483647, %v2903_v61 }
 0x182   : > { %v778_v3 = vpop.f32.mrf.mxu1  ;;  %v1768_v4 = vadd.f32 %v2253_v50, %v1767_v2  ;;  %v1781_v5 = vsub.f32 1.0, %v1780_v32  ;;  %v1222_v44 = vadd.f32 %v1185_v11, %v1001_v58  ;;  %vm1786_vm5 = vmor %vm1784_vm4, %vm1785_vm3  ;;  %vm1799_vm9 = vweird.f32 %v2903_v61 }
 0x183   : > { %v779_v27 = vadd.f32 %v778_v3, %v638_v17  ;;  %vm1804_vm11 = vcmp.eq.f32.partialorder %v1803_v34, 8.507059e+37 }
 0x184   : > { %v1772_v31 = vsel %vm1771_vm0, %v2253_v50, %v1768_v4  ;;  %v1782_v10 = vmul.f32 %v2257_v54, %v1781_v5  ;;  %v2912_v16 = vadd.f32 %v2771_v40, %v1222_v44 }
 0x185   : > { %v1777_v12 = vsel %vm1774_vm2, %v1776_v6, %v1772_v31 }
 0x186   : > { %v2259_v43 = vpop.eup %2258  ;;  %v1894_v13 = vmul.f32 %v1777_v12, %v2876_v23  ;;  %v1783_v15 = vadd.f32 %v2257_v54, %v1782_v10  ;;  %v2134_v23 = vmul.f32 -1.442695, %v2912_v16 }
 0x187   : > { %v2261_v18 = vpop.eup %2260  ;;  %v1385_v22 = vadd.f32 1.0, %v2259_v43  ;;  %v967_v24 = vpop.f32.mrf.mxu2 }
 0x188   : > { %1927 = vst.msk [vmem:[%s2544_s17 + $0xc8] sm:$0xff] %vm1901_vm6, %v1894_v13  ;;  %v1787_v25 = vsel %vm1786_vm5, %v2257_v54, %v1783_v15  ;;  %v1795_v62 = vmul.f32 %v2261_v18, %v2903_v61  ;;  %v1188_v19 = vpop.f32.mrf.mxu3  ;;  %v1002_v35 = vadd.f32 %v967_v24, %v779_v27  ;;  %vm1800_vm8 = vweird.f32 %v2261_v18 }
 0x189   : > { %v1792_v26 = vsel %vm1789_vm7, %v1791_v21, %v1787_v25  ;;  %2262 = vrcp.f32 %v1385_v22  ;;  %v640_v36 = vpop.f32.mrf.mxu0  ;;  %vm1801_vm10 = vmor %vm1799_vm9, %vm1800_vm8  ;;  %v1818_v54 = vand.u32 2147483647, %v1385_v22  ;;  %v1820_v55 = vand.u32 2147483648, %v1385_v22 }
 0x18a   : > { %v1895_v56 = vmul.f32 %v1792_v26, %v2883_v9  ;;  %v1796_v28 = vsub.f32 1.0, %v1795_v62  ;;  %2264 = vpow2.f32 %v2134_v23  ;;  %v780_v47 = vpop.f32.mrf.mxu1  ;;  %v1223_v38 = vadd.f32 %v1188_v19, %v1002_v35 }
 0x18b   : > { %v781_v39 = vadd.f32 %v780_v47, %v640_v36  ;;  %v1806_v9 = vor.u32 1.1754944e-38, %v1805_v33  ;;  %vm1814_vm13 = vweird.f32 %v1385_v22  ;;  %vm1819_vm15 = vcmp.eq.f32.partialorder %v1818_v54, 8.507059e+37 }
 0x18c   : > { %1928 = vst.msk [vmem:[%s2544_s17 + $0xd0] sm:$0xff] %vm1901_vm6, %v1895_v56  ;;  %v1797_v37 = vmul.f32 %v2261_v18, %v1796_v28  ;;  %v2925_v46 = vadd.f32 %v2771_v40, %v1223_v38 }
 0x18e   : > { %v1798_v29 = vadd.f32 %v2261_v18, %v1797_v37  ;;  %v2135_v51 = vmul.f32 -1.442695, %v2925_v46 }
 0x18f   : > { %v2263_v63 = vpop.eup %2262  ;;  %v969_v41 = vpop.f32.mrf.mxu2 }
 0x190   : > { %v2265_v42 = vpop.eup %2264  ;;  %v1802_v45 = vsel %vm1801_vm10, %v2261_v18, %v1798_v29  ;;  %v1810_v60 = vmul.f32 %v2263_v63, %v1385_v22  ;;  %v1003_v48 = vadd.f32 %v969_v41, %v781_v39  ;;  %v1190_v53 = vpop.f32.mrf.mxu3  ;;  %vm1815_vm12 = vweird.f32 %v2263_v63 }
 0x191   : > { %v1807_v50 = vsel %vm1804_vm11, %v1806_v9, %v1802_v45  ;;  %v1386_v49 = vadd.f32 1.0, %v2265_v42  ;;  %vm1816_vm14 = vmor %vm1814_vm13, %vm1815_vm12 }
 0x192   : > { %v1896_v20 = vmul.f32 %v1807_v50, %v2890_v30  ;;  %v1811_v57 = vsub.f32 1.0, %v1810_v60  ;;  %v1224_v52 = vadd.f32 %v1190_v53, %v1003_v48  ;;  %v1821_v30 = vor.u32 1.1754944e-38, %v1820_v55 }
 0x193   : > { %2266 = vrcp.f32 %v1386_v49  ;;  %v1835_v58 = vand.u32 2147483648, %v1386_v49  ;;  %v1833_v8 = vand.u32 2147483647, %v1386_v49  ;;  %vm1829_vm0 = vweird.f32 %v1386_v49 }
 0x194   : > { %1929 = vst.msk [vmem:[%s2544_s17 + $0xd8] sm:$0xff] %vm1901_vm6, %v1896_v20  ;;  %v1812_v59 = vmul.f32 %v2263_v63, %v1811_v57  ;;  %2268 = vpow2.f32 %v2135_v51  ;;  %v2932_v61 = vadd.f32 %v2771_v40, %v1224_v52 }
 0x195   : > { %v1836_v44 = vor.u32 1.1754944e-38, %v1835_v58  ;;  %vm1834_vm3 = vcmp.eq.f32.partialorder %v1833_v8, 8.507059e+37 }
 0x196   : > { %v1813_v0 = vadd.f32 %v2263_v63, %v1812_v59  ;;  %v2136_v1 = vmul.f32 -1.442695, %v2932_v61 }
 0x198   : > { %v1817_v2 = vsel %vm1816_vm14, %v2263_v63, %v1813_v0  ;;  %2270 = vpow2.f32 %v2136_v1 }
 0x199   : > { %v2267_v32 = vpop.eup %2266  ;;  %v1822_v11 = vsel %vm1819_vm15, %v1821_v30, %v1817_v2 }
 0x19a   : > { %v2269_v17 = vpop.eup %2268  ;;  %v1897_v3 = vmul.f32 %v1822_v11, %v2898_v14  ;;  %v1825_v4 = vmul.f32 %v2267_v32, %v1386_v49  ;;  %vm1830_vm1 = vweird.f32 %v2267_v32 }
 0x19b   : > { %v1387_v5 = vadd.f32 1.0, %v2269_v17  ;;  %vm1831_vm2 = vmor %vm1829_vm0, %vm1830_vm1 }
 0x19c   : > { %1930 = vst.msk [vmem:[%s2544_s17 + $0xe0] sm:$0xff] %vm1901_vm6, %v1897_v3  ;;  %v1826_v40 = vsub.f32 1.0, %v1825_v4 }
 0x19d   : > { %2272 = vrcp.f32 %v1387_v5  ;;  %v1848_v22 = vand.u32 2147483647, %v1387_v5  ;;  %v1850_v27 = vand.u32 2147483648, %v1387_v5  ;;  %vm1844_vm5 = vweird.f32 %v1387_v5 }
 0x19e   : > { %v2271_v6 = vpop.eup %2270  ;;  %v1827_v7 = vmul.f32 %v2267_v32, %v1826_v40 }
 0x19f   : > { %v1388_v31 = vadd.f32 1.0, %v2271_v6  ;;  %vm1849_vm8 = vcmp.eq.f32.partialorder %v1848_v22, 8.507059e+37  ;;  %v1851_v19 = vor.u32 1.1754944e-38, %v1850_v27 }
 0x1a0   : > { %v1828_v10 = vadd.f32 %v2267_v32, %v1827_v7 }
 0x1a1   : > { %2274 = vrcp.f32 %v1388_v31  ;;  %v1865_v26 = vand.u32 2147483648, %v1388_v31  ;;  %v1863_v28 = vand.u32 2147483647, %v1388_v31  ;;  %vm1859_vm10 = vweird.f32 %v1388_v31 }
 0x1a2   : > { %v1832_v12 = vsel %vm1831_vm2, %v2267_v32, %v1828_v10 }
 0x1a3   : > { %v2273_v14 = vpop.eup %2272  ;;  %v1837_v43 = vsel %vm1834_vm3, %v1836_v44, %v1832_v12  ;;  %v1866_v47 = vor.u32 1.1754944e-38, %v1865_v26  ;;  %vm1864_vm12 = vcmp.eq.f32.partialorder %v1863_v28, 8.507059e+37 }
 0x1a4   : > { %v1898_v13 = vmul.f32 %v1837_v43, %v2912_v16  ;;  %v1840_v15 = vmul.f32 %v2273_v14, %v1387_v5  ;;  %vm1845_vm4 = vweird.f32 %v2273_v14 }
 0x1a5   : > { %vm1846_vm7 = vmor %vm1844_vm5, %vm1845_vm4 }
 0x1a6   : > { %1931 = vst.msk [vmem:[%s2544_s17 + $0xe8] sm:$0xff] %vm1901_vm6, %v1898_v13  ;;  %v1841_v18 = vsub.f32 1.0, %v1840_v15 }
 0x1a7   : > { %v2275_v21 = vpop.eup %2274 }
 0x1a8   : > { %v1842_v24 = vmul.f32 %v2273_v14, %v1841_v18  ;;  %v1855_v25 = vmul.f32 %v2275_v21, %v1388_v31  ;;  %vm1860_vm9 = vweird.f32 %v2275_v21 }
 0x1a9   : > { %vm1861_vm11 = vmor %vm1859_vm10, %vm1860_vm9 }
 0x1aa   : > { %v1843_v62 = vadd.f32 %v2273_v14, %v1842_v24  ;;  %v1856_v23 = vsub.f32 1.0, %v1855_v25 }
 0x1ac   : > { %v1847_v16 = vsel %vm1846_vm7, %v2273_v14, %v1843_v62  ;;  %v1857_v56 = vmul.f32 %v2275_v21, %v1856_v23 }
 0x1ad   : > { %v1852_v33 = vsel %vm1849_vm8, %v1851_v19, %v1847_v16 }
 0x1ae   : > { %v1899_v35 = vmul.f32 %v1852_v33, %v2925_v46  ;;  %v1858_v36 = vadd.f32 %v2275_v21, %v1857_v56 }
 0x1b0   : > { %1932 = vst.msk [vmem:[%s2544_s17 + $0xf0] sm:$0xff] %vm1901_vm6, %v1899_v35  ;;  %v1862_v37 = vsel %vm1861_vm11, %v2275_v21, %v1858_v36 }
 0x1b1   : > { %v1867_v34 = vsel %vm1864_vm12, %v1866_v47, %v1862_v37 }
 0x1b2   : > { %v1900_v38 = vmul.f32 %v1867_v34, %v2932_v61 }
 0x1b4   : > { %1933 = vst.msk [vmem:[%s2544_s17 + $0xf8] sm:$0xff] %vm1901_vm6, %v1900_v38 }
 0x1b5 PF: > { %s19_s30 = sadd.s32 1, %s2283_s30  }
 0x1b6   : > { %p16_p4 = scmp.ge.s32.totalorder %s19_s30, 4  }
 0x1b8   :  { %18 = sbr.rel (!%p16_p4) target bundleno = 1 (0x1), region = 95 }

// kernel: c2f_forward.5
= control target key start
LH: loop header
LB: loop body
LE: loop exit
PB: predicated region body
PF: predicated region fallthrough
CT: control target
= control target key end

     0   :  { %s6466_s18 = smov 0   ;;  %s9261_s0 = inlined_call_operand.vmem [shape: f32[2,16,16,8], index: 0, kind: input, shape index: {}]   ;;  %s9262_s1 = inlined_call_operand.vmem [shape: bf16[9,8,8], index: 1, kind: input, shape index: {}]   ;;  %s9263_s2 = inlined_call_operand.vmem [shape: f32[1,8], index: 2, kind: input, shape index: {}]   ;;  %s9264_s3 = inlined_call_operand.vmem [shape: bf16[9,8,8], index: 3, kind: input, shape index: {}]   ;;  %s9265_s4 = inlined_call_operand.vmem [shape: f32[1,8], index: 4, kind: input, shape index: {}]   ;;  %s9266_s5 = inlined_call_operand.vmem [shape: f32[2,16,16,8], index: 5, kind: output, shape index: {}]  }
   0x1 LB: > { %s5774_s19 = sadd.s32 4294967295, %s6433_s18   ;;  %p5778_p0 = scmp.ge.s32.totalorder %s6433_s18, 1  ;;  %s6433_s18 = sphi %s6466_s18, %s15_s18  }
   0x2   : > { %p187_p1 = scmp.lt.s32.totalorder %s6433_s18, 3 }
   0x4   : > { %p188_p2 = pnand %p5778_p0, %p187_p1 }
   0x6   : > { %191 = sbr.rel (%p188_p2) target bundleno = 1618 (0x652), region = 40 }
   0xb   : > { %v5783_v0 = vld [vmem:[%s9262_s1 + $0x4] sm:$0xf]  ;;  %vm548_vm0 = vcmask 1043456   ;;  %vm226_vm1 = vcmask 64512   ;;  %vm229_vm2 = vcmask 58368   ;;  %v6435_v2 = vmov 0.0  }
   0xc   : > { %v550_v1 = vsel %vm548_vm0, %v5783_v0, 0  ;;  %227 = vst.msk [vmem:[#allocation2] sm:$0xff] %vm226_vm1, %v6435_v2  ;;  %v449_v3 = vld [vmem:[%s9262_s1] sm:$0xf]  ;;  %v5816_v10 = vld [vmem:[%s9262_s1 + $0x8] sm:$0xf] }
   0xd   : > { %559 = vmatpush.bf16.msra.mxu0 %v550_v1  ;;  %228 = vst.msk [vmem:[#allocation2 + $0x8] sm:$0xff] %vm226_vm1, %v6435_v2  ;;  %6155 = vmatpush.bf16.msra.mxu2 %v550_v1  ;;  %v690_v4 = vsel %vm548_vm0, %v449_v3, 0  ;;  %v5833_v12 = vld [vmem:[%s9262_s1 + $0xc] sm:$0xf]  ;;  %v880_v13 = vsel %vm548_vm0, %v5816_v10, 0  ;;  %p215_p3 = scmp.lt.s32.totalorder %s5774_s19, 1 }
   0xe   : > { %230 = vst.msk [vmem:[#allocation2 + $0x10] sm:$0x3] %vm229_vm2, %v6435_v2  ;;  %6156 = vmatpush.bf16.msra.mxu3 %v690_v4  ;;  %699 = vmatpush.bf16.msra.mxu1 %v690_v4  ;;  %v1102_v14 = vsel %vm548_vm0, %v5833_v12, 0  ;;  %v5850_v15 = vld [vmem:[%s9262_s1 + $0x10] sm:$0xf] }
   0xf   : > { %231 = vst.msk [vmem:[#allocation2 + $0x18] sm:$0xff] %vm226_vm1, %v6435_v2  ;;  %v1324_v16 = vsel %vm548_vm0, %v5850_v15, 0  ;;  %s9448_s19 = smov (!%p215_p3, %s5774_s19), 1 }
  0x10   : > { %232 = vst.msk [vmem:[#allocation2 + $0x20] sm:$0xff] %vm226_vm1, %v6435_v2  ;;  %s6153_s30 = sshll.u32 %s9448_s19, 8 }
  0x11   : > { %233 = vst.msk [vmem:[#allocation2 + $0x28] sm:$0x3] %vm229_vm2, %v6435_v2  ;;  %889 = vmatpush.bf16.msrb.mxu2 %v880_v13  ;;  %1333 = vmatpush.bf16.msrb.mxu0 %v1324_v16  ;;  %s6714_s8 = scalar_lea.vmem %s9261_s0, %s6153_s30  ;;  %s8668_s25 = scalar_lea.vmem %s9266_s5, %s6153_s30 }
  0x12   : > { %234 = vst.msk [vmem:[#allocation2 + $0x30] sm:$0xff] %vm226_vm1, %v6435_v2  ;;  %1111 = vmatpush.bf16.msrb.mxu3 %v1102_v14  ;;  %v6723_v17 = vld [vmem:[%s6714_s8 + $0x70] sm:$0xff]  ;;  %v6728_v18 = vld [vmem:[%s6714_s8 + $0x78] sm:$0xff]  ;;  %v6733_v19 = vld [vmem:[%s6714_s8] sm:$0xff] }
  0x13   : > { %235 = vst.msk [vmem:[#allocation2 + $0x38] sm:$0xff] %vm226_vm1, %v6435_v2  ;;  %v401_v8 = vld [vmem:[#allocation2] sm:$0xff]  ;;  %v6738_v20 = vld [vmem:[%s6714_s8 + $0x8] sm:$0xff]  ;;  %v6753_v23 = vld [vmem:[%s6714_s8 + $0x10] sm:$0xff] }
  0x14   : > { %v450_v5 = vld [vmem:[#allocation2 + $0x1] sm:$0xff]  ;;  %236 = vst.msk [vmem:[#allocation2 + $0x40] sm:$0x3] %vm229_vm2, %v6435_v2  ;;  %v6758_v24 = vld [vmem:[%s6714_s8 + $0x18] sm:$0xff]  ;;  %v6763_v25 = vld [vmem:[%s6714_s8 + $0x90] sm:$0xff] }
  0x15   : > { %v451_v6 = vld [vmem:[#allocation2 + $0x9] sm:$0xff]  ;;  %237 = vst.msk [vmem:[#allocation2 + $0x48] sm:$0xff] %vm226_vm1, %v6435_v2  ;;  %v6743_v21 = vld [vmem:[%s6714_s8 + $0x80] sm:$0xff]  ;;  %v6768_v26 = vld [vmem:[%s6714_s8 + $0x98] sm:$0xff] }
  0x16   : > { %v482_v7 = vpack.c.bf16 %v451_v6, %v450_v5  ;;  %238 = vst.msk [vmem:[#allocation2 + $0x50] sm:$0xff] %vm226_vm1, %v6435_v2  ;;  %v402_v9 = vld [vmem:[#allocation2 + $0x8] sm:$0xff]  ;;  %v6781_v37 = vld [vmem:[%s6714_s8 + $0x20] sm:$0xff]  ;;  %v6821_v55 = vld [vmem:[%s6714_s8 + $0x30] sm:$0xff] }
  0x17   : > { %239 = vst.msk [vmem:[#allocation2 + $0x58] sm:$0x3] %vm229_vm2, %v6435_v2  ;;  %v433_v11 = vpack.c.bf16 %v402_v9, %v401_v8  ;;  %v6748_v22 = vld [vmem:[%s6714_s8 + $0x88] sm:$0xff]  ;;  %v6803_v41 = vld [vmem:[%s6714_s8 + $0xa0] sm:$0xff]  ;;  %v6828_v56 = vld [vmem:[%s6714_s8 + $0x38] sm:$0xff] }
  0x18   : > { %5784 = vmatmul.msk.bf16.vlgmr.msra.gmra.mxu0 %vm226_vm1, %v482_v7  ;;  %240 = vst.msk [vmem:[#allocation2 + $0x60] sm:$0xff] %vm226_vm1, %v6435_v2  ;;  %v6792_v40 = vld [vmem:[%s6714_s8 + $0x28] sm:$0xff]  ;;  %v6839_v57 = vld [vmem:[%s6714_s8 + $0xb0] sm:$0xff]  ;;  %v6842_v58 = vld [vmem:[%s6714_s8 + $0xb8] sm:$0xff] }
  0x19   : > { %241 = vst.msk [vmem:[#allocation2 + $0x68] sm:$0xff] %vm226_vm1, %v6435_v2  ;;  %5800 = vmatmul.msk.bf16.vlgmr.msra.gmra.mxu1 %vm226_vm1, %v433_v11  ;;  %v6806_v42 = vld [vmem:[%s6714_s8 + $0xa8] sm:$0xff]  ;;  %v6857_v7 = vld [vmem:[%s6714_s8 + $0x40] sm:$0xff] }
  0x1a   : > { %242 = vst.msk [vmem:[#allocation2 + $0x70] sm:$0x3] %vm229_vm2, %v6435_v2  ;;  %v6864_v8 = vld [vmem:[%s6714_s8 + $0x48] sm:$0xff]  ;;  %v6875_v9 = vld [vmem:[%s6714_s8 + $0xc0] sm:$0xff] }
  0x1b   : > { %243 = vst.msk [vmem:[#allocation2 + $0x78] sm:$0xff] %vm226_vm1, %v6435_v2  ;;  %v6878_v10 = vld [vmem:[%s6714_s8 + $0xc8] sm:$0xff] }
  0x1c   : > { %244 = vst.msk [vmem:[#allocation2 + $0x80] sm:$0xff] %vm226_vm1, %v6435_v2 }
  0x1d   : > { %245 = vst.msk [vmem:[#allocation2 + $0x88] sm:$0x3] %vm229_vm2, %v6435_v2 }
  0x1e   : > { %246 = vst.msk [vmem:[#allocation2 + $0x90] sm:$0xff] %vm226_vm1, %v6435_v2 }
  0x1f   : > { %247 = vst.msk [vmem:[#allocation2 + $0x98] sm:$0xff] %vm226_vm1, %v6435_v2 }
  0x20   : > { %248 = vst.msk [vmem:[#allocation2 + $0xa0] sm:$0x3] %vm229_vm2, %v6435_v2 }
  0x21   : > { %249 = vst.msk [vmem:[#allocation2 + $0xa8] sm:$0xff] %vm226_vm1, %v6435_v2 }
  0x22   : > { %250 = vst.msk [vmem:[#allocation2 + $0xb0] sm:$0xff] %vm226_vm1, %v6435_v2 }
  0x23   : > { %251 = vst.msk [vmem:[#allocation2 + $0xb8] sm:$0x3] %vm229_vm2, %v6435_v2 }
  0x24   : > { %252 = vst.msk [vmem:[#allocation2 + $0xc0] sm:$0xff] %vm226_vm1, %v6435_v2 }
  0x25   : > { %253 = vst.msk [vmem:[#allocation2 + $0xc8] sm:$0xff] %vm226_vm1, %v6435_v2 }
  0x26   : > { %254 = vst.msk [vmem:[#allocation2 + $0xd0] sm:$0x3] %vm229_vm2, %v6435_v2 }
  0x27   : > { %255 = vst.msk [vmem:[#allocation2 + $0xd8] sm:$0xff] %vm226_vm1, %v6435_v2 }
  0x28   : > { %256 = vst.msk [vmem:[#allocation2 + $0xe0] sm:$0xff] %vm226_vm1, %v6435_v2 }
  0x29   : > { %257 = vst.msk [vmem:[#allocation2 + $0xe8] sm:$0x3] %vm229_vm2, %v6435_v2 }
  0x2a   : > { %258 = vst.msk [vmem:[#allocation2 + $0xf0] sm:$0xff] %vm226_vm1, %v6435_v2 }
  0x2b   : > { %259 = vst.msk [vmem:[#allocation2 + $0xf8] sm:$0xff] %vm226_vm1, %v6435_v2 }
  0x2c   : > { %260 = vst.msk [vmem:[#allocation2 + $0x100] sm:$0x3] %vm229_vm2, %v6435_v2 }
  0x2d   : > { %261 = vst.msk [vmem:[#allocation2 + $0x108] sm:$0xff] %vm226_vm1, %v6435_v2 }
  0x2e   : > { %262 = vst.msk [vmem:[#allocation2 + $0x110] sm:$0xff] %vm226_vm1, %v6435_v2 }
  0x2f   : > { %263 = vst.msk [vmem:[#allocation2 + $0x118] sm:$0x3] %vm229_vm2, %v6435_v2 }
  0x30   : > { %264 = vst.msk [vmem:[#allocation2 + $0x120] sm:$0xff] %vm226_vm1, %v6435_v2 }
  0x31   : > { %265 = vst.msk [vmem:[#allocation2 + $0x128] sm:$0xff] %vm226_vm1, %v6435_v2 }
  0x32   : > { %266 = vst.msk [vmem:[#allocation2 + $0x130] sm:$0x3] %vm229_vm2, %v6435_v2 }
  0x33   : > { %267 = vst.msk [vmem:[#allocation2 + $0x138] sm:$0xff] %vm226_vm1, %v6435_v2 }
  0x34   : > { %268 = vst.msk [vmem:[#allocation2 + $0x140] sm:$0xff] %vm226_vm1, %v6435_v2 }
  0x35   : > { %269 = vst.msk [vmem:[#allocation2 + $0x148] sm:$0x3] %vm229_vm2, %v6435_v2 }
  0x36   : > { %270 = vst.msk [vmem:[#allocation2 + $0x150] sm:$0xff] %vm226_vm1, %v6435_v2 }
  0x37   : > { %271 = vst.msk [vmem:[#allocation2 + $0x158] sm:$0xff] %vm226_vm1, %v6435_v2 }
  0x38   : > { %272 = vst.msk [vmem:[#allocation2 + $0x160] sm:$0x3] %vm229_vm2, %v6435_v2 }
  0x39   : > { %273 = vst.msk [vmem:[#allocation2 + $0x168] sm:$0xff] %vm226_vm1, %v6435_v2 }
  0x3a   : > { %274 = vst.msk [vmem:[#allocation2 + $0x170] sm:$0xff] %vm226_vm1, %v6435_v2 }
  0x3b   : > { %275 = vst.msk [vmem:[#allocation2 + $0x178] sm:$0x3] %vm229_vm2, %v6435_v2 }
  0x3c   : > { %276 = vst.msk [vmem:[#allocation2 + $0x180] sm:$0xff] %vm226_vm1, %v6435_v2 }
  0x3d   : > { %277 = vst.msk [vmem:[#allocation2 + $0x188] sm:$0xff] %vm226_vm1, %v6435_v2 }
  0x3e   : > { %278 = vst.msk [vmem:[#allocation2 + $0x190] sm:$0x3] %vm229_vm2, %v6435_v2 }
  0x3f   : > { %279 = vst.msk [vmem:[#allocation2 + $0x198] sm:$0xff] %vm226_vm1, %v6435_v2 }
  0x40   : > { %280 = vst.msk [vmem:[#allocation2 + $0x1a0] sm:$0xff] %vm226_vm1, %v6435_v2 }
  0x41   : > { %281 = vst.msk [vmem:[#allocation2 + $0x1a8] sm:$0x3] %vm229_vm2, %v6435_v2 }
  0x42   : > { %282 = vst.msk [vmem:[#allocation3] sm:$0xff] %vm226_vm1, %v6435_v2 }
  0x43   : > { %283 = vst.msk [vmem:[#allocation3 + $0x8] sm:$0xff] %vm226_vm1, %v6435_v2 }
  0x44   : > { %284 = vst.msk [vmem:[#allocation3 + $0x10] sm:$0x3] %vm229_vm2, %v6435_v2 }
  0x45   : > { %285 = vst.msk [vmem:[#allocation3 + $0x18] sm:$0xff] %vm226_vm1, %v6435_v2 }
  0x46   : > { %286 = vst.msk [vmem:[#allocation3 + $0x20] sm:$0xff] %vm226_vm1, %v6435_v2 }
  0x47   : > { %287 = vst.msk [vmem:[#allocation3 + $0x28] sm:$0x3] %vm229_vm2, %v6435_v2 }
  0x48   : > { %288 = vst.msk [vmem:[#allocation3 + $0x30] sm:$0xff] %vm226_vm1, %v6435_v2 }
  0x49   : > { %289 = vst.msk [vmem:[#allocation3 + $0x38] sm:$0xff] %vm226_vm1, %v6435_v2 }
  0x4a   : > { %290 = vst.msk [vmem:[#allocation3 + $0x40] sm:$0x3] %vm229_vm2, %v6435_v2 }
  0x4b   : > { %291 = vst.msk [vmem:[#allocation3 + $0x48] sm:$0xff] %vm226_vm1, %v6435_v2 }
  0x4c   : > { %292 = vst.msk [vmem:[#allocation3 + $0x50] sm:$0xff] %vm226_vm1, %v6435_v2 }
  0x4d   : > { %293 = vst.msk [vmem:[#allocation3 + $0x58] sm:$0x3] %vm229_vm2, %v6435_v2 }
  0x4e   : > { %294 = vst.msk [vmem:[#allocation3 + $0x60] sm:$0xff] %vm226_vm1, %v6435_v2 }
  0x4f   : > { %295 = vst.msk [vmem:[#allocation3 + $0x68] sm:$0xff] %vm226_vm1, %v6435_v2 }
  0x50   : > { %296 = vst.msk [vmem:[#allocation3 + $0x70] sm:$0x3] %vm229_vm2, %v6435_v2 }
  0x51   : > { %297 = vst.msk [vmem:[#allocation3 + $0x78] sm:$0xff] %vm226_vm1, %v6435_v2 }
  0x52   : > { %298 = vst.msk [vmem:[#allocation3 + $0x80] sm:$0xff] %vm226_vm1, %v6435_v2 }
  0x53   : > { %299 = vst.msk [vmem:[#allocation3 + $0x88] sm:$0x3] %vm229_vm2, %v6435_v2 }
  0x54   : > { %300 = vst.msk [vmem:[#allocation3 + $0x90] sm:$0xff] %vm226_vm1, %v6435_v2 }
  0x55   : > { %301 = vst.msk [vmem:[#allocation3 + $0x98] sm:$0xff] %vm226_vm1, %v6435_v2 }
  0x56   : > { %302 = vst.msk [vmem:[#allocation3 + $0xa0] sm:$0x3] %vm229_vm2, %v6435_v2 }
  0x57   : > { %303 = vst.msk [vmem:[#allocation3 + $0xa8] sm:$0xff] %vm226_vm1, %v6435_v2 }
  0x58   : > { %304 = vst.msk [vmem:[#allocation3 + $0xb0] sm:$0xff] %vm226_vm1, %v6435_v2 }
  0x59   : > { %305 = vst.msk [vmem:[#allocation3 + $0xb8] sm:$0x3] %vm229_vm2, %v6435_v2 }
  0x5a   : > { %306 = vst.msk [vmem:[#allocation3 + $0xc0] sm:$0xff] %vm226_vm1, %v6435_v2 }
  0x5b   : > { %307 = vst.msk [vmem:[#allocation3 + $0xc8] sm:$0xff] %vm226_vm1, %v6435_v2 }
  0x5c   : > { %308 = vst.msk [vmem:[#allocation3 + $0xd0] sm:$0x3] %vm229_vm2, %v6435_v2 }
  0x5d   : > { %309 = vst.msk [vmem:[#allocation3 + $0xd8] sm:$0xff] %vm226_vm1, %v6435_v2 }
  0x5e   : > { %310 = vst.msk [vmem:[#allocation3 + $0xe0] sm:$0xff] %vm226_vm1, %v6435_v2 }
  0x5f   : > { %311 = vst.msk [vmem:[#allocation3 + $0xe8] sm:$0x3] %vm229_vm2, %v6435_v2 }
  0x60   : > { %312 = vst.msk [vmem:[#allocation3 + $0xf0] sm:$0xff] %vm226_vm1, %v6435_v2 }
  0x61   : > { %313 = vst.msk [vmem:[#allocation3 + $0xf8] sm:$0xff] %vm226_vm1, %v6435_v2 }
  0x62   : > { %314 = vst.msk [vmem:[#allocation3 + $0x100] sm:$0x3] %vm229_vm2, %v6435_v2 }
  0x63   : > { %315 = vst.msk [vmem:[#allocation3 + $0x108] sm:$0xff] %vm226_vm1, %v6435_v2 }
  0x64   : > { %316 = vst.msk [vmem:[#allocation3 + $0x110] sm:$0xff] %vm226_vm1, %v6435_v2 }
  0x65   : > { %317 = vst.msk [vmem:[#allocation3 + $0x118] sm:$0x3] %vm229_vm2, %v6435_v2 }
  0x66   : > { %318 = vst.msk [vmem:[#allocation3 + $0x120] sm:$0xff] %vm226_vm1, %v6435_v2 }
  0x67   : > { %319 = vst.msk [vmem:[#allocation3 + $0x128] sm:$0xff] %vm226_vm1, %v6435_v2 }
  0x68   : > { %320 = vst.msk [vmem:[#allocation3 + $0x130] sm:$0x3] %vm229_vm2, %v6435_v2 }
  0x69   : > { %321 = vst.msk [vmem:[#allocation3 + $0x138] sm:$0xff] %vm226_vm1, %v6435_v2 }
  0x6a   : > { %322 = vst.msk [vmem:[#allocation3 + $0x140] sm:$0xff] %vm226_vm1, %v6435_v2 }
  0x6b   : > { %323 = vst.msk [vmem:[#allocation3 + $0x148] sm:$0x3] %vm229_vm2, %v6435_v2 }
  0x6c   : > { %324 = vst.msk [vmem:[#allocation3 + $0x150] sm:$0xff] %vm226_vm1, %v6435_v2 }
  0x6d   : > { %325 = vst.msk [vmem:[#allocation3 + $0x158] sm:$0xff] %vm226_vm1, %v6435_v2 }
  0x6e   : > { %326 = vst.msk [vmem:[#allocation3 + $0x160] sm:$0x3] %vm229_vm2, %v6435_v2 }
  0x6f   : > { %327 = vst.msk [vmem:[#allocation3 + $0x168] sm:$0xff] %vm226_vm1, %v6435_v2 }
  0x70   : > { %328 = vst.msk [vmem:[#allocation3 + $0x170] sm:$0xff] %vm226_vm1, %v6435_v2 }
  0x71   : > { %329 = vst.msk [vmem:[#allocation3 + $0x178] sm:$0x3] %vm229_vm2, %v6435_v2 }
  0x72   : > { %330 = vst.msk [vmem:[#allocation3 + $0x180] sm:$0xff] %vm226_vm1, %v6435_v2 }
  0x73   : > { %331 = vst.msk [vmem:[#allocation3 + $0x188] sm:$0xff] %vm226_vm1, %v6435_v2 }
  0x74   : > { %332 = vst.msk [vmem:[#allocation3 + $0x190] sm:$0x3] %vm229_vm2, %v6435_v2 }
  0x75   : > { %333 = vst.msk [vmem:[#allocation3 + $0x198] sm:$0xff] %vm226_vm1, %v6435_v2 }
  0x76   : > { %9311 = vst [vmem:[#allocation4_spill] sm:$0xff] %v6723_v17 }
  0x77   : > { %334 = vst.msk [vmem:[#allocation3 + $0x1a0] sm:$0xff] %vm226_vm1, %v6435_v2 }
  0x78   : > { %9312 = vst [vmem:[#allocation5_spill] sm:$0xff] %v6728_v18 }
  0x79   : > { %335 = vst.msk [vmem:[#allocation3 + $0x1a8] sm:$0x3] %vm229_vm2, %v6435_v2 }
  0x7a   : > { %9313 = vst [vmem:[#allocation6_spill] sm:$0xff] %v6733_v19 }
  0x7b   : > { %383 = vst.msk [vmem:[#allocation2 + $0xc1] sm:$0xff] %vm226_vm1, %v6723_v17 }
  0x7c   : > { %9314 = vst [vmem:[#allocation7_spill] sm:$0xff] %v6738_v20 }
  0x7d   : > { %384 = vst.msk [vmem:[#allocation2 + $0xc9] sm:$0xff] %vm226_vm1, %v6728_v18 }
  0x7e   : > { %9315 = vst [vmem:[#allocation8_spill] sm:$0xff] %v6743_v21 }
  0x7f   : > { %369 = vst.msk [vmem:[#allocation2 + $0x19] sm:$0xff] %vm226_vm1, %v6733_v19 }
  0x80   : > { %9316 = vst [vmem:[#allocation9_spill] sm:$0xff] %v6748_v22 }
  0x81   : > { %370 = vst.msk [vmem:[#allocation2 + $0x21] sm:$0xff] %vm226_vm1, %v6738_v20 }
  0x82   : > { %9317 = vst [vmem:[#allocation10_spill] sm:$0xff] %v6753_v23  ;;  %v466_v27 = vld [vmem:[#allocation2 + $0xc1] sm:$0xff] }
  0x83   : > { %385 = vst.msk [vmem:[#allocation2 + $0xd9] sm:$0xff] %vm226_vm1, %v6743_v21  ;;  %v417_v28 = vld [vmem:[#allocation2 + $0xc0] sm:$0xff] }
  0x84   : > { %9318 = vst [vmem:[#allocation11_spill] sm:$0xff] %v6758_v24  ;;  %v467_v29 = vld [vmem:[#allocation2 + $0xc9] sm:$0xff] }
  0x85   : > { %386 = vst.msk [vmem:[#allocation2 + $0xe1] sm:$0xff] %vm226_vm1, %v6748_v22  ;;  %v418_v30 = vld [vmem:[#allocation2 + $0xc8] sm:$0xff]  ;;  %v6774_v31 = vpack.c.bf16 %v467_v29, %v466_v27 }
  0x86   : > { %9319 = vst [vmem:[#allocation12_spill] sm:$0xff] %v6763_v25  ;;  %v6776_v32 = vpack.c.bf16 %v418_v30, %v417_v28  ;;  %v452_v33 = vld [vmem:[#allocation2 + $0x19] sm:$0xff] }
  0x87   : > { %371 = vst.msk [vmem:[#allocation2 + $0x31] sm:$0xff] %vm226_vm1, %v6753_v23  ;;  %v403_v34 = vld [vmem:[#allocation2 + $0x18] sm:$0xff]  ;;  %5792 = vmatmul.msk.bf16.vlgmr.msra.gmra.mxu2 %vm226_vm1, %v6774_v31 }
  0x88   : > { %9320 = vst [vmem:[#allocation13_spill] sm:$0xff] %v6768_v26  ;;  %v453_v35 = vld [vmem:[#allocation2 + $0x21] sm:$0xff]  ;;  %5808 = vmatmul.msk.bf16.vlgmr.msra.gmra.mxu3 %vm226_vm1, %v6776_v32 }
  0x89   : > { %372 = vst.msk [vmem:[#allocation2 + $0x39] sm:$0xff] %vm226_vm1, %v6758_v24  ;;  %v404_v36 = vld [vmem:[#allocation2 + $0x20] sm:$0xff]  ;;  %v6787_v38 = vpack.c.bf16 %v453_v35, %v452_v33  ;;  %v6893_v35 = vld [vmem:[%s6714_s8 + $0x50] sm:$0xff] }
  0x8a   : > { %387 = vst.msk [vmem:[#allocation2 + $0xf1] sm:$0xff] %vm226_vm1, %v6763_v25  ;;  %v6789_v39 = vpack.c.bf16 %v404_v36, %v403_v34  ;;  %v468_v43 = vld [vmem:[#allocation2 + $0xd9] sm:$0xff] }
  0x8b   : > { %388 = vst.msk [vmem:[#allocation2 + $0xf9] sm:$0xff] %vm226_vm1, %v6768_v26  ;;  %5785 = vmatmul.msk.bf16.gmra.mxu0 %vm226_vm1, %v6787_v38  ;;  %v419_v45 = vld [vmem:[#allocation2 + $0xd8] sm:$0xff] }
  0x8c   : > { %9321 = vst [vmem:[#allocation14_spill] sm:$0xff] %v6781_v37  ;;  %5801 = vmatmul.msk.bf16.gmra.mxu1 %vm226_vm1, %v6789_v39  ;;  %v469_v44 = vld [vmem:[#allocation2 + $0xe1] sm:$0xff]  ;;  %v6900_v36 = vld [vmem:[%s6714_s8 + $0x58] sm:$0xff] }
  0x8d   : > { %9322 = vst [vmem:[#allocation15_spill] sm:$0xff] %v6792_v40  ;;  %v420_v46 = vld [vmem:[#allocation2 + $0xe0] sm:$0xff]  ;;  %v6812_v51 = vpack.c.bf16 %v469_v44, %v468_v43  ;;  %v6911_v43 = vld [vmem:[%s6714_s8 + $0xd0] sm:$0xff]  ;;  %v6914_v44 = vld [vmem:[%s6714_s8 + $0xd8] sm:$0xff] }
  0x8e   : > { %373 = vst.msk [vmem:[#allocation2 + $0x49] sm:$0xff] %vm226_vm1, %v6781_v37  ;;  %v454_v47 = vld [vmem:[#allocation2 + $0x31] sm:$0xff]  ;;  %v6814_v52 = vpack.c.bf16 %v420_v46, %v419_v45  ;;  %v1461_v37 = vld [vmem:[#allocation2 + $0xc2] sm:$0xff]  ;;  %v1463_v20 = vld [vmem:[#allocation2 + $0xda] sm:$0xff] }
  0x8f   : > { %374 = vst.msk [vmem:[#allocation2 + $0x51] sm:$0xff] %vm226_vm1, %v6792_v40  ;;  %v405_v49 = vld [vmem:[#allocation2 + $0x30] sm:$0xff] }
  0x90   : > { %9323 = vst [vmem:[#allocation16_spill] sm:$0xff] %v6803_v41  ;;  %v455_v48 = vld [vmem:[#allocation2 + $0x39] sm:$0xff] }
  0x91   : > { %9324 = vst [vmem:[#allocation17_spill] sm:$0xff] %v6806_v42  ;;  %v406_v50 = vld [vmem:[#allocation2 + $0x38] sm:$0xff]  ;;  %v6816_v53 = vpack.c.bf16 %v455_v48, %v454_v47  ;;  %v421_v61 = vld [vmem:[#allocation2 + $0xf0] sm:$0xff] }
  0x92   : > { %389 = vst.msk [vmem:[#allocation2 + $0x109] sm:$0xff] %vm226_vm1, %v6803_v41  ;;  %v6818_v54 = vpack.c.bf16 %v406_v50, %v405_v49  ;;  %v470_v59 = vld [vmem:[#allocation2 + $0xf1] sm:$0xff]  ;;  %v471_v60 = vld [vmem:[#allocation2 + $0xf9] sm:$0xff] }
  0x93   : > { %390 = vst.msk [vmem:[#allocation2 + $0x111] sm:$0xff] %vm226_vm1, %v6806_v42  ;;  %v422_v62 = vld [vmem:[#allocation2 + $0xf8] sm:$0xff]  ;;  %v6848_v3 = vpack.c.bf16 %v471_v60, %v470_v59 }
  0x94   : > { %9325 = vst [vmem:[#allocation18_spill] sm:$0xff] %v6821_v55  ;;  %v6850_v4 = vpack.c.bf16 %v422_v62, %v421_v61 }
  0x95   : > { %9326 = vst [vmem:[#allocation19_spill] sm:$0xff] %v6828_v56  ;;  %v456_v63 = vld [vmem:[#allocation2 + $0x49] sm:$0xff] }
  0x96   : > { %375 = vst.msk [vmem:[#allocation2 + $0x61] sm:$0xff] %vm226_vm1, %v6821_v55  ;;  %v457_v0 = vld [vmem:[#allocation2 + $0x51] sm:$0xff]  ;;  %v407_v1 = vld [vmem:[#allocation2 + $0x48] sm:$0xff] }
  0x97   : > { %5793 = vmatmul.msk.bf16.gmra.mxu2 %vm226_vm1, %v6812_v51  ;;  %376 = vst.msk [vmem:[#allocation2 + $0x69] sm:$0xff] %vm226_vm1, %v6828_v56  ;;  %v408_v2 = vld [vmem:[#allocation2 + $0x50] sm:$0xff]  ;;  %v6852_v5 = vpack.c.bf16 %v457_v0, %v456_v63 }
  0x98   : > { %5809 = vmatmul.msk.bf16.gmra.mxu3 %vm226_vm1, %v6814_v52  ;;  %9327 = vst [vmem:[#allocation20_spill] sm:$0xff] %v6839_v57  ;;  %v6854_v6 = vpack.c.bf16 %v408_v2, %v407_v1  ;;  %v6929_v1 = vld [vmem:[%s6714_s8 + $0x60] sm:$0xff]  ;;  %v6936_v2 = vld [vmem:[%s6714_s8 + $0x68] sm:$0xff] }
  0x99   : > { %9328 = vst [vmem:[#allocation21_spill] sm:$0xff] %v6842_v58  ;;  %v472_v11 = vld [vmem:[#allocation2 + $0x109] sm:$0xff] }
  0x9a   : > { %391 = vst.msk [vmem:[#allocation2 + $0x121] sm:$0xff] %vm226_vm1, %v6839_v57  ;;  %v473_v12 = vld [vmem:[#allocation2 + $0x111] sm:$0xff]  ;;  %v423_v13 = vld [vmem:[#allocation2 + $0x108] sm:$0xff] }
  0x9b   : > { %5786 = vmatmul.msk.bf16.gmra.mxu0 %vm226_vm1, %v6816_v53  ;;  %392 = vst.msk [vmem:[#allocation2 + $0x129] sm:$0xff] %vm226_vm1, %v6842_v58  ;;  %v424_v14 = vld [vmem:[#allocation2 + $0x110] sm:$0xff]  ;;  %v6884_v29 = vpack.c.bf16 %v473_v12, %v472_v11  ;;  %v6947_v11 = vld [vmem:[%s6714_s8 + $0xe0] sm:$0xff]  ;;  %v6950_v12 = vld [vmem:[%s6714_s8 + $0xe8] sm:$0xff] }
  0x9c   : > { %5802 = vmatmul.msk.bf16.gmra.mxu1 %vm226_vm1, %v6818_v54  ;;  %9329 = vst [vmem:[#allocation22_spill] sm:$0xff] %v6857_v7  ;;  %v6886_v30 = vpack.c.bf16 %v424_v14, %v423_v13  ;;  %v1451_v25 = vld [vmem:[#allocation2 + $0x4a] sm:$0xff] }
  0x9d   : > { %9330 = vst [vmem:[#allocation23_spill] sm:$0xff] %v6864_v8  ;;  %v458_v15 = vld [vmem:[#allocation2 + $0x61] sm:$0xff] }
  0x9e   : > { %377 = vst.msk [vmem:[#allocation2 + $0x79] sm:$0xff] %vm226_vm1, %v6857_v7  ;;  %v459_v16 = vld [vmem:[#allocation2 + $0x69] sm:$0xff]  ;;  %v409_v27 = vld [vmem:[#allocation2 + $0x60] sm:$0xff] }
  0x9f   : > { %378 = vst.msk [vmem:[#allocation2 + $0x81] sm:$0xff] %vm226_vm1, %v6864_v8  ;;  %v410_v28 = vld [vmem:[#allocation2 + $0x68] sm:$0xff]  ;;  %v6888_v33 = vpack.c.bf16 %v459_v16, %v458_v15 }
  0xa0   : > { %9331 = vst [vmem:[#allocation24_spill] sm:$0xff] %v6875_v9  ;;  %v6890_v34 = vpack.c.bf16 %v410_v28, %v409_v27  ;;  %v1453_v21 = vld [vmem:[#allocation2 + $0x62] sm:$0xff] }
  0xa1   : > { %9332 = vst [vmem:[#allocation25_spill] sm:$0xff] %v6878_v10  ;;  %v474_v45 = vld [vmem:[#allocation2 + $0x121] sm:$0xff] }
  0xa2   : > { %393 = vst.msk [vmem:[#allocation2 + $0x139] sm:$0xff] %vm226_vm1, %v6875_v9  ;;  %v475_v46 = vld [vmem:[#allocation2 + $0x129] sm:$0xff]  ;;  %v425_v47 = vld [vmem:[#allocation2 + $0x120] sm:$0xff] }
  0xa3   : > { %394 = vst.msk [vmem:[#allocation2 + $0x141] sm:$0xff] %vm226_vm1, %v6878_v10  ;;  %v426_v48 = vld [vmem:[#allocation2 + $0x128] sm:$0xff]  ;;  %v6920_v61 = vpack.c.bf16 %v475_v46, %v474_v45 }
  0xa4   : > { %9333 = vst [vmem:[#allocation26_spill] sm:$0xff] %v6893_v35  ;;  %v6922_v62 = vpack.c.bf16 %v426_v48, %v425_v47 }
  0xa5   : > { %9334 = vst [vmem:[#allocation27_spill] sm:$0xff] %v6900_v36  ;;  %v460_v49 = vld [vmem:[#allocation2 + $0x79] sm:$0xff] }
  0xa6   : > { %379 = vst.msk [vmem:[#allocation2 + $0x91] sm:$0xff] %vm226_vm1, %v6893_v35  ;;  %v461_v50 = vld [vmem:[#allocation2 + $0x81] sm:$0xff]  ;;  %v411_v59 = vld [vmem:[#allocation2 + $0x78] sm:$0xff] }
  0xa7   : > { %5794 = vmatmul.msk.bf16.gmra.mxu2 %vm226_vm1, %v6848_v3  ;;  %380 = vst.msk [vmem:[#allocation2 + $0x99] sm:$0xff] %vm226_vm1, %v6900_v36  ;;  %v412_v60 = vld [vmem:[#allocation2 + $0x80] sm:$0xff]  ;;  %v6924_v63 = vpack.c.bf16 %v461_v50, %v460_v49 }
  0xa8   : > { %5810 = vmatmul.msk.bf16.gmra.mxu3 %vm226_vm1, %v6850_v4  ;;  %9335 = vst [vmem:[#allocation28_spill] sm:$0xff] %v6911_v43  ;;  %v6926_v0 = vpack.c.bf16 %v412_v60, %v411_v59 }
  0xa9   : > { %9336 = vst [vmem:[#allocation29_spill] sm:$0xff] %v6914_v44  ;;  %v476_v13 = vld [vmem:[#allocation2 + $0x139] sm:$0xff] }
  0xaa   : > { %395 = vst.msk [vmem:[#allocation2 + $0x151] sm:$0xff] %vm226_vm1, %v6911_v43  ;;  %v477_v14 = vld [vmem:[#allocation2 + $0x141] sm:$0xff]  ;;  %v427_v15 = vld [vmem:[#allocation2 + $0x138] sm:$0xff]  ;;  %v701_v43 = vpop.f32.mrf.mxu1 }
  0xab   : > { %5787 = vmatmul.msk.bf16.gmra.mxu0 %vm226_vm1, %v6852_v5  ;;  %396 = vst.msk [vmem:[#allocation2 + $0x159] sm:$0xff] %vm226_vm1, %v6914_v44  ;;  %v428_v16 = vld [vmem:[#allocation2 + $0x140] sm:$0xff]  ;;  %v6956_v47 = vpack.c.bf16 %v477_v14, %v476_v13  ;;  %v561_v44 = vpop.f32.mrf.mxu0 }
  0xac   : > { %5803 = vmatmul.msk.bf16.gmra.mxu1 %vm226_vm1, %v6854_v6  ;;  %9337 = vst [vmem:[#allocation30_spill] sm:$0xff] %v6929_v1  ;;  %v6958_v48 = vpack.c.bf16 %v428_v16, %v427_v15  ;;  %v6984_v10 = vadd.f32 %v701_v43, %v561_v44  ;;  %v5867_v43 = vld [vmem:[%s9262_s1 + $0x14] sm:$0xf]  ;;  %v5918_v44 = vld [vmem:[%s9262_s1 + $0x20] sm:$0xf] }
  0xad   : > { %9338 = vst [vmem:[#allocation31_spill] sm:$0xff] %v6936_v2  ;;  %v462_v27 = vld [vmem:[#allocation2 + $0x91] sm:$0xff] }
  0xae   : > { %381 = vst.msk [vmem:[#allocation2 + $0xa9] sm:$0xff] %vm226_vm1, %v6929_v1  ;;  %v463_v28 = vld [vmem:[#allocation2 + $0x99] sm:$0xff]  ;;  %v413_v45 = vld [vmem:[#allocation2 + $0x90] sm:$0xff] }
  0xaf   : > { %382 = vst.msk [vmem:[#allocation2 + $0xb1] sm:$0xff] %vm226_vm1, %v6936_v2  ;;  %v414_v46 = vld [vmem:[#allocation2 + $0x98] sm:$0xff]  ;;  %v6960_v49 = vpack.c.bf16 %v463_v28, %v462_v27 }
  0xb0   : > { %9339 = vst [vmem:[#allocation32_spill] sm:$0xff] %v6947_v11  ;;  %v6962_v50 = vpack.c.bf16 %v414_v46, %v413_v45  ;;  %v1455_v2 = vld [vmem:[#allocation2 + $0x7a] sm:$0xff]  ;;  %v1457_v35 = vld [vmem:[#allocation2 + $0x92] sm:$0xff] }
  0xb1   : > { %9340 = vst [vmem:[#allocation33_spill] sm:$0xff] %v6950_v12  ;;  %v478_v59 = vld [vmem:[#allocation2 + $0x151] sm:$0xff] }
  0xb2   : > { %397 = vst.msk [vmem:[#allocation2 + $0x169] sm:$0xff] %vm226_vm1, %v6947_v11  ;;  %v479_v60 = vld [vmem:[#allocation2 + $0x159] sm:$0xff]  ;;  %v429_v13 = vld [vmem:[#allocation2 + $0x150] sm:$0xff] }
  0xb3   : > { %398 = vst.msk [vmem:[#allocation2 + $0x171] sm:$0xff] %vm226_vm1, %v6950_v12  ;;  %v430_v14 = vld [vmem:[#allocation2 + $0x158] sm:$0xff]  ;;  %v6972_v45 = vpack.c.bf16 %v479_v60, %v478_v59 }
  0xb4   : > { %v6974_v46 = vpack.c.bf16 %v430_v14, %v429_v13  ;;  %v5884_v59 = vld [vmem:[%s9262_s1 + $0x18] sm:$0xf]  ;;  %v5901_v60 = vld [vmem:[%s9262_s1 + $0x1c] sm:$0xf] }
  0xb5   : > { %v464_v15 = vld [vmem:[#allocation2 + $0xa9] sm:$0xff]  ;;  %v1769_v13 = vsel %vm548_vm0, %v5884_v59, 0  ;;  %v1991_v14 = vsel %vm548_vm0, %v5901_v60, 0 }
  0xb6   : > { %v465_v16 = vld [vmem:[#allocation2 + $0xb1] sm:$0xff]  ;;  %v415_v27 = vld [vmem:[#allocation2 + $0xa8] sm:$0xff]  ;;  %1778 = vmatpush.bf16.msra.mxu2 %v1769_v13  ;;  %2000 = vmatpush.bf16.msra.mxu3 %v1991_v14  ;;  %v1447_v13 = vld [vmem:[#allocation2 + $0x1a] sm:$0xff] }
  0xb7   : > { %5795 = vmatmul.msk.bf16.gmra.mxu2 %vm226_vm1, %v6884_v29  ;;  %v416_v28 = vld [vmem:[#allocation2 + $0xb0] sm:$0xff]  ;;  %v6976_v12 = vpack.c.bf16 %v465_v16, %v464_v15  ;;  %v1546_v15 = vsel %vm548_vm0, %v5867_v43, 0  ;;  %v2213_v16 = vsel %vm548_vm0, %v5918_v44, 0  ;;  %v1448_v14 = vld [vmem:[#allocation2 + $0x22] sm:$0xff]  ;;  %v7017_v43 = vpop.f32.mrf.mxu0  ;;  %v7019_v44 = vpop.f32.mrf.mxu1 }
  0xb8   : > { %5811 = vmatmul.msk.bf16.gmra.mxu3 %vm226_vm1, %v6886_v30  ;;  %v6978_v11 = vpack.c.bf16 %v416_v28, %v415_v27  ;;  %1555 = vmatpush.bf16.msrb.mxu1 %v1546_v15  ;;  %v1479_v57 = vpack.c.bf16 %v1448_v14, %v1447_v13  ;;  %v781_v15 = vld [vmem:[#allocation2 + $0x2] sm:$0xff]  ;;  %v1459_v56 = vld [vmem:[#allocation2 + $0xaa] sm:$0xff] }
  0xb9   : > { %2222 = vmatpush.bf16.msra.mxu0 %v2213_v16  ;;  %v480_v27 = vld [vmem:[#allocation2 + $0x169] sm:$0xff] }
  0xba   : > { %v481_v28 = vld [vmem:[#allocation2 + $0x171] sm:$0xff]  ;;  %v431_v59 = vld [vmem:[#allocation2 + $0x168] sm:$0xff] }
  0xbb   : > { %5788 = vmatmul.msk.bf16.gmra.mxu0 %vm226_vm1, %v6888_v33  ;;  %v432_v60 = vld [vmem:[#allocation2 + $0x170] sm:$0xff]  ;;  %v7006_v9 = vpack.c.bf16 %v481_v28, %v480_v27  ;;  %v1450_v28 = vld [vmem:[#allocation2 + $0x3a] sm:$0xff] }
  0xbc   : > { %5804 = vmatmul.msk.bf16.gmra.mxu1 %vm226_vm1, %v6890_v34  ;;  %v7008_v58 = vpack.c.bf16 %v432_v60, %v431_v59  ;;  %v782_v16 = vld [vmem:[#allocation2 + $0xa] sm:$0xff]  ;;  %v1449_v27 = vld [vmem:[#allocation2 + $0x32] sm:$0xff] }
  0xbd   : > { %v813_v59 = vpack.c.bf16 %v782_v16, %v781_v15  ;;  %v7021_v60 = vpack.c.bf16 %v1450_v28, %v1449_v27 }
  0xc7   : > { %5796 = vmatmul.msk.bf16.gmra.mxu2 %vm226_vm1, %v6920_v61 }
  0xc8   : > { %5812 = vmatmul.msk.bf16.gmra.mxu3 %vm226_vm1, %v6922_v62 }
  0xcb   : > { %5789 = vmatmul.msk.bf16.gmra.mxu0 %vm226_vm1, %v6924_v63 }
  0xcc   : > { %5805 = vmatmul.msk.bf16.gmra.mxu1 %vm226_vm1, %v6926_v0 }
  0xd7   : > { %5797 = vmatmul.msk.bf16.gmra.mxu2 %vm226_vm1, %v6956_v47 }
  0xd8   : > { %5813 = vmatmul.msk.bf16.gmra.mxu3 %vm226_vm1, %v6958_v48 }
  0xdb   : > { %5790 = vmatmul.msk.bf16.gmra.mxu0 %vm226_vm1, %v6960_v49 }
  0xdc   : > { %5806 = vmatmul.msk.bf16.gmra.mxu1 %vm226_vm1, %v6962_v50 }
  0xe7   : > { %5798 = vmatmul.msk.bf16.gmra.mxu2 %vm226_vm1, %v6972_v45 }
  0xe8   : > { %5814 = vmatmul.msk.bf16.gmra.mxu3 %vm226_vm1, %v6974_v46 }
  0xeb   : > { %5791 = vmatmul.msk.bf16.gmra.mxu0 %vm226_vm1, %v6976_v12 }
  0xec   : > { %5807 = vmatmul.msk.bf16.gmra.mxu1 %vm226_vm1, %v6978_v11 }
  0xf7   : > { %5799 = vmatmul.msk.bf16.gmra.mxu2 %vm226_vm1, %v7006_v9 }
  0xf8   : > { %5815 = vmatmul.msk.bf16.gmra.mxu3 %vm226_vm1, %v7008_v58 }
  0xfb   : > { %5851 = vmatmul.msk.bf16.vlgmr.msrb.gmra.mxu0 %vm226_vm1, %v6787_v38 }
  0xfc   : > { %5868 = vmatmul.msk.bf16.vlgmr.msrb.gmra.mxu1 %vm226_vm1, %v1479_v57 }
 0x107   : > { %5817 = vmatmul.msk.bf16.vlgmr.msrb.gmra.mxu2 %vm226_vm1, %v813_v59 }
 0x108   : > { %v566_v13 = vpop.f32.mrf.mxu0  ;;  %5834 = vmatmul.msk.bf16.vlgmr.msrb.gmra.mxu3 %vm226_vm1, %v6789_v39  ;;  %v1452_v39 = vld [vmem:[#allocation2 + $0x52] sm:$0xff] }
 0x109   : > { %v706_v14 = vpop.f32.mrf.mxu1 }
 0x10a   : > { %v7026_v38 = vadd.f32 %v706_v14, %v566_v13  ;;  %v601_v42 = vpop.f32.mrf.mxu2  ;;  %v7038_v14 = vpack.c.bf16 %v1452_v39, %v1451_v25 }
 0x10b   : > { %5852 = vmatmul.msk.bf16.gmra.mxu0 %vm226_vm1, %v6816_v53  ;;  %v741_v41 = vpop.f32.mrf.mxu3 }
 0x10c   : > { %5869 = vmatmul.msk.bf16.gmra.mxu1 %vm226_vm1, %v7021_v60  ;;  %v7032_v15 = vadd.f32 %v741_v41, %v601_v42 }
 0x110   : > { %v568_v16 = vpop.f32.mrf.mxu0 }
 0x111   : > { %v708_v27 = vpop.f32.mrf.mxu1 }
 0x112   : > { %v7034_v28 = vadd.f32 %v708_v27, %v568_v16  ;;  %v603_v59 = vpop.f32.mrf.mxu2 }
 0x113   : > { %v743_v26 = vpop.f32.mrf.mxu3 }
 0x114   : > { %v7036_v13 = vadd.f32 %v743_v26, %v603_v59 }
 0x117   : > { %5818 = vmatmul.msk.bf16.gmra.mxu2 %vm226_vm1, %v1479_v57 }
 0x118   : > { %v571_v53 = vpop.f32.mrf.mxu0  ;;  %5835 = vmatmul.msk.bf16.gmra.mxu3 %vm226_vm1, %v6818_v54  ;;  %v1454_v54 = vld [vmem:[#allocation2 + $0x6a] sm:$0xff] }
 0x119   : > { %v711_v22 = vpop.f32.mrf.mxu1 }
 0x11a   : > { %v7043_v41 = vadd.f32 %v711_v22, %v571_v53  ;;  %v606_v42 = vpop.f32.mrf.mxu2  ;;  %v7055_v53 = vpack.c.bf16 %v1454_v54, %v1453_v21 }
 0x11b   : > { %5853 = vmatmul.msk.bf16.gmra.mxu0 %vm226_vm1, %v6852_v5  ;;  %v746_v26 = vpop.f32.mrf.mxu3 }
 0x11c   : > { %5870 = vmatmul.msk.bf16.gmra.mxu1 %vm226_vm1, %v7038_v14  ;;  %v7049_v16 = vadd.f32 %v746_v26, %v606_v42 }
 0x120   : > { %v573_v25 = vpop.f32.mrf.mxu0 }
 0x121   : > { %v713_v27 = vpop.f32.mrf.mxu1 }
 0x122   : > { %v7051_v59 = vadd.f32 %v713_v27, %v573_v25  ;;  %v608_v57 = vpop.f32.mrf.mxu2 }
 0x123   : > { %v748_v39 = vpop.f32.mrf.mxu3 }
 0x124   : > { %v7053_v22 = vadd.f32 %v748_v39, %v608_v57 }
 0x127   : > { %5819 = vmatmul.msk.bf16.gmra.mxu2 %vm226_vm1, %v7021_v60 }
 0x128   : > { %v576_v5 = vpop.f32.mrf.mxu0  ;;  %5836 = vmatmul.msk.bf16.gmra.mxu3 %vm226_vm1, %v6854_v6  ;;  %v1456_v6 = vld [vmem:[#allocation2 + $0x82] sm:$0xff] }
 0x129   : > { %v716_v18 = vpop.f32.mrf.mxu1 }
 0x12a   : > { %v7061_v42 = vadd.f32 %v716_v18, %v576_v5  ;;  %v611_v26 = vpop.f32.mrf.mxu2  ;;  %v7073_v5 = vpack.c.bf16 %v1456_v6, %v1455_v2 }
 0x12b   : > { %5854 = vmatmul.msk.bf16.gmra.mxu0 %vm226_vm1, %v6888_v33  ;;  %v751_v25 = vpop.f32.mrf.mxu3 }
 0x12c   : > { %5871 = vmatmul.msk.bf16.gmra.mxu1 %vm226_vm1, %v7055_v53  ;;  %v7067_v21 = vadd.f32 %v751_v25, %v611_v26 }
 0x130   : > { %v578_v27 = vpop.f32.mrf.mxu0 }
 0x131   : > { %v718_v57 = vpop.f32.mrf.mxu1 }
 0x132   : > { %v7069_v39 = vadd.f32 %v718_v57, %v578_v27  ;;  %v613_v54 = vpop.f32.mrf.mxu2 }
 0x133   : > { %v753_v17 = vpop.f32.mrf.mxu3 }
 0x134   : > { %v7071_v18 = vadd.f32 %v753_v17, %v613_v54 }
 0x137   : > { %5820 = vmatmul.msk.bf16.gmra.mxu2 %vm226_vm1, %v7038_v14 }
 0x138   : > { %v581_v33 = vpop.f32.mrf.mxu0  ;;  %5837 = vmatmul.msk.bf16.gmra.mxu3 %vm226_vm1, %v6890_v34  ;;  %v1458_v34 = vld [vmem:[#allocation2 + $0x9a] sm:$0xff] }
 0x139   : > { %v721_v1 = vpop.f32.mrf.mxu1 }
 0x13a   : > { %v7079_v26 = vadd.f32 %v721_v1, %v581_v33  ;;  %v616_v17 = vpop.f32.mrf.mxu2  ;;  %v7091_v33 = vpack.c.bf16 %v1458_v34, %v1457_v35 }
 0x13b   : > { %5855 = vmatmul.msk.bf16.gmra.mxu0 %vm226_vm1, %v6924_v63  ;;  %v756_v25 = vpop.f32.mrf.mxu3 }
 0x13c   : > { %5872 = vmatmul.msk.bf16.gmra.mxu1 %vm226_vm1, %v7073_v5  ;;  %v7085_v2 = vadd.f32 %v756_v25, %v616_v17 }
 0x140   : > { %v583_v27 = vpop.f32.mrf.mxu0 }
 0x141   : > { %v723_v57 = vpop.f32.mrf.mxu1 }
 0x142   : > { %v7087_v54 = vadd.f32 %v723_v57, %v583_v27  ;;  %v618_v6 = vpop.f32.mrf.mxu2 }
 0x143   : > { %v758_v36 = vpop.f32.mrf.mxu3 }
 0x144   : > { %v7089_v1 = vadd.f32 %v758_v36, %v618_v6 }
 0x146   : > { %9341 = vst [vmem:[#allocation34_spill] sm:$0xff] %v7089_v1 }
 0x147   : > { %5821 = vmatmul.msk.bf16.gmra.mxu2 %vm226_vm1, %v7055_v53 }
 0x148   : > { %v586_v63 = vpop.f32.mrf.mxu0  ;;  %5838 = vmatmul.msk.bf16.gmra.mxu3 %vm226_vm1, %v6926_v0  ;;  %v1460_v0 = vld [vmem:[#allocation2 + $0xb2] sm:$0xff] }
 0x149   : > { %v726_v8 = vpop.f32.mrf.mxu1 }
 0x14a   : > { %v7097_v17 = vadd.f32 %v726_v8, %v586_v63  ;;  %v621_v36 = vpop.f32.mrf.mxu2  ;;  %v7109_v63 = vpack.c.bf16 %v1460_v0, %v1459_v56 }
 0x14b   : > { %5856 = vmatmul.msk.bf16.gmra.mxu0 %vm226_vm1, %v6960_v49  ;;  %v761_v25 = vpop.f32.mrf.mxu3 }
 0x14c   : > { %5873 = vmatmul.msk.bf16.gmra.mxu1 %vm226_vm1, %v7091_v33  ;;  %v7103_v35 = vadd.f32 %v761_v25, %v621_v36  ;;  %9344 = vst [vmem:[#allocation37_spill] sm:$0xff] %v7109_v63 }
 0x14e   : > { %9342 = vst [vmem:[#allocation35_spill] sm:$0xff] %v7103_v35 }
 0x150   : > { %v588_v27 = vpop.f32.mrf.mxu0 }
 0x151   : > { %v728_v57 = vpop.f32.mrf.mxu1 }
 0x152   : > { %v7105_v6 = vadd.f32 %v728_v57, %v588_v27  ;;  %v623_v34 = vpop.f32.mrf.mxu2 }
 0x153   : > { %v763_v7 = vpop.f32.mrf.mxu3 }
 0x154   : > { %v7107_v8 = vadd.f32 %v763_v7, %v623_v34 }
 0x156   : > { %9343 = vst [vmem:[#allocation36_spill] sm:$0xff] %v7107_v8  ;;  %v1467_v8 = vld [vmem:[#allocation2 + $0x10a] sm:$0xff] }
 0x157   : > { %5822 = vmatmul.msk.bf16.gmra.mxu2 %vm226_vm1, %v7073_v5 }
 0x158   : > { %v591_v49 = vpop.f32.mrf.mxu0  ;;  %5839 = vmatmul.msk.bf16.gmra.mxu3 %vm226_vm1, %v6962_v50  ;;  %v1462_v50 = vld [vmem:[#allocation2 + $0xca] sm:$0xff] }
 0x159   : > { %v731_v55 = vpop.f32.mrf.mxu1 }
 0x15a   : > { %v7115_v36 = vadd.f32 %v731_v55, %v591_v49  ;;  %v626_v7 = vpop.f32.mrf.mxu2  ;;  %v7127_v49 = vpack.c.bf16 %v1462_v50, %v1461_v37 }
 0x15b   : > { %5857 = vmatmul.msk.bf16.gmra.mxu0 %vm226_vm1, %v6976_v12  ;;  %v766_v25 = vpop.f32.mrf.mxu3 }
 0x15c   : > { %5874 = vmatmul.msk.bf16.gmra.mxu1 %vm226_vm1, %v7109_v63  ;;  %v7121_v56 = vadd.f32 %v766_v25, %v626_v7  ;;  %9347 = vst [vmem:[#allocation40_spill] sm:$0xff] %v7127_v49 }
 0x15e   : > { %9345 = vst [vmem:[#allocation38_spill] sm:$0xff] %v7121_v56 }
 0x160   : > { %v593_v27 = vpop.f32.mrf.mxu0 }
 0x161   : > { %v733_v57 = vpop.f32.mrf.mxu1 }
 0x162   : > { %v7123_v34 = vadd.f32 %v733_v57, %v593_v27  ;;  %v628_v0 = vpop.f32.mrf.mxu2 }
 0x163   : > { %v768_v40 = vpop.f32.mrf.mxu3 }
 0x164   : > { %v7125_v55 = vadd.f32 %v768_v40, %v628_v0 }
 0x166   : > { %9346 = vst [vmem:[#allocation39_spill] sm:$0xff] %v7125_v55 }
 0x167   : > { %5823 = vmatmul.msk.bf16.gmra.mxu2 %vm226_vm1, %v7091_v33 }
 0x168   : > { %v596_v12 = vpop.f32.mrf.mxu0  ;;  %5840 = vmatmul.msk.bf16.gmra.mxu3 %vm226_vm1, %v6978_v11  ;;  %v1464_v11 = vld [vmem:[#allocation2 + $0xe2] sm:$0xff] }
 0x169   : > { %v736_v24 = vpop.f32.mrf.mxu1 }
 0x16a   : > { %v7133_v7 = vadd.f32 %v736_v24, %v596_v12  ;;  %v631_v40 = vpop.f32.mrf.mxu2  ;;  %v7145_v12 = vpack.c.bf16 %v1464_v11, %v1463_v20  ;;  %v1465_v11 = vld [vmem:[#allocation2 + $0xf2] sm:$0xff] }
 0x16b   : > { %5858 = vmatmul.msk.bf16.gmra.mxu0 %vm226_vm1, %v6774_v31  ;;  %v771_v25 = vpop.f32.mrf.mxu3 }
 0x16c   : > { %5875 = vmatmul.msk.bf16.gmra.mxu1 %vm226_vm1, %v7127_v49  ;;  %v7139_v37 = vadd.f32 %v771_v25, %v631_v40 }
 0x16e   : > { %9348 = vst [vmem:[#allocation41_spill] sm:$0xff] %v7139_v37 }
 0x170   : > { %v598_v27 = vpop.f32.mrf.mxu0 }
 0x171   : > { %v738_v57 = vpop.f32.mrf.mxu1 }
 0x172   : > { %v7141_v0 = vadd.f32 %v738_v57, %v598_v27  ;;  %v633_v50 = vpop.f32.mrf.mxu2 }
 0x173   : > { %v773_v23 = vpop.f32.mrf.mxu3 }
 0x174   : > { %v7143_v24 = vadd.f32 %v773_v23, %v633_v50 }
 0x176   : > { %9349 = vst [vmem:[#allocation42_spill] sm:$0xff] %v7143_v24  ;;  %v1466_v24 = vld [vmem:[#allocation2 + $0xfa] sm:$0xff] }
 0x177   : > { %5824 = vmatmul.msk.bf16.gmra.mxu2 %vm226_vm1, %v7109_v63  ;;  %v7159_v55 = vpack.c.bf16 %v1466_v24, %v1465_v11 }
 0x178   : > { %v1335_v31 = vpop.f32.mrf.mxu0  ;;  %5841 = vmatmul.msk.bf16.gmra.mxu3 %vm226_vm1, %v6776_v32 }
 0x179   : > { %v1557_v19 = vpop.f32.mrf.mxu1 }
 0x17a   : > { %v636_v40 = vpop.f32.mrf.mxu2 }
 0x17b   : > { %5859 = vmatmul.msk.bf16.gmra.mxu0 %vm226_vm1, %v6812_v51  ;;  %v776_v25 = vpop.f32.mrf.mxu3 }
 0x17c   : > { %5876 = vmatmul.msk.bf16.gmra.mxu1 %vm226_vm1, %v7145_v12  ;;  %v7155_v23 = vadd.f32 %v776_v25, %v636_v40 }
 0x17e   : > { %9350 = vst [vmem:[#allocation43_spill] sm:$0xff] %v7155_v23 }
 0x180   : > { %v1337_v20 = vpop.f32.mrf.mxu0 }
 0x181   : > { %v1559_v27 = vpop.f32.mrf.mxu1 }
 0x182   : > { %v638_v57 = vpop.f32.mrf.mxu2 }
 0x183   : > { %v778_v50 = vpop.f32.mrf.mxu3 }
 0x184   : > { %v7157_v37 = vadd.f32 %v778_v50, %v638_v57 }
 0x186   : > { %9351 = vst [vmem:[#allocation44_spill] sm:$0xff] %v7157_v37  ;;  %v704_v37 = vadd.f32 %v7019_v44, %v7017_v43 }
 0x187   : > { %5825 = vmatmul.msk.bf16.gmra.mxu2 %vm226_vm1, %v7127_v49 }
 0x188   : > { %v1340_v32 = vpop.f32.mrf.mxu0  ;;  %5842 = vmatmul.msk.bf16.gmra.mxu3 %vm226_vm1, %v6814_v52 }
 0x189   : > { %v1562_v56 = vpop.f32.mrf.mxu1 }
 0x18a   : > { %v891_v51 = vpop.f32.mrf.mxu2 }
 0x18b   : > { %5860 = vmatmul.msk.bf16.gmra.mxu0 %vm226_vm1, %v6848_v3  ;;  %v1113_v40 = vpop.f32.mrf.mxu3  ;;  %v971_v25 = vadd.f32 %v891_v51, %v6984_v10  ;;  %v1468_v3 = vld [vmem:[#allocation2 + $0x112] sm:$0xff]  ;;  %v5967_v10 = vld [vmem:[%s9264_s3 + $0x4] sm:$0xf] }
 0x18c   : > { %5877 = vmatmul.msk.bf16.gmra.mxu1 %vm226_vm1, %v7159_v55  ;;  %v7174_v1 = vpack.c.bf16 %v1468_v3, %v1467_v8 }
 0x18d   : > { %v1193_v24 = vadd.f32 %v1113_v40, %v971_v25 }
 0x18f   : > { %v1415_v11 = vadd.f32 %v1335_v31, %v1193_v24  ;;  %v3193_v31 = vsel %vm548_vm0, %v5967_v10, 0 }
 0x190   : > { %v1342_v57 = vpop.f32.mrf.mxu0  ;;  %3202 = vmatpush.bf16.msra.mxu1 %v3193_v31 }
 0x191   : > { %v1564_v50 = vpop.f32.mrf.mxu1  ;;  %v7172_v23 = vadd.f32 %v1557_v19, %v1415_v11 }
 0x192   : > { %v893_v52 = vpop.f32.mrf.mxu2 }
 0x193   : > { %v1115_v49 = vpop.f32.mrf.mxu3  ;;  %v972_v35 = vadd.f32 %v893_v52, %v704_v37 }
 0x195   : > { %v1194_v63 = vadd.f32 %v1115_v49, %v972_v35 }
 0x197   : > { %5826 = vmatmul.msk.bf16.gmra.mxu2 %vm226_vm1, %v7145_v12  ;;  %v1416_v19 = vadd.f32 %v1337_v20, %v1194_v63  ;;  %v1469_v20 = vld [vmem:[#allocation2 + $0x122] sm:$0xff] }
 0x198   : > { %v1345_v51 = vpop.f32.mrf.mxu0  ;;  %5843 = vmatmul.msk.bf16.gmra.mxu3 %vm226_vm1, %v6850_v4 }
 0x199   : > { %v1567_v40 = vpop.f32.mrf.mxu1  ;;  %v7184_v43 = vadd.f32 %v1559_v27, %v1416_v19  ;;  %v1470_v27 = vld [vmem:[#allocation2 + $0x12a] sm:$0xff] }
 0x19a   : > { %v896_v44 = vpop.f32.mrf.mxu2  ;;  %v7194_v3 = vpack.c.bf16 %v1470_v27, %v1469_v20 }
 0x19b   : > { %5861 = vmatmul.msk.bf16.gmra.mxu0 %vm226_vm1, %v6884_v29  ;;  %v1118_v35 = vpop.f32.mrf.mxu3  ;;  %v973_v8 = vadd.f32 %v896_v44, %v7026_v38 }
 0x19c   : > { %5878 = vmatmul.msk.bf16.gmra.mxu1 %vm226_vm1, %v7174_v1 }
 0x19d   : > { %v1195_v49 = vadd.f32 %v1118_v35, %v973_v8 }
 0x19f   : > { %v1417_v24 = vadd.f32 %v1340_v32, %v1195_v49 }
 0x1a0   : > { %v1347_v37 = vpop.f32.mrf.mxu0 }
 0x1a1   : > { %v1569_v25 = vpop.f32.mrf.mxu1  ;;  %v7191_v11 = vadd.f32 %v1562_v56, %v1417_v24 }
 0x1a2   : > { %v898_v4 = vpop.f32.mrf.mxu2 }
 0x1a3   : > { %v1120_v63 = vpop.f32.mrf.mxu3  ;;  %v974_v52 = vadd.f32 %v898_v4, %v7034_v28  ;;  %v1472_v4 = vld [vmem:[#allocation2 + $0x142] sm:$0xff] }
 0x1a5   : > { %v1196_v29 = vadd.f32 %v1120_v63, %v974_v52 }
 0x1a7   : > { %5827 = vmatmul.msk.bf16.gmra.mxu2 %vm226_vm1, %v7159_v55  ;;  %v1418_v38 = vadd.f32 %v1342_v57, %v1196_v29 }
 0x1a8   : > { %v1350_v10 = vpop.f32.mrf.mxu0  ;;  %5844 = vmatmul.msk.bf16.gmra.mxu3 %vm226_vm1, %v6886_v30 }
 0x1a9   : > { %v1572_v31 = vpop.f32.mrf.mxu1  ;;  %v7200_v56 = vadd.f32 %v1564_v50, %v1418_v38  ;;  %v1471_v50 = vld [vmem:[#allocation2 + $0x13a] sm:$0xff] }
 0x1aa   : > { %v901_v28 = vpop.f32.mrf.mxu2  ;;  %v7210_v20 = vpack.c.bf16 %v1472_v4, %v1471_v50 }
 0x1ab   : > { %5862 = vmatmul.msk.bf16.gmra.mxu0 %vm226_vm1, %v6920_v61  ;;  %v1123_v32 = vpop.f32.mrf.mxu3  ;;  %v975_v19 = vadd.f32 %v901_v28, %v7043_v41 }
 0x1ac   : > { %5879 = vmatmul.msk.bf16.gmra.mxu1 %vm226_vm1, %v7194_v3 }
 0x1ad   : > { %v1197_v44 = vadd.f32 %v1123_v32, %v975_v19 }
 0x1af   : > { %v1419_v49 = vadd.f32 %v1345_v51, %v1197_v44  ;;  %v1473_v44 = vld [vmem:[#allocation2 + $0x152] sm:$0xff] }
 0x1b0   : > { %v1352_v35 = vpop.f32.mrf.mxu0 }
 0x1b1   : > { %v1574_v8 = vpop.f32.mrf.mxu1  ;;  %v7207_v24 = vadd.f32 %v1567_v40, %v1419_v49 }
 0x1b2   : > { %v903_v30 = vpop.f32.mrf.mxu2 }
 0x1b3   : > { %v1125_v57 = vpop.f32.mrf.mxu3  ;;  %v976_v63 = vadd.f32 %v903_v30, %v7051_v59 }
 0x1b5   : > { %v1198_v61 = vadd.f32 %v1125_v57, %v976_v63  ;;  %v7229_v63 = vld [vmem:[%s6714_s8 + $0xf0] sm:$0xff] }
 0x1b6   : > { %9352 = vst [vmem:[#allocation45_spill] sm:$0xff] %v7229_v63 }
 0x1b7   : > { %5828 = vmatmul.msk.bf16.gmra.mxu2 %vm226_vm1, %v7174_v1  ;;  %v1420_v41 = vadd.f32 %v1347_v37, %v1198_v61  ;;  %399 = vst.msk [vmem:[#allocation2 + $0x181] sm:$0xff] %vm226_vm1, %v7229_v63 }
 0x1b8   : > { %v1355_v27 = vpop.f32.mrf.mxu0  ;;  %5845 = vmatmul.msk.bf16.gmra.mxu3 %vm226_vm1, %v6922_v62 }
 0x1b9   : > { %v1577_v52 = vpop.f32.mrf.mxu1  ;;  %v7216_v51 = vadd.f32 %v1569_v25, %v1420_v41 }
 0x1ba   : > { %v906_v59 = vpop.f32.mrf.mxu2 }
 0x1bb   : > { %5863 = vmatmul.msk.bf16.gmra.mxu0 %vm226_vm1, %v6956_v47  ;;  %v1128_v40 = vpop.f32.mrf.mxu3  ;;  %v977_v29 = vadd.f32 %v906_v59, %v7061_v42  ;;  %v1474_v47 = vld [vmem:[#allocation2 + $0x15a] sm:$0xff] }
 0x1bc   : > { %5880 = vmatmul.msk.bf16.gmra.mxu1 %vm226_vm1, %v7210_v20  ;;  %v1492_v57 = vpack.c.bf16 %v1474_v47, %v1473_v44  ;;  %v7232_v42 = vld [vmem:[%s6714_s8 + $0xf8] sm:$0xff] }
 0x1bd   : > { %v1199_v38 = vadd.f32 %v1128_v40, %v977_v29  ;;  %9353 = vst [vmem:[#allocation46_spill] sm:$0xff] %v7232_v42 }
 0x1be   : > { %400 = vst.msk [vmem:[#allocation2 + $0x189] sm:$0xff] %vm226_vm1, %v7232_v42 }
 0x1bf   : > { %v1421_v62 = vadd.f32 %v1350_v10, %v1199_v38 }
 0x1c0   : > { %v1357_v28 = vpop.f32.mrf.mxu0 }
 0x1c1   : > { %v7223_v32 = vpop.f32.mrf.mxu1  ;;  %v7225_v37 = vadd.f32 %v1572_v31, %v1421_v62 }
 0x1c2   : > { %v908_v25 = vpop.f32.mrf.mxu2 }
 0x1c3   : > { %v1130_v19 = vpop.f32.mrf.mxu3  ;;  %v978_v49 = vadd.f32 %v908_v25, %v7069_v39  ;;  %v1476_v25 = vld [vmem:[#allocation2 + $0x172] sm:$0xff] }
 0x1c5   : > { %v1200_v30 = vadd.f32 %v1130_v19, %v978_v49 }
 0x1c7   : > { %5829 = vmatmul.msk.bf16.gmra.mxu2 %vm226_vm1, %v7194_v3  ;;  %v1422_v10 = vadd.f32 %v1352_v35, %v1200_v30 }
 0x1c8   : > { %v1360_v50 = vpop.f32.mrf.mxu0  ;;  %5846 = vmatmul.msk.bf16.gmra.mxu3 %vm226_vm1, %v6958_v48 }
 0x1c9   : > { %v1582_v4 = vpop.f32.mrf.mxu1  ;;  %v7242_v39 = vadd.f32 %v1574_v8, %v1422_v10  ;;  %v1475_v8 = vld [vmem:[#allocation2 + $0x16a] sm:$0xff] }
 0x1ca   : > { %v911_v31 = vpop.f32.mrf.mxu2  ;;  %v1493_v44 = vpack.c.bf16 %v1476_v25, %v1475_v8 }
 0x1cb   : > { %5864 = vmatmul.msk.bf16.gmra.mxu0 %vm226_vm1, %v6972_v45  ;;  %v1133_v61 = vpop.f32.mrf.mxu3  ;;  %v979_v41 = vadd.f32 %v911_v31, %v7079_v26 }
 0x1cc   : > { %5881 = vmatmul.msk.bf16.gmra.mxu1 %vm226_vm1, %v1492_v57 }
 0x1cd   : > { %v1201_v59 = vadd.f32 %v1133_v61, %v979_v41 }
 0x1cf   : > { %v1423_v40 = vadd.f32 %v1355_v27, %v1201_v59  ;;  %v1255_v59 = vld [vmem:[#allocation2 + $0x181] sm:$0xff] }
 0x1d0   : > { %v1362_v48 = vpop.f32.mrf.mxu0 }
 0x1d1   : > { %v7248_v35 = vpop.f32.mrf.mxu1  ;;  %v7250_v29 = vadd.f32 %v1577_v52, %v1423_v40  ;;  %v1256_v40 = vld [vmem:[#allocation2 + $0x189] sm:$0xff] }
 0x1d2   : > { %v913_v38 = vpop.f32.mrf.mxu2  ;;  %v1272_v25 = vpack.c.bf16 %v1256_v40, %v1255_v59  ;;  %v1033_v59 = vld [vmem:[#allocation2 + $0x180] sm:$0xff] }
 0x1d3   : > { %v1135_v62 = vpop.f32.mrf.mxu3  ;;  %v980_v19 = vadd.f32 %v913_v38, %v7087_v54  ;;  %v1477_v38 = vld [vmem:[#allocation2 + $0x182] sm:$0xff] }
 0x1d5   : > { %v1202_v45 = vadd.f32 %v1135_v62, %v980_v19  ;;  %v1478_v62 = vld [vmem:[#allocation2 + $0x18a] sm:$0xff] }
 0x1d6   : > { %v1494_v19 = vpack.c.bf16 %v1478_v62, %v1477_v38 }
 0x1d7   : > { %5830 = vmatmul.msk.bf16.gmra.mxu2 %vm226_vm1, %v7210_v20  ;;  %v7257_v26 = vadd.f32 %v1357_v28, %v1202_v45 }
 0x1d8   : > { %v1365_v47 = vpop.f32.mrf.mxu0  ;;  %5847 = vmatmul.msk.bf16.gmra.mxu3 %vm226_vm1, %v6974_v46 }
 0x1d9   : > { %v1587_v49 = vpop.f32.mrf.mxu1 }
 0x1da   : > { %v916_v27 = vpop.f32.mrf.mxu2 }
 0x1db   : > { %5865 = vmatmul.msk.bf16.gmra.mxu0 %vm226_vm1, %v7006_v9  ;;  %v1138_v52 = vpop.f32.mrf.mxu3  ;;  %v981_v54 = vadd.f32 %v916_v27, %v7097_v17 }
 0x1dc   : > { %5882 = vmatmul.msk.bf16.gmra.mxu1 %vm226_vm1, %v1493_v44 }
 0x1dd   : > { %v1203_v30 = vadd.f32 %v1138_v52, %v981_v54 }
 0x1df   : > { %v1425_v61 = vadd.f32 %v1360_v50, %v1203_v30 }
 0x1e0   : > { %v1367_v10 = vpop.f32.mrf.mxu0 }
 0x1e1   : > { %v7263_v31 = vpop.f32.mrf.mxu1  ;;  %v7265_v41 = vadd.f32 %v1582_v4, %v1425_v61 }
 0x1e2   : > { %v918_v46 = vpop.f32.mrf.mxu2 }
 0x1e3   : > { %v1140_v28 = vpop.f32.mrf.mxu3  ;;  %v982_v9 = vadd.f32 %v918_v46, %v7105_v6 }
 0x1e5   : > { %v1204_v8 = vadd.f32 %v1140_v28, %v982_v9 }
 0x1e7   : > { %5831 = vmatmul.msk.bf16.gmra.mxu2 %vm226_vm1, %v1492_v57  ;;  %v7271_v50 = vadd.f32 %v1362_v48, %v1204_v8  ;;  %v1034_v57 = vld [vmem:[#allocation2 + $0x188] sm:$0xff] }
 0x1e8   : > { %v1370_v45 = vpop.f32.mrf.mxu0  ;;  %5848 = vmatmul.msk.bf16.gmra.mxu3 %vm226_vm1, %v7008_v58  ;;  %v1050_v40 = vpack.c.bf16 %v1034_v57, %v1033_v59 }
 0x1e9   : > { %v1592_v17 = vpop.f32.mrf.mxu1 }
 0x1ea   : > { %v921_v4 = vpop.f32.mrf.mxu2 }
 0x1eb   : > { %5866 = vmatmul.msk.bf16.gmra.mxu0 %vm226_vm1, %v1272_v25  ;;  %v1143_v27 = vpop.f32.mrf.mxu3  ;;  %v983_v6 = vadd.f32 %v921_v4, %v7115_v36 }
 0x1ec   : > { %5883 = vmatmul.msk.bf16.gmra.mxu1 %vm226_vm1, %v1494_v19 }
 0x1ed   : > { %v1205_v52 = vadd.f32 %v1143_v27, %v983_v6  ;;  %v1670_v27 = vld [vmem:[#allocation2 + $0x30] sm:$0xff]  ;;  %v1671_v6 = vld [vmem:[#allocation2 + $0x38] sm:$0xff] }
 0x1ef   : > { %v1427_v61 = vadd.f32 %v1365_v47, %v1205_v52  ;;  %v1892_v52 = vld [vmem:[#allocation2 + $0x31] sm:$0xff] }
 0x1f0   : > { %v1372_v54 = vpop.f32.mrf.mxu0 }
 0x1f1   : > { %v7276_v30 = vpop.f32.mrf.mxu1  ;;  %v7278_v46 = vadd.f32 %v1587_v49, %v1427_v61 }
 0x1f2   : > { %v923_v58 = vpop.f32.mrf.mxu2 }
 0x1f3   : > { %v1145_v48 = vpop.f32.mrf.mxu3  ;;  %v984_v28 = vadd.f32 %v923_v58, %v7123_v34 }
 0x1f5   : > { %v1206_v38 = vadd.f32 %v1145_v48, %v984_v28 }
 0x1f7   : > { %5832 = vmatmul.msk.bf16.gmra.mxu2 %vm226_vm1, %v1493_v44  ;;  %v7283_v36 = vadd.f32 %v1367_v10, %v1206_v38  ;;  %v1893_v44 = vld [vmem:[#allocation2 + $0x39] sm:$0xff] }
 0x1f8   : > { %v1375_v62 = vpop.f32.mrf.mxu0  ;;  %5849 = vmatmul.msk.bf16.gmra.mxu3 %vm226_vm1, %v1050_v40  ;;  %v1924_v58 = vpack.c.bf16 %v1893_v44, %v1892_v52 }
 0x1f9   : > { %v1597_v9 = vpop.f32.mrf.mxu1 }
 0x1fa   : > { %v926_v47 = vpop.f32.mrf.mxu2 }
 0x1fb   : > { %5919 = vmatmul.msk.bf16.vlgmr.msra.gmra.mxu0 %vm226_vm1, %v7021_v60  ;;  %v1148_v49 = vpop.f32.mrf.mxu3  ;;  %v985_v8 = vadd.f32 %v926_v47, %v7133_v7  ;;  %v1702_v60 = vpack.c.bf16 %v1671_v6, %v1670_v27  ;;  %v1894_v27 = vld [vmem:[#allocation2 + $0x49] sm:$0xff]  ;;  %v1895_v6 = vld [vmem:[#allocation2 + $0x51] sm:$0xff] }
 0x1fd   : > { %v1207_v25 = vadd.f32 %v1148_v49, %v985_v8  ;;  %v1672_v8 = vld [vmem:[#allocation2 + $0x48] sm:$0xff] }
 0x1ff   : > { %v1429_v4 = vadd.f32 %v1370_v45, %v1207_v25 }
 0x200   : > { %v1377_v19 = vpop.f32.mrf.mxu0 }
 0x201   : > { %v7288_v34 = vpop.f32.mrf.mxu1  ;;  %v7290_v61 = vadd.f32 %v1592_v17, %v1429_v4  ;;  %v1673_v4 = vld [vmem:[#allocation2 + $0x50] sm:$0xff] }
 0x202   : > { %v928_v10 = vpop.f32.mrf.mxu2 }
 0x203   : > { %v1150_v59 = vpop.f32.mrf.mxu3  ;;  %v986_v57 = vadd.f32 %v928_v10, %v7141_v0 }
 0x205   : > { %v1208_v48 = vadd.f32 %v1150_v59, %v986_v57  ;;  %v1925_v59 = vpack.c.bf16 %v1895_v6, %v1894_v27 }
 0x207   : > { %5885 = vmatmul.msk.bf16.vlgmr.msra.gmra.mxu2 %vm226_vm1, %v1702_v60  ;;  %v7295_v45 = vadd.f32 %v1372_v54, %v1208_v48 }
 0x208   : > { %v1380_v28 = vpop.f32.mrf.mxu0  ;;  %5902 = vmatmul.msk.bf16.vlgmr.msra.gmra.mxu3 %vm226_vm1, %v1924_v58 }
 0x209   : > { %v1602_v7 = vpop.f32.mrf.mxu1 }
 0x20a   : > { %v931_v17 = vpop.f32.mrf.mxu2 }
 0x20b   : > { %5920 = vmatmul.msk.bf16.gmra.mxu0 %vm226_vm1, %v7038_v14  ;;  %v1153_v40 = vpop.f32.mrf.mxu3  ;;  %v987_v38 = vadd.f32 %v931_v17, %v7032_v15  ;;  %v1703_v14 = vpack.c.bf16 %v1673_v4, %v1672_v8  ;;  %v1897_v8 = vld [vmem:[#allocation2 + $0x69] sm:$0xff] }
 0x20d   : > { %v1209_v47 = vadd.f32 %v1153_v40, %v987_v38  ;;  %v1674_v38 = vld [vmem:[#allocation2 + $0x60] sm:$0xff] }
 0x20f   : > { %v1431_v49 = vadd.f32 %v1375_v62, %v1209_v47  ;;  %v1675_v47 = vld [vmem:[#allocation2 + $0x68] sm:$0xff] }
 0x210   : > { %v1382_v0 = vpop.f32.mrf.mxu0 }
 0x211   : > { %v7300_v25 = vpop.f32.mrf.mxu1  ;;  %v7302_v52 = vadd.f32 %v1597_v9, %v1431_v49  ;;  %v1896_v49 = vld [vmem:[#allocation2 + $0x61] sm:$0xff] }
 0x212   : > { %v933_v54 = vpop.f32.mrf.mxu2 }
 0x213   : > { %v1155_v44 = vpop.f32.mrf.mxu3  ;;  %v988_v10 = vadd.f32 %v933_v54, %v7036_v13  ;;  %v1704_v54 = vpack.c.bf16 %v1675_v47, %v1674_v38  ;;  %v1899_v38 = vld [vmem:[#allocation2 + $0x81] sm:$0xff] }
 0x215   : > { %v1210_v57 = vadd.f32 %v1155_v44, %v988_v10 }
 0x217   : > { %5886 = vmatmul.msk.bf16.gmra.mxu2 %vm226_vm1, %v1703_v14  ;;  %v7307_v15 = vadd.f32 %v1377_v19, %v1210_v57 }
 0x218   : > { %v1385_v60 = vpop.f32.mrf.mxu0  ;;  %5903 = vmatmul.msk.bf16.gmra.mxu3 %vm226_vm1, %v1925_v59 }
 0x219   : > { %v1607_v62 = vpop.f32.mrf.mxu1 }
 0x21a   : > { %v936_v9 = vpop.f32.mrf.mxu2 }
 0x21b   : > { %5921 = vmatmul.msk.bf16.gmra.mxu0 %vm226_vm1, %v7055_v53  ;;  %v1158_v58 = vpop.f32.mrf.mxu3  ;;  %v989_v48 = vadd.f32 %v936_v9, %v7049_v16  ;;  %v1926_v53 = vpack.c.bf16 %v1897_v8, %v1896_v49 }
 0x21d   : > { %v1211_v17 = vadd.f32 %v1158_v58, %v989_v48  ;;  %v1676_v48 = vld [vmem:[#allocation2 + $0x78] sm:$0xff] }
 0x21f   : > { %v1433_v40 = vadd.f32 %v1380_v28, %v1211_v17  ;;  %v1677_v17 = vld [vmem:[#allocation2 + $0x80] sm:$0xff] }
 0x220   : > { %v1387_v13 = vpop.f32.mrf.mxu0 }
 0x221   : > { %v7312_v4 = vadd.f32 %v1602_v7, %v1433_v40  ;;  %v7315_v44 = vpop.f32.mrf.mxu1  ;;  %v1898_v40 = vld [vmem:[#allocation2 + $0x79] sm:$0xff] }
 0x222   : > { %v938_v27 = vpop.f32.mrf.mxu2 }
 0x223   : > { %v1160_v19 = vpop.f32.mrf.mxu3  ;;  %v990_v6 = vadd.f32 %v938_v27, %v7053_v22  ;;  %v1705_v27 = vpack.c.bf16 %v1677_v17, %v1676_v48 }
 0x225   : > { %v1212_v10 = vadd.f32 %v1160_v19, %v990_v6 }
 0x227   : > { %5887 = vmatmul.msk.bf16.gmra.mxu2 %vm226_vm1, %v1704_v54  ;;  %v7319_v16 = vadd.f32 %v1382_v0, %v1212_v10 }
 0x228   : > { %v1390_v14 = vpop.f32.mrf.mxu0  ;;  %5904 = vmatmul.msk.bf16.gmra.mxu3 %vm226_vm1, %v1926_v53 }
 0x229   : > { %v1612_v57 = vpop.f32.mrf.mxu1 }
 0x22a   : > { %v941_v28 = vpop.f32.mrf.mxu2 }
 0x22b   : > { %5922 = vmatmul.msk.bf16.gmra.mxu0 %vm226_vm1, %v7073_v5  ;;  %v1163_v7 = vpop.f32.mrf.mxu3  ;;  %v991_v59 = vadd.f32 %v941_v28, %v7067_v21  ;;  %v1927_v5 = vpack.c.bf16 %v1899_v38, %v1898_v40  ;;  %v9354_v38 = vld [vmem:[#allocation34_spill] sm:$0xff] }
 0x22d   : > { %v1213_v22 = vadd.f32 %v1163_v7, %v991_v59  ;;  %v1678_v7 = vld [vmem:[#allocation2 + $0x90] sm:$0xff]  ;;  %v1679_v59 = vld [vmem:[#allocation2 + $0x98] sm:$0xff] }
 0x22f   : > { %v1435_v58 = vadd.f32 %v1385_v60, %v1213_v22  ;;  %v1900_v22 = vld [vmem:[#allocation2 + $0x91] sm:$0xff] }
 0x230   : > { %v1392_v9 = vpop.f32.mrf.mxu0 }
 0x231   : > { %v7324_v47 = vadd.f32 %v1607_v62, %v1435_v58  ;;  %v7331_v60 = vpop.f32.mrf.mxu1  ;;  %v1901_v58 = vld [vmem:[#allocation2 + $0x99] sm:$0xff] }
 0x232   : > { %v943_v49 = vpop.f32.mrf.mxu2 }
 0x233   : > { %v1165_v0 = vpop.f32.mrf.mxu3  ;;  %v992_v8 = vadd.f32 %v943_v49, %v7071_v18 }
 0x235   : > { %v1214_v19 = vadd.f32 %v1165_v0, %v992_v8  ;;  %v1706_v0 = vpack.c.bf16 %v1679_v59, %v1678_v7  ;;  %v1680_v7 = vld [vmem:[#allocation2 + $0xa8] sm:$0xff]  ;;  %v1681_v59 = vld [vmem:[#allocation2 + $0xb0] sm:$0xff] }
 0x237   : > { %5888 = vmatmul.msk.bf16.gmra.mxu2 %vm226_vm1, %v1705_v27  ;;  %v7329_v21 = vadd.f32 %v1387_v13, %v1214_v19  ;;  %v9356_v19 = vld [vmem:[#allocation35_spill] sm:$0xff] }
 0x238   : > { %v1395_v6 = vpop.f32.mrf.mxu0  ;;  %5905 = vmatmul.msk.bf16.gmra.mxu3 %vm226_vm1, %v1927_v5 }
 0x239   : > { %v1617_v13 = vpop.f32.mrf.mxu1 }
 0x23a   : > { %v946_v62 = vpop.f32.mrf.mxu2 }
 0x23b   : > { %5923 = vmatmul.msk.bf16.gmra.mxu0 %vm226_vm1, %v7091_v33  ;;  %v1168_v54 = vpop.f32.mrf.mxu3  ;;  %v993_v53 = vadd.f32 %v946_v62, %v7085_v2  ;;  %v1928_v33 = vpack.c.bf16 %v1901_v58, %v1900_v22  ;;  %v1902_v22 = vld [vmem:[#allocation2 + $0xa9] sm:$0xff]  ;;  %v1903_v58 = vld [vmem:[#allocation2 + $0xb1] sm:$0xff] }
 0x23d   : > { %v1215_v18 = vadd.f32 %v1168_v54, %v993_v53 }
 0x23f   : > { %v1437_v28 = vadd.f32 %v1390_v14, %v1215_v18  ;;  %v9355_v14 = vld [vmem:[#allocation37_spill] sm:$0xff] }
 0x240   : > { %v1397_v10 = vpop.f32.mrf.mxu0 }
 0x241   : > { %v7336_v48 = vadd.f32 %v1612_v57, %v1437_v28  ;;  %v7346_v54 = vpop.f32.mrf.mxu1 }
 0x242   : > { %v948_v17 = vpop.f32.mrf.mxu2  ;;  %9357 = vst [vmem:[#allocation34_spill] sm:$0xff] %v7346_v54 }
 0x243   : > { %v1170_v40 = vpop.f32.mrf.mxu3  ;;  %v994_v49 = vadd.f32 %v948_v17, %v9354_v38  ;;  %v9358_v38 = vld [vmem:[#allocation36_spill] sm:$0xff] }
 0x245   : > { %v1216_v8 = vadd.f32 %v1170_v40, %v994_v49 }
 0x247   : > { %5889 = vmatmul.msk.bf16.gmra.mxu2 %vm226_vm1, %v1706_v0  ;;  %v7341_v2 = vadd.f32 %v1392_v9, %v1216_v8  ;;  %v1707_v0 = vpack.c.bf16 %v1681_v59, %v1680_v7  ;;  %v1682_v59 = vld [vmem:[#allocation2 + $0xc0] sm:$0xff] }
 0x248   : > { %v1400_v27 = vpop.f32.mrf.mxu0  ;;  %5906 = vmatmul.msk.bf16.gmra.mxu3 %vm226_vm1, %v1928_v33  ;;  %v1929_v33 = vpack.c.bf16 %v1903_v58, %v1902_v22  ;;  %v1683_v58 = vld [vmem:[#allocation2 + $0xc8] sm:$0xff] }
 0x24a   : > { %v951_v57 = vpop.f32.mrf.mxu2 }
 0x24b   : > { %5924 = vmatmul.msk.bf16.gmra.mxu0 %vm226_vm1, %v9355_v14  ;;  %v1173_v5 = vpop.f32.mrf.mxu3  ;;  %v995_v62 = vadd.f32 %v951_v57, %v9356_v19  ;;  %v1622_v14 = vpop.f32.mrf.mxu1 }
 0x24d   : > { %v1217_v53 = vadd.f32 %v1173_v5, %v995_v62  ;;  %v9359_v5 = vld [vmem:[#allocation40_spill] sm:$0xff]  ;;  %v9360_v62 = vld [vmem:[#allocation38_spill] sm:$0xff] }
 0x24f   : > { %v1439_v28 = vadd.f32 %v1395_v6, %v1217_v53 }
 0x250   : > { %v1402_v18 = vpop.f32.mrf.mxu0 }
 0x251   : > { %v7348_v17 = vadd.f32 %v1617_v13, %v1439_v28 }
 0x252   : > { %v953_v9 = vpop.f32.mrf.mxu2 }
 0x253   : > { %v1175_v40 = vpop.f32.mrf.mxu3  ;;  %v996_v49 = vadd.f32 %v953_v9, %v9358_v38  ;;  %v7358_v22 = vpop.f32.mrf.mxu1  ;;  %v1905_v38 = vld [vmem:[#allocation2 + $0xc9] sm:$0xff] }
 0x254   : > { %9361 = vst [vmem:[#allocation37_spill] sm:$0xff] %v7358_v22 }
 0x255   : > { %v1218_v8 = vadd.f32 %v1175_v40, %v996_v49  ;;  %v1904_v40 = vld [vmem:[#allocation2 + $0xc1] sm:$0xff] }
 0x256   : > { %v1930_v42 = vpack.c.bf16 %v1905_v38, %v1904_v40  ;;  %v1685_v40 = vld [vmem:[#allocation2 + $0xe0] sm:$0xff] }
 0x257   : > { %5890 = vmatmul.msk.bf16.gmra.mxu2 %vm226_vm1, %v1707_v0  ;;  %v7353_v6 = vadd.f32 %v1397_v10, %v1218_v8  ;;  %v1906_v38 = vld [vmem:[#allocation2 + $0xd9] sm:$0xff] }
 0x258   : > { %v1405_v57 = vpop.f32.mrf.mxu0  ;;  %5907 = vmatmul.msk.bf16.gmra.mxu3 %vm226_vm1, %v1929_v33  ;;  %v9362_v33 = vld [vmem:[#allocation39_spill] sm:$0xff] }
 0x25a   : > { %v956_v13 = vpop.f32.mrf.mxu2 }
 0x25b   : > { %5925 = vmatmul.msk.bf16.gmra.mxu0 %vm226_vm1, %v9359_v5  ;;  %v1178_v19 = vpop.f32.mrf.mxu3  ;;  %v997_v53 = vadd.f32 %v956_v13, %v9360_v62  ;;  %v1708_v5 = vpack.c.bf16 %v1683_v58, %v1682_v59  ;;  %v1627_v13 = vpop.f32.mrf.mxu1  ;;  %v9364_v62 = vld [vmem:[#allocation41_spill] sm:$0xff]  ;;  %v1684_v58 = vld [vmem:[#allocation2 + $0xd8] sm:$0xff] }
 0x25d   : > { %v1219_v28 = vadd.f32 %v1178_v19, %v997_v53 }
 0x25f   : > { %v1441_v7 = vadd.f32 %v1400_v27, %v1219_v28 }
 0x260   : > { %v1407_v9 = vpop.f32.mrf.mxu0 }
 0x261   : > { %v7360_v49 = vadd.f32 %v1622_v14, %v1441_v7 }
 0x262   : > { %v958_v10 = vpop.f32.mrf.mxu2 }
 0x263   : > { %v1180_v0 = vpop.f32.mrf.mxu3  ;;  %v998_v8 = vadd.f32 %v958_v10, %v9362_v33  ;;  %v1907_v10 = vld [vmem:[#allocation2 + $0xe1] sm:$0xff] }
 0x265   : > { %v1220_v63 = vadd.f32 %v1180_v0, %v998_v8  ;;  %v1709_v8 = vpack.c.bf16 %v1685_v40, %v1684_v58  ;;  %v1686_v40 = vld [vmem:[#allocation2 + $0xf0] sm:$0xff] }
 0x267   : > { %5891 = vmatmul.msk.bf16.gmra.mxu2 %vm226_vm1, %v1708_v5  ;;  %v7365_v27 = vadd.f32 %v1402_v18, %v1220_v63  ;;  %v9365_v18 = vld [vmem:[#allocation42_spill] sm:$0xff]  ;;  %v1931_v5 = vpack.c.bf16 %v1907_v10, %v1906_v38  ;;  %v1687_v38 = vld [vmem:[#allocation2 + $0xf8] sm:$0xff] }
 0x268   : > { %v1410_v54 = vpop.f32.mrf.mxu0  ;;  %5908 = vmatmul.msk.bf16.gmra.mxu3 %vm226_vm1, %v1930_v42  ;;  %v1908_v10 = vld [vmem:[#allocation2 + $0xf1] sm:$0xff] }
 0x269   : > { %9363 = vst [vmem:[#allocation35_spill] sm:$0xff] %v7365_v27 }
 0x26a   : > { %v961_v14 = vpop.f32.mrf.mxu2 }
 0x26b   : > { %5926 = vmatmul.msk.bf16.gmra.mxu0 %vm226_vm1, %v7145_v12  ;;  %v1183_v19 = vpop.f32.mrf.mxu3  ;;  %v999_v53 = vadd.f32 %v961_v14, %v9364_v62  ;;  %v7373_v12 = vpop.f32.mrf.mxu1 }
 0x26c   : > { %9366 = vst [vmem:[#allocation36_spill] sm:$0xff] %v7373_v12 }
 0x26d   : > { %v1221_v28 = vadd.f32 %v1183_v19, %v999_v53  ;;  %v9368_v19 = vld [vmem:[#allocation43_spill] sm:$0xff] }
 0x26f   : > { %v1443_v59 = vadd.f32 %v1405_v57, %v1221_v28 }
 0x270   : > { %v1412_v7 = vpop.f32.mrf.mxu0 }
 0x271   : > { %v7370_v0 = vadd.f32 %v1627_v13, %v1443_v59 }
 0x272   : > { %v963_v42 = vpop.f32.mrf.mxu2 }
 0x273   : > { %v1185_v63 = vpop.f32.mrf.mxu3  ;;  %v1000_v33 = vadd.f32 %v963_v42, %v9365_v18  ;;  %v1632_v28 = vpop.f32.mrf.mxu1  ;;  %v1909_v42 = vld [vmem:[#allocation2 + $0xf9] sm:$0xff] }
 0x275   : > { %v1222_v22 = vadd.f32 %v1185_v63, %v1000_v33 }
 0x277   : > { %5892 = vmatmul.msk.bf16.gmra.mxu2 %vm226_vm1, %v1709_v8  ;;  %v7377_v57 = vadd.f32 %v1407_v9, %v1222_v22  ;;  %v9370_v22 = vld [vmem:[#allocation44_spill] sm:$0xff]  ;;  %v1710_v8 = vpack.c.bf16 %v1687_v38, %v1686_v40 }
 0x278   : > { %v2224_v27 = vpop.f32.mrf.mxu0  ;;  %5909 = vmatmul.msk.bf16.gmra.mxu3 %vm226_vm1, %v1931_v5  ;;  %v7395_v40 = vld [vmem:[%s9263_s2] ss:$0 sm:$0xff] }
 0x279   : > { %9367 = vst [vmem:[#allocation40_spill] sm:$0xff] %v7377_v57 }
 0x27a   : > { %v966_v13 = vpop.f32.mrf.mxu2 }
 0x27b   : > { %5927 = vmatmul.msk.bf16.gmra.mxu0 %vm226_vm1, %v7159_v55  ;;  %v1188_v14 = vpop.f32.mrf.mxu3  ;;  %v1001_v62 = vadd.f32 %v966_v13, %v9368_v19  ;;  %v1932_v55 = vpack.c.bf16 %v1909_v42, %v1908_v10  ;;  %v3094_v19 = vld [vmem:[#allocation3 + $0x1] sm:$0xff]  ;;  %v1688_v10 = vld [vmem:[#allocation2 + $0x108] sm:$0xff] }
 0x27c   : > { %v1689_v42 = vld [vmem:[#allocation2 + $0x110] sm:$0xff] }
 0x27d   : > { %v1223_v53 = vadd.f32 %v1188_v14, %v1001_v62  ;;  %v3095_v62 = vld [vmem:[#allocation3 + $0x9] sm:$0xff] }
 0x27f   : > { %v1445_v58 = vadd.f32 %v1410_v54, %v1223_v53 }
 0x280   : > { %v2226_v59 = vpop.f32.mrf.mxu0 }
 0x281   : > { %v7382_v63 = vadd.f32 %v1632_v28, %v1445_v58  ;;  %v3126_v28 = vpack.c.bf16 %v3095_v62, %v3094_v19 }
 0x282   : > { %v968_v18 = vpop.f32.mrf.mxu2 }
 0x283   : > { %9369 = vst [vmem:[#allocation38_spill] sm:$0xff] %v7382_v63  ;;  %v1190_v9 = vpop.f32.mrf.mxu3  ;;  %v1002_v33 = vadd.f32 %v968_v18, %v9370_v22  ;;  %5968 = vmatmul.msk.bf16.vlgmr.msra.gmra.mxu1 %vm226_vm1, %v3126_v28  ;;  %v1911_v18 = vld [vmem:[#allocation2 + $0x111] sm:$0xff] }
 0x285   : > { %v1224_v5 = vadd.f32 %v1190_v9, %v1002_v33 }
 0x287   : > { %5893 = vmatmul.msk.bf16.gmra.mxu2 %vm226_vm1, %v1710_v8  ;;  %v7387_v13 = vadd.f32 %v1412_v7, %v1224_v5 }
 0x288   : > { %v2229_v12 = vpop.f32.mrf.mxu0  ;;  %5910 = vmatmul.msk.bf16.gmra.mxu3 %vm226_vm1, %v1932_v55  ;;  %v1711_v55 = vpack.c.bf16 %v1689_v42, %v1688_v10 }
 0x289   : > { %9371 = vst [vmem:[#allocation39_spill] sm:$0xff] %v7387_v13 }
 0x28a   : > { %v1780_v54 = vpop.f32.mrf.mxu2 }
 0x28b   : > { %5928 = vmatmul.msk.bf16.gmra.mxu0 %vm226_vm1, %v7174_v1  ;;  %v2002_v14 = vpop.f32.mrf.mxu3  ;;  %v1860_v53 = vadd.f32 %v1780_v54, %v7172_v23  ;;  %v1910_v1 = vld [vmem:[#allocation2 + $0x109] sm:$0xff] }
 0x28c   : > { %v1933_v5 = vpack.c.bf16 %v1911_v18, %v1910_v1  ;;  %v1690_v1 = vld [vmem:[#allocation2 + $0x120] sm:$0xff]  ;;  %v1691_v18 = vld [vmem:[#allocation2 + $0x128] sm:$0xff] }
 0x28d   : > { %v2082_v58 = vadd.f32 %v2002_v14, %v1860_v53 }
 0x28f   : > { %v2304_v38 = vadd.f32 %v2224_v27, %v2082_v58 }
 0x290   : > { %v2231_v7 = vpop.f32.mrf.mxu0 }
 0x291   : > { %v7399_v9 = vadd.f32 %v7395_v40, %v2304_v38 }
 0x292   : > { %v1782_v22 = vpop.f32.mrf.mxu2 }
 0x293   : > { %v2004_v23 = vpop.f32.mrf.mxu3  ;;  %v5935_v33 = vmul.f32 -1.442695, %v7399_v9  ;;  %v1861_v8 = vadd.f32 %v1782_v22, %v7184_v43  ;;  %v1912_v22 = vld [vmem:[#allocation2 + $0x121] sm:$0xff] }
 0x295   : > { %6168 = vpow2.f32 %v5935_v33  ;;  %v2083_v54 = vadd.f32 %v2004_v23, %v1861_v8  ;;  %v1913_v23 = vld [vmem:[#allocation2 + $0x129] sm:$0xff] }
 0x297   : > { %v2305_v27 = vadd.f32 %v2226_v59, %v2083_v54  ;;  %5894 = vmatmul.msk.bf16.gmra.mxu2 %vm226_vm1, %v1711_v55  ;;  %v1712_v54 = vpack.c.bf16 %v1691_v18, %v1690_v1 }
 0x298   : > { %v7403_v14 = vpop.f32.mrf.mxu0  ;;  %5911 = vmatmul.msk.bf16.gmra.mxu3 %vm226_vm1, %v1933_v5 }
 0x299   : > { %v7408_v19 = vadd.f32 %v7395_v40, %v2305_v27  ;;  %v1934_v27 = vpack.c.bf16 %v1913_v23, %v1912_v22  ;;  %v3093_v22 = vld [vmem:[%s9264_s3] sm:$0xf]  ;;  %v6000_v23 = vld [vmem:[%s9264_s3 + $0x8] sm:$0xf] }
 0x29a   : > { %v1785_v62 = vpop.f32.mrf.mxu2 }
 0x29b   : > { %5929 = vmatmul.msk.bf16.gmra.mxu0 %vm226_vm1, %v7194_v3  ;;  %v2007_v53 = vpop.f32.mrf.mxu3  ;;  %v6169_v43 = vpop.eup %6168  ;;  %v5936_v28 = vmul.f32 -1.442695, %v7408_v19  ;;  %v1862_v58 = vadd.f32 %v1785_v62, %v7191_v11 }
 0x29c   : > { %v2468_v38 = vadd.f32 1.0, %v6169_v43 }
 0x29d   : > { %6170 = vpow2.f32 %v5936_v28  ;;  %v2084_v59 = vadd.f32 %v2007_v53, %v1862_v58 }
 0x29e   : > { %6172 = vrcp.f32 %v2468_v38  ;;  %v2509_v1 = vand.u32 2147483647, %v2468_v38  ;;  %vm2505_vm4 = vweird.f32 %v2468_v38 }
 0x29f   : > { %v2306_v42 = vadd.f32 %v2229_v12, %v2084_v59 }
 0x2a0   : > { %v7414_v10 = vpop.f32.mrf.mxu0  ;;  %vm2510_vm6 = vcmp.eq.f32.partialorder %v2509_v1, 8.507059e+37  ;;  %v2139_v1 = vld [vmem:[#allocation2 + $0x15a] sm:$0xff] }
 0x2a1   : > { %v7417_v3 = vadd.f32 %v7395_v40, %v2306_v42  ;;  %v2511_v42 = vand.u32 2147483648, %v2468_v38 }
 0x2a2   : > { %v1787_v33 = vpop.f32.mrf.mxu2 }
 0x2a3   : > { %v2009_v8 = vpop.f32.mrf.mxu3  ;;  %v6171_v55 = vpop.eup %6170  ;;  %v5937_v5 = vmul.f32 -1.442695, %v7417_v3  ;;  %v1863_v11 = vadd.f32 %v1787_v33, %v7200_v56  ;;  %v3523_v33 = vsel %vm548_vm0, %v6000_v23, 0 }
 0x2a4   : > { %v6173_v62 = vpop.eup %6172  ;;  %v7421_v53 = vadd.f32 1.0, %v6171_v55  ;;  %3532 = vmatpush.bf16.msrb.mxu3 %v3523_v33  ;;  %v1693_v33 = vld [vmem:[#allocation2 + $0x140] sm:$0xff] }
 0x2a5   : > { %v2501_v12 = vmul.f32 %v6173_v62, %v2468_v38  ;;  %6174 = vpow2.f32 %v5937_v5  ;;  %v2085_v43 = vadd.f32 %v2009_v8, %v1863_v11  ;;  %vm2506_vm3 = vweird.f32 %v6173_v62 }
 0x2a6   : > { %6176 = vrcp.f32 %v7421_v53  ;;  %vm2507_vm5 = vmor %vm2505_vm4, %vm2506_vm3  ;;  %vm2520_vm8 = vweird.f32 %v7421_v53 }
 0x2a7   : > { %v2502_v58 = vsub.f32 1.0, %v2501_v12  ;;  %v2307_v59 = vadd.f32 %v2231_v7, %v2085_v43  ;;  %5895 = vmatmul.msk.bf16.gmra.mxu2 %vm226_vm1, %v1712_v54  ;;  %v3333_v7 = vsel %vm548_vm0, %v3093_v22, 0  ;;  %v2512_v43 = vor.u32 1.1754944e-38, %v2511_v42  ;;  %v1915_v42 = vld [vmem:[#allocation2 + $0x141] sm:$0xff] }
 0x2a8   : > { %v7424_v28 = vpop.f32.mrf.mxu0  ;;  %5912 = vmatmul.msk.bf16.gmra.mxu3 %vm226_vm1, %v1934_v27  ;;  %3342 = vmatpush.bf16.msrb.mxu2 %v3333_v7 }
 0x2a9   : > { %v2503_v56 = vmul.f32 %v6173_v62, %v2502_v58  ;;  %v7429_v18 = vadd.f32 %v7395_v40, %v2307_v59 }
 0x2aa   : > { %v1790_v8 = vpop.f32.mrf.mxu2 }
 0x2ab   : > { %5930 = vmatmul.msk.bf16.gmra.mxu0 %vm226_vm1, %v7210_v20  ;;  %v2012_v55 = vpop.f32.mrf.mxu3  ;;  %v6175_v5 = vpop.eup %6174  ;;  %v2504_v11 = vadd.f32 %v6173_v62, %v2503_v56  ;;  %v5938_v54 = vmul.f32 -1.442695, %v7429_v18  ;;  %v1864_v27 = vadd.f32 %v1790_v8, %v7207_v24  ;;  %v1692_v56 = vld [vmem:[#allocation2 + $0x138] sm:$0xff] }
 0x2ac   : > { %v6177_v12 = vpop.eup %6176  ;;  %v7444_v20 = vadd.f32 1.0, %v6175_v5  ;;  %v1914_v8 = vld [vmem:[#allocation2 + $0x139] sm:$0xff]  ;;  %v2526_v5 = vand.u32 2147483648, %v7421_v53 }
 0x2ad   : > { %v2508_v58 = vsel %vm2507_vm5, %v6173_v62, %v2504_v11  ;;  %v2516_v59 = vmul.f32 %v6177_v12, %v7421_v53  ;;  %6178 = vpow2.f32 %v5938_v54  ;;  %v2086_v7 = vadd.f32 %v2012_v55, %v1864_v27  ;;  %v2138_v62 = vld [vmem:[#allocation2 + $0x152] sm:$0xff] }
 0x2ae   : > { %v2513_v22 = vsel %vm2510_vm6, %v2512_v43, %v2508_v58  ;;  %6180 = vrcp.f32 %v7444_v20  ;;  %vm2521_vm7 = vweird.f32 %v6177_v12  ;;  %v2524_v54 = vand.u32 2147483647, %v7421_v53 }
 0x2af   : > { %v2980_v23 = vmul.f32 %v2513_v22, %v7399_v9  ;;  %v2517_v24 = vsub.f32 1.0, %v2516_v59  ;;  %v2308_v43 = vadd.f32 %v7403_v14, %v2086_v7  ;;  %v1713_v9 = vpack.c.bf16 %v1693_v33, %v1692_v56  ;;  %vm2522_vm9 = vmor %vm2520_vm8, %vm2521_vm7 }
 0x2b0   : > { %v7448_v38 = vpop.f32.mrf.mxu0  ;;  %v1935_v59 = vpack.c.bf16 %v1915_v42, %v1914_v8  ;;  %v2527_v57 = vor.u32 1.1754944e-38, %v2526_v5  ;;  %vm2525_vm10 = vcmp.eq.f32.partialorder %v2524_v54, 8.507059e+37  ;;  %vm2535_vm12 = vweird.f32 %v7444_v20 }
 0x2b1   : > { %3013 = vst.msk [vmem:[#allocation3 + $0x19] sm:$0xff] %vm226_vm1, %v2980_v23  ;;  %v2518_v11 = vmul.f32 %v6177_v12, %v2517_v24  ;;  %v7457_v22 = vadd.f32 %v7395_v40, %v2308_v43  ;;  %v6017_v23 = vld [vmem:[%s9264_s3 + $0xc] sm:$0xf]  ;;  %v2158_v24 = vpack.c.bf16 %v2139_v1, %v2138_v62 }
 0x2b2   : > { %v1792_v58 = vpop.f32.mrf.mxu2  ;;  %v3745_v56 = vsel %vm548_vm0, %v6017_v23, 0 }
 0x2b3   : > { %v2014_v13 = vpop.f32.mrf.mxu3  ;;  %v6179_v55 = vpop.eup %6178  ;;  %v2519_v27 = vadd.f32 %v6177_v12, %v2518_v11  ;;  %v1865_v7 = vadd.f32 %v1792_v58, %v7216_v51  ;;  %v5939_v8 = vmul.f32 -1.442695, %v7457_v22  ;;  %3754 = vmatpush.bf16.msrb.mxu0 %v3745_v56  ;;  %v2541_v51 = vand.u32 2147483648, %v7444_v20 }
 0x2b4   : > { %v6181_v63 = vpop.eup %6180  ;;  %v7462_v14 = vadd.f32 1.0, %v6179_v55 }
 0x2b5   : > { %v2523_v33 = vsel %vm2522_vm9, %v6177_v12, %v2519_v27  ;;  %v2531_v53 = vmul.f32 %v6181_v63, %v7444_v20  ;;  %v2087_v12 = vadd.f32 %v2014_v13, %v1865_v7  ;;  %vm2536_vm11 = vweird.f32 %v6181_v63 }
 0x2b6   : > { %v2528_v42 = vsel %vm2525_vm10, %v2527_v57, %v2523_v33  ;;  %6182 = vrcp.f32 %v7462_v14  ;;  %v2539_v57 = vand.u32 2147483647, %v7444_v20  ;;  %vm2537_vm13 = vmor %vm2535_vm12, %vm2536_vm11  ;;  %v2542_v13 = vor.u32 1.1754944e-38, %v2541_v51  ;;  %v1916_v51 = vld [vmem:[#allocation2 + $0x151] sm:$0xff] }
 0x2b7   : > { %v2981_v5 = vmul.f32 %v2528_v42, %v7408_v19  ;;  %v2532_v1 = vsub.f32 1.0, %v2531_v53  ;;  %6184 = vpow2.f32 %v5939_v8  ;;  %5896 = vmatmul.msk.bf16.gmra.mxu2 %vm226_vm1, %v1713_v9  ;;  %v2309_v54 = vadd.f32 %v7414_v10, %v2087_v12  ;;  %v6034_v10 = vld [vmem:[%s9264_s3 + $0x10] sm:$0xf]  ;;  %v1917_v12 = vld [vmem:[#allocation2 + $0x159] sm:$0xff] }
 0x2b8   : > { %v7469_v62 = vpop.f32.mrf.mxu0  ;;  %5913 = vmatmul.msk.bf16.gmra.mxu3 %vm226_vm1, %v1935_v59  ;;  %vm2540_vm14 = vcmp.eq.f32.partialorder %v2539_v57, 8.507059e+37  ;;  %v3967_v33 = vsel %vm548_vm0, %v6034_v10, 0  ;;  %v1694_v8 = vld [vmem:[#allocation2 + $0x150] sm:$0xff]  ;;  %v2556_v57 = vand.u32 2147483648, %v7462_v14  ;;  %vm2550_vm2 = vweird.f32 %v7462_v14 }
 0x2b9   : > { %3014 = vst.msk [vmem:[#allocation3 + $0x21] sm:$0xff] %vm226_vm1, %v2981_v5  ;;  %v2533_v11 = vmul.f32 %v6181_v63, %v2532_v1  ;;  %v7482_v55 = vadd.f32 %v7395_v40, %v2309_v54  ;;  %3976 = vmatpush.bf16.msrb.mxu1 %v3967_v33  ;;  %v1695_v1 = vld [vmem:[#allocation2 + $0x158] sm:$0xff]  ;;  %v3096_v54 = vld [vmem:[#allocation3 + $0x19] sm:$0xff] }
 0x2ba   : > { %v1795_v19 = vpop.f32.mrf.mxu2 }
 0x2bb   : > { %5931 = vmatmul.msk.bf16.gmra.mxu0 %vm226_vm1, %v2158_v24  ;;  %v2017_v43 = vpop.f32.mrf.mxu3  ;;  %v2534_v58 = vadd.f32 %v6181_v63, %v2533_v11  ;;  %v1866_v9 = vadd.f32 %v1795_v19, %v7225_v37  ;;  %v5940_v37 = vmul.f32 -1.442695, %v7482_v55  ;;  %v2554_v11 = vand.u32 2147483647, %v7462_v14 }
 0x2bc   : > { %v6183_v59 = vpop.eup %6182 }
 0x2bd   : > { %v6185_v27 = vpop.eup %6184  ;;  %v2538_v23 = vsel %vm2537_vm13, %v6181_v63, %v2534_v58  ;;  %v2546_v24 = vmul.f32 %v6183_v59, %v7462_v14  ;;  %v2088_v56 = vadd.f32 %v2017_v43, %v1866_v9  ;;  %vm2551_vm15 = vweird.f32 %v6183_v59  ;;  %v2140_v58 = vld [vmem:[#allocation2 + $0x16a] sm:$0xff]  ;;  %v2141_v9 = vld [vmem:[#allocation2 + $0x172] sm:$0xff] }
 0x2be   : > { %v2543_v7 = vsel %vm2540_vm14, %v2542_v13, %v2538_v23  ;;  %v7488_v20 = vadd.f32 1.0, %v6185_v27  ;;  %v1714_v23 = vpack.c.bf16 %v1695_v1, %v1694_v8  ;;  %vm2552_vm3 = vmor %vm2550_vm2, %vm2551_vm15  ;;  %v2159_v33 = vpack.c.bf16 %v2141_v9, %v2140_v58 }
 0x2bf   : > { %v2982_v63 = vmul.f32 %v2543_v7, %v7417_v3  ;;  %v2547_v42 = vsub.f32 1.0, %v2546_v24  ;;  %v2310_v5 = vadd.f32 %v7424_v28, %v2088_v56  ;;  %v1936_v24 = vpack.c.bf16 %v1917_v12, %v1916_v51 }
 0x2c0   : > { %v7492_v53 = vpop.f32.mrf.mxu0  ;;  %6186 = vrcp.f32 %v7488_v20  ;;  %v3097_v19 = vld [vmem:[#allocation3 + $0x21] sm:$0xff]  ;;  %vm2555_vm4 = vcmp.eq.f32.partialorder %v2554_v11, 8.507059e+37  ;;  %vm2565_vm6 = vweird.f32 %v7488_v20 }
 0x2c1   : > { %3015 = vst.msk [vmem:[#allocation3 + $0x31] sm:$0xff] %vm226_vm1, %v2982_v63  ;;  %v2548_v43 = vmul.f32 %v6183_v59, %v2547_v42  ;;  %6188 = vpow2.f32 %v5940_v37  ;;  %v7501_v3 = vadd.f32 %v7395_v40, %v2310_v5  ;;  %v3127_v28 = vpack.c.bf16 %v3097_v19, %v3096_v54 }
 0x2c2   : > { %v1797_v13 = vpop.f32.mrf.mxu2  ;;  %v2557_v37 = vor.u32 1.1754944e-38, %v2556_v57  ;;  %v2571_v54 = vand.u32 2147483648, %v7488_v20 }
 0x2c3   : > { %v2019_v27 = vpop.f32.mrf.mxu3  ;;  %v2549_v10 = vadd.f32 %v6183_v59, %v2548_v43  ;;  %v5941_v56 = vmul.f32 -1.442695, %v7501_v3  ;;  %v1867_v7 = vadd.f32 %v1797_v13, %v7242_v39  ;;  %5969 = vmatmul.msk.bf16.gmra.mxu1 %vm226_vm1, %v3127_v28 }
 0x2c5   : > { %v2553_v63 = vsel %vm2552_vm3, %v6183_v59, %v2549_v10  ;;  %6190 = vpow2.f32 %v5941_v56  ;;  %v2089_v42 = vadd.f32 %v2019_v27, %v1867_v7 }
 0x2c6   : > { %v6187_v5 = vpop.eup %6186  ;;  %v2558_v8 = vsel %vm2555_vm4, %v2557_v37, %v2553_v63  ;;  %v1696_v37 = vld [vmem:[#allocation2 + $0x168] sm:$0xff] }
 0x2c7   : > { %v6189_v51 = vpop.eup %6188  ;;  %v2983_v14 = vmul.f32 %v2558_v8, %v7429_v18  ;;  %v2561_v12 = vmul.f32 %v6187_v5, %v7488_v20  ;;  %v2311_v39 = vadd.f32 %v7448_v38, %v2089_v42  ;;  %5897 = vmatmul.msk.bf16.gmra.mxu2 %vm226_vm1, %v1714_v23  ;;  %v2569_v18 = vand.u32 2147483647, %v7488_v20  ;;  %v1918_v8 = vld [vmem:[#allocation2 + $0x169] sm:$0xff] }
 0x2c8   : > { %v7508_v1 = vpop.f32.mrf.mxu0  ;;  %5914 = vmatmul.msk.bf16.gmra.mxu3 %vm226_vm1, %v1936_v24  ;;  %v7515_v57 = vadd.f32 1.0, %v6189_v51  ;;  %vm2566_vm5 = vweird.f32 %v6187_v5  ;;  %v2572_v24 = vor.u32 1.1754944e-38, %v2571_v54  ;;  %v1919_v51 = vld [vmem:[#allocation2 + $0x171] sm:$0xff]  ;;  %v1646_v20 = vadd.f32 %v7223_v32, %v7257_v26 }
 0x2c9   : > { %3016 = vst.msk [vmem:[#allocation3 + $0x39] sm:$0xff] %vm226_vm1, %v2983_v14  ;;  %v2562_v59 = vsub.f32 1.0, %v2561_v12  ;;  %v7519_v11 = vadd.f32 %v7395_v40, %v2311_v39  ;;  %vm2567_vm7 = vmor %vm2565_vm6, %vm2566_vm5  ;;  %vm2570_vm8 = vcmp.eq.f32.partialorder %v2569_v18, 8.507059e+37 }
 0x2ca   : > { %6192 = vrcp.f32 %v7515_v57  ;;  %v1800_v38 = vpop.f32.mrf.mxu2  ;;  %vm2580_vm10 = vweird.f32 %v7515_v57 }
 0x2cb   : > { %5932 = vmatmul.msk.bf16.gmra.mxu0 %vm226_vm1, %v2159_v33  ;;  %v2022_v19 = vpop.f32.mrf.mxu3  ;;  %v6191_v43 = vpop.eup %6190  ;;  %v2563_v28 = vmul.f32 %v6187_v5, %v2562_v59  ;;  %v5942_v58 = vmul.f32 -1.442695, %v7519_v11  ;;  %v1868_v9 = vadd.f32 %v1800_v38, %v7250_v29  ;;  %v1697_v33 = vld [vmem:[#allocation2 + $0x170] sm:$0xff]  ;;  %v2142_v59 = vld [vmem:[#allocation2 + $0x182] sm:$0xff] }
 0x2cc   : > { %v7527_v13 = vadd.f32 1.0, %v6191_v43 }
 0x2cd   : > { %v2564_v27 = vadd.f32 %v6187_v5, %v2563_v28  ;;  %6194 = vpow2.f32 %v5942_v58  ;;  %v2090_v23 = vadd.f32 %v2022_v19, %v1868_v9  ;;  %v1715_v19 = vpack.c.bf16 %v1697_v33, %v1696_v37 }
 0x2ce   : > { %6196 = vrcp.f32 %v7527_v13  ;;  %v2584_v9 = vand.u32 2147483647, %v7515_v57  ;;  %vm2595_vm14 = vweird.f32 %v7527_v13 }
 0x2cf   : > { %v2568_v56 = vsel %vm2567_vm7, %v6187_v5, %v2564_v27  ;;  %v2312_v7 = vadd.f32 %v7469_v62, %v2090_v23  ;;  %v3098_v5 = vld [vmem:[#allocation3 + $0x31] sm:$0xff]  ;;  %v2143_v62 = vld [vmem:[#allocation2 + $0x18a] sm:$0xff]  ;;  %v2586_v27 = vand.u32 2147483648, %v7515_v57 }
 0x2d0   : > { %v7531_v10 = vpop.f32.mrf.mxu0  ;;  %v6193_v29 = vpop.eup %6192  ;;  %v2573_v63 = vsel %vm2570_vm8, %v2572_v24, %v2568_v56  ;;  %v3099_v42 = vld [vmem:[#allocation3 + $0x39] sm:$0xff]  ;;  %v2160_v24 = vpack.c.bf16 %v2143_v62, %v2142_v59  ;;  %vm2585_vm12 = vcmp.eq.f32.partialorder %v2584_v9, 8.507059e+37 }
 0x2d1   : > { %v2984_v14 = vmul.f32 %v2573_v63, %v7457_v22  ;;  %v2576_v12 = vmul.f32 %v6193_v29, %v7515_v57  ;;  %v7539_v39 = vadd.f32 %v7395_v40, %v2312_v7  ;;  %v3128_v38 = vpack.c.bf16 %v3099_v42, %v3098_v5 }
 0x2d2   : > { %v1802_v18 = vpop.f32.mrf.mxu2  ;;  %v1937_v22 = vpack.c.bf16 %v1919_v51, %v1918_v8  ;;  %vm2581_vm9 = vweird.f32 %v6193_v29  ;;  %v2587_v8 = vor.u32 1.1754944e-38, %v2586_v27  ;;  %v2599_v51 = vand.u32 2147483647, %v7527_v13 }
 0x2d3   : > { %v2024_v54 = vpop.f32.mrf.mxu3  ;;  %v6195_v43 = vpop.eup %6194  ;;  %3017 = vst.msk [vmem:[#allocation3 + $0x49] sm:$0xff] %vm226_vm1, %v2984_v14  ;;  %v2577_v28 = vsub.f32 1.0, %v2576_v12  ;;  %v5943_v32 = vmul.f32 -1.442695, %v7539_v39  ;;  %v1869_v26 = vadd.f32 %v1802_v18, %v1646_v20  ;;  %5970 = vmatmul.msk.bf16.gmra.mxu1 %vm226_vm1, %v3128_v38  ;;  %vm2582_vm11 = vmor %vm2580_vm10, %vm2581_vm9  ;;  %v2601_v20 = vand.u32 2147483648, %v7527_v13 }
 0x2d4   : > { %v6197_v58 = vpop.eup %6196  ;;  %v7545_v23 = vadd.f32 1.0, %v6195_v43  ;;  %vm2600_vm2 = vcmp.eq.f32.partialorder %v2599_v51, 8.507059e+37  ;;  %v2144_v51 = vld [vmem:[#allocation2 + $0x19a] sm:$0xff] }
 0x2d5   : > { %v2578_v56 = vmul.f32 %v6193_v29, %v2577_v28  ;;  %v2591_v7 = vmul.f32 %v6197_v58, %v7527_v13  ;;  %6198 = vpow2.f32 %v5943_v32  ;;  %v2091_v42 = vadd.f32 %v2024_v54, %v1869_v26 }
 0x2d6   : > { %6200 = vrcp.f32 %v7545_v23  ;;  %vm2596_vm13 = vweird.f32 %v6197_v58  ;;  %vm2610_vm4 = vweird.f32 %v7545_v23 }
 0x2d7   : > { %v2579_v33 = vadd.f32 %v6193_v29, %v2578_v56  ;;  %v2592_v63 = vsub.f32 1.0, %v2591_v7  ;;  %5898 = vmatmul.msk.bf16.gmra.mxu2 %vm226_vm1, %v1715_v19  ;;  %v2313_v5 = vadd.f32 %v7492_v53, %v2091_v42  ;;  %vm2597_vm15 = vmor %vm2595_vm14, %vm2596_vm13  ;;  %v1699_v56 = vld [vmem:[#allocation2 + $0x188] sm:$0xff] }
 0x2d8   : > { %v7550_v37 = vpop.f32.mrf.mxu0  ;;  %5915 = vmatmul.msk.bf16.gmra.mxu3 %vm226_vm1, %v1937_v22 }
 0x2d9   : > { %v2583_v14 = vsel %vm2582_vm11, %v6193_v29, %v2579_v33  ;;  %v2593_v12 = vmul.f32 %v6197_v58, %v2592_v63  ;;  %v7562_v19 = vadd.f32 %v7395_v40, %v2313_v5  ;;  %v2602_v29 = vor.u32 1.1754944e-38, %v2601_v20  ;;  %v1921_v33 = vld [vmem:[#allocation2 + $0x189] sm:$0xff] }
 0x2da   : > { %v2588_v57 = vsel %vm2585_vm12, %v2587_v8, %v2583_v14  ;;  %v1805_v59 = vpop.f32.mrf.mxu2  ;;  %v1648_v63 = vadd.f32 %v7248_v35, %v7271_v50  ;;  %v2614_v8 = vand.u32 2147483647, %v7545_v23 }
 0x2db   : > { %5933 = vmatmul.msk.bf16.gmra.mxu0 %vm226_vm1, %v2160_v24  ;;  %v2027_v62 = vpop.f32.mrf.mxu3  ;;  %v6199_v18 = vpop.eup %6198  ;;  %v2985_v54 = vmul.f32 %v2588_v57, %v7482_v55  ;;  %v2594_v38 = vadd.f32 %v6197_v58, %v2593_v12  ;;  %v1870_v53 = vadd.f32 %v1805_v59, %v7265_v41  ;;  %v5944_v55 = vmul.f32 -1.442695, %v7562_v19  ;;  %v1698_v24 = vld [vmem:[#allocation2 + $0x180] sm:$0xff] }
 0x2dc   : > { %v6201_v43 = vpop.eup %6200  ;;  %v7564_v28 = vadd.f32 1.0, %v6199_v18  ;;  %v2616_v41 = vand.u32 2147483648, %v7545_v23  ;;  %v1716_v5 = vpack.c.bf16 %v1699_v56, %v1698_v24  ;;  %vm2615_vm6 = vcmp.eq.f32.partialorder %v2614_v8, 8.507059e+37 }
 0x2dd   : > { %3018 = vst.msk [vmem:[#allocation3 + $0x51] sm:$0xff] %vm226_vm1, %v2985_v54  ;;  %v2598_v32 = vsel %vm2597_vm15, %v6197_v58, %v2594_v38  ;;  %v2606_v26 = vmul.f32 %v6201_v43, %v7545_v23  ;;  %v2092_v7 = vadd.f32 %v2027_v62, %v1870_v53  ;;  %v1920_v58 = vld [vmem:[#allocation2 + $0x181] sm:$0xff]  ;;  %vm2611_vm3 = vweird.f32 %v6201_v43 }
 0x2de   : > { %v2603_v22 = vsel %vm2600_vm2, %v2602_v29, %v2598_v32  ;;  %6202 = vrcp.f32 %v7564_v28  ;;  %v1938_v62 = vpack.c.bf16 %v1921_v33, %v1920_v58  ;;  %vm2612_vm5 = vmor %vm2610_vm4, %vm2611_vm3  ;;  %v2617_v35 = vor.u32 1.1754944e-38, %v2616_v41 }
 0x2df   : > { %v2986_v9 = vmul.f32 %v2603_v22, %v7501_v3  ;;  %v2607_v27 = vsub.f32 1.0, %v2606_v26  ;;  %6204 = vpow2.f32 %v5944_v55  ;;  %v2145_v3 = vld [vmem:[#allocation2 + $0x1a2] sm:$0xff]  ;;  %v2314_v20 = vadd.f32 %v7508_v1, %v2092_v7  ;;  %v3100_v26 = vld [vmem:[#allocation3 + $0x49] sm:$0xff] }
 0x2e0   : > { %v7571_v13 = vpop.f32.mrf.mxu0  ;;  %v2161_v38 = vpack.c.bf16 %v2145_v3, %v2144_v51  ;;  %v2631_v7 = vand.u32 2147483648, %v7564_v28  ;;  %vm2625_vm8 = vweird.f32 %v7564_v28 }
 0x2e1   : > { %3019 = vst.msk [vmem:[#allocation3 + $0x61] sm:$0xff] %vm226_vm1, %v2986_v9  ;;  %v2608_v42 = vmul.f32 %v6201_v43, %v2607_v27  ;;  %v7582_v50 = vadd.f32 %v7395_v40, %v2314_v20 }
 0x2e2   : > { %v1807_v14 = vpop.f32.mrf.mxu2  ;;  %v2632_v51 = vor.u32 1.1754944e-38, %v2631_v7 }
 0x2e3   : > { %v2029_v12 = vpop.f32.mrf.mxu3  ;;  %v2609_v57 = vadd.f32 %v6201_v43, %v2608_v42  ;;  %v1871_v59 = vadd.f32 %v1807_v14, %v1648_v63  ;;  %v5945_v23 = vmul.f32 -1.442695, %v7582_v50 }
 0x2e4   : > { %v6203_v18 = vpop.eup %6202  ;;  %v3101_v54 = vld [vmem:[#allocation3 + $0x51] sm:$0xff] }
 0x2e5   : > { %v6205_v29 = vpop.eup %6204  ;;  %v2613_v53 = vsel %vm2612_vm5, %v6201_v43, %v2609_v57  ;;  %v2621_v1 = vmul.f32 %v6203_v18, %v7564_v28  ;;  %v2093_v32 = vadd.f32 %v2029_v12, %v1871_v59  ;;  %v3129_v9 = vpack.c.bf16 %v3101_v54, %v3100_v26  ;;  %v1700_v57 = vld [vmem:[#allocation2 + $0x198] sm:$0xff]  ;;  %v1701_v59 = vld [vmem:[#allocation2 + $0x1a0] sm:$0xff] }
 0x2e6   : > { %v2618_v55 = vsel %vm2615_vm6, %v2617_v35, %v2613_v53  ;;  %v7585_v22 = vadd.f32 1.0, %v6205_v29  ;;  %v2629_v43 = vand.u32 2147483647, %v7564_v28  ;;  %vm2626_vm7 = vweird.f32 %v6203_v18 }
 0x2e7   : > { %v2987_v24 = vmul.f32 %v2618_v55, %v7519_v11  ;;  %v2622_v56 = vsub.f32 1.0, %v2621_v1  ;;  %v2315_v41 = vadd.f32 %v7531_v10, %v2093_v32  ;;  %5899 = vmatmul.msk.bf16.gmra.mxu2 %vm226_vm1, %v1716_v5  ;;  %5971 = vmatmul.msk.bf16.gmra.mxu1 %vm226_vm1, %v3129_v9  ;;  %vm2627_vm9 = vmor %vm2625_vm8, %vm2626_vm7  ;;  %v1717_v26 = vpack.c.bf16 %v1701_v59, %v1700_v57 }
 0x2e8   : > { %v7588_v27 = vpop.f32.mrf.mxu0  ;;  %5916 = vmatmul.msk.bf16.gmra.mxu3 %vm226_vm1, %v1938_v62  ;;  %6206 = vrcp.f32 %v7585_v22  ;;  %vm2630_vm10 = vcmp.eq.f32.partialorder %v2629_v43, 8.507059e+37  ;;  %v2646_v55 = vand.u32 2147483648, %v7585_v22  ;;  %vm2640_vm12 = vweird.f32 %v7585_v22 }
 0x2e9   : > { %3020 = vst.msk [vmem:[#allocation3 + $0x69] sm:$0xff] %vm226_vm1, %v2987_v24  ;;  %v2623_v58 = vmul.f32 %v6203_v18, %v2622_v56  ;;  %6208 = vpow2.f32 %v5945_v23  ;;  %v7600_v11 = vadd.f32 %v7395_v40, %v2315_v41  ;;  %v3102_v41 = vld [vmem:[#allocation3 + $0x61] sm:$0xff] }
 0x2ea   : > { %v1810_v10 = vpop.f32.mrf.mxu2 }
 0x2eb   : > { %5934 = vmatmul.msk.bf16.gmra.mxu0 %vm226_vm1, %v2161_v38  ;;  %v2032_v33 = vpop.f32.mrf.mxu3  ;;  %v2624_v63 = vadd.f32 %v6203_v18, %v2623_v58  ;;  %v5946_v42 = vmul.f32 -1.442695, %v7600_v11  ;;  %v1872_v8 = vadd.f32 %v1810_v10, %v7278_v46  ;;  %v1922_v46 = vld [vmem:[#allocation2 + $0x199] sm:$0xff]  ;;  %v1923_v38 = vld [vmem:[#allocation2 + $0x1a1] sm:$0xff]  ;;  %v3647_v58 = vld [vmem:[#allocation3 + $0x20] sm:$0xff] }
 0x2ec   : > { %v1939_v9 = vpack.c.bf16 %v1923_v38, %v1922_v46 }
 0x2ed   : > { %v2628_v3 = vsel %vm2627_vm9, %v6203_v18, %v2624_v63  ;;  %6210 = vpow2.f32 %v5946_v42  ;;  %v2094_v20 = vadd.f32 %v2032_v33, %v1872_v8  ;;  %v1650_v18 = vadd.f32 %v7263_v31, %v7283_v36  ;;  %v3646_v8 = vld [vmem:[#allocation3 + $0x18] sm:$0xff] }
 0x2ee   : > { %v6207_v14 = vpop.eup %6206  ;;  %v2633_v12 = vsel %vm2630_vm10, %v2632_v51, %v2628_v3  ;;  %v2647_v63 = vor.u32 1.1754944e-38, %v2646_v55  ;;  %v3045_v55 = vld [vmem:[#allocation3] sm:$0xff] }
 0x2ef   : > { %v6209_v62 = vpop.eup %6208  ;;  %v2988_v35 = vmul.f32 %v2633_v12, %v7539_v39  ;;  %v2636_v28 = vmul.f32 %v6207_v14, %v7585_v22  ;;  %v2316_v54 = vadd.f32 %v7550_v37, %v2094_v20  ;;  %v2644_v39 = vand.u32 2147483647, %v7585_v22 }
 0x2f0   : > { %v7606_v5 = vpop.f32.mrf.mxu0  ;;  %v7611_v29 = vadd.f32 1.0, %v6209_v62  ;;  %v3103_v32 = vld [vmem:[#allocation3 + $0x69] sm:$0xff]  ;;  %vm2641_vm11 = vweird.f32 %v6207_v14  ;;  %v7632_v20 = vpack.c.bf16 %v3647_v58, %v3646_v8 }
 0x2f1   : > { %3021 = vst.msk [vmem:[#allocation3 + $0x79] sm:$0xff] %vm226_vm1, %v2988_v35  ;;  %v2637_v53 = vsub.f32 1.0, %v2636_v28  ;;  %v7617_v1 = vadd.f32 %v7395_v40, %v2316_v54  ;;  %v3130_v7 = vpack.c.bf16 %v3103_v32, %v3102_v41  ;;  %vm2642_vm13 = vmor %vm2640_vm12, %vm2641_vm11  ;;  %vm2645_vm14 = vcmp.eq.f32.partialorder %v2644_v39, 8.507059e+37 }
 0x2f2   : > { %6212 = vrcp.f32 %v7611_v29  ;;  %v1812_v37 = vpop.f32.mrf.mxu2  ;;  %vm2655_vm2 = vweird.f32 %v7611_v29 }
 0x2f3   : > { %v2034_v23 = vpop.f32.mrf.mxu3  ;;  %v6211_v24 = vpop.eup %6210  ;;  %v2638_v56 = vmul.f32 %v6207_v14, %v2637_v53  ;;  %v5947_v31 = vmul.f32 -1.442695, %v7617_v1  ;;  %v1873_v36 = vadd.f32 %v1812_v37, %v1650_v18  ;;  %v2661_v18 = vand.u32 2147483648, %v7611_v29 }
 0x2f4   : > { %v7623_v43 = vadd.f32 1.0, %v6211_v24  ;;  %v3424_v24 = vld [vmem:[#allocation3 + $0x2] sm:$0xff] }
 0x2f5   : > { %v2639_v10 = vadd.f32 %v6207_v14, %v2638_v56  ;;  %6214 = vpow2.f32 %v5947_v31  ;;  %v2095_v33 = vadd.f32 %v2034_v23, %v1873_v36  ;;  %v3425_v56 = vld [vmem:[#allocation3 + $0xa] sm:$0xff]  ;;  %v2662_v31 = vor.u32 1.1754944e-38, %v2661_v18 }
 0x2f6   : > { %6216 = vrcp.f32 %v7623_v43  ;;  %v2674_v36 = vand.u32 2147483647, %v7623_v43  ;;  %v2676_v41 = vand.u32 2147483648, %v7623_v43  ;;  %vm2670_vm6 = vweird.f32 %v7623_v43  ;;  %v3648_v18 = vld [vmem:[#allocation3 + $0x30] sm:$0xff] }
 0x2f7   : > { %v2643_v51 = vsel %vm2642_vm13, %v6207_v14, %v2639_v10  ;;  %v2317_v3 = vadd.f32 %v7571_v13, %v2095_v33  ;;  %5900 = vmatmul.msk.bf16.gmra.mxu2 %vm226_vm1, %v1717_v26  ;;  %5972 = vmatmul.msk.bf16.gmra.mxu1 %vm226_vm1, %v3130_v7 }
 0x2f8   : > { %v7627_v42 = vpop.f32.mrf.mxu0  ;;  %5917 = vmatmul.msk.bf16.gmra.mxu3 %vm226_vm1, %v1939_v9  ;;  %v6213_v22 = vpop.eup %6212  ;;  %v2648_v12 = vsel %vm2645_vm14, %v2647_v63, %v2643_v51  ;;  %v3046_v9 = vld [vmem:[#allocation3 + $0x8] sm:$0xff]  ;;  %vm2675_vm8 = vcmp.eq.f32.partialorder %v2674_v36, 8.507059e+37 }
 0x2f9   : > { %v2989_v57 = vmul.f32 %v2648_v12, %v7562_v19  ;;  %v2651_v59 = vmul.f32 %v6213_v22, %v7611_v29  ;;  %v7638_v62 = vadd.f32 %v7395_v40, %v2317_v3  ;;  %v2659_v19 = vand.u32 2147483647, %v7611_v29 }
 0x2fa   : > { %v1815_v13 = vpop.f32.mrf.mxu2  ;;  %vm2656_vm15 = vweird.f32 %v6213_v22  ;;  %v1652_v29 = vadd.f32 %v7276_v30, %v7295_v45  ;;  %v3077_v3 = vpack.c.bf16 %v3046_v9, %v3045_v55  ;;  %v3456_v12 = vpack.c.bf16 %v3425_v56, %v3424_v24 }
 0x2fb   : > { %6018 = vmatmul.msk.bf16.vlgmr.msrb.gmra.mxu0 %vm226_vm1, %v7632_v20  ;;  %v2037_v14 = vpop.f32.mrf.mxu3  ;;  %v6215_v35 = vpop.eup %6214  ;;  %3022 = vst.msk [vmem:[#allocation3 + $0x81] sm:$0xff] %vm226_vm1, %v2989_v57  ;;  %v2652_v28 = vsub.f32 1.0, %v2651_v59  ;;  %v5948_v54 = vmul.f32 -1.442695, %v7638_v62  ;;  %v1874_v46 = vadd.f32 %v1815_v13, %v7290_v61  ;;  %vm2657_vm3 = vmor %vm2655_vm2, %vm2656_vm15  ;;  %vm2660_vm4 = vcmp.eq.f32.partialorder %v2659_v19, 8.507059e+37 }
 0x2fc   : > { %v6217_v38 = vpop.eup %6216  ;;  %v7647_v53 = vadd.f32 1.0, %v6215_v35  ;;  %v2677_v30 = vor.u32 1.1754944e-38, %v2676_v41 }
 0x2fd   : > { %v2653_v32 = vmul.f32 %v6213_v22, %v2652_v28  ;;  %v2666_v26 = vmul.f32 %v6217_v38, %v7623_v43  ;;  %6218 = vpow2.f32 %v5948_v54  ;;  %v2096_v23 = vadd.f32 %v2037_v14, %v1874_v46  ;;  %v3104_v14 = vld [vmem:[#allocation3 + $0x79] sm:$0xff] }
 0x2fe   : > { %6220 = vrcp.f32 %v7647_v53  ;;  %vm2671_vm5 = vweird.f32 %v6217_v38  ;;  %v3649_v54 = vld [vmem:[#allocation3 + $0x38] sm:$0xff]  ;;  %v2691_v55 = vand.u32 2147483648, %v7647_v53  ;;  %vm2685_vm10 = vweird.f32 %v7647_v53 }
 0x2ff   : > { %v2654_v37 = vadd.f32 %v6213_v22, %v2653_v32  ;;  %v2667_v61 = vsub.f32 1.0, %v2666_v26  ;;  %v2318_v10 = vadd.f32 %v7588_v27, %v2096_v23  ;;  %vm2672_vm7 = vmor %vm2670_vm6, %vm2671_vm5  ;;  %v2689_v23 = vand.u32 2147483647, %v7647_v53 }
 0x300   : > { %v7651_v39 = vpop.f32.mrf.mxu0  ;;  %v2692_v41 = vor.u32 1.1754944e-38, %v2691_v55  ;;  %v3650_v55 = vld [vmem:[#allocation3 + $0x48] sm:$0xff] }
 0x301   : > { %v2658_v7 = vsel %vm2657_vm3, %v6213_v22, %v2654_v37  ;;  %v2668_v58 = vmul.f32 %v6217_v38, %v2667_v61  ;;  %v7662_v22 = vadd.f32 %v7395_v40, %v2318_v10  ;;  %vm2690_vm12 = vcmp.eq.f32.partialorder %v2689_v23, 8.507059e+37 }
 0x302   : > { %v2663_v33 = vsel %vm2660_vm4, %v2662_v31, %v2658_v7  ;;  %v1817_v63 = vpop.f32.mrf.mxu2  ;;  %v3105_v51 = vld [vmem:[#allocation3 + $0x81] sm:$0xff]  ;;  %v7690_v7 = vld [vmem:[%s9263_s2] ss:$0 sm:$0xff] }
 0x303   : > { %v2039_v8 = vpop.f32.mrf.mxu3  ;;  %v6219_v57 = vpop.eup %6218  ;;  %v2990_v59 = vmul.f32 %v2663_v33, %v7582_v50  ;;  %v2669_v13 = vadd.f32 %v6217_v38, %v2668_v58  ;;  %v1875_v35 = vadd.f32 %v1817_v63, %v1652_v29  ;;  %v3131_v28 = vpack.c.bf16 %v3105_v51, %v3104_v14 }
 0x304   : > { %v6221_v27 = vpop.eup %6220  ;;  %v7665_v45 = vadd.f32 1.0, %v6219_v57  ;;  %v5949_v43 = vmul.f32 -1.442695, %v7662_v22  ;;  %v1654_v57 = vadd.f32 %v7288_v34, %v7307_v15 }
 0x305   : > { %3023 = vst.msk [vmem:[#allocation3 + $0x91] sm:$0xff] %vm226_vm1, %v2990_v59  ;;  %v2673_v46 = vsel %vm2672_vm7, %v6217_v38, %v2669_v13  ;;  %v2681_v50 = vmul.f32 %v6221_v27, %v7647_v53  ;;  %v7676_v38 = vpack.c.bf16 %v3649_v54, %v3648_v18  ;;  %v2097_v37 = vadd.f32 %v2039_v8, %v1875_v35 }
 0x306   : > { %v2678_v40 = vsel %vm2675_vm8, %v2677_v30, %v2673_v46  ;;  %6222 = vrcp.f32 %v7665_v45  ;;  %vm2686_vm9 = vweird.f32 %v6221_v27  ;;  %v2704_v59 = vand.u32 2147483647, %v7665_v45  ;;  %v3426_v30 = vld [vmem:[#allocation3 + $0x1a] sm:$0xff] }
 0x307   : > { %v2991_v32 = vmul.f32 %v2678_v40, %v7600_v11  ;;  %v2682_v26 = vsub.f32 1.0, %v2681_v50  ;;  %6224 = vpow2.f32 %v5949_v43  ;;  %5984 = vmatmul.msk.bf16.vlgmr.msrb.gmra.mxu2 %vm226_vm1, %v3077_v3  ;;  %5973 = vmatmul.msk.bf16.gmra.mxu1 %vm226_vm1, %v3131_v28  ;;  %v2319_v11 = vadd.f32 %v7606_v5, %v2097_v37  ;;  %vm2687_vm11 = vmor %vm2685_vm10, %vm2686_vm9  ;;  %v3651_v50 = vld [vmem:[#allocation3 + $0x50] sm:$0xff] }
 0x308   : > { %v7671_v19 = vpop.f32.mrf.mxu0  ;;  %6001 = vmatmul.msk.bf16.vlgmr.msrb.gmra.mxu3 %vm226_vm1, %v3456_v12  ;;  %v2706_v13 = vand.u32 2147483648, %v7665_v45  ;;  %vm2700_vm14 = vweird.f32 %v7665_v45  ;;  %vm2705_vm2 = vcmp.eq.f32.partialorder %v2704_v59, 8.507059e+37 }
 0x309   : > { %3024 = vst.msk [vmem:[#allocation3 + $0x99] sm:$0xff] %vm226_vm1, %v2991_v32  ;;  %v2683_v61 = vmul.f32 %v6221_v27, %v2682_v26  ;;  %v7693_v58 = vadd.f32 %v7690_v7, %v2319_v11  ;;  %v7716_v11 = vpack.c.bf16 %v3651_v50, %v3650_v55 }
 0x30a   : > { %v1820_v9 = vpop.f32.mrf.mxu2  ;;  %v2707_v43 = vor.u32 1.1754944e-38, %v2706_v13 }
 0x30b   : > { %6019 = vmatmul.msk.bf16.gmra.mxu0 %vm226_vm1, %v7676_v38  ;;  %v2042_v24 = vpop.f32.mrf.mxu3  ;;  %v2684_v56 = vadd.f32 %v6221_v27, %v2683_v61  ;;  %v1876_v31 = vadd.f32 %v1820_v9, %v7302_v52  ;;  %v5950_v52 = vmul.f32 -1.442695, %v7693_v58 }
 0x30c   : > { %v6223_v36 = vpop.eup %6222  ;;  %v3106_v46 = vld [vmem:[#allocation3 + $0x91] sm:$0xff] }
 0x30d   : > { %v6225_v10 = vpop.eup %6224  ;;  %v2688_v5 = vsel %vm2687_vm11, %v6221_v27, %v2684_v56  ;;  %v2696_v29 = vmul.f32 %v6223_v36, %v7665_v45  ;;  %v2098_v33 = vadd.f32 %v2042_v24, %v1876_v31  ;;  %vm2701_vm13 = vweird.f32 %v6223_v36 }
 0x30e   : > { %v2693_v53 = vsel %vm2690_vm12, %v2692_v41, %v2688_v5  ;;  %v7696_v63 = vadd.f32 1.0, %v6225_v10  ;;  %vm2702_vm15 = vmor %vm2700_vm14, %vm2701_vm13 }
 0x30f   : > { %v2992_v51 = vmul.f32 %v2693_v53, %v7617_v1  ;;  %v2697_v3 = vsub.f32 1.0, %v2696_v29  ;;  %v2320_v12 = vadd.f32 %v7627_v42, %v2098_v33  ;;  %v3427_v42 = vld [vmem:[#allocation3 + $0x22] sm:$0xff] }
 0x310   : > { %v7699_v8 = vpop.f32.mrf.mxu0  ;;  %6226 = vrcp.f32 %v7696_v63  ;;  %v3107_v1 = vld [vmem:[#allocation3 + $0x99] sm:$0xff]  ;;  %v3457_v18 = vpack.c.bf16 %v3427_v42, %v3426_v30  ;;  %vm2715_vm4 = vweird.f32 %v7696_v63  ;;  %v1656_v42 = vadd.f32 %v7300_v25, %v7319_v16  ;;  %v3653_v25 = vld [vmem:[#allocation3 + $0x68] sm:$0xff] }
 0x311   : > { %3025 = vst.msk [vmem:[#allocation3 + $0xa9] sm:$0xff] %vm226_vm1, %v2992_v51  ;;  %v2698_v14 = vmul.f32 %v6223_v36, %v2697_v3  ;;  %6228 = vpow2.f32 %v5950_v52  ;;  %v7710_v27 = vadd.f32 %v7690_v7, %v2320_v12  ;;  %v3132_v40 = vpack.c.bf16 %v3107_v1, %v3106_v46  ;;  %v3429_v30 = vld [vmem:[#allocation3 + $0x3a] sm:$0xff] }
 0x312   : > { %v1822_v35 = vpop.f32.mrf.mxu2 }
 0x313   : > { %v2044_v28 = vpop.f32.mrf.mxu3  ;;  %v2699_v34 = vadd.f32 %v6223_v36, %v2698_v14  ;;  %v5951_v15 = vmul.f32 -1.442695, %v7710_v27  ;;  %v1877_v54 = vadd.f32 %v1822_v35, %v1654_v57 }
 0x315   : > { %v2703_v32 = vsel %vm2702_vm15, %v6223_v36, %v2699_v34  ;;  %6230 = vpow2.f32 %v5951_v15  ;;  %v2099_v26 = vadd.f32 %v2044_v28, %v1877_v54 }
 0x316   : > { %v6227_v37 = vpop.eup %6226  ;;  %v2708_v61 = vsel %vm2705_vm2, %v2707_v43, %v2703_v32 }
 0x317   : > { %v6229_v45 = vpop.eup %6228  ;;  %v2993_v9 = vmul.f32 %v2708_v61, %v7638_v62  ;;  %v2711_v24 = vmul.f32 %v6227_v37, %v7696_v63  ;;  %v2321_v56 = vadd.f32 %v7651_v39, %v2099_v26  ;;  %5985 = vmatmul.msk.bf16.gmra.mxu2 %vm226_vm1, %v7632_v20  ;;  %5974 = vmatmul.msk.bf16.gmra.mxu1 %vm226_vm1, %v3132_v40  ;;  %v2719_v62 = vand.u32 2147483647, %v7696_v63 }
 0x318   : > { %v7714_v23 = vpop.f32.mrf.mxu0  ;;  %6002 = vmatmul.msk.bf16.gmra.mxu3 %vm226_vm1, %v3457_v18  ;;  %v7724_v31 = vadd.f32 1.0, %v6229_v45  ;;  %v2721_v39 = vand.u32 2147483648, %v7696_v63  ;;  %vm2716_vm3 = vweird.f32 %v6227_v37  ;;  %v3108_v40 = vld [vmem:[#allocation3 + $0xa9] sm:$0xff]  ;;  %v3652_v45 = vld [vmem:[#allocation3 + $0x60] sm:$0xff] }
 0x319   : > { %3026 = vst.msk [vmem:[#allocation3 + $0xb1] sm:$0xff] %vm226_vm1, %v2993_v9  ;;  %v2712_v36 = vsub.f32 1.0, %v2711_v24  ;;  %v7729_v41 = vadd.f32 %v7690_v7, %v2321_v56  ;;  %vm2717_vm5 = vmor %vm2715_vm4, %vm2716_vm3  ;;  %vm2720_vm6 = vcmp.eq.f32.partialorder %v2719_v62, 8.507059e+37  ;;  %v7759_v9 = vpop.f32.mrf.mxu1  ;;  %v7764_v56 = vpack.c.bf16 %v3653_v25, %v3652_v45 }
 0x31a   : > { %6232 = vrcp.f32 %v7724_v31  ;;  %v1825_v20 = vpop.f32.mrf.mxu2  ;;  %v2722_v12 = vor.u32 1.1754944e-38, %v2721_v39  ;;  %v2736_v32 = vand.u32 2147483648, %v7724_v31  ;;  %vm2730_vm8 = vweird.f32 %v7724_v31 }
 0x31b   : > { %6020 = vmatmul.msk.bf16.gmra.mxu0 %vm226_vm1, %v7716_v11  ;;  %v2047_v10 = vpop.f32.mrf.mxu3  ;;  %v6231_v5 = vpop.eup %6230  ;;  %v2713_v29 = vmul.f32 %v6227_v37, %v2712_v36  ;;  %v5952_v33 = vmul.f32 -1.442695, %v7729_v41  ;;  %v1878_v53 = vadd.f32 %v1825_v20, %v7312_v4  ;;  %v3428_v4 = vld [vmem:[#allocation3 + $0x32] sm:$0xff] }
 0x31c   : > { %v7738_v52 = vadd.f32 1.0, %v6231_v5  ;;  %v3458_v18 = vpack.c.bf16 %v3429_v30, %v3428_v4  ;;  %v2737_v20 = vor.u32 1.1754944e-38, %v2736_v32 }
 0x31d   : > { %v2714_v51 = vadd.f32 %v6227_v37, %v2713_v29  ;;  %6234 = vpow2.f32 %v5952_v33  ;;  %v2100_v3 = vadd.f32 %v2047_v10, %v1878_v53 }
 0x31e   : > { %6236 = vrcp.f32 %v7738_v52  ;;  %v2749_v10 = vand.u32 2147483647, %v7738_v52  ;;  %v2751_v5 = vand.u32 2147483648, %v7738_v52  ;;  %vm2745_vm12 = vweird.f32 %v7738_v52 }
 0x31f   : > { %v2718_v59 = vsel %vm2717_vm5, %v6227_v37, %v2714_v51  ;;  %v2322_v13 = vadd.f32 %v7671_v19, %v2100_v3 }
 0x320   : > { %v7742_v57 = vpop.f32.mrf.mxu0  ;;  %v6233_v14 = vpop.eup %6232  ;;  %v2723_v1 = vsel %vm2720_vm6, %v2722_v12, %v2718_v59  ;;  %v3109_v34 = vld [vmem:[#allocation3 + $0xb1] sm:$0xff]  ;;  %vm2750_vm14 = vcmp.eq.f32.partialorder %v2749_v10, 8.507059e+37 }
 0x321   : > { %v2994_v63 = vmul.f32 %v2723_v1, %v7662_v22  ;;  %v2726_v35 = vmul.f32 %v6233_v14, %v7724_v31  ;;  %v7750_v28 = vadd.f32 %v7690_v7, %v2322_v13  ;;  %v2734_v22 = vand.u32 2147483647, %v7724_v31 }
 0x322   : > { %v1827_v15 = vpop.f32.mrf.mxu2  ;;  %v3133_v55 = vpack.c.bf16 %v3109_v34, %v3108_v40  ;;  %vm2731_vm7 = vweird.f32 %v6233_v14  ;;  %v2752_v1 = vor.u32 1.1754944e-38, %v2751_v5  ;;  %v3431_v40 = vld [vmem:[#allocation3 + $0x52] sm:$0xff] }
 0x323   : > { %v2049_v54 = vpop.f32.mrf.mxu3  ;;  %v6235_v46 = vpop.eup %6234  ;;  %3027 = vst.msk [vmem:[#allocation3 + $0xc1] sm:$0xff] %vm226_vm1, %v2994_v63  ;;  %v2727_v19 = vsub.f32 1.0, %v2726_v35  ;;  %v5953_v50 = vmul.f32 -1.442695, %v7750_v28  ;;  %v1879_v43 = vadd.f32 %v1827_v15, %v1656_v42  ;;  %vm2732_vm9 = vmor %vm2730_vm8, %vm2731_vm7  ;;  %vm2735_vm10 = vcmp.eq.f32.partialorder %v2734_v22, 8.507059e+37 }
 0x324   : > { %v6237_v16 = vpop.eup %6236  ;;  %v7756_v26 = vadd.f32 1.0, %v6235_v46  ;;  %v1658_v46 = vadd.f32 %v7315_v44, %v7329_v21 }
 0x325   : > { %v2728_v37 = vmul.f32 %v6233_v14, %v2727_v19  ;;  %v2741_v61 = vmul.f32 %v6237_v16, %v7738_v52  ;;  %6238 = vpow2.f32 %v5953_v50  ;;  %v2101_v39 = vadd.f32 %v2049_v54, %v1879_v43  ;;  %v7788_v52 = vpop.f32.mrf.mxu1  ;;  %v3430_v43 = vld [vmem:[#allocation3 + $0x4a] sm:$0xff] }
 0x326   : > { %6240 = vrcp.f32 %v7756_v26  ;;  %vm2746_vm11 = vweird.f32 %v6237_v16  ;;  %v2764_v50 = vand.u32 2147483647, %v7756_v26  ;;  %vm2760_vm2 = vweird.f32 %v7756_v26 }
 0x327   : > { %v2729_v36 = vadd.f32 %v6233_v14, %v2728_v37  ;;  %v2742_v62 = vsub.f32 1.0, %v2741_v61  ;;  %5986 = vmatmul.msk.bf16.gmra.mxu2 %vm226_vm1, %v7676_v38  ;;  %5975 = vmatmul.msk.bf16.gmra.mxu1 %vm226_vm1, %v3133_v55  ;;  %v2323_v31 = vadd.f32 %v7699_v8, %v2101_v39  ;;  %vm2747_vm13 = vmor %vm2745_vm12, %vm2746_vm11  ;;  %v3459_v37 = vpack.c.bf16 %v3431_v40, %v3430_v43  ;;  %v3655_v61 = vld [vmem:[#allocation3 + $0x80] sm:$0xff] }
 0x328   : > { %v7762_v24 = vpop.f32.mrf.mxu0  ;;  %6003 = vmatmul.msk.bf16.gmra.mxu3 %vm226_vm1, %v3458_v18  ;;  %vm2765_vm4 = vcmp.eq.f32.partialorder %v2764_v50, 8.507059e+37  ;;  %v1660_v43 = vadd.f32 %v7331_v60, %v7341_v2 }
 0x329   : > { %v2733_v29 = vsel %vm2732_vm9, %v6233_v14, %v2729_v36  ;;  %v2743_v33 = vmul.f32 %v6237_v16, %v2742_v62  ;;  %v7779_v13 = vadd.f32 %v7690_v7, %v2323_v31 }
 0x32a   : > { %v2738_v38 = vsel %vm2735_vm10, %v2737_v20, %v2733_v29  ;;  %v1830_v53 = vpop.f32.mrf.mxu2  ;;  %v3110_v39 = vld [vmem:[#allocation3 + $0xc1] sm:$0xff] }
 0x32b   : > { %6021 = vmatmul.msk.bf16.gmra.mxu0 %vm226_vm1, %v7764_v56  ;;  %v2052_v51 = vpop.f32.mrf.mxu3  ;;  %v6239_v3 = vpop.eup %6238  ;;  %v2995_v12 = vmul.f32 %v2738_v38, %v7693_v58  ;;  %v2744_v59 = vadd.f32 %v6237_v16, %v2743_v33  ;;  %v1880_v8 = vadd.f32 %v1830_v53, %v7324_v47  ;;  %v5954_v58 = vmul.f32 -1.442695, %v7779_v13  ;;  %v3654_v33 = vld [vmem:[#allocation3 + $0x78] sm:$0xff] }
 0x32c   : > { %v6241_v14 = vpop.eup %6240  ;;  %v7781_v4 = vadd.f32 1.0, %v6239_v3  ;;  %v2766_v47 = vand.u32 2147483648, %v7756_v26 }
 0x32d   : > { %3028 = vst.msk [vmem:[#allocation3 + $0xc9] sm:$0xff] %vm226_vm1, %v2995_v12  ;;  %v2748_v30 = vsel %vm2747_vm13, %v6237_v16, %v2744_v59  ;;  %v2756_v42 = vmul.f32 %v6241_v14, %v7756_v26  ;;  %v2102_v54 = vadd.f32 %v2052_v51, %v1880_v8  ;;  %vm2761_vm15 = vweird.f32 %v6241_v14  ;;  %v7819_v59 = vpop.f32.mrf.mxu1 }
 0x32e   : > { %v2753_v63 = vsel %vm2750_vm14, %v2752_v1, %v2748_v30  ;;  %6242 = vrcp.f32 %v7781_v4  ;;  %vm2762_vm3 = vmor %vm2760_vm2, %vm2761_vm15  ;;  %v2767_v55 = vor.u32 1.1754944e-38, %v2766_v47  ;;  %v7814_v51 = vpack.c.bf16 %v3655_v61, %v3654_v33 }
 0x32f   : > { %v2996_v34 = vmul.f32 %v2753_v63, %v7710_v27  ;;  %v2757_v15 = vsub.f32 1.0, %v2756_v42  ;;  %6244 = vpow2.f32 %v5954_v58  ;;  %v2324_v18 = vadd.f32 %v7714_v23, %v2102_v54 }
 0x330   : > { %v7790_v35 = vpop.f32.mrf.mxu0  ;;  %v2779_v3 = vand.u32 2147483647, %v7781_v4  ;;  %v2781_v12 = vand.u32 2147483648, %v7781_v4  ;;  %vm2775_vm6 = vweird.f32 %v7781_v4 }
 0x331   : > { %3029 = vst.msk [vmem:[#allocation3 + $0xd9] sm:$0xff] %vm226_vm1, %v2996_v34  ;;  %v2758_v19 = vmul.f32 %v6241_v14, %v2757_v15  ;;  %v7801_v44 = vadd.f32 %v7690_v7, %v2324_v18 }
 0x332   : > { %v1832_v25 = vpop.f32.mrf.mxu2  ;;  %v2782_v42 = vor.u32 1.1754944e-38, %v2781_v12  ;;  %vm2780_vm8 = vcmp.eq.f32.partialorder %v2779_v3, 8.507059e+37 }
 0x333   : > { %v2054_v27 = vpop.f32.mrf.mxu3  ;;  %v2759_v16 = vadd.f32 %v6241_v14, %v2758_v19  ;;  %v1881_v22 = vadd.f32 %v1832_v25, %v1658_v46  ;;  %v5955_v26 = vmul.f32 -1.442695, %v7801_v44 }
 0x334   : > { %v6243_v32 = vpop.eup %6242  ;;  %v3111_v21 = vld [vmem:[#allocation3 + $0xc9] sm:$0xff] }
 0x335   : > { %v6245_v45 = vpop.eup %6244  ;;  %v2763_v36 = vsel %vm2762_vm3, %v6241_v14, %v2759_v16  ;;  %v2771_v23 = vmul.f32 %v6243_v32, %v7781_v4  ;;  %v2103_v62 = vadd.f32 %v2054_v27, %v1881_v22  ;;  %v3134_v5 = vpack.c.bf16 %v3111_v21, %v3110_v39  ;;  %v3432_v27 = vld [vmem:[#allocation3 + $0x62] sm:$0xff] }
 0x336   : > { %v2768_v20 = vsel %vm2765_vm4, %v2767_v55, %v2763_v36  ;;  %v7804_v10 = vadd.f32 1.0, %v6245_v45  ;;  %vm2776_vm5 = vweird.f32 %v6243_v32 }
 0x337   : > { %v2997_v31 = vmul.f32 %v2768_v20, %v7729_v41  ;;  %v2772_v38 = vsub.f32 1.0, %v2771_v23  ;;  %v2325_v53 = vadd.f32 %v7742_v57, %v2103_v62  ;;  %5987 = vmatmul.msk.bf16.gmra.mxu2 %vm226_vm1, %v7716_v11  ;;  %5976 = vmatmul.msk.bf16.gmra.mxu1 %vm226_vm1, %v3134_v5  ;;  %vm2777_vm7 = vmor %vm2775_vm6, %vm2776_vm5  ;;  %v3657_v23 = vld [vmem:[#allocation3 + $0x98] sm:$0xff]  ;;  %v3656_v5 = vld [vmem:[#allocation3 + $0x90] sm:$0xff] }
 0x338   : > { %v7807_v29 = vpop.f32.mrf.mxu0  ;;  %6004 = vmatmul.msk.bf16.gmra.mxu3 %vm226_vm1, %v3459_v37  ;;  %6246 = vrcp.f32 %v7804_v10  ;;  %v2794_v16 = vand.u32 2147483647, %v7804_v10  ;;  %v3112_v37 = vld [vmem:[#allocation3 + $0xd9] sm:$0xff]  ;;  %vm2790_vm10 = vweird.f32 %v7804_v10 }
 0x339   : > { %3030 = vst.msk [vmem:[#allocation3 + $0xe1] sm:$0xff] %vm226_vm1, %v2997_v31  ;;  %v2773_v41 = vmul.f32 %v6243_v32, %v2772_v38  ;;  %6248 = vpow2.f32 %v5955_v26  ;;  %v7824_v11 = vadd.f32 %v7690_v7, %v2325_v53  ;;  %v7860_v38 = vpack.c.bf16 %v3657_v23, %v3656_v5 }
 0x33a   : > { %v1835_v57 = vpop.f32.mrf.mxu2  ;;  %vm2795_vm12 = vcmp.eq.f32.partialorder %v2794_v16, 8.507059e+37 }
 0x33b   : > { %6022 = vmatmul.msk.bf16.gmra.mxu0 %vm226_vm1, %v7814_v51  ;;  %v2057_v14 = vpop.f32.mrf.mxu3  ;;  %v2774_v1 = vadd.f32 %v6243_v32, %v2773_v41  ;;  %v5956_v8 = vmul.f32 -1.442695, %v7824_v11  ;;  %v1882_v30 = vadd.f32 %v1835_v57, %v7336_v48 }
 0x33d   : > { %v2778_v58 = vsel %vm2777_vm7, %v6243_v32, %v2774_v1  ;;  %6250 = vpow2.f32 %v5956_v8  ;;  %v2104_v63 = vadd.f32 %v2057_v14, %v1882_v30 }
 0x33e   : > { %v6247_v34 = vpop.eup %6246  ;;  %v2783_v15 = vsel %vm2780_vm8, %v2782_v42, %v2778_v58 }
 0x33f   : > { %v6249_v54 = vpop.eup %6248  ;;  %v2998_v46 = vmul.f32 %v2783_v15, %v7750_v28  ;;  %v2786_v19 = vmul.f32 %v6247_v34, %v7804_v10  ;;  %v2326_v4 = vadd.f32 %v7762_v24, %v2104_v63  ;;  %v3433_v28 = vld [vmem:[#allocation3 + $0x6a] sm:$0xff]  ;;  %v2796_v24 = vand.u32 2147483648, %v7804_v10 }
 0x340   : > { %v7831_v47 = vpop.f32.mrf.mxu0  ;;  %v7836_v50 = vadd.f32 1.0, %v6249_v54  ;;  %v7838_v48 = vpop.f32.mrf.mxu1  ;;  %v3113_v25 = vld [vmem:[#allocation3 + $0xe1] sm:$0xff]  ;;  %vm2791_vm9 = vweird.f32 %v6247_v34  ;;  %v3460_v36 = vpack.c.bf16 %v3433_v28, %v3432_v27 }
 0x341   : > { %3031 = vst.msk [vmem:[#allocation3 + $0xf1] sm:$0xff] %vm226_vm1, %v2998_v46  ;;  %v2787_v40 = vsub.f32 1.0, %v2786_v19  ;;  %v7844_v18 = vadd.f32 %v7690_v7, %v2326_v4  ;;  %v3135_v45 = vpack.c.bf16 %v3113_v25, %v3112_v37  ;;  %vm2792_vm11 = vmor %vm2790_vm10, %vm2791_vm9  ;;  %v2797_v20 = vor.u32 1.1754944e-38, %v2796_v24  ;;  %v3434_v4 = vld [vmem:[#allocation3 + $0x7a] sm:$0xff] }
 0x342   : > { %6252 = vrcp.f32 %v7836_v50  ;;  %v1837_v22 = vpop.f32.mrf.mxu2  ;;  %v2811_v58 = vand.u32 2147483648, %v7836_v50  ;;  %vm2805_vm14 = vweird.f32 %v7836_v50 }
 0x343   : > { %v2059_v32 = vpop.f32.mrf.mxu3  ;;  %v6251_v55 = vpop.eup %6250  ;;  %v2788_v21 = vmul.f32 %v6247_v34, %v2787_v40  ;;  %v5957_v60 = vmul.f32 -1.442695, %v7844_v18  ;;  %v1883_v2 = vadd.f32 %v1837_v22, %v1660_v43  ;;  %v3435_v43 = vld [vmem:[#allocation3 + $0x82] sm:$0xff] }
 0x344   : > { %v7850_v61 = vadd.f32 1.0, %v6251_v55  ;;  %v2812_v40 = vor.u32 1.1754944e-38, %v2811_v58  ;;  %v3461_v37 = vpack.c.bf16 %v3435_v43, %v3434_v4 }
 0x345   : > { %v2789_v62 = vadd.f32 %v6247_v34, %v2788_v21  ;;  %6254 = vpow2.f32 %v5957_v60  ;;  %v2105_v39 = vadd.f32 %v2059_v32, %v1883_v2 }
 0x346   : > { %6256 = vrcp.f32 %v7850_v61  ;;  %v2824_v25 = vand.u32 2147483647, %v7850_v61  ;;  %v2826_v27 = vand.u32 2147483648, %v7850_v61  ;;  %vm2820_vm4 = vweird.f32 %v7850_v61 }
 0x347   : > { %v2793_v33 = vsel %vm2792_vm11, %v6247_v34, %v2789_v62  ;;  %v2327_v31 = vadd.f32 %v7790_v35, %v2105_v39  ;;  %5988 = vmatmul.msk.bf16.gmra.mxu2 %vm226_vm1, %v7764_v56  ;;  %5977 = vmatmul.msk.bf16.gmra.mxu1 %vm226_vm1, %v3135_v45 }
 0x348   : > { %v7854_v26 = vpop.f32.mrf.mxu0  ;;  %6005 = vmatmul.msk.bf16.gmra.mxu3 %vm226_vm1, %v3460_v36  ;;  %v6253_v10 = vpop.eup %6252  ;;  %v2798_v53 = vsel %vm2795_vm12, %v2797_v20, %v2793_v33  ;;  %v2827_v20 = vor.u32 1.1754944e-38, %v2826_v27  ;;  %vm2825_vm6 = vcmp.eq.f32.partialorder %v2824_v25, 8.507059e+37 }
 0x349   : > { %v7863_v3 = vpop.f32.mrf.mxu1  ;;  %v2999_v12 = vmul.f32 %v2798_v53, %v7779_v13  ;;  %v2801_v41 = vmul.f32 %v6253_v10, %v7836_v50  ;;  %v7868_v57 = vadd.f32 %v7690_v7, %v2327_v31  ;;  %v2809_v13 = vand.u32 2147483647, %v7836_v50  ;;  %v9372_v50 = vld [vmem:[#allocation34_spill] sm:$0xff]  ;;  %v3659_v31 = vld [vmem:[#allocation3 + $0xb0] sm:$0xff] }
 0x34a   : > { %v1840_v56 = vpop.f32.mrf.mxu2  ;;  %vm2806_vm13 = vweird.f32 %v6253_v10  ;;  %v1662_v32 = vadd.f32 %v9372_v50, %v7353_v6  ;;  %v9373_v50 = vld [vmem:[#allocation35_spill] sm:$0xff] }
 0x34b   : > { %6023 = vmatmul.msk.bf16.gmra.mxu0 %vm226_vm1, %v7860_v38  ;;  %v2062_v35 = vpop.f32.mrf.mxu3  ;;  %v6255_v14 = vpop.eup %6254  ;;  %3032 = vst.msk [vmem:[#allocation3 + $0xf9] sm:$0xff] %vm226_vm1, %v2999_v12  ;;  %v2802_v1 = vsub.f32 1.0, %v2801_v41  ;;  %v5958_v8 = vmul.f32 -1.442695, %v7868_v57  ;;  %v1884_v30 = vadd.f32 %v1840_v56, %v7348_v17  ;;  %vm2807_vm15 = vmor %vm2805_vm14, %vm2806_vm13  ;;  %vm2810_vm2 = vcmp.eq.f32.partialorder %v2809_v13, 8.507059e+37  ;;  %v3658_v41 = vld [vmem:[#allocation3 + $0xa8] sm:$0xff] }
 0x34c   : > { %v6257_v42 = vpop.eup %6256  ;;  %v7877_v63 = vadd.f32 1.0, %v6255_v14  ;;  %v7909_v14 = vpack.c.bf16 %v3659_v31, %v3658_v41 }
 0x34d   : > { %v2803_v34 = vmul.f32 %v6253_v10, %v2802_v1  ;;  %v2816_v15 = vmul.f32 %v6257_v42, %v7850_v61  ;;  %6258 = vpow2.f32 %v5958_v8  ;;  %v2106_v19 = vadd.f32 %v2062_v35, %v1884_v30 }
 0x34e   : > { %6260 = vrcp.f32 %v7877_v63  ;;  %vm2821_vm3 = vweird.f32 %v6257_v42  ;;  %v2841_v1 = vand.u32 2147483648, %v7877_v63  ;;  %vm2835_vm8 = vweird.f32 %v7877_v63 }
 0x34f   : > { %v2804_v46 = vadd.f32 %v6253_v10, %v2803_v34  ;;  %v2817_v17 = vsub.f32 1.0, %v2816_v15  ;;  %v2328_v24 = vadd.f32 %v7807_v29, %v2106_v19  ;;  %v3114_v29 = vld [vmem:[#allocation3 + $0xf1] sm:$0xff]  ;;  %vm2822_vm5 = vmor %vm2820_vm4, %vm2821_vm3 }
 0x350   : > { %v7881_v54 = vpop.f32.mrf.mxu0 }
 0x351   : > { %v2808_v28 = vsel %vm2807_vm15, %v6253_v10, %v2804_v46  ;;  %v2818_v16 = vmul.f32 %v6257_v42, %v2817_v17  ;;  %v7887_v22 = vpop.f32.mrf.mxu1  ;;  %v7894_v62 = vadd.f32 %v7690_v7, %v2328_v24  ;;  %v2842_v17 = vor.u32 1.1754944e-38, %v2841_v1 }
 0x352   : > { %v2813_v55 = vsel %vm2810_vm2, %v2812_v40, %v2808_v28  ;;  %v1842_v21 = vpop.f32.mrf.mxu2  ;;  %v3115_v2 = vld [vmem:[#allocation3 + $0xf9] sm:$0xff] }
 0x353   : > { %v2064_v60 = vpop.f32.mrf.mxu3  ;;  %v6259_v45 = vpop.eup %6258  ;;  %v3000_v36 = vmul.f32 %v2813_v55, %v7801_v44  ;;  %v2819_v23 = vadd.f32 %v6257_v42, %v2818_v16  ;;  %v1885_v5 = vadd.f32 %v1842_v21, %v1662_v32  ;;  %v3136_v33 = vpack.c.bf16 %v3115_v2, %v3114_v29  ;;  %v9374_v32 = vld [vmem:[#allocation37_spill] sm:$0xff] }
 0x354   : > { %v6261_v39 = vpop.eup %6260  ;;  %v7897_v6 = vadd.f32 1.0, %v6259_v45  ;;  %v5959_v61 = vmul.f32 -1.442695, %v7894_v62  ;;  %v1664_v55 = vadd.f32 %v9374_v32, %v9373_v50  ;;  %v3436_v45 = vld [vmem:[#allocation3 + $0x92] sm:$0xff] }
 0x355   : > { %3033 = vst.msk [vmem:[#allocation3 + $0x109] sm:$0xff] %vm226_vm1, %v3000_v36  ;;  %v2823_v10 = vsel %vm2822_vm5, %v6257_v42, %v2819_v23  ;;  %v2831_v44 = vmul.f32 %v6261_v39, %v7877_v63  ;;  %v2107_v8 = vadd.f32 %v2064_v60, %v1885_v5  ;;  %vm2836_vm7 = vweird.f32 %v6261_v39 }
 0x356   : > { %v2828_v53 = vsel %vm2825_vm6, %v2827_v20, %v2823_v10  ;;  %6262 = vrcp.f32 %v7897_v6  ;;  %vm2837_vm9 = vmor %vm2835_vm8, %vm2836_vm7  ;;  %v2854_v21 = vand.u32 2147483647, %v7897_v6  ;;  %v2856_v60 = vand.u32 2147483648, %v7897_v6 }
 0x357   : > { %v3001_v56 = vmul.f32 %v2828_v53, %v7824_v11  ;;  %v2832_v35 = vsub.f32 1.0, %v2831_v44  ;;  %6264 = vpow2.f32 %v5959_v61  ;;  %5989 = vmatmul.msk.bf16.gmra.mxu2 %vm226_vm1, %v7814_v51  ;;  %5978 = vmatmul.msk.bf16.gmra.mxu1 %vm226_vm1, %v3136_v33  ;;  %v2839_v11 = vand.u32 2147483647, %v7877_v63  ;;  %v3661_v33 = vld [vmem:[#allocation3 + $0xc8] sm:$0xff] }
 0x358   : > { %v7903_v12 = vpop.f32.mrf.mxu0  ;;  %6006 = vmatmul.msk.bf16.gmra.mxu3 %vm226_vm1, %v3461_v37  ;;  %v2329_v51 = vadd.f32 %v7831_v47, %v2107_v8  ;;  %vm2850_vm12 = vweird.f32 %v7897_v6  ;;  %v2857_v31 = vor.u32 1.1754944e-38, %v2856_v60  ;;  %vm2855_vm14 = vcmp.eq.f32.partialorder %v2854_v21, 8.507059e+37  ;;  %v3438_v21 = vld [vmem:[#allocation3 + $0xaa] sm:$0xff]  ;;  %v3439_v60 = vld [vmem:[#allocation3 + $0xb2] sm:$0xff] }
 0x359   : > { %3034 = vst.msk [vmem:[#allocation3 + $0x111] sm:$0xff] %vm226_vm1, %v3001_v56  ;;  %v2833_v30 = vmul.f32 %v6261_v39, %v2832_v35  ;;  %v7919_v34 = vpop.f32.mrf.mxu1  ;;  %vm2840_vm10 = vcmp.eq.f32.partialorder %v2839_v11, 8.507059e+37  ;;  %v3660_v56 = vld [vmem:[#allocation3 + $0xc0] sm:$0xff] }
 0x35a   : > { %v1845_v42 = vpop.f32.mrf.mxu2  ;;  %v7923_v19 = vadd.f32 %v7690_v7, %v2329_v51 }
 0x35b   : > { %6024 = vmatmul.msk.bf16.gmra.mxu0 %vm226_vm1, %v7909_v14  ;;  %v2067_v13 = vpop.f32.mrf.mxu3  ;;  %v2834_v58 = vadd.f32 %v6261_v39, %v2833_v30  ;;  %v1886_v15 = vadd.f32 %v1845_v42, %v7360_v49 }
 0x35c   : > { %v6263_v46 = vpop.eup %6262  ;;  %v5960_v63 = vmul.f32 -1.442695, %v7923_v19  ;;  %v3116_v5 = vld [vmem:[#allocation3 + $0x109] sm:$0xff] }
 0x35d   : > { %v6265_v4 = vpop.eup %6264  ;;  %v2838_v43 = vsel %vm2837_vm9, %v6261_v39, %v2834_v58  ;;  %v2846_v47 = vmul.f32 %v6263_v46, %v7897_v6  ;;  %v2108_v40 = vadd.f32 %v2067_v13, %v1886_v15  ;;  %vm2851_vm11 = vweird.f32 %v6263_v46 }
 0x35e   : > { %v2843_v25 = vsel %vm2840_vm10, %v2842_v17, %v2838_v43  ;;  %v7926_v27 = vadd.f32 1.0, %v6265_v4  ;;  %vm2852_vm13 = vmor %vm2850_vm12, %vm2851_vm11  ;;  %v7948_v6 = vpack.c.bf16 %v3661_v33, %v3660_v56 }
 0x35f   : > { %v3002_v49 = vmul.f32 %v2843_v25, %v7844_v18  ;;  %v2847_v16 = vsub.f32 1.0, %v2846_v47  ;;  %v2330_v24 = vadd.f32 %v7854_v26, %v2108_v40  ;;  %v3437_v26 = vld [vmem:[#allocation3 + $0x9a] sm:$0xff] }
 0x360   : > { %v7929_v28 = vpop.f32.mrf.mxu0  ;;  %6266 = vrcp.f32 %v7926_v27  ;;  %v3117_v18 = vld [vmem:[#allocation3 + $0x111] sm:$0xff]  ;;  %v3462_v44 = vpack.c.bf16 %v3437_v26, %v3436_v45  ;;  %vm2865_vm2 = vweird.f32 %v7926_v27 }
 0x361   : > { %3035 = vst.msk [vmem:[#allocation3 + $0x121] sm:$0xff] %vm226_vm1, %v3002_v49  ;;  %v2848_v2 = vmul.f32 %v6263_v46, %v2847_v16  ;;  %6268 = vpow2.f32 %v5960_v63  ;;  %v7940_v37 = vadd.f32 %v7690_v7, %v2330_v24  ;;  %v3137_v10 = vpack.c.bf16 %v3117_v18, %v3116_v5 }
 0x362   : > { %v1847_v36 = vpop.f32.mrf.mxu2 }
 0x363   : > { %v2069_v23 = vpop.f32.mrf.mxu3  ;;  %v2849_v29 = vadd.f32 %v6263_v46, %v2848_v2  ;;  %v5961_v39 = vmul.f32 -1.442695, %v7940_v37  ;;  %v1887_v20 = vadd.f32 %v1847_v36, %v1664_v55  ;;  %v9375_v2 = vld [vmem:[#allocation40_spill] sm:$0xff] }
 0x364   : > { %v7944_v53 = vpop.f32.mrf.mxu1 }
 0x365   : > { %v2853_v61 = vsel %vm2852_vm13, %v6263_v46, %v2849_v29  ;;  %6270 = vpow2.f32 %v5961_v39  ;;  %v2109_v41 = vadd.f32 %v2069_v23, %v1887_v20 }
 0x366   : > { %v6267_v35 = vpop.eup %6266  ;;  %v2858_v1 = vsel %vm2855_vm14, %v2857_v31, %v2853_v61 }
 0x367   : > { %v6269_v30 = vpop.eup %6268  ;;  %v3003_v11 = vmul.f32 %v2858_v1, %v7868_v57  ;;  %v2861_v51 = vmul.f32 %v6267_v35, %v7926_v27  ;;  %v2331_v42 = vadd.f32 %v7881_v54, %v2109_v41  ;;  %5990 = vmatmul.msk.bf16.gmra.mxu2 %vm226_vm1, %v7860_v38  ;;  %5979 = vmatmul.msk.bf16.gmra.mxu1 %vm226_vm1, %v3137_v10  ;;  %v2869_v57 = vand.u32 2147483647, %v7926_v27 }
 0x368   : > { %v7946_v8 = vpop.f32.mrf.mxu0  ;;  %6007 = vmatmul.msk.bf16.gmra.mxu3 %vm226_vm1, %v3462_v44  ;;  %v7956_v13 = vadd.f32 1.0, %v6269_v30  ;;  %v2871_v54 = vand.u32 2147483648, %v7926_v27  ;;  %vm2866_vm15 = vweird.f32 %v6267_v35  ;;  %v9376_v27 = vld [vmem:[#allocation36_spill] sm:$0xff]  ;;  %v3118_v31 = vld [vmem:[#allocation3 + $0x121] sm:$0xff]  ;;  %v7988_v10 = vpack.c.bf16 %v3439_v60, %v3438_v21 }
 0x369   : > { %3036 = vst.msk [vmem:[#allocation3 + $0x129] sm:$0xff] %vm226_vm1, %v3003_v11  ;;  %v2862_v58 = vsub.f32 1.0, %v2861_v51  ;;  %v7961_v15 = vadd.f32 %v7690_v7, %v2331_v42  ;;  %vm2867_vm3 = vmor %vm2865_vm2, %vm2866_vm15  ;;  %vm2870_vm4 = vcmp.eq.f32.partialorder %v2869_v57, 8.507059e+37  ;;  %v1666_v18 = vadd.f32 %v9376_v27, %v9375_v2  ;;  %v3663_v44 = vld [vmem:[#allocation3 + $0xe0] sm:$0xff]  ;;  %v3662_v51 = vld [vmem:[#allocation3 + $0xd8] sm:$0xff] }
 0x36a   : > { %6272 = vrcp.f32 %v7956_v13  ;;  %v1850_v38 = vpop.f32.mrf.mxu2  ;;  %v2872_v16 = vor.u32 1.1754944e-38, %v2871_v54  ;;  %v2884_v61 = vand.u32 2147483647, %v7956_v13  ;;  %v2886_v41 = vand.u32 2147483648, %v7956_v13 }
 0x36b   : > { %6025 = vmatmul.msk.bf16.gmra.mxu0 %vm226_vm1, %v7948_v6  ;;  %v2072_v46 = vpop.f32.mrf.mxu3  ;;  %v6271_v17 = vpop.eup %6270  ;;  %v2863_v4 = vmul.f32 %v6267_v35, %v2862_v58  ;;  %v5962_v43 = vmul.f32 -1.442695, %v7961_v15  ;;  %v1888_v47 = vadd.f32 %v1850_v38, %v7370_v0  ;;  %v8002_v58 = vpack.c.bf16 %v3663_v44, %v3662_v51  ;;  %v3441_v44 = vld [vmem:[#allocation3 + $0xca] sm:$0xff] }
 0x36c   : > { %v7970_v40 = vadd.f32 1.0, %v6271_v17  ;;  %v7973_v63 = vpop.f32.mrf.mxu1  ;;  %vm2880_vm6 = vweird.f32 %v7956_v13  ;;  %vm2885_vm8 = vcmp.eq.f32.partialorder %v2884_v61, 8.507059e+37 }
 0x36d   : > { %v2864_v25 = vadd.f32 %v6267_v35, %v2863_v4  ;;  %6274 = vpow2.f32 %v5962_v43  ;;  %v2110_v49 = vadd.f32 %v2072_v46, %v1888_v47  ;;  %v2887_v46 = vor.u32 1.1754944e-38, %v2886_v41 }
 0x36e   : > { %6276 = vrcp.f32 %v7970_v40  ;;  %v2899_v17 = vand.u32 2147483647, %v7970_v40  ;;  %v2901_v4 = vand.u32 2147483648, %v7970_v40  ;;  %vm2895_vm10 = vweird.f32 %v7970_v40 }
 0x36f   : > { %v2868_v50 = vsel %vm2867_vm3, %v6267_v35, %v2864_v25  ;;  %v2332_v32 = vadd.f32 %v7903_v12, %v2110_v49 }
 0x370   : > { %v7976_v24 = vpop.f32.mrf.mxu0  ;;  %v6273_v0 = vpop.eup %6272  ;;  %v2873_v55 = vsel %vm2870_vm4, %v2872_v16, %v2868_v50  ;;  %v3119_v23 = vld [vmem:[#allocation3 + $0x129] sm:$0xff]  ;;  %v2902_v21 = vor.u32 1.1754944e-38, %v2901_v4  ;;  %vm2900_vm12 = vcmp.eq.f32.partialorder %v2899_v17, 8.507059e+37 }
 0x371   : > { %v3004_v45 = vmul.f32 %v2873_v55, %v7894_v62  ;;  %v2876_v26 = vmul.f32 %v6273_v0, %v7956_v13  ;;  %v7984_v36 = vadd.f32 %v7690_v7, %v2332_v32  ;;  %v7994_v35 = vpack.c.bf16 %v3119_v23, %v3118_v31  ;;  %v3440_v31 = vld [vmem:[#allocation3 + $0xc2] sm:$0xff] }
 0x372   : > { %v1852_v29 = vpop.f32.mrf.mxu2  ;;  %vm2881_vm5 = vweird.f32 %v6273_v0 }
 0x373   : > { %v2074_v39 = vpop.f32.mrf.mxu3  ;;  %v6275_v20 = vpop.eup %6274  ;;  %3037 = vst.msk [vmem:[#allocation3 + $0x139] sm:$0xff] %vm226_vm1, %v3004_v45  ;;  %v2877_v12 = vsub.f32 1.0, %v2876_v26  ;;  %v5963_v5 = vmul.f32 -1.442695, %v7984_v36  ;;  %v1889_v33 = vadd.f32 %v1852_v29, %v1666_v18  ;;  %vm2882_vm7 = vmor %vm2880_vm6, %vm2881_vm5 }
 0x374   : > { %v6277_v62 = vpop.eup %6276  ;;  %v7992_v56 = vadd.f32 1.0, %v6275_v20  ;;  %v7997_v11 = vpop.f32.mrf.mxu1  ;;  %v9378_v20 = vld [vmem:[#allocation39_spill] sm:$0xff] }
 0x375   : > { %v2878_v1 = vmul.f32 %v6273_v0, %v2877_v12  ;;  %v2891_v30 = vmul.f32 %v6277_v62, %v7970_v40  ;;  %6278 = vpow2.f32 %v5963_v5  ;;  %v2111_v38 = vadd.f32 %v2074_v39, %v1889_v33 }
 0x376   : > { %6280 = vrcp.f32 %v7992_v56  ;;  %vm2896_vm9 = vweird.f32 %v6277_v62  ;;  %v2916_v29 = vand.u32 2147483648, %v7992_v56  ;;  %v1668_v12 = vadd.f32 %v7759_v9, %v9378_v20  ;;  %v6425_v9 = vld [vmem:[%s9263_s2] ss:$0 sm:$0xff] }
 0x377   : > { %v2879_v57 = vadd.f32 %v6273_v0, %v2878_v1  ;;  %v2892_v54 = vsub.f32 1.0, %v2891_v30  ;;  %5991 = vmatmul.msk.bf16.gmra.mxu2 %vm226_vm1, %v7909_v14  ;;  %5980 = vmatmul.msk.bf16.gmra.mxu1 %vm226_vm1, %v7994_v35  ;;  %v2333_v47 = vadd.f32 %v7929_v28, %v2111_v38  ;;  %vm2897_vm11 = vmor %vm2895_vm10, %vm2896_vm9  ;;  %v9377_v28 = vld [vmem:[#allocation38_spill] sm:$0xff]  ;;  %v2914_v33 = vand.u32 2147483647, %v7992_v56 }
 0x378   : > { %v8000_v42 = vpop.f32.mrf.mxu0  ;;  %6008 = vmatmul.msk.bf16.gmra.mxu3 %vm226_vm1, %v7988_v10  ;;  %vm2910_vm14 = vweird.f32 %v7992_v56  ;;  %v2917_v51 = vor.u32 1.1754944e-38, %v2916_v29  ;;  %v8045_v38 = vpack.c.bf16 %v3441_v44, %v3440_v31 }
 0x379   : > { %v2883_v43 = vsel %vm2882_vm7, %v6273_v0, %v2879_v57  ;;  %v2893_v13 = vmul.f32 %v6277_v62, %v2892_v54  ;;  %v8019_v55 = vadd.f32 %v7690_v7, %v2333_v47  ;;  %vm2915_vm2 = vcmp.eq.f32.partialorder %v2914_v33, 8.507059e+37  ;;  %v6068_v33 = vld [vmem:[%s9264_s3 + $0x18] sm:$0xf] }
 0x37a   : > { %v2888_v14 = vsel %vm2885_vm8, %v2887_v46, %v2883_v43  ;;  %v1855_v25 = vpop.f32.mrf.mxu2  ;;  %v3665_v46 = vld [vmem:[#allocation3 + $0xf8] sm:$0xff] }
 0x37b   : > { %6026 = vmatmul.msk.bf16.gmra.mxu0 %vm226_vm1, %v8002_v58  ;;  %v2077_v49 = vpop.f32.mrf.mxu3  ;;  %v6279_v16 = vpop.eup %6278  ;;  %v3005_v50 = vmul.f32 %v2888_v14, %v7923_v19  ;;  %v2894_v32 = vadd.f32 %v6277_v62, %v2893_v13  ;;  %v1890_v2 = vadd.f32 %v1855_v25, %v9377_v28  ;;  %v5964_v19 = vmul.f32 -1.442695, %v8019_v55  ;;  %v3120_v13 = vld [vmem:[#allocation3 + $0x139] sm:$0xff] }
 0x37c   : > { %v6281_v0 = vpop.eup %6280  ;;  %v8021_v60 = vadd.f32 1.0, %v6279_v16  ;;  %v8027_v45 = vpop.f32.mrf.mxu1 }
 0x37d   : > { %3038 = vst.msk [vmem:[#allocation3 + $0x141] sm:$0xff] %vm226_vm1, %v3005_v50  ;;  %v2898_v27 = vsel %vm2897_vm11, %v6277_v62, %v2894_v32  ;;  %v2906_v18 = vmul.f32 %v6281_v0, %v7992_v56  ;;  %v2112_v39 = vadd.f32 %v2077_v49, %v1890_v2  ;;  %vm2911_vm13 = vweird.f32 %v6281_v0  ;;  %v3664_v50 = vld [vmem:[#allocation3 + $0xf0] sm:$0xff] }
 0x37e   : > { %v2903_v40 = vsel %vm2900_vm12, %v2902_v21, %v2898_v27  ;;  %6282 = vrcp.f32 %v8021_v60  ;;  %vm2912_vm15 = vmor %vm2910_vm14, %vm2911_vm13  ;;  %v8063_v28 = vpack.c.bf16 %v3665_v46, %v3664_v50  ;;  %v2929_v2 = vand.u32 2147483647, %v8021_v60 }
 0x37f   : > { %v3006_v26 = vmul.f32 %v2903_v40, %v7940_v37  ;;  %v2907_v23 = vsub.f32 1.0, %v2906_v18  ;;  %6284 = vpow2.f32 %v5964_v19  ;;  %v2334_v62 = vadd.f32 %v7946_v8, %v2112_v39 }
 0x380   : > { %v8030_v7 = vpop.f32.mrf.mxu0  ;;  %v2931_v27 = vand.u32 2147483648, %v8021_v60  ;;  %vm2925_vm4 = vweird.f32 %v8021_v60  ;;  %vm2930_vm6 = vcmp.eq.f32.partialorder %v2929_v2, 8.507059e+37 }
 0x381   : > { %3039 = vst.msk [vmem:[#allocation3 + $0x151] sm:$0xff] %vm226_vm1, %v3006_v26  ;;  %v2908_v5 = vmul.f32 %v6281_v0, %v2907_v23  ;;  %v8043_v57 = vadd.f32 %v6425_v9, %v2334_v62  ;;  %v4412_v62 = vsel %vm548_vm0, %v6068_v33, 0 }
 0x382   : > { %v1857_v61 = vpop.f32.mrf.mxu2  ;;  %v2932_v39 = vor.u32 1.1754944e-38, %v2931_v27  ;;  %4421 = vmatpush.bf16.msra.mxu3 %v4412_v62  ;;  %v3666_v27 = vld [vmem:[#allocation3 + $0x108] sm:$0xff] }
 0x383   : > { %v2079_v37 = vpop.f32.mrf.mxu3  ;;  %v2909_v41 = vadd.f32 %v6281_v0, %v2908_v5  ;;  %v1891_v1 = vadd.f32 %v1857_v61, %v1668_v12  ;;  %v5965_v25 = vmul.f32 -1.442695, %v8043_v57 }
 0x384   : > { %v6283_v30 = vpop.eup %6282  ;;  %v3121_v54 = vld [vmem:[#allocation3 + $0x141] sm:$0xff]  ;;  %v8048_v56 = vpop.f32.mrf.mxu1 }
 0x385   : > { %v6285_v8 = vpop.eup %6284  ;;  %v2913_v17 = vsel %vm2912_vm15, %v6281_v0, %v2909_v41  ;;  %v2921_v4 = vmul.f32 %v6283_v30, %v8021_v60  ;;  %v2113_v43 = vadd.f32 %v2079_v37, %v1891_v1  ;;  %v8053_v49 = vpack.c.bf16 %v3121_v54, %v3120_v13 }
 0x386   : > { %v2918_v47 = vsel %vm2915_vm2, %v2917_v51, %v2913_v17  ;;  %v8050_v14 = vadd.f32 1.0, %v6285_v8  ;;  %vm2926_vm3 = vweird.f32 %v6283_v30  ;;  %v3442_v8 = vld [vmem:[#allocation3 + $0xda] sm:$0xff] }
 0x387   : > { %v3007_v32 = vmul.f32 %v2918_v47, %v7961_v15  ;;  %v2922_v0 = vsub.f32 1.0, %v2921_v4  ;;  %v2335_v21 = vadd.f32 %v7976_v24, %v2113_v43  ;;  %5992 = vmatmul.msk.bf16.gmra.mxu2 %vm226_vm1, %v7948_v6  ;;  %5981 = vmatmul.msk.bf16.gmra.mxu1 %vm226_vm1, %v8053_v49  ;;  %v6051_v24 = vld [vmem:[%s9264_s3 + $0x14] sm:$0xf]  ;;  %vm2927_vm5 = vmor %vm2925_vm4, %vm2926_vm3  ;;  %v3667_v47 = vld [vmem:[#allocation3 + $0x110] sm:$0xff] }
 0x388   : > { %v8055_v16 = vpop.f32.mrf.mxu0  ;;  %6009 = vmatmul.msk.bf16.gmra.mxu3 %vm226_vm1, %v8045_v38  ;;  %6286 = vrcp.f32 %v8050_v14  ;;  %v4189_v40 = vsel %vm548_vm0, %v6051_v24, 0  ;;  %v3122_v13 = vld [vmem:[#allocation3 + $0x151] sm:$0xff]  ;;  %vm2940_vm8 = vweird.f32 %v8050_v14 }
 0x389   : > { %3040 = vst.msk [vmem:[#allocation3 + $0x159] sm:$0xff] %vm226_vm1, %v3007_v32  ;;  %v2923_v15 = vmul.f32 %v6283_v30, %v2922_v0  ;;  %6288 = vpow2.f32 %v5965_v25  ;;  %v8071_v6 = vadd.f32 %v6425_v9, %v2335_v21  ;;  %4198 = vmatpush.bf16.msra.mxu2 %v4189_v40  ;;  %v2946_v9 = vand.u32 2147483648, %v8050_v14 }
 0x38a   : > { %v3344_v18 = vpop.f32.mrf.mxu2 }
 0x38b   : > { %6027 = vmatmul.msk.bf16.gmra.mxu0 %vm226_vm1, %v8063_v28  ;;  %v3534_v19 = vpop.f32.mrf.mxu3  ;;  %v2924_v26 = vadd.f32 %v6283_v30, %v2923_v15  ;;  %v5966_v23 = vmul.f32 -1.442695, %v8071_v6  ;;  %v3345_v29 = vadd.f32 %v3344_v18, %v7788_v52  ;;  %v6085_v15 = vld [vmem:[%s9264_s3 + $0x1c] sm:$0xf]  ;;  %v8117_v18 = vpack.c.bf16 %v3667_v47, %v3666_v27 }
 0x38c   : > { %v8082_v12 = vpop.f32.mrf.mxu1 }
 0x38d   : > { %v2928_v20 = vsel %vm2927_vm5, %v6283_v30, %v2924_v26  ;;  %6290 = vpow2.f32 %v5966_v23  ;;  %v3614_v5 = vadd.f32 %v3534_v19, %v3345_v29  ;;  %v6102_v29 = vld [vmem:[%s9264_s3 + $0x20] sm:$0xf] }
 0x38e   : > { %v6287_v31 = vpop.eup %6286  ;;  %v2933_v44 = vsel %vm2930_vm6, %v2932_v39, %v2928_v20 }
 0x38f   : > { %v6289_v52 = vpop.eup %6288  ;;  %v3008_v61 = vmul.f32 %v2933_v44, %v7984_v36  ;;  %v2936_v37 = vmul.f32 %v6287_v31, %v8050_v14  ;;  %v8093_v41 = vadd.f32 %v8000_v42, %v3614_v5  ;;  %v3443_v36 = vld [vmem:[#allocation3 + $0xe2] sm:$0xff]  ;;  %vm2941_vm7 = vweird.f32 %v6287_v31 }
 0x390   : > { %v8087_v60 = vpop.f32.mrf.mxu0  ;;  %v8095_v1 = vadd.f32 1.0, %v6289_v52  ;;  %v3123_v51 = vld [vmem:[#allocation3 + $0x159] sm:$0xff]  ;;  %v2944_v42 = vand.u32 2147483647, %v8050_v14  ;;  %v8109_v2 = vpack.c.bf16 %v3443_v36, %v3442_v8  ;;  %vm2942_vm9 = vmor %vm2940_vm8, %vm2941_vm7  ;;  %v4634_v14 = vsel %vm548_vm0, %v6085_v15, 0 }
 0x391   : > { %3041 = vst.msk [vmem:[#allocation3 + $0x169] sm:$0xff] %vm226_vm1, %v3008_v61  ;;  %v2937_v30 = vsub.f32 1.0, %v2936_v37  ;;  %v8104_v50 = vpack.c.bf16 %v3123_v51, %v3122_v13  ;;  %4643 = vmatpush.bf16.msra.mxu0 %v4634_v14 }
 0x392   : > { %6292 = vrcp.f32 %v8095_v1  ;;  %v3346_v54 = vpop.f32.mrf.mxu2  ;;  %vm2945_vm10 = vcmp.eq.f32.partialorder %v2944_v42, 8.507059e+37  ;;  %v2959_v52 = vand.u32 2147483647, %v8095_v1 }
 0x393   : > { %v3536_v46 = vpop.f32.mrf.mxu3  ;;  %v6291_v17 = vpop.eup %6290  ;;  %v2938_v4 = vmul.f32 %v6287_v31, %v2937_v30  ;;  %v3347_v43 = vadd.f32 %v3346_v54, %v7819_v59  ;;  %v2947_v59 = vor.u32 1.1754944e-38, %v2946_v9 }
 0x394   : > { %v8102_v25 = vadd.f32 1.0, %v6291_v17  ;;  %v8107_v0 = vpop.f32.mrf.mxu1  ;;  %vm2960_vm13 = vcmp.eq.f32.partialorder %v2959_v52, 8.507059e+37 }
 0x395   : > { %v2939_v32 = vadd.f32 %v6287_v31, %v2938_v4  ;;  %v3615_v21 = vadd.f32 %v3536_v46, %v3347_v43 }
 0x396   : > { %6294 = vrcp.f32 %v8102_v25  ;;  %v2976_v36 = vand.u32 2147483648, %v8102_v25  ;;  %v2974_v42 = vand.u32 2147483647, %v8102_v25  ;;  %vm2970_vm15 = vweird.f32 %v8102_v25 }
 0x397   : > { %v2943_v19 = vsel %vm2942_vm9, %v6287_v31, %v2939_v32  ;;  %5993 = vmatmul.msk.bf16.gmra.mxu2 %vm226_vm1, %v8002_v58  ;;  %v8125_v40 = vadd.f32 %v8030_v7, %v3615_v21  ;;  %5982 = vmatmul.msk.bf16.gmra.mxu1 %vm226_vm1, %v8104_v50  ;;  %v4856_v7 = vsel %vm548_vm0, %v6102_v29, 0  ;;  %vm2955_vm0 = vweird.f32 %v8095_v1  ;;  %v3444_v21 = vld [vmem:[#allocation3 + $0xf2] sm:$0xff] }
 0x398   : > { %v8115_v24 = vpop.f32.mrf.mxu0  ;;  %6010 = vmatmul.msk.bf16.gmra.mxu3 %vm226_vm1, %v8109_v2  ;;  %v6293_v26 = vpop.eup %6292  ;;  %v2948_v23 = vsel %vm2945_vm10, %v2947_v59, %v2943_v19  ;;  %4865 = vmatpush.bf16.msra.mxu1 %v4856_v7  ;;  %v3124_v59 = vld [vmem:[#allocation3 + $0x169] sm:$0xff]  ;;  %v2977_v19 = vor.u32 1.1754944e-38, %v2976_v36  ;;  %vm2975_vm3 = vcmp.eq.f32.partialorder %v2974_v42, 8.507059e+37  ;;  %v3671_v36 = vld [vmem:[#allocation3 + $0x140] sm:$0xff] }
 0x399   : > { %v3009_v39 = vmul.f32 %v2948_v23, %v8019_v55  ;;  %v2951_v20 = vmul.f32 %v6293_v26, %v8095_v1  ;;  %v2961_v55 = vand.u32 2147483648, %v8095_v1  ;;  %vm2956_vm11 = vweird.f32 %v6293_v26  ;;  %v3445_v1 = vld [vmem:[#allocation3 + $0xfa] sm:$0xff] }
 0x39a   : > { %v3349_v5 = vpop.f32.mrf.mxu2  ;;  %vm2957_vm12 = vmor %vm2955_vm0, %vm2956_vm11  ;;  %v3868_v42 = vld [vmem:[#allocation3 + $0x19] sm:$0xff] }
 0x39b   : > { %6028 = vmatmul.msk.bf16.gmra.mxu0 %vm226_vm1, %v8117_v18  ;;  %v3539_v33 = vpop.f32.mrf.mxu3  ;;  %3042 = vst.msk [vmem:[#allocation3 + $0x171] sm:$0xff] %vm226_vm1, %v3009_v39  ;;  %v2952_v31 = vsub.f32 1.0, %v2951_v20  ;;  %v3350_v44 = vadd.f32 %v3349_v5, %v7838_v48  ;;  %v2962_v8 = vor.u32 1.1754944e-38, %v2961_v55  ;;  %v8160_v20 = vpack.c.bf16 %v3445_v1, %v3444_v21 }
 0x39c   : > { %v6295_v62 = vpop.eup %6294  ;;  %v8142_v30 = vpop.f32.mrf.mxu1 }
 0x39d   : > { %v2953_v61 = vmul.f32 %v6293_v26, %v2952_v31  ;;  %v2966_v37 = vmul.f32 %v6295_v62, %v8102_v25  ;;  %v3616_v51 = vadd.f32 %v3539_v33, %v3350_v44  ;;  %vm2971_vm14 = vweird.f32 %v6295_v62  ;;  %v3668_v25 = vld [vmem:[#allocation3 + $0x120] sm:$0xff] }
 0x39e   : > { %vm2972_vm2 = vmor %vm2970_vm15, %vm2971_vm14 }
 0x39f   : > { %v2954_v54 = vadd.f32 %v6293_v26, %v2953_v61  ;;  %v2967_v46 = vsub.f32 1.0, %v2966_v37  ;;  %v8148_v48 = vadd.f32 %v8055_v16, %v3616_v51  ;;  %v3446_v51 = vld [vmem:[#allocation3 + $0x10a] sm:$0xff] }
 0x3a0   : > { %v8144_v9 = vpop.f32.mrf.mxu0 }
 0x3a1   : > { %v2958_v17 = vsel %vm2957_vm12, %v6293_v26, %v2954_v54  ;;  %v2968_v4 = vmul.f32 %v6295_v62, %v2967_v46  ;;  %v3669_v26 = vld [vmem:[#allocation3 + $0x128] sm:$0xff]  ;;  %v3447_v54 = vld [vmem:[#allocation3 + $0x112] sm:$0xff] }
 0x3a2   : > { %v2963_v43 = vsel %vm2960_vm13, %v2962_v8, %v2958_v17  ;;  %v3351_v13 = vpop.f32.mrf.mxu2  ;;  %v3125_v32 = vld [vmem:[#allocation3 + $0x171] sm:$0xff]  ;;  %v8167_v5 = vpack.c.bf16 %v3669_v26, %v3668_v25  ;;  %v3869_v8 = vld [vmem:[#allocation3 + $0x21] sm:$0xff] }
 0x3a3   : > { %v3541_v47 = vpop.f32.mrf.mxu3  ;;  %v3010_v27 = vmul.f32 %v2963_v43, %v8043_v57  ;;  %v2969_v16 = vadd.f32 %v6295_v62, %v2968_v4  ;;  %v3352_v15 = vadd.f32 %v3351_v13, %v7863_v3  ;;  %v8155_v14 = vpack.c.bf16 %v3125_v32, %v3124_v59  ;;  %v3673_v25 = vld [vmem:[#allocation3 + $0x158] sm:$0xff] }
 0x3a4   : > { %v8158_v29 = vpop.f32.mrf.mxu1  ;;  %v3900_v43 = vpack.c.bf16 %v3869_v8, %v3868_v42 }
 0x3a5   : > { %3043 = vst.msk [vmem:[#allocation3 + $0x181] sm:$0xff] %vm226_vm1, %v3010_v27  ;;  %v2973_v23 = vsel %vm2972_vm2, %v6295_v62, %v2969_v16  ;;  %v3617_v39 = vadd.f32 %v3541_v47, %v3352_v15  ;;  %v3670_v47 = vld [vmem:[#allocation3 + $0x138] sm:$0xff] }
 0x3a6   : > { %v2978_v57 = vsel %vm2975_vm3, %v2977_v19, %v2973_v23  ;;  %v3448_v23 = vld [vmem:[#allocation3 + $0x122] sm:$0xff] }
 0x3a7   : > { %v3011_v3 = vmul.f32 %v2978_v57, %v8071_v6  ;;  %5994 = vmatmul.msk.bf16.gmra.mxu2 %vm226_vm1, %v8063_v28  ;;  %v8170_v33 = vadd.f32 %v8087_v60, %v3617_v39  ;;  %5983 = vmatmul.msk.bf16.gmra.mxu1 %vm226_vm1, %v8155_v14  ;;  %v3871_v57 = vld [vmem:[#allocation3 + $0x39] sm:$0xff] }
 0x3a8   : > { %v3771_v7 = vpop.f32.mrf.mxu0  ;;  %6011 = vmatmul.msk.bf16.gmra.mxu3 %vm226_vm1, %v8160_v20 }
 0x3a9   : > { %3044 = vst.msk [vmem:[#allocation3 + $0x189] sm:$0xff] %vm226_vm1, %v3011_v3 }
 0x3aa   : > { %v3354_v6 = vpop.f32.mrf.mxu2 }
 0x3ab   : > { %6029 = vmatmul.msk.bf16.gmra.mxu0 %vm226_vm1, %v8167_v5  ;;  %v3544_v31 = vpop.f32.mrf.mxu3  ;;  %v3355_v44 = vadd.f32 %v3354_v6, %v7887_v22  ;;  %v8186_v22 = vpack.c.bf16 %v3447_v54, %v3446_v51 }
 0x3ac   : > { %v8178_v62 = vpop.f32.mrf.mxu1 }
 0x3ad   : > { %v3618_v52 = vadd.f32 %v3544_v31, %v3355_v44  ;;  %v3870_v31 = vld [vmem:[#allocation3 + $0x31] sm:$0xff] }
 0x3af   : > { %v8181_v61 = vadd.f32 %v8115_v24, %v3618_v52  ;;  %v8192_v24 = vpack.c.bf16 %v3671_v36, %v3670_v47  ;;  %v3451_v47 = vld [vmem:[#allocation3 + $0x142] sm:$0xff] }
 0x3b0   : > { %v3773_v55 = vpop.f32.mrf.mxu0 }
 0x3b1   : > { %9379 = vst [vmem:[#allocation41_spill] sm:$0xff] %v8192_v24 }
 0x3b2   : > { %v3356_v60 = vpop.f32.mrf.mxu2 }
 0x3b3   : > { %v3546_v37 = vpop.f32.mrf.mxu3  ;;  %v3357_v46 = vadd.f32 %v3356_v60, %v7919_v34  ;;  %v3672_v60 = vld [vmem:[#allocation3 + $0x150] sm:$0xff] }
 0x3b4   : > { %v8184_v17 = vpop.f32.mrf.mxu1 }
 0x3b5   : > { %v3619_v4 = vadd.f32 %v3546_v37, %v3357_v46 }
 0x3b7   : > { %5995 = vmatmul.msk.bf16.gmra.mxu2 %vm226_vm1, %v8117_v18  ;;  %v8195_v34 = vadd.f32 %v8144_v9, %v3619_v4  ;;  %6035 = vmatmul.msk.bf16.vlgmr.msrb.gmra.mxu1 %vm226_vm1, %v3900_v43  ;;  %v3449_v9 = vld [vmem:[#allocation3 + $0x12a] sm:$0xff] }
 0x3b8   : > { %v3776_v13 = vpop.f32.mrf.mxu0  ;;  %6012 = vmatmul.msk.bf16.gmra.mxu3 %vm226_vm1, %v8186_v22  ;;  %v8208_v44 = vpack.c.bf16 %v3449_v9, %v3448_v23 }
 0x3ba   : > { %v3359_v32 = vpop.f32.mrf.mxu2  ;;  %9380 = vst [vmem:[#allocation42_spill] sm:$0xff] %v8208_v44 }
 0x3bb   : > { %6030 = vmatmul.msk.bf16.gmra.mxu0 %vm226_vm1, %v8192_v24  ;;  %v3549_v21 = vpop.f32.mrf.mxu3  ;;  %v3360_v1 = vadd.f32 %v3359_v32, %v7944_v53  ;;  %v8210_v53 = vpack.c.bf16 %v3871_v57, %v3870_v31 }
 0x3bc   : > { %v8201_v27 = vpop.f32.mrf.mxu1 }
 0x3bd   : > { %v3620_v16 = vadd.f32 %v3549_v21, %v3360_v1  ;;  %v3873_v21 = vld [vmem:[#allocation3 + $0x51] sm:$0xff] }
 0x3be   : > { %v3675_v1 = vld [vmem:[#allocation3 + $0x170] sm:$0xff] }
 0x3bf   : > { %v8203_v59 = vadd.f32 %v3771_v7, %v3620_v16  ;;  %v8216_v7 = vpack.c.bf16 %v3673_v25, %v3672_v60 }
 0x3c0   : > { %v3778_v15 = vpop.f32.mrf.mxu0 }
 0x3c1   : > { %9381 = vst [vmem:[#allocation43_spill] sm:$0xff] %v8216_v7 }
 0x3c2   : > { %v3361_v19 = vpop.f32.mrf.mxu2 }
 0x3c3   : > { %v3551_v26 = vpop.f32.mrf.mxu3  ;;  %v3362_v39 = vadd.f32 %v3361_v19, %v7973_v63 }
 0x3c4   : > { %v8206_v3 = vpop.f32.mrf.mxu1 }
 0x3c5   : > { %v3621_v6 = vadd.f32 %v3551_v26, %v3362_v39  ;;  %v3872_v26 = vld [vmem:[#allocation3 + $0x49] sm:$0xff] }
 0x3c6   : > { %v3674_v39 = vld [vmem:[#allocation3 + $0x168] sm:$0xff] }
 0x3c7   : > { %5996 = vmatmul.msk.bf16.gmra.mxu2 %vm226_vm1, %v8167_v5  ;;  %v8218_v63 = vadd.f32 %v3773_v55, %v3621_v6  ;;  %6036 = vmatmul.msk.bf16.gmra.mxu1 %vm226_vm1, %v8210_v53  ;;  %v3450_v55 = vld [vmem:[#allocation3 + $0x13a] sm:$0xff] }
 0x3c8   : > { %v3781_v52 = vpop.f32.mrf.mxu0  ;;  %6013 = vmatmul.msk.bf16.gmra.mxu3 %vm226_vm1, %v8208_v44  ;;  %v8232_v23 = vpack.c.bf16 %v3451_v47, %v3450_v55  ;;  %v3875_v55 = vld [vmem:[#allocation3 + $0x69] sm:$0xff] }
 0x3c9   : > { %v3677_v47 = vld [vmem:[#allocation3 + $0x188] sm:$0xff] }
 0x3ca   : > { %v3364_v37 = vpop.f32.mrf.mxu2  ;;  %9382 = vst [vmem:[#allocation44_spill] sm:$0xff] %v8232_v23  ;;  %v3880_v44 = vld [vmem:[#allocation3 + $0xa9] sm:$0xff] }
 0x3cb   : > { %6031 = vmatmul.msk.bf16.gmra.mxu0 %vm226_vm1, %v8216_v7  ;;  %v3554_v51 = vpop.f32.mrf.mxu3  ;;  %v3365_v54 = vadd.f32 %v3364_v37, %v7997_v11  ;;  %v8234_v11 = vpack.c.bf16 %v3873_v21, %v3872_v26 }
 0x3cc   : > { %v8225_v46 = vpop.f32.mrf.mxu1 }
 0x3cd   : > { %v3622_v8 = vadd.f32 %v3554_v51, %v3365_v54 }
 0x3cf   : > { %v8227_v4 = vadd.f32 %v3776_v13, %v3622_v8  ;;  %v8240_v13 = vpack.c.bf16 %v3675_v1, %v3674_v39  ;;  %v3874_v1 = vld [vmem:[#allocation3 + $0x61] sm:$0xff] }
 0x3d0   : > { %v3783_v36 = vpop.f32.mrf.mxu0  ;;  %v3676_v39 = vld [vmem:[#allocation3 + $0x180] sm:$0xff] }
 0x3d1   : > { %9383 = vst [vmem:[#allocation34_spill] sm:$0xff] %v8240_v13 }
 0x3d2   : > { %v3366_v42 = vpop.f32.mrf.mxu2 }
 0x3d3   : > { %v3556_v43 = vpop.f32.mrf.mxu3  ;;  %v3367_v32 = vadd.f32 %v3366_v42, %v8027_v45  ;;  %v3453_v42 = vld [vmem:[#allocation3 + $0x15a] sm:$0xff] }
 0x3d4   : > { %v8230_v16 = vpop.f32.mrf.mxu1 }
 0x3d5   : > { %v3623_v19 = vadd.f32 %v3556_v43, %v3367_v32 }
 0x3d7   : > { %5997 = vmatmul.msk.bf16.gmra.mxu2 %vm226_vm1, %v8192_v24  ;;  %v8242_v45 = vadd.f32 %v3778_v15, %v3623_v19  ;;  %6037 = vmatmul.msk.bf16.gmra.mxu1 %vm226_vm1, %v8234_v11  ;;  %v3452_v15 = vld [vmem:[#allocation3 + $0x152] sm:$0xff] }
 0x3d8   : > { %v3786_v9 = vpop.f32.mrf.mxu0  ;;  %6014 = vmatmul.msk.bf16.gmra.mxu3 %vm226_vm1, %v8232_v23  ;;  %v8256_v19 = vpack.c.bf16 %v3453_v42, %v3452_v15  ;;  %v3878_v23 = vld [vmem:[#allocation3 + $0x91] sm:$0xff] }
 0x3da   : > { %v3369_v57 = vpop.f32.mrf.mxu2  ;;  %9384 = vst [vmem:[#allocation35_spill] sm:$0xff] %v8256_v19 }
 0x3db   : > { %6032 = vmatmul.msk.bf16.gmra.mxu0 %vm226_vm1, %v8240_v13  ;;  %v3559_v25 = vpop.f32.mrf.mxu3  ;;  %v3370_v6 = vadd.f32 %v3369_v57, %v8048_v56  ;;  %v8258_v56 = vpack.c.bf16 %v3875_v55, %v3874_v1  ;;  %v3455_v55 = vld [vmem:[#allocation3 + $0x172] sm:$0xff] }
 0x3dc   : > { %v8249_v31 = vpop.f32.mrf.mxu1 }
 0x3dd   : > { %v3624_v60 = vadd.f32 %v3559_v25, %v3370_v6 }
 0x3df   : > { %v8251_v51 = vadd.f32 %v3781_v52, %v3624_v60  ;;  %v8264_v52 = vpack.c.bf16 %v3677_v47, %v3676_v39 }
 0x3e0   : > { %v3788_v37 = vpop.f32.mrf.mxu0 }
 0x3e1   : > { %9385 = vst [vmem:[#allocation37_spill] sm:$0xff] %v8264_v52 }
 0x3e2   : > { %v3371_v54 = vpop.f32.mrf.mxu2 }
 0x3e3   : > { %v3561_v8 = vpop.f32.mrf.mxu3  ;;  %v3372_v43 = vadd.f32 %v3371_v54, %v8082_v12 }
 0x3e4   : > { %v8254_v32 = vpop.f32.mrf.mxu1 }
 0x3e5   : > { %v3625_v21 = vadd.f32 %v3561_v8, %v3372_v43 }
 0x3e7   : > { %5998 = vmatmul.msk.bf16.gmra.mxu2 %vm226_vm1, %v8216_v7  ;;  %v8266_v12 = vadd.f32 %v3783_v36, %v3625_v21  ;;  %6038 = vmatmul.msk.bf16.gmra.mxu1 %vm226_vm1, %v8258_v56  ;;  %v3454_v36 = vld [vmem:[#allocation3 + $0x16a] sm:$0xff]  ;;  %v3877_v21 = vld [vmem:[#allocation3 + $0x81] sm:$0xff] }
 0x3e8   : > { %v3791_v26 = vpop.f32.mrf.mxu0  ;;  %6015 = vmatmul.msk.bf16.gmra.mxu3 %vm226_vm1, %v8256_v19  ;;  %v8280_v19 = vpack.c.bf16 %v3455_v55, %v3454_v36 }
 0x3ea   : > { %v3374_v57 = vpop.f32.mrf.mxu2  ;;  %9386 = vst [vmem:[#allocation40_spill] sm:$0xff] %v8280_v19 }
 0x3eb   : > { %6033 = vmatmul.msk.bf16.gmra.mxu0 %vm226_vm1, %v8264_v52  ;;  %v3564_v25 = vpop.f32.mrf.mxu3  ;;  %v3375_v6 = vadd.f32 %v3374_v57, %v8107_v0  ;;  %v3876_v52 = vld [vmem:[#allocation3 + $0x79] sm:$0xff] }
 0x3ec   : > { %v8273_v60 = vpop.f32.mrf.mxu1  ;;  %v8282_v0 = vpack.c.bf16 %v3877_v21, %v3876_v52  ;;  %v4314_v21 = vld [vmem:[#allocation3 + $0x38] sm:$0xff] }
 0x3ed   : > { %v3626_v54 = vadd.f32 %v3564_v25, %v3375_v6 }
 0x3ef   : > { %v8275_v15 = vadd.f32 %v3786_v9, %v3626_v54 }
 0x3f0   : > { %v3793_v8 = vpop.f32.mrf.mxu0 }
 0x3f2   : > { %v3376_v42 = vpop.f32.mrf.mxu2 }
 0x3f3   : > { %v3566_v43 = vpop.f32.mrf.mxu3  ;;  %v3377_v47 = vadd.f32 %v3376_v42, %v8142_v30 }
 0x3f4   : > { %v8278_v1 = vpop.f32.mrf.mxu1 }
 0x3f5   : > { %v3627_v39 = vadd.f32 %v3566_v43, %v3377_v47  ;;  %v4091_v47 = vld [vmem:[#allocation3 + $0x22] sm:$0xff] }
 0x3f7   : > { %5999 = vmatmul.msk.bf16.gmra.mxu2 %vm226_vm1, %v8240_v13  ;;  %v8288_v9 = vadd.f32 %v3788_v37, %v3627_v39  ;;  %6039 = vmatmul.msk.bf16.gmra.mxu1 %vm226_vm1, %v8282_v0  ;;  %v4090_v37 = vld [vmem:[#allocation3 + $0x1a] sm:$0xff]  ;;  %v4313_v13 = vld [vmem:[#allocation3 + $0x30] sm:$0xff] }
 0x3f8   : > { %v3796_v57 = vpop.f32.mrf.mxu0  ;;  %6016 = vmatmul.msk.bf16.gmra.mxu3 %vm226_vm1, %v8280_v19  ;;  %v3879_v19 = vld [vmem:[#allocation3 + $0x99] sm:$0xff] }
 0x3f9   : > { %v8302_v24 = vpack.c.bf16 %v3879_v19, %v3878_v23 }
 0x3fa   : > { %v3379_v30 = vpop.f32.mrf.mxu2 }
 0x3fb   : > { %6086 = vmatmul.msk.bf16.vlgmr.msra.gmra.mxu0 %vm226_vm1, %v8210_v53  ;;  %v3569_v25 = vpop.f32.mrf.mxu3  ;;  %v3380_v52 = vadd.f32 %v3379_v30, %v8158_v29  ;;  %v4122_v29 = vpack.c.bf16 %v4091_v47, %v4090_v37  ;;  %v4345_v30 = vpack.c.bf16 %v4314_v21, %v4313_v13  ;;  %v4316_v47 = vld [vmem:[#allocation3 + $0x50] sm:$0xff] }
 0x3fc   : > { %v8295_v6 = vpop.f32.mrf.mxu1 }
 0x3fd   : > { %v3628_v54 = vadd.f32 %v3569_v25, %v3380_v52 }
 0x3ff   : > { %v8297_v43 = vadd.f32 %v3791_v26, %v3628_v54 }
 0x400   : > { %v3798_v42 = vpop.f32.mrf.mxu0 }
 0x402   : > { %v3381_v36 = vpop.f32.mrf.mxu2 }
 0x403   : > { %v3571_v55 = vpop.f32.mrf.mxu3  ;;  %v3382_v39 = vadd.f32 %v3381_v36, %v8178_v62 }
 0x404   : > { %v8300_v53 = vpop.f32.mrf.mxu1 }
 0x405   : > { %v3629_v7 = vadd.f32 %v3571_v55, %v3382_v39  ;;  %v3881_v39 = vld [vmem:[#allocation3 + $0xb1] sm:$0xff] }
 0x407   : > { %6052 = vmatmul.msk.bf16.vlgmr.msra.gmra.mxu2 %vm226_vm1, %v4122_v29  ;;  %v8306_v26 = vadd.f32 %v3793_v8, %v3629_v7  ;;  %6040 = vmatmul.msk.bf16.gmra.mxu1 %vm226_vm1, %v8302_v24  ;;  %v4092_v7 = vld [vmem:[#allocation3 + $0x32] sm:$0xff]  ;;  %v4093_v8 = vld [vmem:[#allocation3 + $0x3a] sm:$0xff]  ;;  %v4315_v29 = vld [vmem:[#allocation3 + $0x48] sm:$0xff] }
 0x408   : > { %v3801_v25 = vpop.f32.mrf.mxu0  ;;  %6069 = vmatmul.msk.bf16.vlgmr.msra.gmra.mxu3 %vm226_vm1, %v4345_v30 }
 0x409   : > { %9387 = vst [vmem:[#allocation36_spill] sm:$0xff] %v8306_v26 }
 0x40a   : > { %v3384_v62 = vpop.f32.mrf.mxu2 }
 0x40b   : > { %6087 = vmatmul.msk.bf16.gmra.mxu0 %vm226_vm1, %v8234_v11  ;;  %v3574_v52 = vpop.f32.mrf.mxu3  ;;  %v3385_v54 = vadd.f32 %v3384_v62, %v8184_v17  ;;  %v8320_v17 = vpack.c.bf16 %v4093_v8, %v4092_v7  ;;  %v4346_v62 = vpack.c.bf16 %v4316_v47, %v4315_v29  ;;  %v4318_v29 = vld [vmem:[#allocation3 + $0x68] sm:$0xff] }
 0x40c   : > { %v8313_v13 = vpop.f32.mrf.mxu1 }
 0x40d   : > { %v3630_v23 = vadd.f32 %v3574_v52, %v3385_v54  ;;  %9389 = vst [vmem:[#allocation39_spill] sm:$0xff] %v8320_v17  ;;  %v8322_v52 = vpack.c.bf16 %v3881_v39, %v3880_v44  ;;  %v4095_v39 = vld [vmem:[#allocation3 + $0x52] sm:$0xff] }
 0x40f   : > { %v8315_v36 = vadd.f32 %v3796_v57, %v3630_v23 }
 0x410   : > { %v3803_v19 = vpop.f32.mrf.mxu0 }
 0x411   : > { %9388 = vst [vmem:[#allocation38_spill] sm:$0xff] %v8315_v36  ;;  %v3882_v36 = vld [vmem:[#allocation3 + $0xc1] sm:$0xff] }
 0x412   : > { %v3386_v55 = vpop.f32.mrf.mxu2 }
 0x413   : > { %v3576_v37 = vpop.f32.mrf.mxu3  ;;  %v3387_v21 = vadd.f32 %v3386_v55, %v8201_v27 }
 0x414   : > { %v8318_v11 = vpop.f32.mrf.mxu1 }
 0x415   : > { %v3631_v30 = vadd.f32 %v3576_v37, %v3387_v21 }
 0x417   : > { %6053 = vmatmul.msk.bf16.gmra.mxu2 %vm226_vm1, %v8320_v17  ;;  %v8327_v54 = vadd.f32 %v3798_v42, %v3631_v30  ;;  %6041 = vmatmul.msk.bf16.gmra.mxu1 %vm226_vm1, %v8322_v52  ;;  %v4094_v42 = vld [vmem:[#allocation3 + $0x4a] sm:$0xff] }
 0x418   : > { %v3806_v57 = vpop.f32.mrf.mxu0  ;;  %6070 = vmatmul.msk.bf16.gmra.mxu3 %vm226_vm1, %v4346_v62  ;;  %v3883_v62 = vld [vmem:[#allocation3 + $0xc9] sm:$0xff] }
 0x419   : > { %9390 = vst [vmem:[#allocation47_spill] sm:$0xff] %v8327_v54  ;;  %v4317_v54 = vld [vmem:[#allocation3 + $0x60] sm:$0xff] }
 0x41a   : > { %v3389_v27 = vpop.f32.mrf.mxu2 }
 0x41b   : > { %6088 = vmatmul.msk.bf16.gmra.mxu0 %vm226_vm1, %v8258_v56  ;;  %v3579_v23 = vpop.f32.mrf.mxu3  ;;  %v3390_v55 = vadd.f32 %v3389_v27, %v8206_v3  ;;  %v8341_v3 = vpack.c.bf16 %v4095_v39, %v4094_v42  ;;  %v4347_v27 = vpack.c.bf16 %v4318_v29, %v4317_v54 }
 0x41c   : > { %v8334_v44 = vpop.f32.mrf.mxu1 }
 0x41d   : > { %v3632_v37 = vadd.f32 %v3579_v23, %v3390_v55  ;;  %9392 = vst [vmem:[#allocation49_spill] sm:$0xff] %v8341_v3  ;;  %v8343_v23 = vpack.c.bf16 %v3883_v62, %v3882_v36 }
 0x41f   : > { %v8336_v8 = vadd.f32 %v3801_v25, %v3632_v37 }
 0x420   : > { %v3808_v7 = vpop.f32.mrf.mxu0 }
 0x421   : > { %9391 = vst [vmem:[#allocation48_spill] sm:$0xff] %v8336_v8  ;;  %v3884_v8 = vld [vmem:[#allocation3 + $0xd9] sm:$0xff] }
 0x422   : > { %v3391_v47 = vpop.f32.mrf.mxu2 }
 0x423   : > { %v3581_v21 = vpop.f32.mrf.mxu3  ;;  %v3392_v30 = vadd.f32 %v3391_v47, %v8225_v46 }
 0x424   : > { %v8339_v56 = vpop.f32.mrf.mxu1 }
 0x425   : > { %v3633_v17 = vadd.f32 %v3581_v21, %v3392_v30  ;;  %v4320_v30 = vld [vmem:[#allocation3 + $0x80] sm:$0xff] }
 0x427   : > { %6054 = vmatmul.msk.bf16.gmra.mxu2 %vm226_vm1, %v8341_v3  ;;  %v8348_v55 = vadd.f32 %v3803_v19, %v3633_v17  ;;  %6042 = vmatmul.msk.bf16.gmra.mxu1 %vm226_vm1, %v8343_v23  ;;  %v4096_v19 = vld [vmem:[#allocation3 + $0x62] sm:$0xff]  ;;  %v4097_v17 = vld [vmem:[#allocation3 + $0x6a] sm:$0xff] }
 0x428   : > { %v3811_v25 = vpop.f32.mrf.mxu0  ;;  %6071 = vmatmul.msk.bf16.gmra.mxu3 %vm226_vm1, %v4347_v27  ;;  %v3885_v27 = vld [vmem:[#allocation3 + $0xe1] sm:$0xff]  ;;  %v8360_v26 = vpack.c.bf16 %v4097_v17, %v4096_v19 }
 0x429   : > { %9393 = vst [vmem:[#allocation50_spill] sm:$0xff] %v8348_v55  ;;  %v4319_v55 = vld [vmem:[#allocation3 + $0x78] sm:$0xff] }
 0x42a   : > { %v3394_v46 = vpop.f32.mrf.mxu2  ;;  %v4098_v17 = vld [vmem:[#allocation3 + $0x7a] sm:$0xff] }
 0x42b   : > { %6089 = vmatmul.msk.bf16.gmra.mxu0 %vm226_vm1, %v8282_v0  ;;  %v3584_v37 = vpop.f32.mrf.mxu3  ;;  %v3395_v54 = vadd.f32 %v3394_v46, %v8230_v16  ;;  %v4348_v16 = vpack.c.bf16 %v4320_v30, %v4319_v55  ;;  %v4099_v30 = vld [vmem:[#allocation3 + $0x82] sm:$0xff] }
 0x42c   : > { %v8355_v36 = vpop.f32.mrf.mxu1 }
 0x42d   : > { %v3634_v47 = vadd.f32 %v3584_v37, %v3395_v54 }
 0x42f   : > { %v8357_v42 = vadd.f32 %v3806_v57, %v3634_v47  ;;  %v8365_v57 = vpack.c.bf16 %v3885_v27, %v3884_v8 }
 0x430   : > { %v3813_v21 = vpop.f32.mrf.mxu0 }
 0x432   : > { %v3396_v39 = vpop.f32.mrf.mxu2 }
 0x433   : > { %v3586_v29 = vpop.f32.mrf.mxu3  ;;  %v3397_v62 = vadd.f32 %v3396_v39, %v8249_v31 }
 0x434   : > { %v3978_v0 = vpop.f32.mrf.mxu1 }
 0x435   : > { %v3635_v3 = vadd.f32 %v3586_v29, %v3397_v62  ;;  %v8363_v46 = vadd.f32 %v3978_v0, %v8093_v41  ;;  %v4322_v62 = vld [vmem:[#allocation3 + $0x98] sm:$0xff]  ;;  %v4321_v0 = vld [vmem:[#allocation3 + $0x90] sm:$0xff] }
 0x437   : > { %6055 = vmatmul.msk.bf16.gmra.mxu2 %vm226_vm1, %v8360_v26  ;;  %v8370_v31 = vadd.f32 %v3808_v7, %v3635_v3  ;;  %6043 = vmatmul.msk.bf16.gmra.mxu1 %vm226_vm1, %v8365_v57 }
 0x438   : > { %v3816_v37 = vpop.f32.mrf.mxu0  ;;  %6072 = vmatmul.msk.bf16.gmra.mxu3 %vm226_vm1, %v4348_v16 }
 0x439   : > { %9394 = vst [vmem:[#allocation51_spill] sm:$0xff] %v8370_v31 }
 0x43a   : > { %v3399_v55 = vpop.f32.mrf.mxu2 }
 0x43b   : > { %6090 = vmatmul.msk.bf16.gmra.mxu0 %vm226_vm1, %v8302_v24  ;;  %v3589_v54 = vpop.f32.mrf.mxu3  ;;  %v3400_v41 = vadd.f32 %v3399_v55, %v8254_v32  ;;  %v3887_v24 = vld [vmem:[#allocation3 + $0xf9] sm:$0xff]  ;;  %v3886_v32 = vld [vmem:[#allocation3 + $0xf1] sm:$0xff]  ;;  %v8383_v55 = vpack.c.bf16 %v4099_v30, %v4098_v17 }
 0x43c   : > { %v3980_v8 = vpop.f32.mrf.mxu1 }
 0x43d   : > { %v3636_v47 = vadd.f32 %v3589_v54, %v3400_v41  ;;  %v8378_v39 = vadd.f32 %v3980_v8, %v8125_v40  ;;  %v4349_v54 = vpack.c.bf16 %v4322_v62, %v4321_v0  ;;  %v4324_v0 = vld [vmem:[#allocation3 + $0xb0] sm:$0xff] }
 0x43f   : > { %v8380_v19 = vadd.f32 %v3811_v25, %v3636_v47  ;;  %v8388_v25 = vpack.c.bf16 %v3887_v24, %v3886_v32  ;;  %v4101_v24 = vld [vmem:[#allocation3 + $0x9a] sm:$0xff]  ;;  %v4323_v32 = vld [vmem:[#allocation3 + $0xa8] sm:$0xff] }
 0x440   : > { %v3818_v29 = vpop.f32.mrf.mxu0 }
 0x442   : > { %v3401_v7 = vpop.f32.mrf.mxu2 }
 0x443   : > { %v3591_v3 = vpop.f32.mrf.mxu3  ;;  %v3402_v27 = vadd.f32 %v3401_v7, %v8273_v60 }
 0x444   : > { %v3983_v16 = vpop.f32.mrf.mxu1 }
 0x445   : > { %v3637_v31 = vadd.f32 %v3591_v3, %v3402_v27  ;;  %v8386_v40 = vadd.f32 %v3983_v16, %v8148_v48  ;;  %v4100_v27 = vld [vmem:[#allocation3 + $0x92] sm:$0xff] }
 0x447   : > { %6056 = vmatmul.msk.bf16.gmra.mxu2 %vm226_vm1, %v8383_v55  ;;  %v8393_v60 = vadd.f32 %v3813_v21, %v3637_v31  ;;  %6044 = vmatmul.msk.bf16.gmra.mxu1 %vm226_vm1, %v8388_v25 }
 0x448   : > { %v3821_v41 = vpop.f32.mrf.mxu0  ;;  %6073 = vmatmul.msk.bf16.gmra.mxu3 %vm226_vm1, %v4349_v54 }
 0x449   : > { %9395 = vst [vmem:[#allocation52_spill] sm:$0xff] %v8393_v60 }
 0x44a   : > { %v3404_v8 = vpop.f32.mrf.mxu2 }
 0x44b   : > { %6091 = vmatmul.msk.bf16.gmra.mxu0 %vm226_vm1, %v8322_v52  ;;  %v3594_v47 = vpop.f32.mrf.mxu3  ;;  %v3405_v48 = vadd.f32 %v3404_v8, %v8278_v1  ;;  %v3889_v52 = vld [vmem:[#allocation3 + $0x111] sm:$0xff]  ;;  %v3888_v1 = vld [vmem:[#allocation3 + $0x109] sm:$0xff]  ;;  %v8406_v8 = vpack.c.bf16 %v4101_v24, %v4100_v27 }
 0x44c   : > { %v3985_v7 = vpop.f32.mrf.mxu1 }
 0x44d   : > { %v3638_v3 = vadd.f32 %v3594_v47, %v3405_v48  ;;  %v8401_v17 = vadd.f32 %v3985_v7, %v8170_v33  ;;  %v4350_v47 = vpack.c.bf16 %v4324_v0, %v4323_v32  ;;  %v4325_v32 = vld [vmem:[#allocation3 + $0xc0] sm:$0xff] }
 0x44f   : > { %v8403_v62 = vadd.f32 %v3816_v37, %v3638_v3  ;;  %v8411_v37 = vpack.c.bf16 %v3889_v52, %v3888_v1 }
 0x450   : > { %v3823_v30 = vpop.f32.mrf.mxu0 }
 0x452   : > { %v3406_v21 = vpop.f32.mrf.mxu2 }
 0x453   : > { %v3596_v31 = vpop.f32.mrf.mxu3  ;;  %v3407_v16 = vadd.f32 %v3406_v21, %v8295_v6 }
 0x454   : > { %v3988_v54 = vpop.f32.mrf.mxu1 }
 0x455   : > { %v3639_v60 = vadd.f32 %v3596_v31, %v3407_v16  ;;  %v8409_v33 = vadd.f32 %v3988_v54, %v8181_v61  ;;  %v4326_v16 = vld [vmem:[#allocation3 + $0xc8] sm:$0xff] }
 0x456   : > { %v4351_v1 = vpack.c.bf16 %v4326_v16, %v4325_v32 }
 0x457   : > { %6057 = vmatmul.msk.bf16.gmra.mxu2 %vm226_vm1, %v8406_v8  ;;  %v8416_v6 = vadd.f32 %v3818_v29, %v3639_v60  ;;  %6045 = vmatmul.msk.bf16.gmra.mxu1 %vm226_vm1, %v8411_v37 }
 0x458   : > { %6074 = vmatmul.msk.bf16.gmra.mxu3 %vm226_vm1, %v4350_v47  ;;  %v3826_v48 = vpop.f32.mrf.mxu0 }
 0x45a   : > { %v3409_v7 = vpop.f32.mrf.mxu2 }
 0x45b   : > { %6092 = vmatmul.msk.bf16.gmra.mxu0 %vm226_vm1, %v8343_v23  ;;  %v3599_v3 = vpop.f32.mrf.mxu3  ;;  %v3410_v61 = vadd.f32 %v3409_v7, %v8300_v53 }
 0x45c   : > { %v3990_v21 = vpop.f32.mrf.mxu1 }
 0x45d   : > { %v3640_v31 = vadd.f32 %v3599_v3, %v3410_v61  ;;  %v8424_v27 = vadd.f32 %v3990_v21, %v8195_v34 }
 0x45f   : > { %v8426_v24 = vadd.f32 %v3821_v41, %v3640_v31 }
 0x460   : > { %v3828_v0 = vpop.f32.mrf.mxu0 }
 0x462   : > { %v3411_v29 = vpop.f32.mrf.mxu2 }
 0x463   : > { %v3601_v60 = vpop.f32.mrf.mxu3  ;;  %v3412_v52 = vadd.f32 %v3411_v29, %v8313_v13 }
 0x464   : > { %v3993_v54 = vpop.f32.mrf.mxu1 }
 0x465   : > { %v3641_v23 = vadd.f32 %v3601_v60, %v3412_v52  ;;  %v8430_v47 = vadd.f32 %v3993_v54, %v8203_v59 }
 0x467   : > { %6058 = vmatmul.msk.bf16.gmra.mxu2 %vm226_vm1, %v7988_v10  ;;  %v8435_v34 = vadd.f32 %v3823_v30, %v3641_v23  ;;  %6046 = vmatmul.msk.bf16.gmra.mxu1 %vm226_vm1, %v7994_v35 }
 0x468   : > { %6075 = vmatmul.msk.bf16.gmra.mxu3 %vm226_vm1, %v4351_v1  ;;  %v3831_v7 = vpop.f32.mrf.mxu0 }
 0x46a   : > { %v3414_v53 = vpop.f32.mrf.mxu2 }
 0x46b   : > { %6093 = vmatmul.msk.bf16.gmra.mxu0 %vm226_vm1, %v8365_v57  ;;  %v3604_v13 = vpop.f32.mrf.mxu3  ;;  %v3415_v41 = vadd.f32 %v3414_v53, %v8318_v11 }
 0x46c   : > { %v3995_v59 = vpop.f32.mrf.mxu1 }
 0x46d   : > { %v3642_v3 = vadd.f32 %v3604_v13, %v3415_v41  ;;  %v8443_v61 = vadd.f32 %v3995_v59, %v8218_v63 }
 0x46f   : > { %v8445_v10 = vadd.f32 %v3826_v48, %v3642_v3  ;;  %v4556_v3 = vld [vmem:[#allocation3 + $0x129] sm:$0xff] }
 0x470   : > { %v3833_v60 = vpop.f32.mrf.mxu0 }
 0x472   : > { %v3416_v30 = vpop.f32.mrf.mxu2 }
 0x473   : > { %v3606_v21 = vpop.f32.mrf.mxu3  ;;  %v3417_v31 = vadd.f32 %v3416_v30, %v8334_v44 }
 0x474   : > { %v3998_v35 = vpop.f32.mrf.mxu1 }
 0x475   : > { %v3643_v29 = vadd.f32 %v3606_v21, %v3417_v31  ;;  %v8449_v57 = vadd.f32 %v3998_v35, %v8227_v4  ;;  %v4555_v31 = vld [vmem:[#allocation3 + $0x121] sm:$0xff] }
 0x477   : > { %6059 = vmatmul.msk.bf16.gmra.mxu2 %vm226_vm1, %v8045_v38  ;;  %v8455_v63 = vadd.f32 %v3828_v0, %v3643_v29  ;;  %6047 = vmatmul.msk.bf16.gmra.mxu1 %vm226_vm1, %v8053_v49 }
 0x478   : > { %6076 = vmatmul.msk.bf16.gmra.mxu3 %vm226_vm1, %v8002_v58  ;;  %v4645_v38 = vpop.f32.mrf.mxu0 }
 0x47a   : > { %v3419_v11 = vpop.f32.mrf.mxu2 }
 0x47b   : > { %6094 = vmatmul.msk.bf16.gmra.mxu0 %vm226_vm1, %v8388_v25  ;;  %v3609_v44 = vpop.f32.mrf.mxu3  ;;  %v3420_v48 = vadd.f32 %v3419_v11, %v8339_v56 }
 0x47c   : > { %v4000_v4 = vpop.f32.mrf.mxu1 }
 0x47d   : > { %v3644_v16 = vadd.f32 %v3609_v44, %v3420_v48  ;;  %v8463_v52 = vadd.f32 %v4000_v4, %v8242_v45 }
 0x47f   : > { %v8465_v32 = vadd.f32 %v3831_v7, %v3644_v16  ;;  %v3899_v16 = vld [vmem:[#allocation3 + $0x189] sm:$0xff] }
 0x480   : > { %v4647_v56 = vpop.f32.mrf.mxu0 }
 0x482   : > { %v3421_v58 = vpop.f32.mrf.mxu2 }
 0x483   : > { %v3611_v0 = vpop.f32.mrf.mxu3  ;;  %v3422_v54 = vadd.f32 %v3421_v58, %v8355_v36 }
 0x484   : > { %v4003_v49 = vpop.f32.mrf.mxu1 }
 0x485   : > { %v3645_v23 = vadd.f32 %v3611_v0, %v3422_v54  ;;  %v8469_v25 = vadd.f32 %v4003_v49, %v8251_v51  ;;  %v3898_v0 = vld [vmem:[#allocation3 + $0x181] sm:$0xff]  ;;  %v4557_v49 = vld [vmem:[#allocation3 + $0x139] sm:$0xff] }
 0x487   : > { %6060 = vmatmul.msk.bf16.gmra.mxu2 %vm226_vm1, %v8109_v2  ;;  %v8475_v45 = vadd.f32 %v3833_v60, %v3645_v23  ;;  %6048 = vmatmul.msk.bf16.gmra.mxu1 %vm226_vm1, %v8104_v50 }
 0x488   : > { %6077 = vmatmul.msk.bf16.gmra.mxu3 %vm226_vm1, %v8063_v28  ;;  %v4650_v59 = vpop.f32.mrf.mxu0 }
 0x48a   : > { %v4200_v36 = vpop.f32.mrf.mxu2 }
 0x48b   : > { %6095 = vmatmul.msk.bf16.gmra.mxu0 %vm226_vm1, %v8411_v37  ;;  %v4423_v1 = vpop.f32.mrf.mxu3  ;;  %v4280_v51 = vadd.f32 %v4200_v36, %v8363_v46 }
 0x48c   : > { %v4005_v53 = vpop.f32.mrf.mxu1 }
 0x48d   : > { %v4503_v13 = vadd.f32 %v4423_v1, %v4280_v51  ;;  %v8483_v2 = vadd.f32 %v4005_v53, %v8266_v12  ;;  %v4577_v12 = vpack.c.bf16 %v4556_v3, %v4555_v31  ;;  %v9396_v53 = vld [vmem:[#allocation36_spill] sm:$0xff] }
 0x48f   : > { %v8485_v41 = vadd.f32 %v4645_v38, %v4503_v13 }
 0x490   : > { %v4652_v29 = vpop.f32.mrf.mxu0 }
 0x492   : > { %v4202_v28 = vpop.f32.mrf.mxu2 }
 0x493   : > { %v4425_v7 = vpop.f32.mrf.mxu3  ;;  %v4281_v50 = vadd.f32 %v4202_v28, %v8378_v39 }
 0x494   : > { %v4008_v30 = vpop.f32.mrf.mxu1 }
 0x495   : > { %v4504_v21 = vadd.f32 %v4425_v7, %v4281_v50  ;;  %v8489_v37 = vadd.f32 %v4008_v30, %v8275_v15  ;;  %v4560_v50 = vld [vmem:[#allocation3 + $0x159] sm:$0xff] }
 0x497   : > { %6061 = vmatmul.msk.bf16.gmra.mxu2 %vm226_vm1, %v8160_v20  ;;  %v8495_v46 = vadd.f32 %v4647_v56, %v4504_v21  ;;  %6049 = vmatmul.msk.bf16.gmra.mxu1 %vm226_vm1, %v8155_v14  ;;  %v4558_v14 = vld [vmem:[#allocation3 + $0x141] sm:$0xff] }
 0x498   : > { %6078 = vmatmul.msk.bf16.gmra.mxu3 %vm226_vm1, %v8117_v18  ;;  %v4655_v23 = vpop.f32.mrf.mxu0  ;;  %v9397_v21 = vld [vmem:[#allocation38_spill] sm:$0xff] }
 0x49a   : > { %v4205_v39 = vpop.f32.mrf.mxu2 }
 0x49b   : > { %6096 = vmatmul.msk.bf16.gmra.mxu0 %vm226_vm1, %v4577_v12  ;;  %v4428_v35 = vpop.f32.mrf.mxu3  ;;  %v4282_v15 = vadd.f32 %v4205_v39, %v8386_v40  ;;  %v3915_v40 = vpack.c.bf16 %v3899_v16, %v3898_v0  ;;  %v4559_v12 = vld [vmem:[#allocation3 + $0x151] sm:$0xff]  ;;  %v9401_v16 = vld [vmem:[#allocation47_spill] sm:$0xff] }
 0x49c   : > { %v4010_v60 = vpop.f32.mrf.mxu1  ;;  %v9399_v39 = vld [vmem:[#allocation41_spill] sm:$0xff] }
 0x49d   : > { %v4505_v11 = vadd.f32 %v4428_v35, %v4282_v15  ;;  %v8502_v20 = vadd.f32 %v4010_v60, %v8288_v9  ;;  %v4578_v9 = vpack.c.bf16 %v4558_v14, %v4557_v49  ;;  %v4579_v35 = vpack.c.bf16 %v4560_v50, %v4559_v12  ;;  %v9408_v12 = vld [vmem:[#allocation34_spill] sm:$0xff] }
 0x49f   : > { %v8504_v44 = vadd.f32 %v4650_v59, %v4505_v11 }
 0x4a0   : > { %v4657_v28 = vpop.f32.mrf.mxu0 }
 0x4a2   : > { %v4207_v18 = vpop.f32.mrf.mxu2 }
 0x4a3   : > { %v4430_v48 = vpop.f32.mrf.mxu3  ;;  %v4283_v4 = vadd.f32 %v4207_v18, %v8401_v17 }
 0x4a4   : > { %v4013_v38 = vpop.f32.mrf.mxu1 }
 0x4a5   : > { %v4506_v58 = vadd.f32 %v4430_v48, %v4283_v4  ;;  %v8508_v54 = vadd.f32 %v4013_v38, %v8297_v43 }
 0x4a7   : > { %6062 = vmatmul.msk.bf16.gmra.mxu2 %vm226_vm1, %v8186_v22  ;;  %v8514_v56 = vadd.f32 %v4652_v29, %v4506_v58  ;;  %6050 = vmatmul.msk.bf16.gmra.mxu1 %vm226_vm1, %v3915_v40  ;;  %v9400_v29 = vld [vmem:[#allocation39_spill] sm:$0xff] }
 0x4a8   : > { %6079 = vmatmul.msk.bf16.gmra.mxu3 %vm226_vm1, %v8167_v5  ;;  %v4660_v18 = vpop.f32.mrf.mxu0 }
 0x4aa   : > { %v4210_v17 = vpop.f32.mrf.mxu2 }
 0x4ab   : > { %6097 = vmatmul.msk.bf16.gmra.mxu0 %vm226_vm1, %v4578_v9  ;;  %v4433_v36 = vpop.f32.mrf.mxu3  ;;  %v4284_v43 = vadd.f32 %v4210_v17, %v8409_v33  ;;  %v9398_v33 = vld [vmem:[#allocation42_spill] sm:$0xff] }
 0x4ac   : > { %v4015_v1 = vpop.f32.mrf.mxu1 }
 0x4ad   : > { %v4507_v51 = vadd.f32 %v4433_v36, %v4284_v43  ;;  %v8520_v13 = vadd.f32 %v4015_v1, %v9396_v53  ;;  %v9402_v43 = vld [vmem:[#allocation48_spill] sm:$0xff]  ;;  %v9404_v53 = vld [vmem:[#allocation43_spill] sm:$0xff] }
 0x4af   : > { %v8522_v22 = vadd.f32 %v4655_v23, %v4507_v51  ;;  %v4562_v23 = vld [vmem:[#allocation3 + $0x171] sm:$0xff] }
 0x4b0   : > { %v4662_v36 = vpop.f32.mrf.mxu0  ;;  %v9403_v51 = vld [vmem:[#allocation44_spill] sm:$0xff] }
 0x4b2   : > { %v4212_v5 = vpop.f32.mrf.mxu2 }
 0x4b3   : > { %v4435_v7 = vpop.f32.mrf.mxu3  ;;  %v4285_v59 = vadd.f32 %v4212_v5, %v8424_v27 }
 0x4b4   : > { %v4018_v3 = vpop.f32.mrf.mxu1 }
 0x4b5   : > { %v4508_v30 = vadd.f32 %v4435_v7, %v4285_v59  ;;  %v8526_v31 = vadd.f32 %v4018_v3, %v9397_v21  ;;  %v9405_v7 = vld [vmem:[#allocation49_spill] sm:$0xff]  ;;  %v9406_v59 = vld [vmem:[#allocation50_spill] sm:$0xff]  ;;  %v9407_v21 = vld [vmem:[#allocation35_spill] sm:$0xff] }
 0x4b7   : > { %6063 = vmatmul.msk.bf16.gmra.mxu2 %vm226_vm1, %v9398_v33  ;;  %v8532_v15 = vadd.f32 %v4657_v28, %v4508_v30  ;;  %6103 = vmatmul.msk.bf16.vlgmr.msra.gmra.mxu1 %vm226_vm1, %v9400_v29 }
 0x4b8   : > { %6080 = vmatmul.msk.bf16.gmra.mxu3 %vm226_vm1, %v9399_v39  ;;  %v9409_v39 = vld [vmem:[#allocation51_spill] sm:$0xff] }
 0x4ba   : > { %v4215_v27 = vpop.f32.mrf.mxu2 }
 0x4bb   : > { %6098 = vmatmul.msk.bf16.gmra.mxu0 %vm226_vm1, %v4579_v35  ;;  %v4438_v60 = vpop.f32.mrf.mxu3  ;;  %v4286_v11 = vadd.f32 %v4215_v27, %v8430_v47  ;;  %v4561_v47 = vld [vmem:[#allocation3 + $0x169] sm:$0xff] }
 0x4bc   : > { %v4020_v48 = vpop.f32.mrf.mxu1  ;;  %v4580_v28 = vpack.c.bf16 %v4562_v23, %v4561_v47  ;;  %v4768_v47 = vld [vmem:[#allocation3 + $0xb2] sm:$0xff] }
 0x4bd   : > { %v4509_v4 = vadd.f32 %v4438_v60, %v4286_v11  ;;  %v8539_v14 = vadd.f32 %v4020_v48, %v9401_v16  ;;  %v4566_v60 = vld [vmem:[#allocation3 + $0x1a1] sm:$0xff]  ;;  %v9410_v11 = vld [vmem:[#allocation40_spill] sm:$0xff] }
 0x4be   : > { %v4344_v16 = vld [vmem:[#allocation3 + $0x1a0] sm:$0xff] }
 0x4bf   : > { %v8541_v38 = vadd.f32 %v4660_v18, %v4509_v4  ;;  %v9411_v18 = vld [vmem:[#allocation37_spill] sm:$0xff] }
 0x4c2   : > { %v4217_v58 = vpop.f32.mrf.mxu2 }
 0x4c3   : > { %v4287_v0 = vadd.f32 %v4217_v58, %v8443_v61  ;;  %v4440_v49 = vpop.f32.mrf.mxu3  ;;  %v4120_v58 = vld [vmem:[#allocation3 + $0x182] sm:$0xff] }
 0x4c4   : > { %v4023_v9 = vpop.f32.mrf.mxu1 }
 0x4c5   : > { %v4510_v17 = vadd.f32 %v4440_v49, %v4287_v0  ;;  %v8545_v1 = vadd.f32 %v4023_v9, %v9402_v43  ;;  %v4121_v0 = vld [vmem:[#allocation3 + $0x18a] sm:$0xff] }
 0x4c6   : > { %v8585_v9 = vpack.c.bf16 %v4121_v0, %v4120_v58  ;;  %v4767_v43 = vld [vmem:[#allocation3 + $0xaa] sm:$0xff] }
 0x4c7   : > { %6064 = vmatmul.msk.bf16.gmra.mxu2 %vm226_vm1, %v9403_v51  ;;  %v8551_v5 = vadd.f32 %v4662_v36, %v4510_v17  ;;  %6104 = vmatmul.msk.bf16.gmra.mxu1 %vm226_vm1, %v9405_v7 }
 0x4c8   : > { %6081 = vmatmul.msk.bf16.gmra.mxu3 %vm226_vm1, %v9404_v53 }
 0x4cb   : > { %6099 = vmatmul.msk.bf16.gmra.mxu0 %vm226_vm1, %v4580_v28  ;;  %v8630_v58 = vpop.f32.mrf.mxu3 }
 0x4cc   : > { %v4025_v61 = vpop.f32.mrf.mxu1 }
 0x4cd   : > { %v8557_v50 = vadd.f32 %v4025_v61, %v9406_v59  ;;  %v4769_v61 = vld [vmem:[#allocation3 + $0xc2] sm:$0xff]  ;;  %v4770_v59 = vld [vmem:[#allocation3 + $0xca] sm:$0xff] }
 0x4d4   : > { %v4028_v3 = vpop.f32.mrf.mxu1 }
 0x4d5   : > { %v8560_v30 = vadd.f32 %v4028_v3, %v8357_v42  ;;  %v4565_v42 = vld [vmem:[#allocation3 + $0x199] sm:$0xff] }
 0x4d6   : > { %v4582_v48 = vpack.c.bf16 %v4566_v60, %v4565_v42  ;;  %v4773_v60 = vld [vmem:[#allocation3 + $0xf2] sm:$0xff] }
 0x4d7   : > { %6065 = vmatmul.msk.bf16.gmra.mxu2 %vm226_vm1, %v9407_v21  ;;  %6105 = vmatmul.msk.bf16.gmra.mxu1 %vm226_vm1, %v8360_v26 }
 0x4d8   : > { %6082 = vmatmul.msk.bf16.gmra.mxu3 %vm226_vm1, %v9408_v12  ;;  %v4771_v12 = vld [vmem:[#allocation3 + $0xda] sm:$0xff] }
 0x4db   : > { %6100 = vmatmul.msk.bf16.gmra.mxu0 %vm226_vm1, %v3915_v40  ;;  %v9412_v40 = vld [vmem:[#allocation52_spill] sm:$0xff] }
 0x4dc   : > { %v4030_v33 = vpop.f32.mrf.mxu1 }
 0x4dd   : > { %v8570_v35 = vadd.f32 %v4030_v33, %v9409_v39  ;;  %v4772_v33 = vld [vmem:[#allocation3 + $0xe2] sm:$0xff] }
 0x4e4   : > { %v4033_v29 = vpop.f32.mrf.mxu1 }
 0x4e5   : > { %v8573_v27 = vadd.f32 %v4033_v29, %v8380_v19  ;;  %v4343_v19 = vld [vmem:[#allocation3 + $0x198] sm:$0xff] }
 0x4e6   : > { %v4360_v49 = vpack.c.bf16 %v4344_v16, %v4343_v19 }
 0x4e7   : > { %6066 = vmatmul.msk.bf16.gmra.mxu2 %vm226_vm1, %v9410_v11  ;;  %6106 = vmatmul.msk.bf16.gmra.mxu1 %vm226_vm1, %v8383_v55  ;;  %v4774_v11 = vld [vmem:[#allocation3 + $0xfa] sm:$0xff] }
 0x4e8   : > { %6083 = vmatmul.msk.bf16.gmra.mxu3 %vm226_vm1, %v9411_v18 }
 0x4eb   : > { %6101 = vmatmul.msk.bf16.gmra.mxu0 %vm226_vm1, %v4582_v48 }
 0x4ec   : > { %v4035_v26 = vpop.f32.mrf.mxu1 }
 0x4ed   : > { %v8583_v4 = vadd.f32 %v4035_v26, %v9412_v40  ;;  %v4797_v26 = vpack.c.bf16 %v4774_v11, %v4773_v60  ;;  %v8627_v40 = vpop.f32.mrf.mxu2 }
 0x4f4   : > { %v4038_v23 = vpop.f32.mrf.mxu1 }
 0x4f5   : > { %v8588_v17 = vadd.f32 %v4038_v23, %v8403_v62  ;;  %v4794_v62 = vpack.c.bf16 %v4768_v47, %v4767_v43  ;;  %v4776_v43 = vld [vmem:[#allocation3 + $0x112] sm:$0xff]  ;;  %v8636_v47 = vpop.f32.mrf.mxu0 }
 0x4f7   : > { %6067 = vmatmul.msk.bf16.gmra.mxu2 %vm226_vm1, %v8585_v9  ;;  %6107 = vmatmul.msk.bf16.gmra.mxu1 %vm226_vm1, %v8406_v8 }
 0x4f8   : > { %6084 = vmatmul.msk.bf16.gmra.mxu3 %vm226_vm1, %v4360_v49 }
 0x4fc   : > { %v4040_v55 = vpop.f32.mrf.mxu1 }
 0x4fd   : > { %v8596_v36 = vadd.f32 %v4040_v55, %v8416_v6  ;;  %v4795_v6 = vpack.c.bf16 %v4770_v59, %v4769_v61  ;;  %v4775_v55 = vld [vmem:[#allocation3 + $0x10a] sm:$0xff] }
 0x504   : > { %v4043_v51 = vpop.f32.mrf.mxu1 }
 0x505   : > { %v8599_v53 = vadd.f32 %v4043_v51, %v8426_v24  ;;  %v8638_v51 = vpop.f32.mrf.mxu2 }
 0x507   : > { %6108 = vmatmul.msk.bf16.gmra.mxu1 %vm226_vm1, %v4794_v62 }
 0x50c   : > { %v4045_v28 = vpop.f32.mrf.mxu1 }
 0x50d   : > { %v8603_v7 = vadd.f32 %v4045_v28, %v8435_v34  ;;  %v4796_v34 = vpack.c.bf16 %v4772_v33, %v4771_v12  ;;  %v4798_v28 = vpack.c.bf16 %v4776_v43, %v4775_v55  ;;  %v4777_v43 = vld [vmem:[#allocation3 + $0x122] sm:$0xff] }
 0x514   : > { %v4048_v8 = vpop.f32.mrf.mxu1 }
 0x515   : > { %v8606_v3 = vadd.f32 %v4048_v8, %v8445_v10  ;;  %v8645_v8 = vpop.f32.mrf.mxu3 }
 0x517   : > { %6109 = vmatmul.msk.bf16.gmra.mxu1 %vm226_vm1, %v4795_v6 }
 0x51c   : > { %v4050_v21 = vpop.f32.mrf.mxu1 }
 0x51d   : > { %v8610_v24 = vadd.f32 %v4050_v21, %v8455_v63  ;;  %v8622_v63 = vld [vmem:[%s9265_s4] ss:$0 sm:$0xff] }
 0x524   : > { %v4053_v39 = vpop.f32.mrf.mxu1 }
 0x525   : > { %v8613_v29 = vadd.f32 %v4053_v39, %v8465_v32 }
 0x527   : > { %6110 = vmatmul.msk.bf16.gmra.mxu1 %vm226_vm1, %v4796_v34  ;;  %v8648_v34 = vpop.f32.mrf.mxu0 }
 0x52c   : > { %v4055_v42 = vpop.f32.mrf.mxu1 }
 0x52d   : > { %v8617_v10 = vadd.f32 %v4055_v42, %v8475_v45 }
 0x52f   : > { %9413 = vst [vmem:[#allocation36_spill] sm:$0xff] %v8617_v10 }
 0x534   : > { %v4867_v18 = vpop.f32.mrf.mxu1 }
 0x535   : > { %v4947_v48 = vadd.f32 %v4867_v18, %v8485_v41 }
 0x537   : > { %v4983_v32 = vadd.f32 %v8622_v63, %v4947_v48  ;;  %6111 = vmatmul.msk.bf16.gmra.mxu1 %vm226_vm1, %v4797_v26 }
 0x539   : > { %v6119_v19 = vmul.f32 -1.442695, %v4983_v32 }
 0x53b   : > { %6296 = vpow2.f32 %v6119_v19 }
 0x53c   : > { %v4869_v45 = vpop.f32.mrf.mxu1 }
 0x53d   : > { %v4948_v16 = vadd.f32 %v4869_v45, %v8495_v46 }
 0x53f   : > { %v8633_v0 = vadd.f32 %v8622_v63, %v4948_v16 }
 0x541   : > { %v6297_v49 = vpop.eup %6296  ;;  %v6120_v41 = vmul.f32 -1.442695, %v8633_v0 }
 0x542   : > { %v5111_v23 = vadd.f32 1.0, %v6297_v49 }
 0x543   : > { %6298 = vpow2.f32 %v6120_v41 }
 0x544   : > { %6300 = vrcp.f32 %v5111_v23  ;;  %v4872_v62 = vpop.f32.mrf.mxu1  ;;  %v5154_v11 = vand.u32 2147483648, %v5111_v23  ;;  %v5152_v48 = vand.u32 2147483647, %v5111_v23  ;;  %vm5148_vm5 = vweird.f32 %v5111_v23 }
 0x545   : > { %v4949_v46 = vadd.f32 %v4872_v62, %v8504_v44  ;;  %v8650_v44 = vpop.f32.mrf.mxu2  ;;  %v8659_v62 = vpop.f32.mrf.mxu3 }
 0x546   : > { %v5155_v41 = vor.u32 1.1754944e-38, %v5154_v11  ;;  %vm5153_vm7 = vcmp.eq.f32.partialorder %v5152_v48, 8.507059e+37  ;;  %v8670_v11 = vpop.f32.mrf.mxu0  ;;  %v9414_v48 = vld [vmem:[#allocation6_spill] sm:$0xff] }
 0x547   : > { %v8642_v61 = vadd.f32 %v8622_v63, %v4949_v46  ;;  %6112 = vmatmul.msk.bf16.gmra.mxu1 %vm226_vm1, %v4798_v28 }
 0x549   : > { %v6299_v59 = vpop.eup %6298  ;;  %v6121_v6 = vmul.f32 -1.442695, %v8642_v61 }
 0x54a   : > { %v6301_v21 = vpop.eup %6300  ;;  %v5112_v12 = vadd.f32 1.0, %v6299_v59 }
 0x54b   : > { %v5144_v33 = vmul.f32 %v6301_v21, %v5111_v23  ;;  %6302 = vpow2.f32 %v6121_v6  ;;  %vm5149_vm4 = vweird.f32 %v6301_v21 }
 0x54c   : > { %6304 = vrcp.f32 %v5112_v12  ;;  %v4874_v39 = vpop.f32.mrf.mxu1  ;;  %vm5150_vm6 = vmor %vm5148_vm5, %vm5149_vm4  ;;  %vm5163_vm9 = vweird.f32 %v5112_v12 }
 0x54d   : > { %v5145_v42 = vsub.f32 1.0, %v5144_v33  ;;  %v4950_v60 = vadd.f32 %v4874_v39, %v8514_v56  ;;  %v4778_v56 = vld [vmem:[#allocation3 + $0x12a] sm:$0xff] }
 0x54f   : > { %v5146_v18 = vmul.f32 %v6301_v21, %v5145_v42  ;;  %v8654_v26 = vadd.f32 %v8622_v63, %v4950_v60  ;;  %v4799_v42 = vpack.c.bf16 %v4778_v56, %v4777_v43  ;;  %v5169_v60 = vand.u32 2147483648, %v5112_v12 }
 0x551   : > { %v6303_v19 = vpop.eup %6302  ;;  %v5147_v45 = vadd.f32 %v6301_v21, %v5146_v18  ;;  %v6122_v16 = vmul.f32 -1.442695, %v8654_v26  ;;  %v8672_v18 = vpop.f32.mrf.mxu2  ;;  %v5170_v56 = vor.u32 1.1754944e-38, %v5169_v60 }
 0x552   : > { %v6305_v49 = vpop.eup %6304  ;;  %v8657_v55 = vadd.f32 1.0, %v6303_v19 }
 0x553   : > { %v5151_v46 = vsel %vm5150_vm6, %v6301_v21, %v5147_v45  ;;  %v5159_v28 = vmul.f32 %v6305_v49, %v5112_v12  ;;  %6306 = vpow2.f32 %v6122_v16  ;;  %v5167_v21 = vand.u32 2147483647, %v5112_v12 }
 0x554   : > { %v5156_v59 = vsel %vm5153_vm7, %v5155_v41, %v5151_v46  ;;  %6308 = vrcp.f32 %v8657_v55  ;;  %v4877_v23 = vpop.f32.mrf.mxu1  ;;  %vm5164_vm8 = vweird.f32 %v6305_v49  ;;  %v5182_v60 = vand.u32 2147483647, %v8657_v55 }
 0x555   : > { %v5623_v6 = vmul.f32 %v5156_v59, %v4983_v32  ;;  %v5160_v33 = vsub.f32 1.0, %v5159_v28  ;;  %v4951_v39 = vadd.f32 %v4877_v23, %v8522_v22  ;;  %vm5165_vm10 = vmor %vm5163_vm9, %vm5164_vm8  ;;  %vm5168_vm11 = vcmp.eq.f32.partialorder %v5167_v21, 8.507059e+37  ;;  %v9415_v21 = vld [vmem:[#allocation7_spill] sm:$0xff] }
 0x556   : > { %vm5178_vm12 = vweird.f32 %v8657_v55  ;;  %vm5183_vm14 = vcmp.eq.f32.partialorder %v5182_v60, 8.507059e+37  ;;  %v9416_v60 = vld [vmem:[#allocation10_spill] sm:$0xff] }
 0x557   : > { %v5655_v19 = vadd.f32 %v5623_v6, %v9414_v48  ;;  %v5161_v32 = vmul.f32 %v6305_v49, %v5160_v33  ;;  %v8676_v22 = vadd.f32 %v8622_v63, %v4951_v39  ;;  %6113 = vmatmul.msk.bf16.gmra.mxu1 %vm226_vm1, %v4799_v42  ;;  %v8686_v33 = vpop.f32.mrf.mxu3 }
 0x559   : > { %v6307_v45 = vpop.eup %6306  ;;  %5687 = vst.msk [vmem:[%s8668_s25] sm:$0xff] %vm226_vm1, %v5655_v19  ;;  %v5162_v16 = vadd.f32 %v6305_v49, %v5161_v32  ;;  %v6123_v41 = vmul.f32 -1.442695, %v8676_v22 }
 0x55a   : > { %v6309_v43 = vpop.eup %6308  ;;  %v8682_v46 = vadd.f32 1.0, %v6307_v45 }
 0x55b   : > { %v5166_v28 = vsel %vm5165_vm10, %v6305_v49, %v5162_v16  ;;  %v5174_v59 = vmul.f32 %v6309_v43, %v8657_v55  ;;  %6310 = vpow2.f32 %v6123_v41  ;;  %v5184_v49 = vand.u32 2147483648, %v8657_v55  ;;  %v8696_v16 = vpop.f32.mrf.mxu0  ;;  %v8698_v41 = vpop.f32.mrf.mxu2 }
 0x55c   : > { %v5171_v23 = vsel %vm5168_vm11, %v5170_v56, %v5166_v28  ;;  %6312 = vrcp.f32 %v8682_v46  ;;  %v4879_v6 = vpop.f32.mrf.mxu1  ;;  %vm5179_vm0 = vweird.f32 %v6309_v43  ;;  %v5199_v10 = vand.u32 2147483648, %v8682_v46 }
 0x55d   : > { %v5624_v12 = vmul.f32 %v5171_v23, %v8633_v0  ;;  %v5175_v39 = vsub.f32 1.0, %v5174_v59  ;;  %v4952_v42 = vadd.f32 %v4879_v6, %v8532_v15  ;;  %vm5180_vm13 = vmor %vm5178_vm12, %vm5179_vm0  ;;  %v5185_v28 = vor.u32 1.1754944e-38, %v5184_v49  ;;  %v4779_v23 = vld [vmem:[#allocation3 + $0x13a] sm:$0xff]  ;;  %v4780_v6 = vld [vmem:[#allocation3 + $0x142] sm:$0xff] }
 0x55e   : > { %v4800_v49 = vpack.c.bf16 %v4780_v6, %v4779_v23  ;;  %vm5193_vm2 = vweird.f32 %v8682_v46 }
 0x55f   : > { %v5656_v48 = vadd.f32 %v5624_v12, %v9415_v21  ;;  %v5176_v19 = vmul.f32 %v6309_v43, %v5175_v39  ;;  %v8694_v32 = vadd.f32 %v8622_v63, %v4952_v42 }
 0x561   : > { %v6311_v45 = vpop.eup %6310  ;;  %5688 = vst.msk [vmem:[%s8668_s25 + $0x8] sm:$0xff] %vm226_vm1, %v5656_v48  ;;  %v5177_v0 = vadd.f32 %v6309_v43, %v5176_v19  ;;  %v6124_v15 = vmul.f32 -1.442695, %v8694_v32 }
 0x562   : > { %v6313_v56 = vpop.eup %6312  ;;  %v8704_v59 = vadd.f32 1.0, %v6311_v45  ;;  %v5197_v45 = vand.u32 2147483647, %v8682_v46 }
 0x563   : > { %v5181_v12 = vsel %vm5180_vm13, %v6309_v43, %v5177_v0  ;;  %v5189_v39 = vmul.f32 %v6313_v56, %v8682_v46  ;;  %6314 = vpow2.f32 %v6124_v15  ;;  %v8712_v43 = vpop.f32.mrf.mxu3  ;;  %vm5194_vm15 = vweird.f32 %v6313_v56 }
 0x564   : > { %v5186_v42 = vsel %vm5183_vm14, %v5185_v28, %v5181_v12  ;;  %6316 = vrcp.f32 %v8704_v59  ;;  %v4882_v21 = vpop.f32.mrf.mxu1  ;;  %v4288_v12 = vadd.f32 %v8627_v40, %v8449_v57  ;;  %vm5195_vm3 = vmor %vm5193_vm2, %vm5194_vm15  ;;  %vm5198_vm4 = vcmp.eq.f32.partialorder %v5197_v45, 8.507059e+37  ;;  %v9417_v45 = vld [vmem:[#allocation11_spill] sm:$0xff] }
 0x565   : > { %v5625_v55 = vmul.f32 %v5186_v42, %v8642_v61  ;;  %v5190_v48 = vsub.f32 1.0, %v5189_v39  ;;  %v4953_v19 = vadd.f32 %v4882_v21, %v8541_v38  ;;  %v5200_v39 = vor.u32 1.1754944e-38, %v5199_v10  ;;  %v8727_v21 = vpop.f32.mrf.mxu0 }
 0x566   : > { %vm5208_vm6 = vweird.f32 %v8704_v59 }
 0x567   : > { %v5657_v0 = vadd.f32 %v5625_v55, %v9416_v60  ;;  %v5191_v15 = vmul.f32 %v6313_v56, %v5190_v48  ;;  %v8716_v28 = vadd.f32 %v8622_v63, %v4953_v19  ;;  %6114 = vmatmul.msk.bf16.gmra.mxu1 %vm226_vm1, %v4800_v49  ;;  %v8729_v55 = vpop.f32.mrf.mxu2  ;;  %v4511_v60 = vadd.f32 %v8630_v58, %v4288_v12 }
 0x568   : > { %v4289_v12 = vadd.f32 %v8638_v51, %v8463_v52 }
 0x569   : > { %v6315_v61 = vpop.eup %6314  ;;  %5689 = vst.msk [vmem:[%s8668_s25 + $0x10] sm:$0xff] %vm226_vm1, %v5657_v0  ;;  %v5192_v38 = vadd.f32 %v6313_v56, %v5191_v15  ;;  %v6125_v23 = vmul.f32 -1.442695, %v8716_v28  ;;  %v5212_v0 = vand.u32 2147483647, %v8704_v59 }
 0x56a   : > { %v6317_v6 = vpop.eup %6316  ;;  %v8725_v42 = vadd.f32 1.0, %v6315_v61 }
 0x56b   : > { %v5196_v48 = vsel %vm5195_vm3, %v6313_v56, %v5192_v38  ;;  %v5204_v19 = vmul.f32 %v6317_v6, %v8704_v59  ;;  %6318 = vpow2.f32 %v6125_v23  ;;  %v5214_v56 = vand.u32 2147483648, %v8704_v59 }
 0x56c   : > { %v5201_v46 = vsel %vm5198_vm4, %v5200_v39, %v5196_v48  ;;  %6320 = vrcp.f32 %v8725_v42  ;;  %v4884_v49 = vpop.f32.mrf.mxu1  ;;  %vm5209_vm5 = vweird.f32 %v6317_v6  ;;  %v8742_v39 = vpop.f32.mrf.mxu3  ;;  %vm5213_vm8 = vcmp.eq.f32.partialorder %v5212_v0, 8.507059e+37 }
 0x56d   : > { %v5626_v57 = vmul.f32 %v5201_v46, %v8654_v26  ;;  %v5205_v40 = vsub.f32 1.0, %v5204_v19  ;;  %v4954_v10 = vadd.f32 %v4884_v49, %v8551_v5  ;;  %vm5210_vm7 = vmor %vm5208_vm6, %vm5209_vm5  ;;  %v5215_v48 = vor.u32 1.1754944e-38, %v5214_v56  ;;  %v4781_v49 = vld [vmem:[#allocation3 + $0x152] sm:$0xff] }
 0x56e   : > { %v4733_v46 = vadd.f32 %v8636_v47, %v4511_v60  ;;  %v5227_v0 = vand.u32 2147483647, %v8725_v42  ;;  %vm5223_vm10 = vweird.f32 %v8725_v42 }
 0x56f   : > { %v5658_v15 = vadd.f32 %v5626_v57, %v9417_v45  ;;  %v5206_v61 = vmul.f32 %v6317_v6, %v5205_v40  ;;  %v8740_v38 = vadd.f32 %v8622_v63, %v4954_v10  ;;  %v4782_v57 = vld [vmem:[#allocation3 + $0x15a] sm:$0xff]  ;;  %v8757_v52 = vpop.f32.mrf.mxu2 }
 0x570   : > { %v4801_v60 = vpack.c.bf16 %v4782_v57, %v4781_v49  ;;  %vm5228_vm0 = vcmp.eq.f32.partialorder %v5227_v0, 8.507059e+37 }
 0x571   : > { %v6319_v23 = vpop.eup %6318  ;;  %5690 = vst.msk [vmem:[%s8668_s25 + $0x18] sm:$0xff] %vm226_vm1, %v5658_v15  ;;  %v5207_v26 = vadd.f32 %v6317_v6, %v5206_v61  ;;  %v6126_v5 = vmul.f32 -1.442695, %v8740_v38  ;;  %v8755_v15 = vpop.f32.mrf.mxu0  ;;  %v5229_v61 = vand.u32 2147483648, %v8725_v42 }
 0x572   : > { %v6321_v58 = vpop.eup %6320  ;;  %v8750_v19 = vadd.f32 1.0, %v6319_v23  ;;  %v9418_v23 = vld [vmem:[#allocation14_spill] sm:$0xff] }
 0x573   : > { %v5211_v40 = vsel %vm5210_vm7, %v6317_v6, %v5207_v26  ;;  %v5219_v10 = vmul.f32 %v6321_v58, %v8725_v42  ;;  %6322 = vpow2.f32 %v6126_v5  ;;  %v4512_v6 = vadd.f32 %v8645_v8, %v4289_v12 }
 0x574   : > { %v5216_v59 = vsel %vm5213_vm8, %v5215_v48, %v5211_v40  ;;  %6324 = vrcp.f32 %v8750_v19  ;;  %v4887_v45 = vpop.f32.mrf.mxu1  ;;  %vm5224_vm9 = vweird.f32 %v6321_v58  ;;  %v5230_v49 = vor.u32 1.1754944e-38, %v5229_v61  ;;  %v9419_v61 = vld [vmem:[#allocation15_spill] sm:$0xff] }
 0x575   : > { %v5627_v51 = vmul.f32 %v5216_v59, %v8676_v22  ;;  %v5220_v56 = vsub.f32 1.0, %v5219_v10  ;;  %v4955_v47 = vadd.f32 %v4887_v45, %v4733_v46  ;;  %v4290_v46 = vadd.f32 %v8650_v44, %v8469_v25  ;;  %vm5225_vm11 = vmor %vm5223_vm10, %vm5224_vm9  ;;  %v8777_v59 = vpop.f32.mrf.mxu3 }
 0x576   : > { %v4734_v10 = vadd.f32 %v8648_v34, %v4512_v6  ;;  %v5242_v34 = vand.u32 2147483647, %v8750_v19  ;;  %v5244_v6 = vand.u32 2147483648, %v8750_v19  ;;  %vm5238_vm13 = vweird.f32 %v8750_v19 }
 0x577   : > { %v5659_v26 = vadd.f32 %v5627_v51, %v9418_v23  ;;  %v5221_v5 = vmul.f32 %v6321_v58, %v5220_v56  ;;  %v8765_v48 = vadd.f32 %v8622_v63, %v4955_v47  ;;  %6115 = vmatmul.msk.bf16.gmra.mxu1 %vm226_vm1, %v4801_v60  ;;  %v4513_v60 = vadd.f32 %v8659_v62, %v4290_v46  ;;  %v8787_v0 = vpop.f32.mrf.mxu2 }
 0x578   : > { %v5245_v46 = vor.u32 1.1754944e-38, %v5244_v6  ;;  %vm5243_vm15 = vcmp.eq.f32.partialorder %v5242_v34, 8.507059e+37  ;;  %v9420_v34 = vld [vmem:[#allocation18_spill] sm:$0xff] }
 0x579   : > { %v6323_v40 = vpop.eup %6322  ;;  %5691 = vst.msk [vmem:[%s8668_s25 + $0x20] sm:$0xff] %vm226_vm1, %v5659_v26  ;;  %v5222_v22 = vadd.f32 %v6321_v58, %v5221_v5  ;;  %v6127_v8 = vmul.f32 -1.442695, %v8765_v48 }
 0x57a   : > { %v6325_v12 = vpop.eup %6324  ;;  %v8774_v57 = vadd.f32 1.0, %v6323_v40 }
 0x57b   : > { %v5226_v45 = vsel %vm5225_vm11, %v6321_v58, %v5222_v22  ;;  %v5234_v51 = vmul.f32 %v6325_v12, %v8750_v19  ;;  %6326 = vpow2.f32 %v6127_v8  ;;  %v8785_v58 = vpop.f32.mrf.mxu0  ;;  %vm5239_vm12 = vweird.f32 %v6325_v12 }
 0x57c   : > { %v5231_v42 = vsel %vm5228_vm0, %v5230_v49, %v5226_v45  ;;  %6328 = vrcp.f32 %v8774_v57  ;;  %v4889_v56 = vpop.f32.mrf.mxu1  ;;  %v4291_v8 = vadd.f32 %v8672_v18, %v8483_v2  ;;  %vm5240_vm14 = vmor %vm5238_vm13, %vm5239_vm12  ;;  %v4783_v45 = vld [vmem:[#allocation3 + $0x16a] sm:$0xff]  ;;  %vm5253_vm3 = vweird.f32 %v8774_v57 }
 0x57d   : > { %v5628_v25 = vmul.f32 %v5231_v42, %v8694_v32  ;;  %v5235_v44 = vsub.f32 1.0, %v5234_v51  ;;  %v4956_v47 = vadd.f32 %v4889_v56, %v4734_v10  ;;  %v4735_v10 = vadd.f32 %v8670_v11, %v4513_v60  ;;  %v4784_v51 = vld [vmem:[#allocation3 + $0x172] sm:$0xff] }
 0x57e   : > { %v4802_v6 = vpack.c.bf16 %v4784_v51, %v4783_v45  ;;  %v4514_v11 = vadd.f32 %v8686_v33, %v4291_v8  ;;  %v5259_v60 = vand.u32 2147483648, %v8774_v57 }
 0x57f   : > { %v5660_v23 = vadd.f32 %v5628_v25, %v9419_v61  ;;  %v5236_v26 = vmul.f32 %v6325_v12, %v5235_v44  ;;  %v8791_v5 = vadd.f32 %v8622_v63, %v4956_v47  ;;  %v8804_v44 = vpop.f32.mrf.mxu3 }
 0x580   : > { %v4736_v51 = vadd.f32 %v8696_v16, %v4514_v11 }
 0x581   : > { %v6327_v32 = vpop.eup %6326  ;;  %5692 = vst.msk [vmem:[%s8668_s25 + $0x28] sm:$0xff] %vm226_vm1, %v5660_v23  ;;  %v5237_v40 = vadd.f32 %v6325_v12, %v5236_v26  ;;  %v6128_v62 = vmul.f32 -1.442695, %v8791_v5 }
 0x582   : > { %v6329_v22 = vpop.eup %6328  ;;  %v8799_v49 = vadd.f32 1.0, %v6327_v32 }
 0x583   : > { %v5241_v42 = vsel %vm5240_vm14, %v6325_v12, %v5237_v40  ;;  %v5249_v56 = vmul.f32 %v6329_v22, %v8774_v57  ;;  %6330 = vpow2.f32 %v6128_v62  ;;  %v5257_v12 = vand.u32 2147483647, %v8774_v57  ;;  %v8817_v40 = vpop.f32.mrf.mxu2 }
 0x584   : > { %v5246_v19 = vsel %vm5243_vm15, %v5245_v46, %v5241_v42  ;;  %6332 = vrcp.f32 %v8799_v49  ;;  %v4892_v25 = vpop.f32.mrf.mxu1  ;;  %vm5254_vm2 = vweird.f32 %v6329_v22  ;;  %v4292_v46 = vadd.f32 %v8698_v41, %v8489_v37 }
 0x585   : > { %v5629_v2 = vmul.f32 %v5246_v19, %v8716_v28  ;;  %v5250_v18 = vsub.f32 1.0, %v5249_v56  ;;  %v4957_v47 = vadd.f32 %v4892_v25, %v4735_v10  ;;  %v8815_v28 = vpop.f32.mrf.mxu0  ;;  %vm5255_vm4 = vmor %vm5253_vm3, %vm5254_vm2  ;;  %v5260_v10 = vor.u32 1.1754944e-38, %v5259_v60 }
 0x586   : > { %vm5258_vm5 = vcmp.eq.f32.partialorder %v5257_v12, 8.507059e+37  ;;  %v4515_v41 = vadd.f32 %v8712_v43, %v4292_v46  ;;  %v5274_v16 = vand.u32 2147483648, %v8799_v49  ;;  %vm5268_vm7 = vweird.f32 %v8799_v49 }
 0x587   : > { %v5661_v61 = vadd.f32 %v5629_v2, %v9420_v34  ;;  %v5251_v23 = vmul.f32 %v6329_v22, %v5250_v18  ;;  %v8812_v26 = vadd.f32 %v8622_v63, %v4957_v47  ;;  %6116 = vmatmul.msk.bf16.gmra.mxu1 %vm226_vm1, %v4802_v6  ;;  %v5272_v18 = vand.u32 2147483647, %v8799_v49  ;;  %v9421_v47 = vld [vmem:[#allocation19_spill] sm:$0xff] }
 0x589   : > { %v6331_v32 = vpop.eup %6330  ;;  %5693 = vst.msk [vmem:[%s8668_s25 + $0x30] sm:$0xff] %vm226_vm1, %v5661_v61  ;;  %v5252_v33 = vadd.f32 %v6329_v22, %v5251_v23  ;;  %v6129_v62 = vmul.f32 -1.442695, %v8812_v26  ;;  %v4293_v61 = vadd.f32 %v8729_v55, %v8502_v20  ;;  %v5275_v23 = vor.u32 1.1754944e-38, %v5274_v16 }
 0x58a   : > { %v6333_v8 = vpop.eup %6332  ;;  %v8825_v45 = vadd.f32 1.0, %v6331_v32  ;;  %vm5273_vm9 = vcmp.eq.f32.partialorder %v5272_v18, 8.507059e+37 }
 0x58b   : > { %v5256_v42 = vsel %vm5255_vm4, %v6329_v22, %v5252_v33  ;;  %v5264_v56 = vmul.f32 %v6333_v8, %v8799_v49  ;;  %6334 = vpow2.f32 %v6129_v62  ;;  %v8834_v22 = vpop.f32.mrf.mxu3  ;;  %vm5269_vm6 = vweird.f32 %v6333_v8  ;;  %v8851_v46 = vpop.f32.mrf.mxu2 }
 0x58c   : > { %v5261_v19 = vsel %vm5258_vm5, %v5260_v10, %v5256_v42  ;;  %6336 = vrcp.f32 %v8825_v45  ;;  %v4894_v57 = vpop.f32.mrf.mxu1  ;;  %vm5270_vm8 = vmor %vm5268_vm7, %vm5269_vm6  ;;  %v4737_v33 = vadd.f32 %v8727_v21, %v4515_v41  ;;  %v4516_v21 = vadd.f32 %v8742_v39, %v4293_v61 }
 0x58d   : > { %v5630_v25 = vmul.f32 %v5261_v19, %v8740_v38  ;;  %v5265_v2 = vsub.f32 1.0, %v5264_v56  ;;  %v4958_v37 = vadd.f32 %v4894_v57, %v4736_v51  ;;  %v8849_v62 = vpop.f32.mrf.mxu0  ;;  %v5287_v19 = vand.u32 2147483647, %v8825_v45 }
 0x58e   : > { %v5289_v57 = vand.u32 2147483648, %v8825_v45  ;;  %vm5283_vm11 = vweird.f32 %v8825_v45 }
 0x58f   : > { %v5662_v6 = vadd.f32 %v5630_v25, %v9421_v47  ;;  %v5266_v11 = vmul.f32 %v6333_v8, %v5265_v2  ;;  %v8838_v12 = vadd.f32 %v8622_v63, %v4958_v37  ;;  %vm5288_vm12 = vcmp.eq.f32.partialorder %v5287_v19, 8.507059e+37 }
 0x591   : > { %v6335_v60 = vpop.eup %6334  ;;  %5694 = vst.msk [vmem:[%s8668_s25 + $0x38] sm:$0xff] %vm226_vm1, %v5662_v6  ;;  %v5267_v38 = vadd.f32 %v6333_v8, %v5266_v11  ;;  %v6130_v43 = vmul.f32 -1.442695, %v8838_v12  ;;  %v5290_v6 = vor.u32 1.1754944e-38, %v5289_v57 }
 0x592   : > { %v6337_v34 = vpop.eup %6336  ;;  %v8846_v32 = vadd.f32 1.0, %v6335_v60 }
 0x593   : > { %v5271_v10 = vsel %vm5270_vm8, %v6333_v8, %v5267_v38  ;;  %v5279_v49 = vmul.f32 %v6337_v34, %v8825_v45  ;;  %6338 = vpow2.f32 %v6130_v43  ;;  %v9422_v8 = vld [vmem:[#allocation22_spill] sm:$0xff]  ;;  %vm5284_vm10 = vweird.f32 %v6337_v34  ;;  %v8867_v18 = vpop.f32.mrf.mxu3  ;;  %v8881_v61 = vpop.f32.mrf.mxu2 }
 0x594   : > { %v5276_v51 = vsel %vm5273_vm9, %v5275_v23, %v5271_v10  ;;  %6340 = vrcp.f32 %v8846_v32  ;;  %v4897_v20 = vpop.f32.mrf.mxu1  ;;  %vm5285_vm0 = vmor %vm5283_vm11, %vm5284_vm10  ;;  %v5304_v10 = vand.u32 2147483648, %v8846_v32  ;;  %vm5298_vm14 = vweird.f32 %v8846_v32 }
 0x595   : > { %v5631_v55 = vmul.f32 %v5276_v51, %v8765_v48  ;;  %v5280_v42 = vsub.f32 1.0, %v5279_v49  ;;  %v4959_v56 = vadd.f32 %v4897_v20, %v4737_v33  ;;  %v4294_v48 = vadd.f32 %v8757_v52, %v8508_v54  ;;  %v8879_v43 = vpop.f32.mrf.mxu0  ;;  %v9423_v49 = vld [vmem:[#allocation23_spill] sm:$0xff] }
 0x597   : > { %v5663_v25 = vadd.f32 %v5631_v55, %v9422_v8  ;;  %v5281_v2 = vmul.f32 %v6337_v34, %v5280_v42  ;;  %v8861_v37 = vadd.f32 %v8622_v63, %v4959_v56  ;;  %6117 = vmatmul.msk.bf16.gmra.mxu1 %vm226_vm1, %v8585_v9  ;;  %v4738_v9 = vadd.f32 %v8755_v15, %v4516_v21  ;;  %v4788_v42 = vld [vmem:[#allocation3 + $0x1a2] sm:$0xff] }
 0x598   : > { %v4517_v45 = vadd.f32 %v8777_v59, %v4294_v48  ;;  %v4787_v59 = vld [vmem:[#allocation3 + $0x19a] sm:$0xff]  ;;  %v4295_v8 = vadd.f32 %v8787_v0, %v8520_v13 }
 0x599   : > { %v6339_v41 = vpop.eup %6338  ;;  %5695 = vst.msk [vmem:[%s8668_s25 + $0x40] sm:$0xff] %vm226_vm1, %v5663_v25  ;;  %v5282_v39 = vadd.f32 %v6337_v34, %v5281_v2  ;;  %v6131_v16 = vmul.f32 -1.442695, %v8861_v37  ;;  %v5305_v25 = vor.u32 1.1754944e-38, %v5304_v10  ;;  %v4296_v10 = vadd.f32 %v8817_v40, %v8526_v31 }
 0x59a   : > { %v6341_v47 = vpop.eup %6340  ;;  %v8873_v11 = vadd.f32 1.0, %v6339_v41  ;;  %v4739_v19 = vadd.f32 %v8785_v58, %v4517_v45  ;;  %v4804_v41 = vpack.c.bf16 %v4788_v42, %v4787_v59 }
 0x59b   : > { %v5286_v60 = vsel %vm5285_vm0, %v6337_v34, %v5282_v39  ;;  %v5294_v54 = vmul.f32 %v6341_v47, %v8846_v32  ;;  %6342 = vpow2.f32 %v6131_v16  ;;  %v5302_v34 = vand.u32 2147483647, %v8846_v32  ;;  %v8899_v48 = vpop.f32.mrf.mxu3 }
 0x59c   : > { %v5291_v52 = vsel %vm5288_vm12, %v5290_v6, %v5286_v60  ;;  %6344 = vrcp.f32 %v8873_v11  ;;  %v4899_v38 = vpop.f32.mrf.mxu1  ;;  %vm5299_vm13 = vweird.f32 %v6341_v47  ;;  %v5317_v60 = vand.u32 2147483647, %v8873_v11 }
 0x59d   : > { %v5632_v23 = vmul.f32 %v5291_v52, %v8791_v5  ;;  %v5295_v33 = vsub.f32 1.0, %v5294_v54  ;;  %v4960_v15 = vadd.f32 %v4899_v38, %v4738_v9  ;;  %vm5300_vm15 = vmor %vm5298_vm14, %vm5299_vm13  ;;  %vm5303_vm2 = vcmp.eq.f32.partialorder %v5302_v34, 8.507059e+37  ;;  %v8909_v52 = vpop.f32.mrf.mxu2  ;;  %v9424_v38 = vld [vmem:[#allocation26_spill] sm:$0xff] }
 0x59e   : > { %v4518_v9 = vadd.f32 %v8804_v44, %v4295_v8  ;;  %v5319_v54 = vand.u32 2147483648, %v8873_v11  ;;  %vm5313_vm4 = vweird.f32 %v8873_v11  ;;  %vm5318_vm6 = vcmp.eq.f32.partialorder %v5317_v60, 8.507059e+37  ;;  %v9425_v8 = vld [vmem:[#allocation27_spill] sm:$0xff] }
 0x59f   : > { %v5664_v51 = vadd.f32 %v5632_v23, %v9423_v49  ;;  %v5296_v20 = vmul.f32 %v6341_v47, %v5295_v33  ;;  %v8888_v55 = vadd.f32 %v8622_v63, %v4960_v15 }
 0x5a0   : > { %v5320_v49 = vor.u32 1.1754944e-38, %v5319_v54 }
 0x5a1   : > { %v6343_v56 = vpop.eup %6342  ;;  %5696 = vst.msk [vmem:[%s8668_s25 + $0x48] sm:$0xff] %vm226_vm1, %v5664_v51  ;;  %v5297_v21 = vadd.f32 %v6341_v47, %v5296_v20  ;;  %v6132_v5 = vmul.f32 -1.442695, %v8888_v55  ;;  %v4740_v20 = vadd.f32 %v8815_v28, %v4518_v9 }
 0x5a2   : > { %v6345_v57 = vpop.eup %6344  ;;  %v8897_v2 = vadd.f32 1.0, %v6343_v56 }
 0x5a3   : > { %v5301_v39 = vsel %vm5300_vm15, %v6341_v47, %v5297_v21  ;;  %v5309_v16 = vmul.f32 %v6345_v57, %v8873_v11  ;;  %6346 = vpow2.f32 %v6132_v5  ;;  %v8907_v47 = vpop.f32.mrf.mxu0  ;;  %vm5314_vm3 = vweird.f32 %v6345_v57  ;;  %v8927_v21 = vpop.f32.mrf.mxu3 }
 0x5a4   : > { %v5306_v32 = vsel %vm5303_vm2, %v5305_v25, %v5301_v39  ;;  %6348 = vrcp.f32 %v8897_v2  ;;  %v4902_v58 = vpop.f32.mrf.mxu1  ;;  %vm5315_vm5 = vmor %vm5313_vm4, %vm5314_vm3  ;;  %v5332_v28 = vand.u32 2147483647, %v8897_v2  ;;  %vm5328_vm8 = vweird.f32 %v8897_v2 }
 0x5a5   : > { %v5633_v6 = vmul.f32 %v5306_v32, %v8812_v26  ;;  %v5310_v13 = vsub.f32 1.0, %v5309_v16  ;;  %v4961_v0 = vadd.f32 %v4902_v58, %v4739_v19  ;;  %v4519_v19 = vadd.f32 %v8834_v22, %v4296_v10  ;;  %v8939_v58 = vpop.f32.mrf.mxu2 }
 0x5a6   : > { %vm5333_vm10 = vcmp.eq.f32.partialorder %v5332_v28, 8.507059e+37 }
 0x5a7   : > { %v5665_v45 = vadd.f32 %v5633_v6, %v9424_v38  ;;  %v5311_v23 = vmul.f32 %v6345_v57, %v5310_v13  ;;  %v8913_v33 = vadd.f32 %v8622_v63, %v4961_v0  ;;  %6118 = vmatmul.msk.bf16.gmra.mxu1 %vm226_vm1, %v4804_v41  ;;  %v4297_v13 = vadd.f32 %v8851_v46, %v8539_v14 }
 0x5a8   : > { %v4741_v60 = vadd.f32 %v8849_v62, %v4519_v19 }
 0x5a9   : > { %v6347_v26 = vpop.eup %6346  ;;  %5697 = vst.msk [vmem:[%s8668_s25 + $0x50] sm:$0xff] %vm226_vm1, %v5665_v45  ;;  %v5312_v44 = vadd.f32 %v6345_v57, %v5311_v23  ;;  %v6133_v15 = vmul.f32 -1.442695, %v8913_v33  ;;  %v4520_v46 = vadd.f32 %v8867_v18, %v4297_v13 }
 0x5aa   : > { %v6349_v34 = vpop.eup %6348  ;;  %v8922_v51 = vadd.f32 1.0, %v6347_v26 }
 0x5ab   : > { %v5316_v59 = vsel %vm5315_vm5, %v6345_v57, %v5312_v44  ;;  %v5324_v42 = vmul.f32 %v6349_v34, %v8897_v2  ;;  %6350 = vpow2.f32 %v6133_v15  ;;  %v5334_v57 = vand.u32 2147483648, %v8897_v2  ;;  %v8937_v32 = vpop.f32.mrf.mxu0  ;;  %v8956_v15 = vpop.f32.mrf.mxu3 }
 0x5ac   : > { %v5321_v56 = vsel %vm5318_vm6, %v5320_v49, %v5316_v59  ;;  %6352 = vrcp.f32 %v8922_v51  ;;  %v4904_v11 = vpop.f32.mrf.mxu1  ;;  %vm5329_vm7 = vweird.f32 %v6349_v34  ;;  %v5347_v44 = vand.u32 2147483647, %v8922_v51 }
 0x5ad   : > { %v5634_v31 = vmul.f32 %v5321_v56, %v8838_v12  ;;  %v5325_v40 = vsub.f32 1.0, %v5324_v42  ;;  %v4962_v5 = vadd.f32 %v4904_v11, %v4740_v20  ;;  %vm5330_vm9 = vmor %vm5328_vm8, %vm5329_vm7  ;;  %v5335_v0 = vor.u32 1.1754944e-38, %v5334_v57  ;;  %v8973_v19 = vpop.f32.mrf.mxu2 }
 0x5ae   : > { %v5349_v62 = vand.u32 2147483648, %v8922_v51  ;;  %vm5343_vm0 = vweird.f32 %v8922_v51  ;;  %v4298_v56 = vadd.f32 %v8881_v61, %v8545_v1  ;;  %vm5348_vm13 = vcmp.eq.f32.partialorder %v5347_v44, 8.507059e+37 }
 0x5af   : > { %v5666_v25 = vadd.f32 %v5634_v31, %v9425_v8  ;;  %v5326_v41 = vmul.f32 %v6349_v34, %v5325_v40  ;;  %v8935_v39 = vadd.f32 %v8622_v63, %v4962_v5  ;;  %v4742_v40 = vadd.f32 %v8879_v43, %v4520_v46 }
 0x5b0   : > { %v5350_v11 = vor.u32 1.1754944e-38, %v5349_v62  ;;  %v4521_v43 = vadd.f32 %v8899_v48, %v4298_v56 }
 0x5b1   : > { %v6351_v16 = vpop.eup %6350  ;;  %5698 = vst.msk [vmem:[%s8668_s25 + $0x58] sm:$0xff] %vm226_vm1, %v5666_v25  ;;  %v5327_v12 = vadd.f32 %v6349_v34, %v5326_v41  ;;  %v6134_v22 = vmul.f32 -1.442695, %v8935_v39 }
 0x5b2   : > { %v6353_v6 = vpop.eup %6352  ;;  %v8947_v9 = vadd.f32 1.0, %v6351_v16 }
 0x5b3   : > { %v5331_v54 = vsel %vm5330_vm9, %v6349_v34, %v5327_v12  ;;  %v5339_v38 = vmul.f32 %v6353_v6, %v8922_v51  ;;  %6354 = vpow2.f32 %v6134_v22  ;;  %v9426_v34 = vld [vmem:[#allocation30_spill] sm:$0xff]  ;;  %vm5344_vm11 = vweird.f32 %v6353_v6  ;;  %v8971_v5 = vpop.f32.mrf.mxu0  ;;  %v9427_v12 = vld [vmem:[#allocation31_spill] sm:$0xff] }
 0x5b4   : > { %v5336_v45 = vsel %vm5333_vm10, %v5335_v0, %v5331_v54  ;;  %6356 = vrcp.f32 %v8947_v9  ;;  %v4907_v2 = vpop.f32.mrf.mxu1  ;;  %vm5345_vm12 = vmor %vm5343_vm0, %vm5344_vm11  ;;  %v5362_v41 = vand.u32 2147483647, %v8947_v9  ;;  %v5364_v16 = vand.u32 2147483648, %v8947_v9 }
 0x5b5   : > { %v5635_v23 = vmul.f32 %v5336_v45, %v8861_v37  ;;  %v5340_v26 = vsub.f32 1.0, %v5339_v38  ;;  %v4963_v14 = vadd.f32 %v4907_v2, %v4741_v60  ;;  %v8985_v60 = vpop.f32.mrf.mxu3  ;;  %vm5358_vm15 = vweird.f32 %v8947_v9  ;;  %v9000_v62 = vpop.f32.mrf.mxu2 }
 0x5b6   : > { %v4299_v38 = vadd.f32 %v8909_v52, %v8557_v50  ;;  %v5365_v45 = vor.u32 1.1754944e-38, %v5364_v16  ;;  %vm5363_vm3 = vcmp.eq.f32.partialorder %v5362_v41, 8.507059e+37 }
 0x5b7   : > { %v5667_v10 = vadd.f32 %v5635_v23, %v9426_v34  ;;  %v5341_v49 = vmul.f32 %v6353_v6, %v5340_v26  ;;  %v8960_v20 = vadd.f32 %v8622_v63, %v4963_v14  ;;  %v4743_v23 = vadd.f32 %v8907_v47, %v4521_v43 }
 0x5b8   : > { %v4522_v47 = vadd.f32 %v8927_v21, %v4299_v38 }
 0x5b9   : > { %v6355_v59 = vpop.eup %6354  ;;  %5699 = vst.msk [vmem:[%s8668_s25 + $0x60] sm:$0xff] %vm226_vm1, %v5667_v10  ;;  %v5342_v37 = vadd.f32 %v6353_v6, %v5341_v49  ;;  %v6135_v18 = vmul.f32 -1.442695, %v8960_v20 }
 0x5ba   : > { %v6357_v42 = vpop.eup %6356  ;;  %v8968_v31 = vadd.f32 1.0, %v6355_v59  ;;  %v9428_v59 = vld [vmem:[#allocation4_spill] sm:$0xff] }
 0x5bb   : > { %v5346_v28 = vsel %vm5345_vm12, %v6353_v6, %v5342_v37  ;;  %v5354_v51 = vmul.f32 %v6357_v42, %v8947_v9  ;;  %6358 = vpow2.f32 %v6135_v18  ;;  %vm5359_vm14 = vweird.f32 %v6357_v42  ;;  %v8998_v44 = vpop.f32.mrf.mxu0 }
 0x5bc   : > { %v5351_v57 = vsel %vm5348_vm13, %v5350_v11, %v5346_v28  ;;  %6360 = vrcp.f32 %v8968_v31  ;;  %v4909_v1 = vpop.f32.mrf.mxu1  ;;  %vm5360_vm2 = vmor %vm5358_vm15, %vm5359_vm14  ;;  %v5377_v10 = vand.u32 2147483647, %v8968_v31  ;;  %v5379_v49 = vand.u32 2147483648, %v8968_v31 }
 0x5bd   : > { %v5636_v61 = vmul.f32 %v5351_v57, %v8888_v55  ;;  %v5355_v8 = vsub.f32 1.0, %v5354_v51  ;;  %v4964_v25 = vadd.f32 %v4909_v1, %v4742_v40  ;;  %vm5373_vm5 = vweird.f32 %v8968_v31 }
 0x5be   : > { %v4300_v40 = vadd.f32 %v8939_v58, %v8560_v30  ;;  %v5380_v28 = vor.u32 1.1754944e-38, %v5379_v49  ;;  %v4744_v57 = vadd.f32 %v8937_v32, %v4522_v47  ;;  %vm5378_vm7 = vcmp.eq.f32.partialorder %v5377_v10, 8.507059e+37  ;;  %v9430_v49 = vld [vmem:[#allocation8_spill] sm:$0xff] }
 0x5bf   : > { %v5668_v22 = vadd.f32 %v5636_v61, %v9427_v12  ;;  %v5356_v6 = vmul.f32 %v6357_v42, %v5355_v8  ;;  %v8983_v13 = vadd.f32 %v8622_v63, %v4964_v25  ;;  %v9029_v12 = vpop.f32.mrf.mxu2 }
 0x5c0   : > { %v4523_v43 = vadd.f32 %v8956_v15, %v4300_v40  ;;  %v4302_v40 = vadd.f32 %v9000_v62, %v8573_v27 }
 0x5c1   : > { %v6359_v0 = vpop.eup %6358  ;;  %5700 = vst.msk [vmem:[%s8668_s25 + $0x68] sm:$0xff] %vm226_vm1, %v5668_v22  ;;  %v5357_v55 = vadd.f32 %v6357_v42, %v5356_v6  ;;  %v6136_v48 = vmul.f32 -1.442695, %v8983_v13  ;;  %v9429_v22 = vld [vmem:[#allocation5_spill] sm:$0xff] }
 0x5c2   : > { %v6361_v54 = vpop.eup %6360  ;;  %v8993_v2 = vadd.f32 1.0, %v6359_v0 }
 0x5c3   : > { %v5361_v26 = vsel %vm5360_vm2, %v6357_v42, %v5357_v55  ;;  %v5369_v14 = vmul.f32 %v6361_v54, %v8968_v31  ;;  %6362 = vpow2.f32 %v6136_v48  ;;  %vm5374_vm4 = vweird.f32 %v6361_v54  ;;  %v9027_v16 = vpop.f32.mrf.mxu0 }
 0x5c4   : > { %v5366_v46 = vsel %vm5363_vm3, %v5365_v45, %v5361_v26  ;;  %6364 = vrcp.f32 %v8993_v2  ;;  %v4912_v9 = vpop.f32.mrf.mxu1  ;;  %vm5375_vm6 = vmor %vm5373_vm5, %vm5374_vm4  ;;  %v5392_v32 = vand.u32 2147483647, %v8993_v2  ;;  %v5394_v41 = vand.u32 2147483648, %v8993_v2 }
 0x5c5   : > { %v5637_v50 = vmul.f32 %v5366_v46, %v8913_v33  ;;  %v5370_v52 = vsub.f32 1.0, %v5369_v14  ;;  %v4965_v34 = vadd.f32 %v4912_v9, %v4743_v23  ;;  %vm5388_vm9 = vweird.f32 %v8993_v2 }
 0x5c6   : > { %v4301_v45 = vadd.f32 %v8973_v19, %v8570_v35  ;;  %v5395_v23 = vor.u32 1.1754944e-38, %v5394_v41  ;;  %v4745_v14 = vadd.f32 %v8971_v5, %v4523_v43  ;;  %vm5393_vm11 = vcmp.eq.f32.partialorder %v5392_v32, 8.507059e+37  ;;  %v9431_v32 = vld [vmem:[#allocation9_spill] sm:$0xff] }
 0x5c7   : > { %v5669_v37 = vadd.f32 %v5637_v50, %v9428_v59  ;;  %v5371_v18 = vmul.f32 %v6361_v54, %v5370_v52  ;;  %v9008_v42 = vadd.f32 %v8622_v63, %v4965_v34  ;;  %v9019_v63 = vpop.f32.mrf.mxu3 }
 0x5c8   : > { %v4524_v47 = vadd.f32 %v8985_v60, %v4301_v45  ;;  %v4525_v62 = vadd.f32 %v9019_v63, %v4302_v40 }
 0x5c9   : > { %v6363_v56 = vpop.eup %6362  ;;  %5701 = vst.msk [vmem:[%s8668_s25 + $0x70] sm:$0xff] %vm226_vm1, %v5669_v37  ;;  %v5372_v11 = vadd.f32 %v6361_v54, %v5371_v18  ;;  %v6137_v33 = vmul.f32 -1.442695, %v9008_v42 }
 0x5ca   : > { %v6365_v21 = vpop.eup %6364  ;;  %v9016_v51 = vadd.f32 1.0, %v6363_v56  ;;  %v4747_v45 = vadd.f32 %v9027_v16, %v4525_v62 }
 0x5cb   : > { %v5376_v1 = vsel %vm5375_vm6, %v6361_v54, %v5372_v11  ;;  %v5384_v61 = vmul.f32 %v6365_v21, %v8993_v2  ;;  %6366 = vpow2.f32 %v6137_v33  ;;  %vm5389_vm8 = vweird.f32 %v6365_v21  ;;  %v9061_v11 = vpop.f32.mrf.mxu0  ;;  %v9063_v33 = vpop.f32.mrf.mxu2 }
 0x5cc   : > { %v5381_v31 = vsel %vm5378_vm7, %v5380_v28, %v5376_v1  ;;  %6368 = vrcp.f32 %v9016_v51  ;;  %v4914_v8 = vpop.f32.mrf.mxu1  ;;  %vm5390_vm10 = vmor %vm5388_vm9, %vm5389_vm8  ;;  %v5407_v5 = vand.u32 2147483647, %v9016_v51  ;;  %v5409_v10 = vand.u32 2147483648, %v9016_v51 }
 0x5cd   : > { %v5638_v30 = vmul.f32 %v5381_v31, %v8935_v39  ;;  %v5385_v58 = vsub.f32 1.0, %v5384_v61  ;;  %v4966_v25 = vadd.f32 %v4914_v8, %v4744_v57  ;;  %v9035_v39 = vld [vmem:[%s9265_s4] ss:$0 sm:$0xff]  ;;  %vm5403_vm12 = vweird.f32 %v9016_v51 }
 0x5ce   : > { %v5410_v28 = vor.u32 1.1754944e-38, %v5409_v10  ;;  %v4746_v1 = vadd.f32 %v8998_v44, %v4524_v47  ;;  %vm5408_vm14 = vcmp.eq.f32.partialorder %v5407_v5, 8.507059e+37 }
 0x5cf   : > { %v5670_v6 = vadd.f32 %v5638_v30, %v9429_v22  ;;  %v5386_v0 = vmul.f32 %v6365_v21, %v5385_v58  ;;  %v9038_v55 = vadd.f32 %v9035_v39, %v4966_v25  ;;  %v9051_v52 = vpop.f32.mrf.mxu3 }
 0x5d1   : > { %v6367_v15 = vpop.eup %6366  ;;  %5702 = vst.msk [vmem:[%s8668_s25 + $0x78] sm:$0xff] %vm226_vm1, %v5670_v6  ;;  %v5387_v48 = vadd.f32 %v6365_v21, %v5386_v0  ;;  %v6138_v54 = vmul.f32 -1.442695, %v9038_v55 }
 0x5d2   : > { %v6369_v38 = vpop.eup %6368  ;;  %v9046_v26 = vadd.f32 1.0, %v6367_v15 }
 0x5d3   : > { %v5391_v46 = vsel %vm5390_vm10, %v6365_v21, %v5387_v48  ;;  %v5399_v9 = vmul.f32 %v6369_v38, %v9016_v51  ;;  %6370 = vpow2.f32 %v6138_v54  ;;  %vm5404_vm0 = vweird.f32 %v6369_v38 }
 0x5d4   : > { %v5396_v50 = vsel %vm5393_vm11, %v5395_v23, %v5391_v46  ;;  %6372 = vrcp.f32 %v9046_v26  ;;  %v4917_v2 = vpop.f32.mrf.mxu1  ;;  %vm5405_vm13 = vmor %vm5403_vm12, %vm5404_vm0  ;;  %v5422_v25 = vand.u32 2147483647, %v9046_v26  ;;  %v5424_v44 = vand.u32 2147483648, %v9046_v26  ;;  %v4705_v23 = vpop.f32.mrf.mxu0 }
 0x5d5   : > { %v5639_v35 = vmul.f32 %v5396_v50, %v8960_v20  ;;  %v5400_v19 = vsub.f32 1.0, %v5399_v9  ;;  %v4967_v34 = vadd.f32 %v4917_v2, %v4745_v14  ;;  %vm5418_vm2 = vweird.f32 %v9046_v26  ;;  %v4262_v14 = vpop.f32.mrf.mxu2 }
 0x5d6   : > { %v4303_v48 = vadd.f32 %v9029_v12, %v8583_v4  ;;  %v5425_v54 = vor.u32 1.1754944e-38, %v5424_v44  ;;  %vm5423_vm4 = vcmp.eq.f32.partialorder %v5422_v25, 8.507059e+37 }
 0x5d7   : > { %v5671_v59 = vadd.f32 %v5639_v35, %v9430_v49  ;;  %v5401_v37 = vmul.f32 %v6369_v38, %v5400_v19  ;;  %v9059_v18 = vadd.f32 %v9035_v39, %v4967_v34  ;;  %v4483_v43 = vpop.f32.mrf.mxu3  ;;  %v9432_v34 = vld [vmem:[#allocation12_spill] sm:$0xff] }
 0x5d8   : > { %v4526_v35 = vadd.f32 %v9051_v52, %v4303_v48 }
 0x5d9   : > { %v6371_v56 = vpop.eup %6370  ;;  %5703 = vst.msk [vmem:[%s8668_s25 + $0x80] sm:$0xff] %vm226_vm1, %v5671_v59  ;;  %v5402_v20 = vadd.f32 %v6369_v38, %v5401_v37  ;;  %v6139_v60 = vmul.f32 -1.442695, %v9059_v18 }
 0x5da   : > { %v6373_v21 = vpop.eup %6372  ;;  %v9071_v57 = vadd.f32 1.0, %v6371_v56  ;;  %v4304_v56 = vadd.f32 %v9063_v33, %v8588_v17 }
 0x5db   : > { %v5406_v61 = vsel %vm5405_vm13, %v6369_v38, %v5402_v20  ;;  %v5414_v31 = vmul.f32 %v6373_v21, %v9046_v26  ;;  %6374 = vpow2.f32 %v6139_v60  ;;  %vm5419_vm15 = vweird.f32 %v6373_v21 }
 0x5dc   : > { %v5411_v8 = vsel %vm5408_vm14, %v5410_v28, %v5406_v61  ;;  %6376 = vrcp.f32 %v9071_v57  ;;  %v4919_v51 = vpop.f32.mrf.mxu1  ;;  %vm5420_vm3 = vmor %vm5418_vm2, %vm5419_vm15  ;;  %v5437_v16 = vand.u32 2147483647, %v9071_v57  ;;  %v5439_v19 = vand.u32 2147483648, %v9071_v57  ;;  %v4707_v61 = vpop.f32.mrf.mxu0 }
 0x5dd   : > { %v5640_v30 = vmul.f32 %v5411_v8, %v8983_v13  ;;  %v5415_v58 = vsub.f32 1.0, %v5414_v31  ;;  %v4968_v27 = vadd.f32 %v4919_v51, %v4746_v1  ;;  %vm5433_vm6 = vweird.f32 %v9071_v57  ;;  %v4265_v31 = vpop.f32.mrf.mxu2 }
 0x5de   : > { %v5440_v20 = vor.u32 1.1754944e-38, %v5439_v19  ;;  %vm5438_vm8 = vcmp.eq.f32.partialorder %v5437_v16, 8.507059e+37  ;;  %v4527_v51 = vadd.f32 %v4483_v43, %v4304_v56 }
 0x5df   : > { %v5672_v41 = vadd.f32 %v5640_v30, %v9431_v32  ;;  %v5416_v22 = vmul.f32 %v6373_v21, %v5415_v58  ;;  %v9082_v6 = vadd.f32 %v9035_v39, %v4968_v27  ;;  %v4485_v59 = vpop.f32.mrf.mxu3  ;;  %v9433_v58 = vld [vmem:[#allocation13_spill] sm:$0xff] }
 0x5e1   : > { %v6375_v0 = vpop.eup %6374  ;;  %5704 = vst.msk [vmem:[%s8668_s25 + $0x88] sm:$0xff] %vm226_vm1, %v5672_v41  ;;  %v5417_v13 = vadd.f32 %v6373_v21, %v5416_v22  ;;  %v6140_v63 = vmul.f32 -1.442695, %v9082_v6  ;;  %v4305_v41 = vadd.f32 %v4262_v14, %v8596_v36 }
 0x5e2   : > { %v6377_v15 = vpop.eup %6376  ;;  %v9090_v38 = vadd.f32 1.0, %v6375_v0 }
 0x5e3   : > { %v5421_v46 = vsel %vm5420_vm3, %v6373_v21, %v5417_v13  ;;  %v5429_v9 = vmul.f32 %v6377_v15, %v9071_v57  ;;  %6378 = vpow2.f32 %v6140_v63  ;;  %vm5434_vm5 = vweird.f32 %v6377_v15 }
 0x5e4   : > { %v5426_v26 = vsel %vm5423_vm4, %v5425_v54, %v5421_v46  ;;  %6380 = vrcp.f32 %v9090_v38  ;;  %v4922_v50 = vpop.f32.mrf.mxu1  ;;  %vm5435_vm7 = vmor %vm5433_vm6, %vm5434_vm5  ;;  %v4748_v21 = vadd.f32 %v9061_v11, %v4526_v35  ;;  %v5452_v30 = vand.u32 2147483647, %v9090_v38 }
 0x5e5   : > { %v5641_v4 = vmul.f32 %v5426_v26, %v9008_v42  ;;  %v5430_v12 = vsub.f32 1.0, %v5429_v9  ;;  %v4969_v2 = vadd.f32 %v4922_v50, %v4747_v45  ;;  %v5454_v11 = vand.u32 2147483648, %v9090_v38  ;;  %v4710_v26 = vpop.f32.mrf.mxu0  ;;  %v4267_v50 = vpop.f32.mrf.mxu2 }
 0x5e6   : > { %vm5448_vm10 = vweird.f32 %v9090_v38  ;;  %v4749_v13 = vadd.f32 %v4705_v23, %v4527_v51  ;;  %vm5453_vm0 = vcmp.eq.f32.partialorder %v5452_v30, 8.507059e+37  ;;  %v4528_v14 = vadd.f32 %v4485_v59, %v4305_v41 }
 0x5e7   : > { %v5673_v47 = vadd.f32 %v5641_v4, %v9432_v34  ;;  %v5431_v5 = vmul.f32 %v6377_v15, %v5430_v12  ;;  %v9101_v10 = vadd.f32 %v9035_v39, %v4969_v2  ;;  %v5455_v22 = vor.u32 1.1754944e-38, %v5454_v11  ;;  %v4488_v63 = vpop.f32.mrf.mxu3  ;;  %v9434_v4 = vld [vmem:[#allocation16_spill] sm:$0xff] }
 0x5e8   : > { %v4750_v59 = vadd.f32 %v4707_v61, %v4528_v14 }
 0x5e9   : > { %v6379_v49 = vpop.eup %6378  ;;  %5705 = vst.msk [vmem:[%s8668_s25 + $0x90] sm:$0xff] %vm226_vm1, %v5673_v47  ;;  %v5432_v42 = vadd.f32 %v6377_v15, %v5431_v5  ;;  %v6141_v52 = vmul.f32 -1.442695, %v9101_v10  ;;  %v4306_v47 = vadd.f32 %v4265_v31, %v8599_v53 }
 0x5ea   : > { %v6381_v37 = vpop.eup %6380  ;;  %v9109_v60 = vadd.f32 1.0, %v6379_v49 }
 0x5eb   : > { %v5436_v40 = vsel %vm5435_vm7, %v6377_v15, %v5432_v42  ;;  %v5444_v28 = vmul.f32 %v6381_v37, %v9090_v38  ;;  %6382 = vpow2.f32 %v6141_v52  ;;  %vm5449_vm9 = vweird.f32 %v6381_v37 }
 0x5ec   : > { %v5441_v1 = vsel %vm5438_vm8, %v5440_v20, %v5436_v40  ;;  %6384 = vrcp.f32 %v9109_v60  ;;  %v4924_v57 = vpop.f32.mrf.mxu1  ;;  %vm5450_vm11 = vmor %vm5448_vm10, %vm5449_vm9  ;;  %v5467_v9 = vand.u32 2147483647, %v9109_v60  ;;  %v5469_v23 = vand.u32 2147483648, %v9109_v60 }
 0x5ed   : > { %v5642_v17 = vmul.f32 %v5441_v1, %v9038_v55  ;;  %v5445_v33 = vsub.f32 1.0, %v5444_v28  ;;  %v4970_v8 = vadd.f32 %v4924_v57, %v4748_v21  ;;  %vm5463_vm13 = vweird.f32 %v9109_v60  ;;  %v9435_v57 = vld [vmem:[#allocation17_spill] sm:$0xff]  ;;  %v4270_v51 = vpop.f32.mrf.mxu2 }
 0x5ee   : > { %v5470_v5 = vor.u32 1.1754944e-38, %v5469_v23  ;;  %vm5468_vm15 = vcmp.eq.f32.partialorder %v5467_v9, 8.507059e+37  ;;  %v4529_v40 = vadd.f32 %v4488_v63, %v4306_v47  ;;  %v4308_v23 = vadd.f32 %v4270_v51, %v8606_v3 }
 0x5ef   : > { %v5674_v27 = vadd.f32 %v5642_v17, %v9433_v58  ;;  %v5446_v62 = vmul.f32 %v6381_v37, %v5445_v33  ;;  %v9119_v25 = vadd.f32 %v9035_v39, %v4970_v8  ;;  %v4490_v20 = vpop.f32.mrf.mxu3  ;;  %v4712_v8 = vpop.f32.mrf.mxu0  ;;  %v4307_v58 = vadd.f32 %v4267_v50, %v8603_v7 }
 0x5f1   : > { %v6383_v44 = vpop.eup %6382  ;;  %5706 = vst.msk [vmem:[%s8668_s25 + $0x98] sm:$0xff] %vm226_vm1, %v5674_v27  ;;  %v5447_v32 = vadd.f32 %v6381_v37, %v5446_v62  ;;  %v6142_v55 = vmul.f32 -1.442695, %v9119_v25  ;;  %v4530_v7 = vadd.f32 %v4490_v20, %v4307_v58 }
 0x5f2   : > { %v6385_v43 = vpop.eup %6384  ;;  %v9126_v0 = vadd.f32 1.0, %v6383_v44  ;;  %v4751_v44 = vadd.f32 %v4710_v26, %v4529_v40 }
 0x5f3   : > { %v5451_v15 = vsel %vm5450_vm11, %v6381_v37, %v5447_v32  ;;  %v5459_v48 = vmul.f32 %v6385_v43, %v9109_v60  ;;  %6386 = vpow2.f32 %v6142_v55  ;;  %vm5464_vm12 = vweird.f32 %v6385_v43 }
 0x5f4   : > { %v5456_v54 = vsel %vm5453_vm0, %v5455_v22, %v5451_v15  ;;  %6388 = vrcp.f32 %v9126_v0  ;;  %v4927_v38 = vpop.f32.mrf.mxu1  ;;  %vm5465_vm14 = vmor %vm5463_vm13, %vm5464_vm12  ;;  %v5482_v28 = vand.u32 2147483647, %v9126_v0  ;;  %v5484_v1 = vand.u32 2147483648, %v9126_v0 }
 0x5f5   : > { %v5643_v45 = vmul.f32 %v5456_v54, %v9059_v18  ;;  %v5460_v46 = vsub.f32 1.0, %v5459_v48  ;;  %v4971_v36 = vadd.f32 %v4927_v38, %v4749_v13  ;;  %vm5478_vm3 = vweird.f32 %v9126_v0  ;;  %v9436_v54 = vld [vmem:[#allocation20_spill] sm:$0xff] }
 0x5f6   : > { %v5485_v27 = vor.u32 1.1754944e-38, %v5484_v1  ;;  %vm5483_vm5 = vcmp.eq.f32.partialorder %v5482_v28, 8.507059e+37 }
 0x5f7   : > { %v5675_v12 = vadd.f32 %v5643_v45, %v9434_v4  ;;  %v5461_v2 = vmul.f32 %v6385_v43, %v5460_v46  ;;  %v9135_v35 = vadd.f32 %v9035_v39, %v4971_v36  ;;  %v4493_v48 = vpop.f32.mrf.mxu3  ;;  %v4752_v4 = vadd.f32 %v4712_v8, %v4530_v7 }
 0x5f9   : > { %v6387_v16 = vpop.eup %6386  ;;  %5707 = vst.msk [vmem:[%s8668_s25 + $0xa0] sm:$0xff] %vm226_vm1, %v5675_v12  ;;  %v5462_v18 = vadd.f32 %v6385_v43, %v5461_v2  ;;  %v6143_v19 = vmul.f32 -1.442695, %v9135_v35  ;;  %v4715_v12 = vpop.f32.mrf.mxu0 }
 0x5fa   : > { %v6389_v34 = vpop.eup %6388  ;;  %v9142_v49 = vadd.f32 1.0, %v6387_v16  ;;  %v4272_v2 = vpop.f32.mrf.mxu2 }
 0x5fb   : > { %v5466_v42 = vsel %vm5465_vm14, %v6385_v43, %v5462_v18  ;;  %v5474_v52 = vmul.f32 %v6389_v34, %v9126_v0  ;;  %6390 = vpow2.f32 %v6143_v19  ;;  %vm5479_vm2 = vweird.f32 %v6389_v34 }
 0x5fc   : > { %v5471_v37 = vsel %vm5468_vm15, %v5470_v5, %v5466_v42  ;;  %6392 = vrcp.f32 %v9142_v49  ;;  %v4929_v56 = vpop.f32.mrf.mxu1  ;;  %vm5480_vm4 = vmor %vm5478_vm3, %vm5479_vm2  ;;  %v5497_v63 = vand.u32 2147483647, %v9142_v49  ;;  %v5499_v15 = vand.u32 2147483648, %v9142_v49 }
 0x5fd   : > { %v5644_v60 = vmul.f32 %v5471_v37, %v9082_v6  ;;  %v5475_v21 = vsub.f32 1.0, %v5474_v52  ;;  %v4972_v53 = vadd.f32 %v4929_v56, %v4750_v59  ;;  %vm5493_vm7 = vweird.f32 %v9142_v49  ;;  %v9437_v52 = vld [vmem:[#allocation21_spill] sm:$0xff] }
 0x5fe   : > { %v5500_v26 = vor.u32 1.1754944e-38, %v5499_v15  ;;  %vm5498_vm9 = vcmp.eq.f32.partialorder %v5497_v63, 8.507059e+37  ;;  %v4309_v28 = vadd.f32 %v4272_v2, %v8610_v24  ;;  %v9439_v2 = vld [vmem:[#allocation25_spill] sm:$0xff] }
 0x5ff   : > { %v5676_v61 = vadd.f32 %v5644_v60, %v9435_v57  ;;  %v5476_v31 = vmul.f32 %v6389_v34, %v5475_v21  ;;  %v9151_v17 = vadd.f32 %v9035_v39, %v4972_v53  ;;  %v4495_v21 = vpop.f32.mrf.mxu3 }
 0x601   : > { %v6391_v33 = vpop.eup %6390  ;;  %5708 = vst.msk [vmem:[%s8668_s25 + $0xa8] sm:$0xff] %vm226_vm1, %v5676_v61  ;;  %v5477_v6 = vadd.f32 %v6389_v34, %v5476_v31  ;;  %v6144_v30 = vmul.f32 -1.442695, %v9151_v17 }
 0x602   : > { %v6393_v11 = vpop.eup %6392  ;;  %v9158_v62 = vadd.f32 1.0, %v6391_v33 }
 0x603   : > { %v5481_v32 = vsel %vm5480_vm4, %v6389_v34, %v5477_v6  ;;  %v5489_v55 = vmul.f32 %v6393_v11, %v9142_v49  ;;  %6394 = vpow2.f32 %v6144_v30  ;;  %vm5494_vm6 = vweird.f32 %v6393_v11  ;;  %v4717_v6 = vpop.f32.mrf.mxu0  ;;  %v4275_v30 = vpop.f32.mrf.mxu2 }
 0x604   : > { %v5486_v43 = vsel %vm5483_vm5, %v5485_v27, %v5481_v32  ;;  %6396 = vrcp.f32 %v9158_v62  ;;  %v4932_v41 = vpop.f32.mrf.mxu1  ;;  %vm5495_vm8 = vmor %vm5493_vm7, %vm5494_vm6  ;;  %v4531_v49 = vadd.f32 %v4493_v48, %v4308_v23  ;;  %v5512_v59 = vand.u32 2147483647, %v9158_v62  ;;  %v9438_v32 = vld [vmem:[#allocation24_spill] sm:$0xff] }
 0x605   : > { %v5645_v22 = vmul.f32 %v5486_v43, %v9101_v10  ;;  %v5490_v0 = vsub.f32 1.0, %v5489_v55  ;;  %v4973_v13 = vadd.f32 %v4932_v41, %v4751_v44  ;;  %v5514_v42 = vand.u32 2147483648, %v9158_v62 }
 0x606   : > { %vm5508_vm11 = vweird.f32 %v9158_v62  ;;  %v4753_v61 = vadd.f32 %v4715_v12, %v4531_v49  ;;  %vm5513_vm12 = vcmp.eq.f32.partialorder %v5512_v59, 8.507059e+37  ;;  %v4532_v27 = vadd.f32 %v4495_v21, %v4309_v28  ;;  %v9440_v49 = vld [vmem:[#allocation36_spill] sm:$0xff] }
 0x607   : > { %v5677_v38 = vadd.f32 %v5645_v22, %v9436_v54  ;;  %v5491_v45 = vmul.f32 %v6393_v11, %v5490_v0  ;;  %v9167_v46 = vadd.f32 %v9035_v39, %v4973_v13  ;;  %v5515_v1 = vor.u32 1.1754944e-38, %v5514_v42  ;;  %v4498_v0 = vpop.f32.mrf.mxu3 }
 0x608   : > { %v4310_v63 = vadd.f32 %v4275_v30, %v8613_v29  ;;  %v4754_v54 = vadd.f32 %v4717_v6, %v4532_v27 }
 0x609   : > { %v6395_v36 = vpop.eup %6394  ;;  %5709 = vst.msk [vmem:[%s8668_s25 + $0xb0] sm:$0xff] %vm226_vm1, %v5677_v38  ;;  %v5492_v14 = vadd.f32 %v6393_v11, %v5491_v45  ;;  %v6145_v10 = vmul.f32 -1.442695, %v9167_v46 }
 0x60a   : > { %v6397_v9 = vpop.eup %6396  ;;  %v9174_v50 = vadd.f32 1.0, %v6395_v36 }
 0x60b   : > { %v5496_v16 = vsel %vm5495_vm8, %v6393_v11, %v5492_v14  ;;  %v5504_v18 = vmul.f32 %v6397_v9, %v9158_v62  ;;  %6398 = vpow2.f32 %v6145_v10  ;;  %vm5509_vm10 = vweird.f32 %v6397_v9  ;;  %v4720_v10 = vpop.f32.mrf.mxu0  ;;  %v4277_v12 = vpop.f32.mrf.mxu2 }
 0x60c   : > { %v5501_v19 = vsel %vm5498_vm9, %v5500_v26, %v5496_v16  ;;  %6400 = vrcp.f32 %v9174_v50  ;;  %v4934_v34 = vpop.f32.mrf.mxu1  ;;  %vm5510_vm0 = vmor %vm5508_vm11, %vm5509_vm10  ;;  %v5527_v62 = vand.u32 2147483647, %v9174_v50  ;;  %v5529_v44 = vand.u32 2147483648, %v9174_v50 }
 0x60d   : > { %v5646_v47 = vmul.f32 %v5501_v19, %v9119_v25  ;;  %v5505_v3 = vsub.f32 1.0, %v5504_v18  ;;  %v4974_v5 = vadd.f32 %v4934_v34, %v4752_v4  ;;  %vm5523_vm14 = vweird.f32 %v9174_v50 }
 0x60e   : > { %v5530_v15 = vor.u32 1.1754944e-38, %v5529_v44  ;;  %vm5528_vm2 = vcmp.eq.f32.partialorder %v5527_v62, 8.507059e+37  ;;  %v4533_v26 = vadd.f32 %v4498_v0, %v4310_v63  ;;  %v4311_v59 = vadd.f32 %v4277_v12, %v9440_v49  ;;  %v9442_v63 = vld [vmem:[#allocation29_spill] sm:$0xff] }
 0x60f   : > { %v5678_v37 = vadd.f32 %v5646_v47, %v9437_v52  ;;  %v5506_v56 = vmul.f32 %v6397_v9, %v5505_v3  ;;  %v9183_v20 = vadd.f32 %v9035_v39, %v4974_v5 }
 0x610   : > { %v4755_v5 = vadd.f32 %v4720_v10, %v4533_v26 }
 0x611   : > { %v6399_v60 = vpop.eup %6398  ;;  %5710 = vst.msk [vmem:[%s8668_s25 + $0xb8] sm:$0xff] %vm226_vm1, %v5678_v37  ;;  %v5507_v53 = vadd.f32 %v6397_v9, %v5506_v56  ;;  %v6146_v25 = vmul.f32 -1.442695, %v9183_v20  ;;  %v4500_v37 = vpop.f32.mrf.mxu3 }
 0x612   : > { %v6401_v40 = vpop.eup %6400  ;;  %v9190_v57 = vadd.f32 1.0, %v6399_v60 }
 0x613   : > { %v5511_v31 = vsel %vm5510_vm0, %v6397_v9, %v5507_v53  ;;  %v5519_v33 = vmul.f32 %v6401_v40, %v9174_v50  ;;  %6402 = vpow2.f32 %v6146_v25  ;;  %vm5524_vm13 = vweird.f32 %v6401_v40 }
 0x614   : > { %v5516_v8 = vsel %vm5513_vm12, %v5515_v1, %v5511_v31  ;;  %6404 = vrcp.f32 %v9190_v57  ;;  %v4937_v51 = vpop.f32.mrf.mxu1  ;;  %vm5525_vm15 = vmor %vm5523_vm14, %vm5524_vm13  ;;  %v5542_v50 = vand.u32 2147483647, %v9190_v57  ;;  %v5544_v4 = vand.u32 2147483648, %v9190_v57  ;;  %v4722_v31 = vpop.f32.mrf.mxu0 }
 0x615   : > { %v5647_v11 = vmul.f32 %v5516_v8, %v9135_v35  ;;  %v5520_v24 = vsub.f32 1.0, %v5519_v33  ;;  %v4975_v58 = vadd.f32 %v4937_v51, %v4753_v61  ;;  %vm5538_vm4 = vweird.f32 %v9190_v57  ;;  %v9441_v33 = vld [vmem:[#allocation28_spill] sm:$0xff] }
 0x616   : > { %v5545_v42 = vor.u32 1.1754944e-38, %v5544_v4  ;;  %vm5543_vm6 = vcmp.eq.f32.partialorder %v5542_v50, 8.507059e+37  ;;  %v4534_v1 = vadd.f32 %v4500_v37, %v4311_v59  ;;  %v9443_v4 = vld [vmem:[#allocation32_spill] sm:$0xff]  ;;  %v9444_v37 = vld [vmem:[#allocation33_spill] sm:$0xff] }
 0x617   : > { %v5679_v55 = vadd.f32 %v5647_v11, %v9438_v32  ;;  %v5521_v43 = vmul.f32 %v6401_v40, %v5520_v24  ;;  %v9199_v41 = vadd.f32 %v9035_v39, %v4975_v58 }
 0x618   : > { %v4756_v58 = vadd.f32 %v4722_v31, %v4534_v1 }
 0x619   : > { %v6403_v22 = vpop.eup %6402  ;;  %5711 = vst.msk [vmem:[%s8668_s25 + $0xc0] sm:$0xff] %vm226_vm1, %v5679_v55  ;;  %v5522_v13 = vadd.f32 %v6401_v40, %v5521_v43  ;;  %v6147_v35 = vmul.f32 -1.442695, %v9199_v41 }
 0x61a   : > { %v6405_v7 = vpop.eup %6404  ;;  %v9206_v48 = vadd.f32 1.0, %v6403_v22 }
 0x61b   : > { %v5526_v38 = vsel %vm5525_vm15, %v6401_v40, %v5522_v13  ;;  %v5534_v45 = vmul.f32 %v6405_v7, %v9190_v57  ;;  %6406 = vpow2.f32 %v6147_v35  ;;  %vm5539_vm3 = vweird.f32 %v6405_v7 }
 0x61c   : > { %v5531_v36 = vsel %vm5528_vm2, %v5530_v15, %v5526_v38  ;;  %6408 = vrcp.f32 %v9206_v48  ;;  %v4939_v14 = vpop.f32.mrf.mxu1  ;;  %vm5540_vm5 = vmor %vm5538_vm4, %vm5539_vm3  ;;  %v5557_v57 = vand.u32 2147483647, %v9206_v48  ;;  %v5559_v61 = vand.u32 2147483648, %v9206_v48 }
 0x61d   : > { %v5648_v9 = vmul.f32 %v5531_v36, %v9151_v17  ;;  %v5535_v23 = vsub.f32 1.0, %v5534_v45  ;;  %v4976_v29 = vadd.f32 %v4939_v14, %v4754_v54  ;;  %vm5553_vm8 = vweird.f32 %v9206_v48 }
 0x61e   : > { %v5560_v27 = vor.u32 1.1754944e-38, %v5559_v61  ;;  %vm5558_vm10 = vcmp.eq.f32.partialorder %v5557_v57, 8.507059e+37 }
 0x61f   : > { %v5680_v16 = vadd.f32 %v5648_v9, %v9439_v2  ;;  %v5536_v18 = vmul.f32 %v6405_v7, %v5535_v23  ;;  %v9215_v19 = vadd.f32 %v9035_v39, %v4976_v29 }
 0x621   : > { %v6407_v34 = vpop.eup %6406  ;;  %5712 = vst.msk [vmem:[%s8668_s25 + $0xc8] sm:$0xff] %vm226_vm1, %v5680_v16  ;;  %v5537_v47 = vadd.f32 %v6405_v7, %v5536_v18  ;;  %v6148_v17 = vmul.f32 -1.442695, %v9215_v19 }
 0x622   : > { %v6409_v3 = vpop.eup %6408  ;;  %v5139_v52 = vadd.f32 1.0, %v6407_v34 }
 0x623   : > { %v5541_v56 = vsel %vm5540_vm5, %v6405_v7, %v5537_v47  ;;  %v5549_v60 = vmul.f32 %v6409_v3, %v9206_v48  ;;  %6410 = vpow2.f32 %v6148_v17  ;;  %vm5554_vm7 = vweird.f32 %v6409_v3 }
 0x624   : > { %v5546_v21 = vsel %vm5543_vm6, %v5545_v42, %v5541_v56  ;;  %6412 = vrcp.f32 %v5139_v52  ;;  %v4942_v53 = vpop.f32.mrf.mxu1  ;;  %vm5555_vm9 = vmor %vm5553_vm8, %vm5554_vm7  ;;  %v5572_v35 = vand.u32 2147483647, %v5139_v52  ;;  %v5574_v7 = vand.u32 2147483648, %v5139_v52 }
 0x625   : > { %v5649_v25 = vmul.f32 %v5546_v21, %v9167_v46  ;;  %v5550_v40 = vsub.f32 1.0, %v5549_v60  ;;  %v4977_v28 = vadd.f32 %v4942_v53, %v4755_v5  ;;  %vm5568_vm0 = vweird.f32 %v5139_v52 }
 0x626   : > { %vm5573_vm13 = vcmp.eq.f32.partialorder %v5572_v35, 8.507059e+37 }
 0x627   : > { %v5681_v8 = vadd.f32 %v5649_v25, %v9441_v33  ;;  %v5551_v51 = vmul.f32 %v6409_v3, %v5550_v40  ;;  %v9228_v6 = vadd.f32 %v9035_v39, %v4977_v28  ;;  %v9445_v33 = vld [vmem:[#allocation45_spill] sm:$0xff] }
 0x629   : > { %v6411_v30 = vpop.eup %6410  ;;  %5713 = vst.msk [vmem:[%s8668_s25 + $0xd0] sm:$0xff] %vm226_vm1, %v5681_v8  ;;  %v5552_v11 = vadd.f32 %v6409_v3, %v5551_v51  ;;  %v6149_v46 = vmul.f32 -1.442695, %v9228_v6 }
 0x62a   : > { %v6413_v24 = vpop.eup %6412  ;;  %v5140_v62 = vadd.f32 1.0, %v6411_v30 }
 0x62b   : > { %v5556_v44 = vsel %vm5555_vm9, %v6409_v3, %v5552_v11  ;;  %v5564_v32 = vmul.f32 %v6413_v24, %v5139_v52  ;;  %6414 = vpow2.f32 %v6149_v46  ;;  %vm5569_vm11 = vweird.f32 %v6413_v24 }
 0x62c   : > { %v5561_v55 = vsel %vm5558_vm10, %v5560_v27, %v5556_v44  ;;  %6416 = vrcp.f32 %v5140_v62  ;;  %v4944_v43 = vpop.f32.mrf.mxu1  ;;  %vm5570_vm12 = vmor %vm5568_vm0, %vm5569_vm11  ;;  %v5589_v50 = vand.u32 2147483648, %v5140_v62  ;;  %v5587_v16 = vand.u32 2147483647, %v5140_v62 }
 0x62d   : > { %v5650_v22 = vmul.f32 %v5561_v55, %v9183_v20  ;;  %v5565_v0 = vsub.f32 1.0, %v5564_v32  ;;  %v4978_v13 = vadd.f32 %v4944_v43, %v4756_v58  ;;  %v5575_v20 = vor.u32 1.1754944e-38, %v5574_v7 }
 0x62e   : > { %vm5583_vm15 = vweird.f32 %v5140_v62  ;;  %v5590_v17 = vor.u32 1.1754944e-38, %v5589_v50  ;;  %vm5588_vm3 = vcmp.eq.f32.partialorder %v5587_v16, 8.507059e+37 }
 0x62f   : > { %v5682_v15 = vadd.f32 %v5650_v22, %v9442_v63  ;;  %v5566_v48 = vmul.f32 %v6413_v24, %v5565_v0  ;;  %v9237_v54 = vadd.f32 %v9035_v39, %v4978_v13 }
 0x631   : > { %v6415_v38 = vpop.eup %6414  ;;  %5714 = vst.msk [vmem:[%s8668_s25 + $0xd8] sm:$0xff] %vm226_vm1, %v5682_v15  ;;  %v5567_v45 = vadd.f32 %v6413_v24, %v5566_v48  ;;  %v6150_v36 = vmul.f32 -1.442695, %v9237_v54 }
 0x632   : > { %v6417_v14 = vpop.eup %6416  ;;  %v5141_v10 = vadd.f32 1.0, %v6415_v38 }
 0x633   : > { %v5571_v9 = vsel %vm5570_vm12, %v6413_v24, %v5567_v45  ;;  %v5579_v23 = vmul.f32 %v6417_v14, %v5140_v62  ;;  %6418 = vpow2.f32 %v6150_v36  ;;  %vm5584_vm14 = vweird.f32 %v6417_v14 }
 0x634   : > { %v5576_v29 = vsel %vm5573_vm13, %v5575_v20, %v5571_v9  ;;  %6420 = vrcp.f32 %v5141_v10  ;;  %vm5585_vm2 = vmor %vm5583_vm15, %vm5584_vm14  ;;  %v5604_v52 = vand.u32 2147483648, %v5141_v10  ;;  %v5602_v21 = vand.u32 2147483647, %v5141_v10 }
 0x635   : > { %v5651_v39 = vmul.f32 %v5576_v29, %v9199_v41  ;;  %v5580_v26 = vsub.f32 1.0, %v5579_v23  ;;  %vm5598_vm5 = vweird.f32 %v5141_v10 }
 0x636   : > { %v5605_v40 = vor.u32 1.1754944e-38, %v5604_v52  ;;  %vm5603_vm7 = vcmp.eq.f32.partialorder %v5602_v21, 8.507059e+37 }
 0x637   : > { %v5683_v12 = vadd.f32 %v5651_v39, %v9443_v4  ;;  %v5581_v2 = vmul.f32 %v6417_v14, %v5580_v26 }
 0x639   : > { %v6419_v18 = vpop.eup %6418  ;;  %5715 = vst.msk [vmem:[%s8668_s25 + $0xe0] sm:$0xff] %vm226_vm1, %v5683_v12  ;;  %v5582_v34 = vadd.f32 %v6417_v14, %v5581_v2 }
 0x63a   : > { %v6421_v47 = vpop.eup %6420  ;;  %v5142_v3 = vadd.f32 1.0, %v6419_v18 }
 0x63b   : > { %v5586_v5 = vsel %vm5585_vm2, %v6417_v14, %v5582_v34  ;;  %v5594_v41 = vmul.f32 %v6421_v47, %v5141_v10  ;;  %vm5599_vm4 = vweird.f32 %v6421_v47 }
 0x63c   : > { %v5591_v49 = vsel %vm5588_vm3, %v5590_v17, %v5586_v5  ;;  %6422 = vrcp.f32 %v5142_v3  ;;  %vm5600_vm6 = vmor %vm5598_vm5, %vm5599_vm4  ;;  %v5619_v31 = vand.u32 2147483648, %v5142_v3  ;;  %v5617_v30 = vand.u32 2147483647, %v5142_v3 }
 0x63d   : > { %v5652_v59 = vmul.f32 %v5591_v49, %v9215_v19  ;;  %v5595_v42 = vsub.f32 1.0, %v5594_v41  ;;  %vm5613_vm9 = vweird.f32 %v5142_v3 }
 0x63e   : > { %v5620_v46 = vor.u32 1.1754944e-38, %v5619_v31  ;;  %vm5618_vm11 = vcmp.eq.f32.partialorder %v5617_v30, 8.507059e+37 }
 0x63f   : > { %v5684_v56 = vadd.f32 %v5652_v59, %v9444_v37  ;;  %v5596_v60 = vmul.f32 %v6421_v47, %v5595_v42 }
 0x641   : > { %5716 = vst.msk [vmem:[%s8668_s25 + $0xe8] sm:$0xff] %vm226_vm1, %v5684_v56  ;;  %v5597_v53 = vadd.f32 %v6421_v47, %v5596_v60 }
 0x642   : > { %v6423_v25 = vpop.eup %6422 }
 0x643   : > { %v5601_v28 = vsel %vm5600_vm6, %v6421_v47, %v5597_v53  ;;  %v5609_v1 = vmul.f32 %v6423_v25, %v5142_v3  ;;  %vm5614_vm8 = vweird.f32 %v6423_v25 }
 0x644   : > { %v5606_v57 = vsel %vm5603_vm7, %v5605_v40, %v5601_v28  ;;  %vm5615_vm10 = vmor %vm5613_vm9, %vm5614_vm8 }
 0x645   : > { %v5653_v19 = vmul.f32 %v5606_v57, %v9228_v6  ;;  %v5610_v61 = vsub.f32 1.0, %v5609_v1  ;;  %v9446_v6 = vld [vmem:[#allocation46_spill] sm:$0xff] }
 0x647   : > { %v5685_v8 = vadd.f32 %v5653_v19, %v9445_v33  ;;  %v5611_v51 = vmul.f32 %v6423_v25, %v5610_v61 }
 0x649   : > { %5717 = vst.msk [vmem:[%s8668_s25 + $0xf0] sm:$0xff] %vm226_vm1, %v5685_v8  ;;  %v5612_v11 = vadd.f32 %v6423_v25, %v5611_v51 }
 0x64b   : > { %v5616_v24 = vsel %vm5615_vm10, %v6423_v25, %v5612_v11 }
 0x64c   : > { %v5621_v58 = vsel %vm5618_vm11, %v5620_v46, %v5616_v24 }
 0x64d   : > { %v5654_v27 = vmul.f32 %v5621_v58, %v9237_v54 }
 0x64f   : > { %v5686_v62 = vadd.f32 %v5654_v27, %v9446_v6 }
 0x651   : > { %5718 = vst.msk [vmem:[%s8668_s25 + $0xf8] sm:$0xff] %vm226_vm1, %v5686_v62 }
 0x652 PF: > { %s15_s18 = sadd.s32 1, %s6433_s18  }
 0x653   : > { %p12_p4 = scmp.ge.s32.totalorder %s15_s18, 4  }
 0x655   :  { %14 = sbr.rel (!%p12_p4) target bundleno = 1 (0x1), region = 90 }

</bundles_post_ra>
